<compile_context>
chip_gen: v7x
topology: tpu7x:2x2x1
jax: 0.10.0
libtpu: 0.0.40
codegen_flags: <defaults>
</compile_context>

<pallas_src>
import functools
import jax
import jax.numpy as jnp
from jax.experimental import pallas as pl
from jax.experimental.pallas import tpu as pltpu


def _round_up(x, m):
    return (x + m - 1) // m * m


def _pick_tile(dp, cap, unit=128):
    """Largest multiple of `unit` <= cap that divides dp (dp already a multiple of unit)."""
    if dp <= cap:
        return dp
    t = (cap // unit) * unit
    while t > unit and dp % t != 0:
        t -= unit
    return t


def _elu(y):
    # ELU(alpha=1): y if y > 0 else exp(y) - 1.  Clamp the exp arg so the masked
    # branch never produces inf (select keeps it correct either way).
    return jnp.where(y > 0, y, jnp.exp(jnp.minimum(y, 0.0)) - 1.0)


# ---------------------------------------------------------------------------
# Pallas kernel: tiled matmul with fused bias + optional ELU
#   y = act(x @ w + b) ; bf16 operands, f32 MXU accumulation, direct o_ref accumulate.
# ---------------------------------------------------------------------------
def _mm_kernel(x_ref, w_ref, b_ref, o_ref, *, act, nk):
    def _finish(acc):
        y = acc + b_ref[...]
        if act == "elu":
            y = _elu(y)
        return y.astype(o_ref.dtype)

    if nk == 1:
        acc = jnp.dot(x_ref[...], w_ref[...], preferred_element_type=jnp.float32)
        o_ref[...] = _finish(acc)
    else:
        k = pl.program_id(2)

        @pl.when(k == 0)
        def _():
            o_ref[...] = jnp.zeros_like(o_ref)

        o_ref[...] += jnp.dot(x_ref[...], w_ref[...], preferred_element_type=jnp.float32)

        @pl.when(k == nk - 1)
        def _():
            o_ref[...] = _finish(o_ref[...])


def matmul_bias_act(x, w, b, act=None, out_dtype=jnp.float32, cap_k=6144, cap_n=6144):
    """y = act(x @ w + b) with a tiled Pallas TPU kernel. x:(M,K), w:(K,N), b:(N,)."""
    M, K = x.shape
    K2, N = w.shape
    assert K == K2 and b.shape == (N,)

    # Tile sizes (lane dims multiples of 128; M tile multiple of 16 or full dim).
    if M <= 512:
        tm = _round_up(M, 16)
        Mp = tm
    else:
        tm = 512
        Mp = _round_up(M, tm)
    Kp = _round_up(K, 128)
    Np = _round_up(N, 128)
    tk = _pick_tile(Kp, cap_k)
    tn = _pick_tile(Np, cap_n)
    nk = Kp // tk
    if nk > 1:
        out_dtype = jnp.float32      # exact accumulation across K-steps in o_ref

    x = x.astype(jnp.bfloat16)
    w = w.astype(jnp.bfloat16)
    b = b.astype(jnp.float32).reshape(1, N)
    if (Mp, Kp) != (M, K):
        x = jnp.pad(x, ((0, Mp - M), (0, Kp - K)))
    if (Kp, Np) != (K, N):
        w = jnp.pad(w, ((0, Kp - K), (0, Np - N)))
    if Np != N:
        b = jnp.pad(b, ((0, 0), (0, Np - N)))

    out = pl.pallas_call(
        functools.partial(_mm_kernel, act=act, nk=nk),
        out_shape=jax.ShapeDtypeStruct((Mp, Np), out_dtype),
        grid_spec=pltpu.PrefetchScalarGridSpec(
            num_scalar_prefetch=0,
            grid=(Mp // tm, Np // tn, nk),
            in_specs=[
                pl.BlockSpec((tm, tk), lambda i, j, k: (i, k)),
                pl.BlockSpec((tk, tn), lambda i, j, k: (k, j)),
                pl.BlockSpec((1, tn), lambda i, j, k: (0, j)),
            ],
            out_specs=pl.BlockSpec((tm, tn), lambda i, j, k: (i, j)),
        ),
        compiler_params=pltpu.CompilerParams(
            dimension_semantics=("parallel", "parallel", "arbitrary"),
            vmem_limit_bytes=32 * 1024 * 1024),
    )(x, w, b)
    if (Mp, Np) != (M, N):
        out = out[:M, :N]
    return out


# ---------------------------------------------------------------------------
# Conv helpers (NHWC; im2col glue in plain JAX, all arithmetic in the Pallas matmul)
# ---------------------------------------------------------------------------
def _extract_patches_nhwc(x, k, s):
    """x: (B,H,W,C) -> patches (B*OH*OW, k*k*C), columns ordered (kh, kw, c)."""
    B, H, W, C = x.shape
    OH = (H - k) // s + 1
    OW = (W - k) // s + 1
    cols = [x[:, i:i + s * OH:s, j:j + s * OW:s, :] for i in range(k) for j in range(k)]
    p = jnp.concatenate(cols, axis=-1)          # (B, OH, OW, k*k*C)
    return p.reshape(B * OH * OW, k * k * C), OH, OW


def conv2d_nhwc(x, wm, b, k, stride, act=None, out_dtype=jnp.bfloat16):
    """x: (B,H,W,Cin); wm: (k*k*Cin, Cout) rows ordered (kh, kw, ci); no padding."""
    B = x.shape[0]
    Cout = wm.shape[1]
    patches, OH, OW = _extract_patches_nhwc(x.astype(jnp.bfloat16), k, stride)
    y = matmul_bias_act(patches, wm, b, act=act, out_dtype=out_dtype)
    return y.reshape(B, OH, OW, Cout)


def conv_transpose_nhwc(x, wm, bm, Cout, stride, act=None, nchw_out=False,
                        out_dtype=jnp.bfloat16):
    """ConvTranspose2d with kernel_size == 2*stride, no padding, as a 2x2/stride-1 conv
    over the 1-padded input. x: (B,H,W,Cin) NHWC.
    wm rows ordered (a, b, ci); columns (ph,pw,co) for NHWC out, (co,ph,pw) for NCHW out."""
    B, H, W, Cin = x.shape
    s = stride
    xp = jnp.pad(x.astype(jnp.bfloat16), ((0, 0), (1, 1), (1, 1), (0, 0)))
    patches, OH, OW = _extract_patches_nhwc(xp, 2, 1)        # OH = H+1, OW = W+1
    y = matmul_bias_act(patches, wm, bm, act=act, out_dtype=out_dtype)
    if nchw_out:
        y = y.reshape(B, OH, OW, Cout, s, s).transpose(0, 3, 1, 4, 2, 5)
        return y.reshape(B, Cout, OH * s, OW * s)
    y = y.reshape(B, OH, OW, s, s, Cout).transpose(0, 1, 3, 2, 4, 5)
    return y.reshape(B, OH * s, OW * s, Cout)


# ---------------------------------------------------------------------------
# Parameters
# ---------------------------------------------------------------------------
def init_params(key):
    """PyTorch-layout f32 parameters (shapes from the module's __init__)."""
    ks = jax.random.split(key, 16)
    n = lambda k, shape, s=0.05: (s * jax.random.normal(k, shape)).astype(jnp.float32)
    p = {}
    # encoder (mirror CNN; encoder_network is an injected dependency in PyTorch)
    p["e_c1_w"] = n(ks[0], (16, 4, 8, 8));       p["e_c1_b"] = n(ks[1], (16,), 0.01)
    p["e_c2_w"] = n(ks[2], (32, 16, 4, 4));      p["e_c2_b"] = n(ks[3], (32,), 0.01)
    p["e_f1_w"] = n(ks[4], (28800, 128), 0.01);  p["e_f1_b"] = n(ks[5], (128,), 0.01)
    p["e_f2_w"] = n(ks[6], (128, 512));          p["e_f2_b"] = n(ks[7], (512,), 0.01)
    # decoder (exact shapes from DecoderNetwork(4, 256, 256, latent_dim=512))
    p["d_fc_w"]  = n(ks[8],  (512, 128));         p["d_fc_b"]  = n(ks[9],  (128,), 0.01)
    p["d_fc2_w"] = n(ks[10], (128, 28800), 0.01); p["d_fc2_b"] = n(ks[11], (28800,), 0.01)
    p["d_ct1_w"] = n(ks[12], (32, 16, 4, 4));     p["d_ct1_b"] = n(ks[13], (16,), 0.01)
    p["d_ct2_w"] = n(ks[14], (16, 4, 8, 8));      p["d_ct2_b"] = n(ks[15], (4,), 0.01)
    return p


def prepare_params(p):
    """One-time conversion to matmul-ready layout: bf16 weights, (kh,kw,ci) conv rows,
    decomposed transposed-conv matrices, and the d_fc2 column permutation that makes
    its output land directly in NHWC (equivalent to PyTorch view(B,32,30,30) + permute)."""
    bf = jnp.bfloat16
    q = {}
    # encoder convs: (Cout, Cin, k, k) -> (k*k*Cin, Cout), rows ordered (kh, kw, ci)
    q["e_c1_w"] = p["e_c1_w"].transpose(2, 3, 1, 0).reshape(-1, 16).astype(bf)
    q["e_c1_b"] = p["e_c1_b"]
    q["e_c2_w"] = p["e_c2_w"].transpose(2, 3, 1, 0).reshape(-1, 32).astype(bf)
    q["e_c2_b"] = p["e_c2_b"]
    q["e_f1_w"] = p["e_f1_w"].astype(bf);  q["e_f1_b"] = p["e_f1_b"]
    q["e_f2_w"] = p["e_f2_w"].astype(bf);  q["e_f2_b"] = p["e_f2_b"]
    # decoder FCs
    q["d_fc_w"] = p["d_fc_w"].astype(bf);  q["d_fc_b"] = p["d_fc_b"]
    # d_fc2: permute output columns from PyTorch view order (c, h, w) to NHWC (h, w, c)
    w = p["d_fc2_w"].reshape(128, 32, 30, 30).transpose(0, 2, 3, 1).reshape(128, 28800)
    q["d_fc2_w"] = w.astype(bf)
    q["d_fc2_b"] = p["d_fc2_b"].reshape(32, 30, 30).transpose(1, 2, 0).reshape(28800)

    # ConvTranspose2d (kernel = 2*stride): Wm[(a,b,ci), col] = w[ci, co, (1-a)*s+ph, (1-b)*s+pw]
    def prep_ct(w, b, s, nchw_out):
        Cin, Cout = w.shape[0], w.shape[1]
        w6 = w.reshape(Cin, Cout, 2, s, 2, s)[:, :, ::-1, :, ::-1, :]   # (ci,co,a,ph,b,pw)
        if nchw_out:   # columns (co, ph, pw)
            wm = w6.transpose(2, 4, 0, 1, 3, 5).reshape(4 * Cin, Cout * s * s)
            bm = jnp.repeat(b, s * s)
        else:          # columns (ph, pw, co)
            wm = w6.transpose(2, 4, 0, 3, 5, 1).reshape(4 * Cin, s * s * Cout)
            bm = jnp.tile(b, s * s)
        return wm.astype(bf), bm

    q["d_ct1_w"], q["d_ct1_b"] = prep_ct(p["d_ct1_w"], p["d_ct1_b"], 2, nchw_out=False)
    q["d_ct2_w"], q["d_ct2_b"] = prep_ct(p["d_ct2_w"], p["d_ct2_b"], 4, nchw_out=True)
    return q


# ---------------------------------------------------------------------------
# Forward pass: ImageAutoencoder.forward (internal layout: NHWC)
# ---------------------------------------------------------------------------
def image_autoencoder_forward(params, x):
    if x.ndim == 3:
        x = x[None]
    # PyTorch: shape[1]==256 means NHWC input (it permutes to NCHW). We keep NHWC internally,
    # so only an NCHW input needs converting.
    if x.shape[1] != 256:
        x = jnp.transpose(x, (0, 2, 3, 1))
    B = x.shape[0]

    # encoder_network (mirror CNN)
    h = conv2d_nhwc(x, params["e_c1_w"], params["e_c1_b"], k=8, stride=4, act="elu")   # (B,63,63,16)
    h = conv2d_nhwc(h, params["e_c2_w"], params["e_c2_b"], k=4, stride=2, act="elu")   # (B,30,30,32)
    h = h.reshape(B, -1)                                                               # (B,28800)
    h = matmul_bias_act(h, params["e_f1_w"], params["e_f1_b"], act="elu")              # (B,128)
    latent = matmul_bias_act(h, params["e_f2_w"], params["e_f2_b"], act=None)          # (B,512) f32

    # fc = nn.Identity(); latent_space = latent
    # DecoderNetwork.forward
    d = matmul_bias_act(latent, params["d_fc_w"], params["d_fc_b"], act="elu")         # (B,128)
    d = matmul_bias_act(d, params["d_fc2_w"], params["d_fc2_b"], act="elu",
                        out_dtype=jnp.bfloat16)                                        # (B,28800) NHWC cols
    d = d.reshape(B, 30, 30, 32)                                                       # (B,30,30,32) NHWC
    d = conv_transpose_nhwc(d, params["d_ct1_w"], params["d_ct1_b"], Cout=16, stride=2,
                            act="elu")                                                 # (B,62,62,16) NHWC
    d = conv_transpose_nhwc(d, params["d_ct2_w"], params["d_ct2_b"], Cout=4, stride=4,
                            act=None, nchw_out=True, out_dtype=jnp.float32)            # (B,4,252,252) NCHW

    # F.interpolate(size=(256,256), mode='nearest'): src = floor(dst*in/out); single fused gather.
    idx = (jnp.arange(256) * 252) // 256
    decoded = d[:, :, idx[:, None], idx[None, :]]                                      # (B,4,256,256)
    return decoded, latent


# TODO(synk): im2col patch extraction, the sub-pixel interleave of the transposed convs and
# the nearest-neighbor gather are pure index shuffles done in plain-JAX glue; all arithmetic
# (matmuls, bias, ELU) runs inside the Pallas matmul kernel. encoder_network is an injected
# dependency in the PyTorch module and is realized here as a deterministic mirror CNN.


if __name__ == "__main__":
    key = jax.random.PRNGKey(0)
    pkey, xkey = jax.random.split(key)
    params = prepare_params(init_params(pkey))

    # NHWC input (shape[1] == 256 triggers the permute branch in PyTorch). Spatial size is
    # fixed at 256x256 by the module (the 28800-wide FC layers depend on it); batch kept small.
    x = jax.random.normal(xkey, (2, 256, 256, 4), dtype=jnp.float32)

    fwd = jax.jit(image_autoencoder_forward)
    decoded, latent = fwd(params, x)
    decoded = jax.block_until_ready(decoded)
    latent = jax.block_until_ready(latent)

    assert decoded.shape == (2, 4, 256, 256), decoded.shape
    assert latent.shape == (2, 512), latent.shape
    assert bool(jnp.all(jnp.isfinite(decoded))) and bool(jnp.all(jnp.isfinite(latent)))
    print("KERNEL_OK")
</pallas_src>

<mosaic_0001>
module attributes {stable_mosaic.version = 11 : i64} {
  func.func private @main(%arg0: i32) attributes {dimension_semantics = [#tpu.dimension_semantics<core_parallel>], iteration_bounds = array<i64: 2>, tpu.core_type = #tpu.core_type<sc_scalar_subcore>, window_params = []} {
    return
  }
}

module attributes {stable_mosaic.version = 11 : i64} {
  func.func private @main(%arg0: i32) attributes {dimension_semantics = [#tpu.dimension_semantics<core_parallel>], iteration_bounds = array<i64: 2>, tpu.core_type = #tpu.core_type<sc_scalar_subcore>, window_params = []} {
    return
  }
}

module attributes {stable_mosaic.version = 11 : i64} {
  func.func @_mm_kernel(%arg0: i32, %arg1: i32, %arg2: i32, %arg3: memref<512x256xbf16, #tpu.memory_space<vmem>>, %arg4: memref<256x128xbf16, #tpu.memory_space<vmem>>, %arg5: memref<1x128xf32, #tpu.memory_space<vmem>>, %arg6: memref<512x128xbf16, #tpu.memory_space<vmem>>) attributes {dimension_semantics = [#tpu.dimension_semantics<parallel>, #tpu.dimension_semantics<parallel>, #tpu.dimension_semantics<arbitrary>], iteration_bounds = array<i64: 16, 1, 1>, scalar_prefetch = 0 : i64, scratch_operands = 0 : i64, tpu.core_type = #tpu.core_type<tc>, window_params = [{transform_indices = @transform_0, window_bounds = array<i64: 512, 256>}, {transform_indices = @transform_1, window_bounds = array<i64: 256, 128>}, {transform_indices = @transform_2, window_bounds = array<i64: 1, 128>}, {transform_indices = @transform_3, window_bounds = array<i64: 512, 128>}]} {
    %c0 = arith.constant 0 : index
    %c0_0 = arith.constant 0 : index
    %0 = vector.load %arg3[%c0, %c0_0] : memref<512x256xbf16, #tpu.memory_space<vmem>>, vector<512x256xbf16>
    %c0_1 = arith.constant 0 : index
    %c0_2 = arith.constant 0 : index
    %1 = vector.load %arg4[%c0_1, %c0_2] : memref<256x128xbf16, #tpu.memory_space<vmem>>, vector<256x128xbf16>
    %cst = arith.constant dense<0.000000e+00> : vector<512x128xf32>
    %2 = tpu.matmul %0, %1, %cst {dimension_numbers = #tpu.dot_dimension_numbers<[1], [0], [0], [1], [0, 0, 1, 1], [], []>} : vector<512x256xbf16>, vector<256x128xbf16>, vector<512x128xf32> -> vector<512x128xf32>
    %c0_3 = arith.constant 0 : index
    %c0_4 = arith.constant 0 : index
    %3 = vector.load %arg5[%c0_3, %c0_4] : memref<1x128xf32, #tpu.memory_space<vmem>>, vector<1x128xf32>
    %4 = vector.broadcast %3 : vector<1x128xf32> to vector<512x128xf32>
    %5 = arith.addf %2, %4 : vector<512x128xf32>
    %cst_5 = arith.constant 0.000000e+00 : f32
    %6 = vector.broadcast %cst_5 : f32 to vector<512x128xf32>
    %7 = arith.cmpf ogt, %5, %6 : vector<512x128xf32>
    %cst_6 = arith.constant 0.000000e+00 : f32
    %8 = vector.broadcast %cst_6 : f32 to vector<512x128xf32>
    %9 = arith.minimumf %5, %8 : vector<512x128xf32>
    %10 = math.exp %9 : vector<512x128xf32>
    %cst_7 = arith.constant 1.000000e+00 : f32
    %11 = vector.broadcast %cst_7 : f32 to vector<512x128xf32>
    %12 = arith.subf %10, %11 : vector<512x128xf32>
    %13 = arith.select %7, %5, %12 : vector<512x128xi1>, vector<512x128xf32>
    %14 = arith.truncf %13 : vector<512x128xf32> to vector<512x128xbf16>
    %c0_8 = arith.constant 0 : index
    %c0_9 = arith.constant 0 : index
    %15 = vector.load %arg6[%c0_8, %c0_9] : memref<512x128xbf16, #tpu.memory_space<vmem>>, vector<512x128xbf16>
    tpu.vector_store %arg6[%c0_8, %c0_9], %14 {strides = array<i32>} : memref<512x128xbf16, #tpu.memory_space<vmem>>, vector<512x128xbf16>,
    return
  }
  func.func @transform_0(%arg0: i32, %arg1: i32, %arg2: i32) -> (i32, i32) {
    %c0_i32 = arith.constant 0 : i32
    return %arg0, %arg2 : i32, i32
  }
  func.func @transform_1(%arg0: i32, %arg1: i32, %arg2: i32) -> (i32, i32) {
    %c0_i32 = arith.constant 0 : i32
    return %arg2, %arg1 : i32, i32
  }
  func.func @transform_2(%arg0: i32, %arg1: i32, %arg2: i32) -> (i32, i32) {
    %c0_i32 = arith.constant 0 : i32
    %c0_i32_0 = arith.constant 0 : i32
    return %c0_i32, %arg1 : i32, i32
  }
  func.func @transform_3(%arg0: i32, %arg1: i32, %arg2: i32) -> (i32, i32) {
    %c0_i32 = arith.constant 0 : i32
    return %arg0, %arg1 : i32, i32
  }
}

module attributes {stable_mosaic.version = 11 : i64} {
  func.func @_mm_kernel(%arg0: i32, %arg1: i32, %arg2: i32, %arg3: memref<512x256xbf16, #tpu.memory_space<vmem>>, %arg4: memref<256x128xbf16, #tpu.memory_space<vmem>>, %arg5: memref<1x128xf32, #tpu.memory_space<vmem>>, %arg6: memref<512x128xbf16, #tpu.memory_space<vmem>>) attributes {dimension_semantics = [#tpu.dimension_semantics<parallel>, #tpu.dimension_semantics<parallel>, #tpu.dimension_semantics<arbitrary>], iteration_bounds = array<i64: 4, 1, 1>, scalar_prefetch = 0 : i64, scratch_operands = 0 : i64, tpu.core_type = #tpu.core_type<tc>, window_params = [{transform_indices = @transform_0, window_bounds = array<i64: 512, 256>}, {transform_indices = @transform_1, window_bounds = array<i64: 256, 128>}, {transform_indices = @transform_2, window_bounds = array<i64: 1, 128>}, {transform_indices = @transform_3, window_bounds = array<i64: 512, 128>}]} {
    %c0 = arith.constant 0 : index
    %c0_0 = arith.constant 0 : index
    %0 = vector.load %arg3[%c0, %c0_0] : memref<512x256xbf16, #tpu.memory_space<vmem>>, vector<512x256xbf16>
    %c0_1 = arith.constant 0 : index
    %c0_2 = arith.constant 0 : index
    %1 = vector.load %arg4[%c0_1, %c0_2] : memref<256x128xbf16, #tpu.memory_space<vmem>>, vector<256x128xbf16>
    %cst = arith.constant dense<0.000000e+00> : vector<512x128xf32>
    %2 = tpu.matmul %0, %1, %cst {dimension_numbers = #tpu.dot_dimension_numbers<[1], [0], [0], [1], [0, 0, 1, 1], [], []>} : vector<512x256xbf16>, vector<256x128xbf16>, vector<512x128xf32> -> vector<512x128xf32>
    %c0_3 = arith.constant 0 : index
    %c0_4 = arith.constant 0 : index
    %3 = vector.load %arg5[%c0_3, %c0_4] : memref<1x128xf32, #tpu.memory_space<vmem>>, vector<1x128xf32>
    %4 = vector.broadcast %3 : vector<1x128xf32> to vector<512x128xf32>
    %5 = arith.addf %2, %4 : vector<512x128xf32>
    %cst_5 = arith.constant 0.000000e+00 : f32
    %6 = vector.broadcast %cst_5 : f32 to vector<512x128xf32>
    %7 = arith.cmpf ogt, %5, %6 : vector<512x128xf32>
    %cst_6 = arith.constant 0.000000e+00 : f32
    %8 = vector.broadcast %cst_6 : f32 to vector<512x128xf32>
    %9 = arith.minimumf %5, %8 : vector<512x128xf32>
    %10 = math.exp %9 : vector<512x128xf32>
    %cst_7 = arith.constant 1.000000e+00 : f32
    %11 = vector.broadcast %cst_7 : f32 to vector<512x128xf32>
    %12 = arith.subf %10, %11 : vector<512x128xf32>
    %13 = arith.select %7, %5, %12 : vector<512x128xi1>, vector<512x128xf32>
    %14 = arith.truncf %13 : vector<512x128xf32> to vector<512x128xbf16>
    %c0_8 = arith.constant 0 : index
    %c0_9 = arith.constant 0 : index
    %15 = vector.load %arg6[%c0_8, %c0_9] : memref<512x128xbf16, #tpu.memory_space<vmem>>, vector<512x128xbf16>
    tpu.vector_store %arg6[%c0_8, %c0_9], %14 {strides = array<i32>} : memref<512x128xbf16, #tpu.memory_space<vmem>>, vector<512x128xbf16>,
    return
  }
  func.func @transform_0(%arg0: i32, %arg1: i32, %arg2: i32) -> (i32, i32) {
    %c0_i32 = arith.constant 0 : i32
    return %arg0, %arg2 : i32, i32
  }
  func.func @transform_1(%arg0: i32, %arg1: i32, %arg2: i32) -> (i32, i32) {
    %c0_i32 = arith.constant 0 : i32
    return %arg2, %arg1 : i32, i32
  }
  func.func @transform_2(%arg0: i32, %arg1: i32, %arg2: i32) -> (i32, i32) {
    %c0_i32 = arith.constant 0 : i32
    %c0_i32_0 = arith.constant 0 : i32
    return %c0_i32, %arg1 : i32, i32
  }
  func.func @transform_3(%arg0: i32, %arg1: i32, %arg2: i32) -> (i32, i32) {
    %c0_i32 = arith.constant 0 : i32
    return %arg0, %arg1 : i32, i32
  }
}

module attributes {stable_mosaic.version = 11 : i64} {
  func.func @_mm_kernel(%arg0: i32, %arg1: i32, %arg2: i32, %arg3: memref<16x5760xbf16, #tpu.memory_space<vmem>>, %arg4: memref<5760x128xbf16, #tpu.memory_space<vmem>>, %arg5: memref<1x128xf32, #tpu.memory_space<vmem>>, %arg6: memref<16x128xf32, #tpu.memory_space<vmem>>) attributes {dimension_semantics = [#tpu.dimension_semantics<parallel>, #tpu.dimension_semantics<parallel>, #tpu.dimension_semantics<arbitrary>], iteration_bounds = array<i64: 1, 1, 5>, scalar_prefetch = 0 : i64, scratch_operands = 0 : i64, tpu.core_type = #tpu.core_type<tc>, window_params = [{transform_indices = @transform_0, window_bounds = array<i64: 16, 5760>}, {transform_indices = @transform_1, window_bounds = array<i64: 5760, 128>}, {transform_indices = @transform_2, window_bounds = array<i64: 1, 128>}, {transform_indices = @transform_3, window_bounds = array<i64: 16, 128>}]} {
    %c0_i32 = arith.constant 0 : i32
    %0 = arith.cmpi eq, %arg2, %c0_i32 : i32
    %1 = arith.extui %0 : i1 to i32
    %c0_i32_0 = arith.constant 0 : i32
    %2 = arith.cmpi ne, %1, %c0_i32_0 : i32
    scf.if %2 {
      %cst_9 = arith.constant 0.000000e+00 : f32
      %12 = vector.broadcast %cst_9 : f32 to vector<16x128xf32>
      %c0_10 = arith.constant 0 : index
      %c0_11 = arith.constant 0 : index
      %13 = vector.load %arg6[%c0_10, %c0_11] : memref<16x128xf32, #tpu.memory_space<vmem>>, vector<16x128xf32>
      tpu.vector_store %arg6[%c0_10, %c0_11], %12 {strides = array<i32>} : memref<16x128xf32, #tpu.memory_space<vmem>>, vector<16x128xf32>,
    } else {
    }
    %c0 = arith.constant 0 : index
    %c0_1 = arith.constant 0 : index
    %3 = vector.load %arg6[%c0, %c0_1] : memref<16x128xf32, #tpu.memory_space<vmem>>, vector<16x128xf32>
    %c0_2 = arith.constant 0 : index
    %c0_3 = arith.constant 0 : index
    %4 = vector.load %arg3[%c0_2, %c0_3] : memref<16x5760xbf16, #tpu.memory_space<vmem>>, vector<16x5760xbf16>
    %c0_4 = arith.constant 0 : index
    %c0_5 = arith.constant 0 : index
    %5 = vector.load %arg4[%c0_4, %c0_5] : memref<5760x128xbf16, #tpu.memory_space<vmem>>, vector<5760x128xbf16>
    %cst = arith.constant dense<0.000000e+00> : vector<16x128xf32>
    %6 = tpu.matmul %4, %5, %cst {dimension_numbers = #tpu.dot_dimension_numbers<[1], [0], [0], [1], [0, 0, 1, 1], [], []>} : vector<16x5760xbf16>, vector<5760x128xbf16>, vector<16x128xf32> -> vector<16x128xf32>
    %7 = arith.addf %3, %6 : vector<16x128xf32>
    %c0_6 = arith.constant 0 : index
    %c0_7 = arith.constant 0 : index
    %8 = vector.load %arg6[%c0_6, %c0_7] : memref<16x128xf32, #tpu.memory_space<vmem>>, vector<16x128xf32>
    tpu.vector_store %arg6[%c0_6, %c0_7], %7 {strides = array<i32>} : memref<16x128xf32, #tpu.memory_space<vmem>>, vector<16x128xf32>,
    %c4_i32 = arith.constant 4 : i32
    %9 = arith.cmpi eq, %arg2, %c4_i32 : i32
    %10 = arith.extui %9 : i1 to i32
    %c0_i32_8 = arith.constant 0 : i32
    %11 = arith.cmpi ne, %10, %c0_i32_8 : i32
    scf.if %11 {
      %c0_9 = arith.constant 0 : index
      %c0_10 = arith.constant 0 : index
      %12 = vector.load %arg6[%c0_9, %c0_10] : memref<16x128xf32, #tpu.memory_space<vmem>>, vector<16x128xf32>
      %c0_11 = arith.constant 0 : index
      %c0_12 = arith.constant 0 : index
      %13 = vector.load %arg5[%c0_11, %c0_12] : memref<1x128xf32, #tpu.memory_space<vmem>>, vector<1x128xf32>
      %14 = vector.broadcast %13 : vector<1x128xf32> to vector<16x128xf32>
      %15 = arith.addf %12, %14 : vector<16x128xf32>
      %cst_13 = arith.constant 0.000000e+00 : f32
      %16 = vector.broadcast %cst_13 : f32 to vector<16x128xf32>
      %17 = arith.cmpf ogt, %15, %16 : vector<16x128xf32>
      %cst_14 = arith.constant 0.000000e+00 : f32
      %18 = vector.broadcast %cst_14 : f32 to vector<16x128xf32>
      %19 = arith.minimumf %15, %18 : vector<16x128xf32>
      %20 = math.exp %19 : vector<16x128xf32>
      %cst_15 = arith.constant 1.000000e+00 : f32
      %21 = vector.broadcast %cst_15 : f32 to vector<16x128xf32>
      %22 = arith.subf %20, %21 : vector<16x128xf32>
      %23 = arith.select %17, %15, %22 : vector<16x128xi1>, vector<16x128xf32>
      %c0_16 = arith.constant 0 : index
      %c0_17 = arith.constant 0 : index
      %24 = vector.load %arg6[%c0_16, %c0_17] : memref<16x128xf32, #tpu.memory_space<vmem>>, vector<16x128xf32>
      tpu.vector_store %arg6[%c0_16, %c0_17], %23 {strides = array<i32>} : memref<16x128xf32, #tpu.memory_space<vmem>>, vector<16x128xf32>,
    } else {
    }
    return
  }
  func.func @transform_0(%arg0: i32, %arg1: i32, %arg2: i32) -> (i32, i32) {
    %c0_i32 = arith.constant 0 : i32
    return %arg0, %arg2 : i32, i32
  }
  func.func @transform_1(%arg0: i32, %arg1: i32, %arg2: i32) -> (i32, i32) {
    %c0_i32 = arith.constant 0 : i32
    return %arg2, %arg1 : i32, i32
  }
  func.func @transform_2(%arg0: i32, %arg1: i32, %arg2: i32) -> (i32, i32) {
    %c0_i32 = arith.constant 0 : i32
    %c0_i32_0 = arith.constant 0 : i32
    return %c0_i32, %arg1 : i32, i32
  }
  func.func @transform_3(%arg0: i32, %arg1: i32, %arg2: i32) -> (i32, i32) {
    %c0_i32 = arith.constant 0 : i32
    return %arg0, %arg1 : i32, i32
  }
}

module attributes {stable_mosaic.version = 11 : i64} {
  func.func @_mm_kernel(%arg0: i32, %arg1: i32, %arg2: i32, %arg3: memref<16x128xbf16, #tpu.memory_space<vmem>>, %arg4: memref<128x512xbf16, #tpu.memory_space<vmem>>, %arg5: memref<1x512xf32, #tpu.memory_space<vmem>>, %arg6: memref<16x512xf32, #tpu.memory_space<vmem>>) attributes {dimension_semantics = [#tpu.dimension_semantics<parallel>, #tpu.dimension_semantics<parallel>, #tpu.dimension_semantics<arbitrary>], iteration_bounds = array<i64: 1, 1, 1>, scalar_prefetch = 0 : i64, scratch_operands = 0 : i64, tpu.core_type = #tpu.core_type<tc>, window_params = [{transform_indices = @transform_0, window_bounds = array<i64: 16, 128>}, {transform_indices = @transform_1, window_bounds = array<i64: 128, 512>}, {transform_indices = @transform_2, window_bounds = array<i64: 1, 512>}, {transform_indices = @transform_3, window_bounds = array<i64: 16, 512>}]} {
    %c0 = arith.constant 0 : index
    %c0_0 = arith.constant 0 : index
    %0 = vector.load %arg3[%c0, %c0_0] : memref<16x128xbf16, #tpu.memory_space<vmem>>, vector<16x128xbf16>
    %c0_1 = arith.constant 0 : index
    %c0_2 = arith.constant 0 : index
    %1 = vector.load %arg4[%c0_1, %c0_2] : memref<128x512xbf16, #tpu.memory_space<vmem>>, vector<128x512xbf16>
    %cst = arith.constant dense<0.000000e+00> : vector<16x512xf32>
    %2 = tpu.matmul %0, %1, %cst {dimension_numbers = #tpu.dot_dimension_numbers<[1], [0], [0], [1], [0, 0, 1, 1], [], []>} : vector<16x128xbf16>, vector<128x512xbf16>, vector<16x512xf32> -> vector<16x512xf32>
    %c0_3 = arith.constant 0 : index
    %c0_4 = arith.constant 0 : index
    %3 = vector.load %arg5[%c0_3, %c0_4] : memref<1x512xf32, #tpu.memory_space<vmem>>, vector<1x512xf32>
    %4 = vector.broadcast %3 : vector<1x512xf32> to vector<16x512xf32>
    %5 = arith.addf %2, %4 : vector<16x512xf32>
    %c0_5 = arith.constant 0 : index
    %c0_6 = arith.constant 0 : index
    %6 = vector.load %arg6[%c0_5, %c0_6] : memref<16x512xf32, #tpu.memory_space<vmem>>, vector<16x512xf32>
    tpu.vector_store %arg6[%c0_5, %c0_6], %5 {strides = array<i32>} : memref<16x512xf32, #tpu.memory_space<vmem>>, vector<16x512xf32>,
    return
  }
  func.func @transform_0(%arg0: i32, %arg1: i32, %arg2: i32) -> (i32, i32) {
    %c0_i32 = arith.constant 0 : i32
    return %arg0, %arg2 : i32, i32
  }
  func.func @transform_1(%arg0: i32, %arg1: i32, %arg2: i32) -> (i32, i32) {
    %c0_i32 = arith.constant 0 : i32
    return %arg2, %arg1 : i32, i32
  }
  func.func @transform_2(%arg0: i32, %arg1: i32, %arg2: i32) -> (i32, i32) {
    %c0_i32 = arith.constant 0 : i32
    %c0_i32_0 = arith.constant 0 : i32
    return %c0_i32, %arg1 : i32, i32
  }
  func.func @transform_3(%arg0: i32, %arg1: i32, %arg2: i32) -> (i32, i32) {
    %c0_i32 = arith.constant 0 : i32
    return %arg0, %arg1 : i32, i32
  }
}

module attributes {stable_mosaic.version = 11 : i64} {
  func.func @_mm_kernel(%arg0: i32, %arg1: i32, %arg2: i32, %arg3: memref<16x512xbf16, #tpu.memory_space<vmem>>, %arg4: memref<512x128xbf16, #tpu.memory_space<vmem>>, %arg5: memref<1x128xf32, #tpu.memory_space<vmem>>, %arg6: memref<16x128xf32, #tpu.memory_space<vmem>>) attributes {dimension_semantics = [#tpu.dimension_semantics<parallel>, #tpu.dimension_semantics<parallel>, #tpu.dimension_semantics<arbitrary>], iteration_bounds = array<i64: 1, 1, 1>, scalar_prefetch = 0 : i64, scratch_operands = 0 : i64, tpu.core_type = #tpu.core_type<tc>, window_params = [{transform_indices = @transform_0, window_bounds = array<i64: 16, 512>}, {transform_indices = @transform_1, window_bounds = array<i64: 512, 128>}, {transform_indices = @transform_2, window_bounds = array<i64: 1, 128>}, {transform_indices = @transform_3, window_bounds = array<i64: 16, 128>}]} {
    %c0 = arith.constant 0 : index
    %c0_0 = arith.constant 0 : index
    %0 = vector.load %arg3[%c0, %c0_0] : memref<16x512xbf16, #tpu.memory_space<vmem>>, vector<16x512xbf16>
    %c0_1 = arith.constant 0 : index
    %c0_2 = arith.constant 0 : index
    %1 = vector.load %arg4[%c0_1, %c0_2] : memref<512x128xbf16, #tpu.memory_space<vmem>>, vector<512x128xbf16>
    %cst = arith.constant dense<0.000000e+00> : vector<16x128xf32>
    %2 = tpu.matmul %0, %1, %cst {dimension_numbers = #tpu.dot_dimension_numbers<[1], [0], [0], [1], [0, 0, 1, 1], [], []>} : vector<16x512xbf16>, vector<512x128xbf16>, vector<16x128xf32> -> vector<16x128xf32>
    %c0_3 = arith.constant 0 : index
    %c0_4 = arith.constant 0 : index
    %3 = vector.load %arg5[%c0_3, %c0_4] : memref<1x128xf32, #tpu.memory_space<vmem>>, vector<1x128xf32>
    %4 = vector.broadcast %3 : vector<1x128xf32> to vector<16x128xf32>
    %5 = arith.addf %2, %4 : vector<16x128xf32>
    %cst_5 = arith.constant 0.000000e+00 : f32
    %6 = vector.broadcast %cst_5 : f32 to vector<16x128xf32>
    %7 = arith.cmpf ogt, %5, %6 : vector<16x128xf32>
    %cst_6 = arith.constant 0.000000e+00 : f32
    %8 = vector.broadcast %cst_6 : f32 to vector<16x128xf32>
    %9 = arith.minimumf %5, %8 : vector<16x128xf32>
    %10 = math.exp %9 : vector<16x128xf32>
    %cst_7 = arith.constant 1.000000e+00 : f32
    %11 = vector.broadcast %cst_7 : f32 to vector<16x128xf32>
    %12 = arith.subf %10, %11 : vector<16x128xf32>
    %13 = arith.select %7, %5, %12 : vector<16x128xi1>, vector<16x128xf32>
    %c0_8 = arith.constant 0 : index
    %c0_9 = arith.constant 0 : index
    %14 = vector.load %arg6[%c0_8, %c0_9] : memref<16x128xf32, #tpu.memory_space<vmem>>, vector<16x128xf32>
    tpu.vector_store %arg6[%c0_8, %c0_9], %13 {strides = array<i32>} : memref<16x128xf32, #tpu.memory_space<vmem>>, vector<16x128xf32>,
    return
  }
  func.func @transform_0(%arg0: i32, %arg1: i32, %arg2: i32) -> (i32, i32) {
    %c0_i32 = arith.constant 0 : i32
    return %arg0, %arg2 : i32, i32
  }
  func.func @transform_1(%arg0: i32, %arg1: i32, %arg2: i32) -> (i32, i32) {
    %c0_i32 = arith.constant 0 : i32
    return %arg2, %arg1 : i32, i32
  }
  func.func @transform_2(%arg0: i32, %arg1: i32, %arg2: i32) -> (i32, i32) {
    %c0_i32 = arith.constant 0 : i32
    %c0_i32_0 = arith.constant 0 : i32
    return %c0_i32, %arg1 : i32, i32
  }
  func.func @transform_3(%arg0: i32, %arg1: i32, %arg2: i32) -> (i32, i32) {
    %c0_i32 = arith.constant 0 : i32
    return %arg0, %arg1 : i32, i32
  }
}

module attributes {stable_mosaic.version = 11 : i64} {
  func.func @_mm_kernel(%arg0: i32, %arg1: i32, %arg2: i32, %arg3: memref<16x128xbf16, #tpu.memory_space<vmem>>, %arg4: memref<128x5760xbf16, #tpu.memory_space<vmem>>, %arg5: memref<1x5760xf32, #tpu.memory_space<vmem>>, %arg6: memref<16x5760xbf16, #tpu.memory_space<vmem>>) attributes {dimension_semantics = [#tpu.dimension_semantics<parallel>, #tpu.dimension_semantics<parallel>, #tpu.dimension_semantics<arbitrary>], iteration_bounds = array<i64: 1, 5, 1>, scalar_prefetch = 0 : i64, scratch_operands = 0 : i64, tpu.core_type = #tpu.core_type<tc>, window_params = [{transform_indices = @transform_0, window_bounds = array<i64: 16, 128>}, {transform_indices = @transform_1, window_bounds = array<i64: 128, 5760>}, {transform_indices = @transform_2, window_bounds = array<i64: 1, 5760>}, {transform_indices = @transform_3, window_bounds = array<i64: 16, 5760>}]} {
    %c0 = arith.constant 0 : index
    %c0_0 = arith.constant 0 : index
    %0 = vector.load %arg3[%c0, %c0_0] : memref<16x128xbf16, #tpu.memory_space<vmem>>, vector<16x128xbf16>
    %c0_1 = arith.constant 0 : index
    %c0_2 = arith.constant 0 : index
    %1 = vector.load %arg4[%c0_1, %c0_2] : memref<128x5760xbf16, #tpu.memory_space<vmem>>, vector<128x5760xbf16>
    %cst = arith.constant dense<0.000000e+00> : vector<16x5760xf32>
    %2 = tpu.matmul %0, %1, %cst {dimension_numbers = #tpu.dot_dimension_numbers<[1], [0], [0], [1], [0, 0, 1, 1], [], []>} : vector<16x128xbf16>, vector<128x5760xbf16>, vector<16x5760xf32> -> vector<16x5760xf32>
    %c0_3 = arith.constant 0 : index
    %c0_4 = arith.constant 0 : index
    %3 = vector.load %arg5[%c0_3, %c0_4] : memref<1x5760xf32, #tpu.memory_space<vmem>>, vector<1x5760xf32>
    %4 = vector.broadcast %3 : vector<1x5760xf32> to vector<16x5760xf32>
    %5 = arith.addf %2, %4 : vector<16x5760xf32>
    %cst_5 = arith.constant 0.000000e+00 : f32
    %6 = vector.broadcast %cst_5 : f32 to vector<16x5760xf32>
    %7 = arith.cmpf ogt, %5, %6 : vector<16x5760xf32>
    %cst_6 = arith.constant 0.000000e+00 : f32
    %8 = vector.broadcast %cst_6 : f32 to vector<16x5760xf32>
    %9 = arith.minimumf %5, %8 : vector<16x5760xf32>
    %10 = math.exp %9 : vector<16x5760xf32>
    %cst_7 = arith.constant 1.000000e+00 : f32
    %11 = vector.broadcast %cst_7 : f32 to vector<16x5760xf32>
    %12 = arith.subf %10, %11 : vector<16x5760xf32>
    %13 = arith.select %7, %5, %12 : vector<16x5760xi1>, vector<16x5760xf32>
    %14 = arith.truncf %13 : vector<16x5760xf32> to vector<16x5760xbf16>
    %c0_8 = arith.constant 0 : index
    %c0_9 = arith.constant 0 : index
    %15 = vector.load %arg6[%c0_8, %c0_9] : memref<16x5760xbf16, #tpu.memory_space<vmem>>, vector<16x5760xbf16>
    tpu.vector_store %arg6[%c0_8, %c0_9], %14 {strides = array<i32>} : memref<16x5760xbf16, #tpu.memory_space<vmem>>, vector<16x5760xbf16>,
    return
  }
  func.func @transform_0(%arg0: i32, %arg1: i32, %arg2: i32) -> (i32, i32) {
    %c0_i32 = arith.constant 0 : i32
    return %arg0, %arg2 : i32, i32
  }
  func.func @transform_1(%arg0: i32, %arg1: i32, %arg2: i32) -> (i32, i32) {
    %c0_i32 = arith.constant 0 : i32
    return %arg2, %arg1 : i32, i32
  }
  func.func @transform_2(%arg0: i32, %arg1: i32, %arg2: i32) -> (i32, i32) {
    %c0_i32 = arith.constant 0 : i32
    %c0_i32_0 = arith.constant 0 : i32
    return %c0_i32, %arg1 : i32, i32
  }
  func.func @transform_3(%arg0: i32, %arg1: i32, %arg2: i32) -> (i32, i32) {
    %c0_i32 = arith.constant 0 : i32
    return %arg0, %arg1 : i32, i32
  }
}

module attributes {stable_mosaic.version = 11 : i64} {
  func.func @_mm_kernel(%arg0: i32, %arg1: i32, %arg2: i32, %arg3: memref<512x128xbf16, #tpu.memory_space<vmem>>, %arg4: memref<128x128xbf16, #tpu.memory_space<vmem>>, %arg5: memref<1x128xf32, #tpu.memory_space<vmem>>, %arg6: memref<512x128xbf16, #tpu.memory_space<vmem>>) attributes {dimension_semantics = [#tpu.dimension_semantics<parallel>, #tpu.dimension_semantics<parallel>, #tpu.dimension_semantics<arbitrary>], iteration_bounds = array<i64: 4, 1, 1>, scalar_prefetch = 0 : i64, scratch_operands = 0 : i64, tpu.core_type = #tpu.core_type<tc>, window_params = [{transform_indices = @transform_0, window_bounds = array<i64: 512, 128>}, {transform_indices = @transform_1, window_bounds = array<i64: 128, 128>}, {transform_indices = @transform_2, window_bounds = array<i64: 1, 128>}, {transform_indices = @transform_3, window_bounds = array<i64: 512, 128>}]} {
    %c0 = arith.constant 0 : index
    %c0_0 = arith.constant 0 : index
    %0 = vector.load %arg3[%c0, %c0_0] : memref<512x128xbf16, #tpu.memory_space<vmem>>, vector<512x128xbf16>
    %c0_1 = arith.constant 0 : index
    %c0_2 = arith.constant 0 : index
    %1 = vector.load %arg4[%c0_1, %c0_2] : memref<128x128xbf16, #tpu.memory_space<vmem>>, vector<128x128xbf16>
    %cst = arith.constant dense<0.000000e+00> : vector<512x128xf32>
    %2 = tpu.matmul %0, %1, %cst {dimension_numbers = #tpu.dot_dimension_numbers<[1], [0], [0], [1], [0, 0, 1, 1], [], []>} : vector<512x128xbf16>, vector<128x128xbf16>, vector<512x128xf32> -> vector<512x128xf32>
    %c0_3 = arith.constant 0 : index
    %c0_4 = arith.constant 0 : index
    %3 = vector.load %arg5[%c0_3, %c0_4] : memref<1x128xf32, #tpu.memory_space<vmem>>, vector<1x128xf32>
    %4 = vector.broadcast %3 : vector<1x128xf32> to vector<512x128xf32>
    %5 = arith.addf %2, %4 : vector<512x128xf32>
    %cst_5 = arith.constant 0.000000e+00 : f32
    %6 = vector.broadcast %cst_5 : f32 to vector<512x128xf32>
    %7 = arith.cmpf ogt, %5, %6 : vector<512x128xf32>
    %cst_6 = arith.constant 0.000000e+00 : f32
    %8 = vector.broadcast %cst_6 : f32 to vector<512x128xf32>
    %9 = arith.minimumf %5, %8 : vector<512x128xf32>
    %10 = math.exp %9 : vector<512x128xf32>
    %cst_7 = arith.constant 1.000000e+00 : f32
    %11 = vector.broadcast %cst_7 : f32 to vector<512x128xf32>
    %12 = arith.subf %10, %11 : vector<512x128xf32>
    %13 = arith.select %7, %5, %12 : vector<512x128xi1>, vector<512x128xf32>
    %14 = arith.truncf %13 : vector<512x128xf32> to vector<512x128xbf16>
    %c0_8 = arith.constant 0 : index
    %c0_9 = arith.constant 0 : index
    %15 = vector.load %arg6[%c0_8, %c0_9] : memref<512x128xbf16, #tpu.memory_space<vmem>>, vector<512x128xbf16>
    tpu.vector_store %arg6[%c0_8, %c0_9], %14 {strides = array<i32>} : memref<512x128xbf16, #tpu.memory_space<vmem>>, vector<512x128xbf16>,
    return
  }
  func.func @transform_0(%arg0: i32, %arg1: i32, %arg2: i32) -> (i32, i32) {
    %c0_i32 = arith.constant 0 : i32
    return %arg0, %arg2 : i32, i32
  }
  func.func @transform_1(%arg0: i32, %arg1: i32, %arg2: i32) -> (i32, i32) {
    %c0_i32 = arith.constant 0 : i32
    return %arg2, %arg1 : i32, i32
  }
  func.func @transform_2(%arg0: i32, %arg1: i32, %arg2: i32) -> (i32, i32) {
    %c0_i32 = arith.constant 0 : i32
    %c0_i32_0 = arith.constant 0 : i32
    return %c0_i32, %arg1 : i32, i32
  }
  func.func @transform_3(%arg0: i32, %arg1: i32, %arg2: i32) -> (i32, i32) {
    %c0_i32 = arith.constant 0 : i32
    return %arg0, %arg1 : i32, i32
  }
}

module attributes {stable_mosaic.version = 11 : i64} {
  func.func @_mm_kernel(%arg0: i32, %arg1: i32, %arg2: i32, %arg3: memref<512x128xbf16, #tpu.memory_space<vmem>>, %arg4: memref<128x128xbf16, #tpu.memory_space<vmem>>, %arg5: memref<1x128xf32, #tpu.memory_space<vmem>>, %arg6: memref<512x128xf32, #tpu.memory_space<vmem>>) attributes {dimension_semantics = [#tpu.dimension_semantics<parallel>, #tpu.dimension_semantics<parallel>, #tpu.dimension_semantics<arbitrary>], iteration_bounds = array<i64: 16, 1, 1>, scalar_prefetch = 0 : i64, scratch_operands = 0 : i64, tpu.core_type = #tpu.core_type<tc>, window_params = [{transform_indices = @transform_0, window_bounds = array<i64: 512, 128>}, {transform_indices = @transform_1, window_bounds = array<i64: 128, 128>}, {transform_indices = @transform_2, window_bounds = array<i64: 1, 128>}, {transform_indices = @transform_3, window_bounds = array<i64: 512, 128>}]} {
    %c0 = arith.constant 0 : index
    %c0_0 = arith.constant 0 : index
    %0 = vector.load %arg3[%c0, %c0_0] : memref<512x128xbf16, #tpu.memory_space<vmem>>, vector<512x128xbf16>
    %c0_1 = arith.constant 0 : index
    %c0_2 = arith.constant 0 : index
    %1 = vector.load %arg4[%c0_1, %c0_2] : memref<128x128xbf16, #tpu.memory_space<vmem>>, vector<128x128xbf16>
    %cst = arith.constant dense<0.000000e+00> : vector<512x128xf32>
    %2 = tpu.matmul %0, %1, %cst {dimension_numbers = #tpu.dot_dimension_numbers<[1], [0], [0], [1], [0, 0, 1, 1], [], []>} : vector<512x128xbf16>, vector<128x128xbf16>, vector<512x128xf32> -> vector<512x128xf32>
    %c0_3 = arith.constant 0 : index
    %c0_4 = arith.constant 0 : index
    %3 = vector.load %arg5[%c0_3, %c0_4] : memref<1x128xf32, #tpu.memory_space<vmem>>, vector<1x128xf32>
    %4 = vector.broadcast %3 : vector<1x128xf32> to vector<512x128xf32>
    %5 = arith.addf %2, %4 : vector<512x128xf32>
    %c0_5 = arith.constant 0 : index
    %c0_6 = arith.constant 0 : index
    %6 = vector.load %arg6[%c0_5, %c0_6] : memref<512x128xf32, #tpu.memory_space<vmem>>, vector<512x128xf32>
    tpu.vector_store %arg6[%c0_5, %c0_6], %5 {strides = array<i32>} : memref<512x128xf32, #tpu.memory_space<vmem>>, vector<512x128xf32>,
    return
  }
  func.func @transform_0(%arg0: i32, %arg1: i32, %arg2: i32) -> (i32, i32) {
    %c0_i32 = arith.constant 0 : i32
    return %arg0, %arg2 : i32, i32
  }
  func.func @transform_1(%arg0: i32, %arg1: i32, %arg2: i32) -> (i32, i32) {
    %c0_i32 = arith.constant 0 : i32
    return %arg2, %arg1 : i32, i32
  }
  func.func @transform_2(%arg0: i32, %arg1: i32, %arg2: i32) -> (i32, i32) {
    %c0_i32 = arith.constant 0 : i32
    %c0_i32_0 = arith.constant 0 : i32
    return %c0_i32, %arg1 : i32, i32
  }
  func.func @transform_3(%arg0: i32, %arg1: i32, %arg2: i32) -> (i32, i32) {
    %c0_i32 = arith.constant 0 : i32
    return %arg0, %arg1 : i32, i32
  }
}

</mosaic_0001>

<bundles_post_ra>
// kernel: image_autoencoder_forward.8
= control target key start
LH: loop header
LB: loop body
LE: loop exit
PB: predicated region body
PF: predicated region fallthrough
CT: control target
= control target key end

     0   :  { %s2716_s12 = smov 0   ;;  %s2718_s13 = smov 0   ;;  %s3345_s0 = inlined_call_operand.vmem [shape: bf16[8192,256], index: 0, kind: input, shape index: {}]   ;;  %s3346_s1 = inlined_call_operand.vmem [shape: bf16[256,128], index: 1, kind: input, shape index: {}]   ;;  %s3347_s2 = inlined_call_operand.vmem [shape: f32[1,128], index: 2, kind: input, shape index: {}]   ;;  %s3348_s3 = inlined_call_operand.vmem [shape: bf16[8192,128], index: 3, kind: output, shape index: {}]  }
   0x1   :  { %s2720_s14 = smov 0  }
   0x2 LB: > { %s32_s15 = sadd.s32 1, %s2689_s13  ;;  %p1900_p0 = scmp.ge.s32.totalorder %s2693_s14, 1  ;;  %s2693_s14 = sphi %s2720_s14, %s13_s14   ;;  %s2689_s13 = sphi %s2718_s13, %s3350_s13   ;;  %s2685_s12 = sphi %s2716_s12, %s3349_s12  }
   0x3   : > { %p34_p1 = scmp.ge.s32.totalorder %s32_s15, 16  ;;  %p191_p2 = scmp.lt.s32.totalorder %s2693_s14, 17 }
   0x5   : > { %s3352_s15 = smov (%p34_p1, %s32_s15), 0  ;;  %p192_p3 = pnand %p1900_p0, %p191_p2 }
   0x6   : > { %v2430_v0 = vld [vmem:[%s3346_s1] sm:$0xff] (!%p192_p3)   ;;  %v2695_v1 = vmov (!%p192_p3), 0   ;;  %s1901_s18 = sshll.u32 (!%p192_p3), %s2685_s12, 6  ;;  %v2431_v2 = vld [vmem:[%s3346_s1 + $0x8] sm:$0xff] (!%p192_p3)   ;;  %v2432_v3 = vld [vmem:[%s3346_s1 + $0x10] sm:$0xff] (!%p192_p3)  }
   0x7   : > { %195 = sbr.rel (%p192_p3) target bundleno = 430 (0x1ae), region = 32  ;;  %787 = vmatprep.subr.bf16.mxu0 (!%p192_p3), %v2695_v1  ;;  %2373 = vmatprep.subr.bf16.mxu1 (!%p192_p3), %v2695_v1  ;;  %p236_p4 = scmp.lt.s32.totalorder (!%p192_p3), %s1901_s18, 1023  ;;  %v2433_v4 = vld [vmem:[%s3346_s1 + $0x18] sm:$0xff] (!%p192_p3)   ;;  %v2434_v5 = vld [vmem:[%s3346_s1 + $0x20] sm:$0xff] (!%p192_p3)   ;;  %v2435_v7 = vld [vmem:[%s3346_s1 + $0x28] sm:$0xff] (!%p192_p3)  }
   0x8   : > { %788 = vmatpush1.bf16.msra.mxu0 (!%p192_p3), %v2430_v0  ;;  %2389 = vmatpush1.bf16.msra.mxu1 (!%p192_p3), %v2430_v0  ;;  %v2436_v9 = vld [vmem:[%s3346_s1 + $0x30] sm:$0xff] (!%p192_p3)   ;;  %v2437_v10 = vld [vmem:[%s3346_s1 + $0x38] sm:$0xff] (!%p192_p3)   ;;  %v2438_v11 = vld [vmem:[%s3346_s1 + $0x40] sm:$0xff] (!%p192_p3)  }
   0x9   : > { %789 = vmatprep.subr.bf16.mxu0 (!%p192_p3), %v2695_v1  ;;  %2374 = vmatprep.subr.bf16.mxu1 (!%p192_p3), %v2695_v1  ;;  %v2439_v12 = vld [vmem:[%s3346_s1 + $0x48] sm:$0xff] (!%p192_p3)   ;;  %v2440_v13 = vld [vmem:[%s3346_s1 + $0x50] sm:$0xff] (!%p192_p3)   ;;  %v2441_v14 = vld [vmem:[%s3346_s1 + $0x58] sm:$0xff] (!%p192_p3)  }
   0xa   : > { %v2442_v15 = vld [vmem:[%s3346_s1 + $0x60] sm:$0xff] (!%p192_p3)   ;;  %v2443_v16 = vld [vmem:[%s3346_s1 + $0x68] sm:$0xff] (!%p192_p3)   ;;  %v2444_v17 = vld [vmem:[%s3346_s1 + $0x70] sm:$0xff] (!%p192_p3)  }
   0xb   : > { %v2445_v18 = vld [vmem:[%s3346_s1 + $0x78] sm:$0xff] (!%p192_p3)  }
   0xc   : > { %790 = vmatpush1.bf16.msra.mxu0 (!%p192_p3), %v2431_v2  ;;  %2390 = vmatpush1.bf16.msra.mxu1 (!%p192_p3), %v2431_v2 }
   0xd   : > { %791 = vmatprep.subr.bf16.mxu0 (!%p192_p3), %v2695_v1  ;;  %2375 = vmatprep.subr.bf16.mxu1 (!%p192_p3), %v2695_v1 }
   0xe   : > { %s3354_s18 = smov (!%p236_p4, %s1901_s18), 1023 }
   0xf   : > { %s2117_s25 = sshll.u32 %s3354_s18, 3 }
  0x10   : > { %792 = vmatpush1.bf16.msra.mxu0 %v2432_v3  ;;  %2391 = vmatpush1.bf16.msra.mxu1 %v2432_v3  ;;  %s2763_s30 = scalar_lea.vmem %s3345_s0, %s2117_s25 }
  0x11   : > { %793 = vmatprep.subr.bf16.mxu0 %v2695_v1  ;;  %2376 = vmatprep.subr.bf16.mxu1 %v2695_v1  ;;  %v2448_v6 = vld [vmem:[%s2763_s30 + $0x4] ss:$8 sps:$4 sm:$0xff]   ;;  %v2446_v19 = vld [vmem:[%s2763_s30] ss:$8 sps:$4 sm:$0xff]   ;;  %v2452_v21 = vld [vmem:[%s2763_s30 + $0x14] ss:$8 sps:$4 sm:$0xff]  }
  0x12   : > { %v2451_v8 = vld [vmem:[%s2763_s30 + $0x104] ss:$8 sps:$4 sm:$0xff]   ;;  %819 = vmatprep.mubr.bf16.mxu0 %v2448_v6  ;;  %v2449_v20 = vld [vmem:[%s2763_s30 + $0x100] ss:$8 sps:$4 sm:$0xff]   ;;  %v2454_v22 = vld [vmem:[%s2763_s30 + $0x114] ss:$8 sps:$4 sm:$0xff]  }
  0x13   : > { %947 = vmatprep.mubr.bf16.mxu1 %v2451_v8  ;;  %v2456_v23 = vld [vmem:[%s2763_s30 + $0x10] ss:$8 sps:$4 sm:$0xff]   ;;  %v2458_v25 = vld [vmem:[%s2763_s30 + $0x24] ss:$8 sps:$4 sm:$0xff]   ;;  %v2462_v27 = vld [vmem:[%s2763_s30 + $0x20] ss:$8 sps:$4 sm:$0xff]  }
  0x14   : > { %794 = vmatpush1.bf16.msra.mxu0 %v2433_v4  ;;  %2392 = vmatpush1.bf16.msra.mxu1 %v2433_v4  ;;  %v2457_v24 = vld [vmem:[%s2763_s30 + $0x110] ss:$8 sps:$4 sm:$0xff]   ;;  %v2460_v26 = vld [vmem:[%s2763_s30 + $0x124] ss:$8 sps:$4 sm:$0xff]   ;;  %v2463_v28 = vld [vmem:[%s2763_s30 + $0x120] ss:$8 sps:$4 sm:$0xff]  }
  0x15   : > { %795 = vmatprep.subr.bf16.mxu0 %v2695_v1  ;;  %2377 = vmatprep.subr.bf16.mxu1 %v2695_v1  ;;  %v2464_v29 = vld [vmem:[%s2763_s30 + $0x34] ss:$8 sps:$4 sm:$0xff]   ;;  %v2468_v31 = vld [vmem:[%s2763_s30 + $0x30] ss:$8 sps:$4 sm:$0xff]   ;;  %v2470_v33 = vld [vmem:[%s2763_s30 + $0x44] ss:$8 sps:$4 sm:$0xff]  }
  0x16   : > { %v2466_v30 = vld [vmem:[%s2763_s30 + $0x134] ss:$8 sps:$4 sm:$0xff]   ;;  %v2469_v32 = vld [vmem:[%s2763_s30 + $0x130] ss:$8 sps:$4 sm:$0xff]   ;;  %v2472_v34 = vld [vmem:[%s2763_s30 + $0x144] ss:$8 sps:$4 sm:$0xff]  }
  0x17   : > { %v2474_v35 = vld [vmem:[%s2763_s30 + $0x40] ss:$8 sps:$4 sm:$0xff]   ;;  %v2476_v37 = vld [vmem:[%s2763_s30 + $0x54] ss:$8 sps:$4 sm:$0xff]   ;;  %v2480_v39 = vld [vmem:[%s2763_s30 + $0x50] ss:$8 sps:$4 sm:$0xff]  }
  0x18   : > { %796 = vmatpush1.bf16.msra.mxu0 %v2434_v5  ;;  %2393 = vmatpush1.bf16.msra.mxu1 %v2434_v5  ;;  %v2475_v36 = vld [vmem:[%s2763_s30 + $0x140] ss:$8 sps:$4 sm:$0xff]   ;;  %v2478_v38 = vld [vmem:[%s2763_s30 + $0x154] ss:$8 sps:$4 sm:$0xff]   ;;  %v2481_v40 = vld [vmem:[%s2763_s30 + $0x150] ss:$8 sps:$4 sm:$0xff]  }
  0x19   : > { %797 = vmatprep.subr.bf16.mxu0 %v2695_v1  ;;  %2378 = vmatprep.subr.bf16.mxu1 %v2695_v1  ;;  %v2482_v41 = vld [vmem:[%s2763_s30 + $0x64] ss:$8 sps:$4 sm:$0xff]   ;;  %v2486_v43 = vld [vmem:[%s2763_s30 + $0x60] ss:$8 sps:$4 sm:$0xff]   ;;  %v2488_v45 = vld [vmem:[%s2763_s30 + $0x74] ss:$8 sps:$4 sm:$0xff]  }
  0x1a   : > { %v2484_v42 = vld [vmem:[%s2763_s30 + $0x164] ss:$8 sps:$4 sm:$0xff]   ;;  %v2487_v44 = vld [vmem:[%s2763_s30 + $0x160] ss:$8 sps:$4 sm:$0xff]   ;;  %v2490_v46 = vld [vmem:[%s2763_s30 + $0x174] ss:$8 sps:$4 sm:$0xff]  }
  0x1b   : > { %v2492_v47 = vld [vmem:[%s2763_s30 + $0x70] ss:$8 sps:$4 sm:$0xff]   ;;  %v2494_v49 = vld [vmem:[%s2763_s30 + $0x84] ss:$8 sps:$4 sm:$0xff]   ;;  %v2498_v51 = vld [vmem:[%s2763_s30 + $0x80] ss:$8 sps:$4 sm:$0xff]  }
  0x1c   : > { %798 = vmatpush1.bf16.msra.mxu0 %v2435_v7  ;;  %2394 = vmatpush1.bf16.msra.mxu1 %v2435_v7  ;;  %v2493_v48 = vld [vmem:[%s2763_s30 + $0x170] ss:$8 sps:$4 sm:$0xff]   ;;  %v2496_v50 = vld [vmem:[%s2763_s30 + $0x184] ss:$8 sps:$4 sm:$0xff]   ;;  %v2499_v52 = vld [vmem:[%s2763_s30 + $0x180] ss:$8 sps:$4 sm:$0xff]  }
  0x1d   : > { %799 = vmatprep.subr.bf16.mxu0 %v2695_v1  ;;  %2379 = vmatprep.subr.bf16.mxu1 %v2695_v1  ;;  %v2500_v53 = vld [vmem:[%s2763_s30 + $0x94] ss:$8 sps:$4 sm:$0xff]   ;;  %v2504_v55 = vld [vmem:[%s2763_s30 + $0x90] ss:$8 sps:$4 sm:$0xff]   ;;  %v2506_v57 = vld [vmem:[%s2763_s30 + $0xa4] ss:$8 sps:$4 sm:$0xff]  }
  0x1e   : > { %v2502_v54 = vld [vmem:[%s2763_s30 + $0x194] ss:$8 sps:$4 sm:$0xff]   ;;  %v2505_v56 = vld [vmem:[%s2763_s30 + $0x190] ss:$8 sps:$4 sm:$0xff]   ;;  %v2508_v58 = vld [vmem:[%s2763_s30 + $0x1a4] ss:$8 sps:$4 sm:$0xff]  }
  0x1f   : > { %v2510_v59 = vld [vmem:[%s2763_s30 + $0xa0] ss:$8 sps:$4 sm:$0xff]   ;;  %v2512_v61 = vld [vmem:[%s2763_s30 + $0xb4] ss:$8 sps:$4 sm:$0xff]   ;;  %v2516_v63 = vld [vmem:[%s2763_s30 + $0xb0] ss:$8 sps:$4 sm:$0xff]  }
  0x20   : > { %800 = vmatpush1.bf16.msra.mxu0 %v2436_v9  ;;  %2395 = vmatpush1.bf16.msra.mxu1 %v2436_v9  ;;  %v2511_v60 = vld [vmem:[%s2763_s30 + $0x1a0] ss:$8 sps:$4 sm:$0xff]   ;;  %v2514_v62 = vld [vmem:[%s2763_s30 + $0x1b4] ss:$8 sps:$4 sm:$0xff]   ;;  %v2517_v0 = vld [vmem:[%s2763_s30 + $0x1b0] ss:$8 sps:$4 sm:$0xff]  }
  0x21   : > { %801 = vmatprep.subr.bf16.mxu0 %v2695_v1  ;;  %2380 = vmatprep.subr.bf16.mxu1 %v2695_v1  ;;  %v2520_v2 = vld [vmem:[%s2763_s30 + $0x1c4] ss:$8 sps:$4 sm:$0xff]   ;;  %v2522_v3 = vld [vmem:[%s2763_s30 + $0xc0] ss:$8 sps:$4 sm:$0xff]   ;;  %v2524_v5 = vld [vmem:[%s2763_s30 + $0xd4] ss:$8 sps:$4 sm:$0xff]  }
  0x22   : > { %v2523_v4 = vld [vmem:[%s2763_s30 + $0x1c0] ss:$8 sps:$4 sm:$0xff]   ;;  %v2526_v6 = vld [vmem:[%s2763_s30 + $0x1d4] ss:$8 sps:$4 sm:$0xff]   ;;  %v2528_v7 = vld [vmem:[%s2763_s30 + $0xd0] ss:$8 sps:$4 sm:$0xff]  }
  0x23   : > { %v2529_v8 = vld [vmem:[%s2763_s30 + $0x1d0] ss:$8 sps:$4 sm:$0xff]   ;;  %v2530_v9 = vld [vmem:[%s2763_s30 + $0xe4] ss:$8 sps:$4 sm:$0xff]  }
  0x24   : > { %802 = vmatpush1.bf16.msra.mxu0 %v2437_v10  ;;  %2396 = vmatpush1.bf16.msra.mxu1 %v2437_v10  ;;  %v2532_v10 = vld [vmem:[%s2763_s30 + $0x1e4] ss:$8 sps:$4 sm:$0xff]  }
  0x25   : > { %803 = vmatprep.subr.bf16.mxu0 %v2695_v1  ;;  %2381 = vmatprep.subr.bf16.mxu1 %v2695_v1 }
  0x28   : > { %804 = vmatpush1.bf16.msra.mxu0 %v2438_v11  ;;  %2397 = vmatpush1.bf16.msra.mxu1 %v2438_v11  ;;  %v2534_v11 = vld [vmem:[%s2763_s30 + $0xe0] ss:$8 sps:$4 sm:$0xff]  }
  0x29   : > { %805 = vmatprep.subr.bf16.mxu0 %v2695_v1  ;;  %2382 = vmatprep.subr.bf16.mxu1 %v2695_v1 }
  0x2c   : > { %806 = vmatpush1.bf16.msra.mxu0 %v2439_v12  ;;  %2398 = vmatpush1.bf16.msra.mxu1 %v2439_v12  ;;  %v2535_v12 = vld [vmem:[%s2763_s30 + $0x1e0] ss:$8 sps:$4 sm:$0xff]  }
  0x2d   : > { %807 = vmatprep.subr.bf16.mxu0 %v2695_v1  ;;  %2383 = vmatprep.subr.bf16.mxu1 %v2695_v1 }
  0x30   : > { %808 = vmatpush1.bf16.msra.mxu0 %v2440_v13  ;;  %2399 = vmatpush1.bf16.msra.mxu1 %v2440_v13  ;;  %v2536_v13 = vld [vmem:[%s2763_s30 + $0xf4] ss:$8 sps:$4 sm:$0xff]  }
  0x31   : > { %809 = vmatprep.subr.bf16.mxu0 %v2695_v1  ;;  %2384 = vmatprep.subr.bf16.mxu1 %v2695_v1 }
  0x34   : > { %810 = vmatpush1.bf16.msra.mxu0 %v2441_v14  ;;  %2400 = vmatpush1.bf16.msra.mxu1 %v2441_v14  ;;  %v2538_v14 = vld [vmem:[%s2763_s30 + $0x1f4] ss:$8 sps:$4 sm:$0xff]  }
  0x35   : > { %811 = vmatprep.subr.bf16.mxu0 %v2695_v1  ;;  %2385 = vmatprep.subr.bf16.mxu1 %v2695_v1 }
  0x38   : > { %812 = vmatpush1.bf16.msra.mxu0 %v2442_v15  ;;  %2401 = vmatpush1.bf16.msra.mxu1 %v2442_v15  ;;  %v2540_v15 = vld [vmem:[%s2763_s30 + $0xf0] ss:$8 sps:$4 sm:$0xff]  }
  0x39   : > { %813 = vmatprep.subr.bf16.mxu0 %v2695_v1  ;;  %2386 = vmatprep.subr.bf16.mxu1 %v2695_v1 }
  0x3c   : > { %814 = vmatpush1.bf16.msra.mxu0 %v2443_v16  ;;  %2402 = vmatpush1.bf16.msra.mxu1 %v2443_v16  ;;  %v2541_v16 = vld [vmem:[%s2763_s30 + $0x1f0] ss:$8 sps:$4 sm:$0xff]  }
  0x3d   : > { %815 = vmatprep.subr.bf16.mxu0 %v2695_v1  ;;  %2387 = vmatprep.subr.bf16.mxu1 %v2695_v1 }
  0x40   : > { %816 = vmatpush1.bf16.msra.mxu0 %v2444_v17  ;;  %2403 = vmatpush1.bf16.msra.mxu1 %v2444_v17  ;;  %v2889_v17 = vld [vmem:[%s3347_s2] ss:$0 sm:$0xff] }
  0x41   : > { %817 = vmatprep.subr.bf16.mxu0 %v2695_v1  ;;  %2388 = vmatprep.subr.bf16.mxu1 %v2695_v1  ;;  %v2518_v1 = vld [vmem:[%s2763_s30 + $0xc4] ss:$8 sps:$4 sm:$0xff]   ;;  %s1905_s30 = sshll.u32 %s3354_s18, 2 }
  0x42   : > { %s2950_s7 = scalar_lea.vmem %s3348_s3, %s1905_s30 }
  0x44   : > { %818 = vmatpush1.bf16.msra.mxu0 %v2445_v18  ;;  %2404 = vmatpush1.bf16.msra.mxu1 %v2445_v18 }
  0x47   : > { %820 = vmatmul.mubr.bf16.vlgmr.msra.gmra.mrb[0].mxu0 %v2446_v19  ;;  %948 = vmatmul.mubr.bf16.vlgmr.msra.gmra.mrb[0].mxu1 %v2449_v20 }
  0x48   : > { %827 = vmatprep.mubr.bf16.mxu0 %v2452_v21  ;;  %955 = vmatprep.mubr.bf16.mxu1 %v2454_v22 }
  0x4f   : > { %828 = vmatmul.mubr.bf16.gmra.mrb[4].mxu0 %v2456_v23  ;;  %956 = vmatmul.mubr.bf16.gmra.mrb[4].mxu1 %v2457_v24 }
  0x50   : > { %835 = vmatprep.mubr.bf16.mxu0 %v2458_v25  ;;  %963 = vmatprep.mubr.bf16.mxu1 %v2460_v26 }
  0x57   : > { %836 = vmatmul.mubr.bf16.gmra.mrb[8].mxu0 %v2462_v27  ;;  %964 = vmatmul.mubr.bf16.gmra.mrb[8].mxu1 %v2463_v28 }
  0x58   : > { %843 = vmatprep.mubr.bf16.mxu0 %v2464_v29  ;;  %971 = vmatprep.mubr.bf16.mxu1 %v2466_v30 }
  0x5f   : > { %844 = vmatmul.mubr.bf16.gmra.mrb[12].mxu0 %v2468_v31  ;;  %972 = vmatmul.mubr.bf16.gmra.mrb[12].mxu1 %v2469_v32 }
  0x60   : > { %851 = vmatprep.mubr.bf16.mxu0 %v2470_v33  ;;  %979 = vmatprep.mubr.bf16.mxu1 %v2472_v34 }
  0x67   : > { %852 = vmatmul.mubr.bf16.gmra.mrb[16].mxu0 %v2474_v35  ;;  %980 = vmatmul.mubr.bf16.gmra.mrb[16].mxu1 %v2475_v36 }
  0x68   : > { %859 = vmatprep.mubr.bf16.mxu0 %v2476_v37  ;;  %987 = vmatprep.mubr.bf16.mxu1 %v2478_v38 }
  0x6f   : > { %860 = vmatmul.mubr.bf16.gmra.mrb[20].mxu0 %v2480_v39  ;;  %988 = vmatmul.mubr.bf16.gmra.mrb[20].mxu1 %v2481_v40 }
  0x70   : > { %867 = vmatprep.mubr.bf16.mxu0 %v2482_v41  ;;  %995 = vmatprep.mubr.bf16.mxu1 %v2484_v42 }
  0x77   : > { %868 = vmatmul.mubr.bf16.gmra.mrb[24].mxu0 %v2486_v43  ;;  %996 = vmatmul.mubr.bf16.gmra.mrb[24].mxu1 %v2487_v44 }
  0x78   : > { %875 = vmatprep.mubr.bf16.mxu0 %v2488_v45  ;;  %1003 = vmatprep.mubr.bf16.mxu1 %v2490_v46 }
  0x7f   : > { %876 = vmatmul.mubr.bf16.gmra.mrb[28].mxu0 %v2492_v47  ;;  %1004 = vmatmul.mubr.bf16.gmra.mrb[28].mxu1 %v2493_v48 }
  0x80   : > { %883 = vmatprep.mubr.bf16.mxu0 %v2494_v49  ;;  %1011 = vmatprep.mubr.bf16.mxu1 %v2496_v50 }
  0x87   : > { %884 = vmatmul.mubr.bf16.gmra.mrb[32].mxu0 %v2498_v51  ;;  %1012 = vmatmul.mubr.bf16.gmra.mrb[32].mxu1 %v2499_v52 }
  0x88   : > { %891 = vmatprep.mubr.bf16.mxu0 %v2500_v53  ;;  %1019 = vmatprep.mubr.bf16.mxu1 %v2502_v54 }
  0x8f   : > { %892 = vmatmul.mubr.bf16.gmra.mrb[36].mxu0 %v2504_v55  ;;  %1020 = vmatmul.mubr.bf16.gmra.mrb[36].mxu1 %v2505_v56 }
  0x90   : > { %899 = vmatprep.mubr.bf16.mxu0 %v2506_v57  ;;  %1027 = vmatprep.mubr.bf16.mxu1 %v2508_v58 }
  0x97   : > { %900 = vmatmul.mubr.bf16.gmra.mrb[40].mxu0 %v2510_v59  ;;  %1028 = vmatmul.mubr.bf16.gmra.mrb[40].mxu1 %v2511_v60 }
  0x98   : > { %907 = vmatprep.mubr.bf16.mxu0 %v2512_v61  ;;  %1035 = vmatprep.mubr.bf16.mxu1 %v2514_v62 }
  0x9f   : > { %908 = vmatmul.mubr.bf16.gmra.mrb[44].mxu0 %v2516_v63  ;;  %1036 = vmatmul.mubr.bf16.gmra.mrb[44].mxu1 %v2517_v0 }
  0xa0   : > { %915 = vmatprep.mubr.bf16.mxu0 %v2518_v1  ;;  %1043 = vmatprep.mubr.bf16.mxu1 %v2520_v2 }
  0xa7   : > { %916 = vmatmul.mubr.bf16.gmra.mrb[48].mxu0 %v2522_v3  ;;  %1044 = vmatmul.mubr.bf16.gmra.mrb[48].mxu1 %v2523_v4 }
  0xa8   : > { %923 = vmatprep.mubr.bf16.mxu0 %v2524_v5  ;;  %1051 = vmatprep.mubr.bf16.mxu1 %v2526_v6 }
  0xaf   : > { %924 = vmatmul.mubr.bf16.gmra.mrb[52].mxu0 %v2528_v7  ;;  %1052 = vmatmul.mubr.bf16.gmra.mrb[52].mxu1 %v2529_v8 }
  0xb0   : > { %931 = vmatprep.mubr.bf16.mxu0 %v2530_v9  ;;  %1059 = vmatprep.mubr.bf16.mxu1 %v2532_v10 }
  0xb7   : > { %932 = vmatmul.mubr.bf16.gmra.mrb[56].mxu0 %v2534_v11  ;;  %1060 = vmatmul.mubr.bf16.gmra.mrb[56].mxu1 %v2535_v12 }
  0xb8   : > { %939 = vmatprep.mubr.bf16.mxu0 %v2536_v13  ;;  %1067 = vmatprep.mubr.bf16.mxu1 %v2538_v14 }
  0xbf   : > { %940 = vmatmul.mubr.bf16.gmra.mrb[60].mxu0 %v2540_v15  ;;  %1068 = vmatmul.mubr.bf16.gmra.mrb[60].mxu1 %v2541_v16 }
 0x11a   : > { %v821_v18 = vpop.f32.mrb[0].mxu0  ;;  %v949_v19 = vpop.f32.mrb[0].mxu1 }
 0x11b   : > { %v2892_v20 = vadd.f32 %v2889_v17, %v821_v18  ;;  %v2895_v21 = vadd.f32 %v2889_v17, %v949_v19  ;;  %v823_v22 = vpop.f32.mrb[1].mxu0  ;;  %v951_v23 = vpop.f32.mrb[1].mxu1 }
 0x11c   : > { %v824_v24 = vpop.f32.mrb[2].mxu0  ;;  %v952_v25 = vpop.f32.mrb[2].mxu1 }
 0x11d   : > { %v1140_v26 = vmin.f32 %v2892_v20, 0.0  ;;  %v1172_v27 = vmin.f32 %v2895_v21, 0.0  ;;  %v826_v28 = vpop.f32.mrb[3].mxu0  ;;  %v954_v29 = vpop.f32.mrb[3].mxu1  ;;  %v2900_v30 = vadd.f32 %v2889_v17, %v824_v24  ;;  %v2903_v31 = vadd.f32 %v2889_v17, %v952_v25 }
 0x11e   : > { %vm1076_vm0 = vcmp.gt.f32.partialorder %v2892_v20, 0.0  ;;  %vm1108_vm1 = vcmp.gt.f32.partialorder %v2895_v21, 0.0 }
 0x11f   : > { %v1204_v32 = vmul.f32 1.442695, %v1140_v26  ;;  %v1268_v33 = vmul.f32 1.442695, %v1172_v27  ;;  %v1141_v34 = vmin.f32 %v2900_v30, 0.0  ;;  %v1173_v35 = vmin.f32 %v2903_v31, 0.0 }
 0x120   : > { %vm1077_vm2 = vcmp.gt.f32.partialorder %v2900_v30, 0.0  ;;  %vm1109_vm3 = vcmp.gt.f32.partialorder %v2903_v31, 0.0 }
 0x121   : > { %2542 = vpow2.f32 %v1204_v32  ;;  %v1206_v36 = vmul.f32 1.442695, %v1141_v34  ;;  %v1270_v37 = vmul.f32 1.442695, %v1173_v35 }
 0x122   : > { %2544 = vpow2.f32 %v1268_v33  ;;  %v829_v38 = vpop.f32.mrb[4].mxu0  ;;  %v957_v39 = vpop.f32.mrb[4].mxu1 }
 0x123   : > { %v2908_v40 = vadd.f32 %v2889_v17, %v829_v38  ;;  %v2911_v41 = vadd.f32 %v2889_v17, %v957_v39  ;;  %v831_v42 = vpop.f32.mrb[5].mxu0  ;;  %v959_v43 = vpop.f32.mrb[5].mxu1  ;;  %2546 = vpow2.f32 %v1206_v36 }
 0x124   : > { %v832_v44 = vpop.f32.mrb[6].mxu0  ;;  %v960_v45 = vpop.f32.mrb[6].mxu1  ;;  %2548 = vpow2.f32 %v1270_v37 }
 0x125   : > { %v1142_v46 = vmin.f32 %v2908_v40, 0.0  ;;  %v834_v47 = vpop.f32.mrb[7].mxu0  ;;  %v962_v48 = vpop.f32.mrb[7].mxu1  ;;  %v1174_v49 = vmin.f32 %v2911_v41, 0.0  ;;  %v2916_v50 = vadd.f32 %v2889_v17, %v832_v44  ;;  %v2919_v51 = vadd.f32 %v2889_v17, %v960_v45 }
 0x126   : > { %vm1078_vm4 = vcmp.gt.f32.partialorder %v2908_v40, 0.0  ;;  %vm1110_vm5 = vcmp.gt.f32.partialorder %v2911_v41, 0.0 }
 0x127   : > { %v1208_v52 = vmul.f32 1.442695, %v1142_v46  ;;  %v1272_v53 = vmul.f32 1.442695, %v1174_v49  ;;  %v1143_v54 = vmin.f32 %v2916_v50, 0.0  ;;  %v1175_v55 = vmin.f32 %v2919_v51, 0.0 }
 0x128   : > { %vm1079_vm6 = vcmp.gt.f32.partialorder %v2916_v50, 0.0  ;;  %vm1111_vm7 = vcmp.gt.f32.partialorder %v2919_v51, 0.0 }
 0x129   : > { %2550 = vpow2.f32 %v1208_v52  ;;  %v1210_v56 = vmul.f32 1.442695, %v1143_v54  ;;  %v1274_v60 = vmul.f32 1.442695, %v1175_v55 }
 0x12a   : > { %2552 = vpow2.f32 %v1272_v53  ;;  %v837_v57 = vpop.f32.mrb[8].mxu0  ;;  %v965_v58 = vpop.f32.mrb[8].mxu1 }
 0x12b   : > { %v2543_v59 = vpop.eup %2542  ;;  %v2924_v61 = vadd.f32 %v2889_v17, %v837_v57  ;;  %v2927_v62 = vadd.f32 %v2889_v17, %v965_v58  ;;  %v839_v63 = vpop.f32.mrb[9].mxu0  ;;  %2554 = vpow2.f32 %v1210_v56 }
 0x12c   : > { %v967_v0 = vpop.f32.mrb[9].mxu1  ;;  %v2545_v1 = vpop.eup %2544  ;;  %v1987_v2 = vadd.f32 -1.0, %v2543_v59  ;;  %2556 = vpow2.f32 %v1274_v60 }
 0x12d   : > { %v840_v3 = vpop.f32.mrb[10].mxu0  ;;  %v968_v4 = vpop.f32.mrb[10].mxu1  ;;  %v2019_v5 = vadd.f32 -1.0, %v2545_v1  ;;  %v1144_v6 = vmin.f32 %v2924_v61, 0.0  ;;  %v1176_v10 = vmin.f32 %v2927_v62, 0.0  ;;  %vm1080_vm8 = vcmp.gt.f32.partialorder %v2924_v61, 0.0 }
 0x12e   : > { %v842_v7 = vpop.f32.mrb[11].mxu0  ;;  %v970_v8 = vpop.f32.mrb[11].mxu1  ;;  %v2936_v11 = vadd.f32 %v2889_v17, %v840_v3  ;;  %v2940_v15 = vadd.f32 %v2889_v17, %v968_v4  ;;  %v1396_v16 = vsel %vm1076_vm0, %v2892_v20, %v1987_v2  ;;  %vm1112_vm9 = vcmp.gt.f32.partialorder %v2927_v62, 0.0 }
 0x12f   : > { %v2547_v9 = vpop.eup %2546  ;;  %v1212_v14 = vmul.f32 1.442695, %v1144_v6  ;;  %v1276_v19 = vmul.f32 1.442695, %v1176_v10  ;;  %v1428_v23 = vsel %vm1108_vm1, %v2895_v21, %v2019_v5 }
 0x130   : > { %v2549_v12 = vpop.eup %2548  ;;  %v1988_v13 = vadd.f32 -1.0, %v2547_v9  ;;  %v1145_v22 = vmin.f32 %v2936_v11, 0.0  ;;  %v1177_v25 = vmin.f32 %v2940_v15, 0.0  ;;  %vm1081_vm10 = vcmp.gt.f32.partialorder %v2936_v11, 0.0 }
 0x131   : > { %v2020_v18 = vadd.f32 -1.0, %v2549_v12  ;;  %2558 = vpow2.f32 %v1212_v14  ;;  %vm1113_vm11 = vcmp.gt.f32.partialorder %v2940_v15, 0.0 }
 0x132   : > { %v1397_v24 = vsel %vm1077_vm2, %v2900_v30, %v1988_v13  ;;  %2560 = vpow2.f32 %v1276_v19  ;;  %v1214_v27 = vmul.f32 1.442695, %v1145_v22  ;;  %v845_v28 = vpop.f32.mrb[12].mxu0  ;;  %v973_v29 = vpop.f32.mrb[12].mxu1  ;;  %v1278_v33 = vmul.f32 1.442695, %v1177_v25 }
 0x133   : > { %v2185_v26 = vpack.c.bf16 %v1397_v24, %v1396_v16  ;;  %v1429_v20 = vsel %vm1109_vm3, %v2903_v31, %v2020_v18  ;;  %v2551_v21 = vpop.eup %2550  ;;  %v2956_v34 = vadd.f32 %v2889_v17, %v845_v28  ;;  %v2959_v30 = vadd.f32 %v2889_v17, %v973_v29  ;;  %v847_v35 = vpop.f32.mrb[13].mxu0 }
 0x134   : > { %v2265_v32 = vpack.c.bf16 %v1429_v20, %v1428_v23  ;;  %v975_v36 = vpop.f32.mrb[13].mxu1  ;;  %v2553_v37 = vpop.eup %2552  ;;  %v1989_v38 = vadd.f32 -1.0, %v2551_v21  ;;  %2562 = vpow2.f32 %v1214_v27 }
 0x135   : > { %2186 = vst [vmem:[%s2950_s7] sm:$0xff] %v2185_v26   ;;  %v848_v31 = vpop.f32.mrb[14].mxu0  ;;  %v976_v39 = vpop.f32.mrb[14].mxu1  ;;  %v2021_v42 = vadd.f32 -1.0, %v2553_v37  ;;  %2564 = vpow2.f32 %v1278_v33  ;;  %v1146_v43 = vmin.f32 %v2956_v34, 0.0  ;;  %v1178_v47 = vmin.f32 %v2959_v30, 0.0 }
 0x136   : > { %2357 = vst [vmem:[%s2950_s7 + $0x80] sm:$0xff] %v2265_v32   ;;  %v850_v44 = vpop.f32.mrb[15].mxu0  ;;  %v978_v45 = vpop.f32.mrb[15].mxu1  ;;  %v2969_v48 = vadd.f32 %v2889_v17, %v848_v31  ;;  %v2973_v54 = vadd.f32 %v2889_v17, %v976_v39  ;;  %v1398_v55 = vsel %vm1078_vm4, %v2908_v40, %v1989_v38  ;;  %vm1082_vm12 = vcmp.gt.f32.partialorder %v2956_v34, 0.0 }
 0x137   : > { %v2555_v46 = vpop.eup %2554  ;;  %v1216_v53 = vmul.f32 1.442695, %v1146_v43  ;;  %v1280_v57 = vmul.f32 1.442695, %v1178_v47  ;;  %v1430_v59 = vsel %vm1110_vm5, %v2911_v41, %v2021_v42  ;;  %vm1114_vm13 = vcmp.gt.f32.partialorder %v2959_v30, 0.0 }
 0x138   : > { %v2557_v49 = vpop.eup %2556  ;;  %v1990_v52 = vadd.f32 -1.0, %v2555_v46  ;;  %v1147_v58 = vmin.f32 %v2969_v48, 0.0  ;;  %v1179_v63 = vmin.f32 %v2973_v54, 0.0  ;;  %vm1083_vm14 = vcmp.gt.f32.partialorder %v2969_v48, 0.0 }
 0x139   : > { %v2022_v56 = vadd.f32 -1.0, %v2557_v49  ;;  %2566 = vpow2.f32 %v1216_v53  ;;  %vm1115_vm15 = vcmp.gt.f32.partialorder %v2973_v54, 0.0 }
 0x13a   : > { %v1399_v60 = vsel %vm1079_vm6, %v2916_v50, %v1990_v52  ;;  %2568 = vpow2.f32 %v1280_v57  ;;  %v1218_v2 = vmul.f32 1.442695, %v1147_v58  ;;  %v853_v3 = vpop.f32.mrb[16].mxu0  ;;  %v981_v40 = vpop.f32.mrb[16].mxu1  ;;  %v1282_v6 = vmul.f32 1.442695, %v1179_v63 }
 0x13b   : > { %v2190_v0 = vpack.c.bf16 %v1399_v60, %v1398_v55  ;;  %v1431_v1 = vsel %vm1111_vm7, %v2919_v51, %v2022_v56  ;;  %v2559_v4 = vpop.eup %2558  ;;  %v2984_v7 = vadd.f32 %v2889_v17, %v853_v3  ;;  %v2987_v41 = vadd.f32 %v2889_v17, %v981_v40  ;;  %v855_v50 = vpop.f32.mrb[17].mxu0 }
 0x13c   : > { %v2270_v5 = vpack.c.bf16 %v1431_v1, %v1430_v59  ;;  %v983_v8 = vpop.f32.mrb[17].mxu1  ;;  %v2561_v9 = vpop.eup %2560  ;;  %v1991_v10 = vadd.f32 -1.0, %v2559_v4  ;;  %2570 = vpow2.f32 %v1218_v2 }
 0x13d   : > { %2342 = vst [vmem:[%s2950_s7 + $0x8] sm:$0xff] %v2190_v0   ;;  %v856_v51 = vpop.f32.mrb[18].mxu0  ;;  %v984_v12 = vpop.f32.mrb[18].mxu1  ;;  %v2023_v13 = vadd.f32 -1.0, %v2561_v9  ;;  %2572 = vpow2.f32 %v1282_v6  ;;  %v1148_v14 = vmin.f32 %v2984_v7, 0.0  ;;  %v1180_v22 = vmin.f32 %v2987_v41, 0.0 }
 0x13e   : > { %2358 = vst [vmem:[%s2950_s7 + $0x88] sm:$0xff] %v2270_v5   ;;  %v858_v16 = vpop.f32.mrb[19].mxu0  ;;  %v986_v18 = vpop.f32.mrb[19].mxu1  ;;  %v2997_v23 = vadd.f32 %v2889_v17, %v856_v51  ;;  %v3001_v20 = vadd.f32 %v2889_v17, %v984_v12  ;;  %v1400_v27 = vsel %vm1080_vm8, %v2924_v61, %v1991_v10  ;;  %vm1084_vm0 = vcmp.gt.f32.partialorder %v2984_v7, 0.0 }
 0x13f   : > { %v2563_v19 = vpop.eup %2562  ;;  %v1220_v26 = vmul.f32 1.442695, %v1148_v14  ;;  %v1284_v29 = vmul.f32 1.442695, %v1180_v22  ;;  %v1432_v32 = vsel %vm1112_vm9, %v2927_v62, %v2023_v13  ;;  %vm1116_vm1 = vcmp.gt.f32.partialorder %v2987_v41, 0.0 }
 0x140   : > { %v2565_v24 = vpop.eup %2564  ;;  %v1992_v25 = vadd.f32 -1.0, %v2563_v19  ;;  %v1149_v21 = vmin.f32 %v2997_v23, 0.0  ;;  %v1181_v35 = vmin.f32 %v3001_v20, 0.0  ;;  %vm1085_vm2 = vcmp.gt.f32.partialorder %v2997_v23, 0.0 }
 0x141   : > { %v2024_v28 = vadd.f32 -1.0, %v2565_v24  ;;  %2574 = vpow2.f32 %v1220_v26  ;;  %vm1117_vm3 = vcmp.gt.f32.partialorder %v3001_v20, 0.0 }
 0x142   : > { %v1401_v33 = vsel %vm1081_vm10, %v2936_v11, %v1992_v25  ;;  %2576 = vpow2.f32 %v1284_v29  ;;  %v1222_v38 = vmul.f32 1.442695, %v1149_v21  ;;  %v861_v31 = vpop.f32.mrb[20].mxu0  ;;  %v989_v61 = vpop.f32.mrb[20].mxu1  ;;  %v1286_v43 = vmul.f32 1.442695, %v1181_v35 }
 0x143   : > { %v2195_v36 = vpack.c.bf16 %v1401_v33, %v1400_v27  ;;  %v1433_v37 = vsel %vm1113_vm11, %v2940_v15, %v2024_v28  ;;  %v2567_v39 = vpop.eup %2566  ;;  %v3012_v44 = vadd.f32 %v2889_v17, %v861_v31  ;;  %v3015_v62 = vadd.f32 %v2889_v17, %v989_v61  ;;  %v863_v11 = vpop.f32.mrb[21].mxu0 }
 0x144   : > { %v2275_v42 = vpack.c.bf16 %v1433_v37, %v1432_v32  ;;  %v991_v45 = vpop.f32.mrb[21].mxu1  ;;  %v2569_v46 = vpop.eup %2568  ;;  %v1993_v47 = vadd.f32 -1.0, %v2567_v39  ;;  %2578 = vpow2.f32 %v1222_v38 }
 0x145   : > { %2343 = vst [vmem:[%s2950_s7 + $0x10] sm:$0xff] %v2195_v36   ;;  %v864_v15 = vpop.f32.mrb[22].mxu0  ;;  %v992_v49 = vpop.f32.mrb[22].mxu1  ;;  %v2025_v52 = vadd.f32 -1.0, %v2569_v46  ;;  %2580 = vpow2.f32 %v1286_v43  ;;  %v1150_v53 = vmin.f32 %v3012_v44, 0.0  ;;  %v1182_v58 = vmin.f32 %v3015_v62, 0.0 }
 0x146   : > { %2359 = vst [vmem:[%s2950_s7 + $0x90] sm:$0xff] %v2275_v42   ;;  %v866_v55 = vpop.f32.mrb[23].mxu0  ;;  %v994_v56 = vpop.f32.mrb[23].mxu1  ;;  %v3025_v59 = vadd.f32 %v2889_v17, %v864_v15  ;;  %v3029_v1 = vadd.f32 %v2889_v17, %v992_v49  ;;  %v1402_v2 = vsel %vm1082_vm12, %v2956_v34, %v1993_v47  ;;  %vm1086_vm4 = vcmp.gt.f32.partialorder %v3012_v44, 0.0 }
 0x147   : > { %v2571_v57 = vpop.eup %2570  ;;  %v1224_v0 = vmul.f32 1.442695, %v1150_v53  ;;  %v1288_v40 = vmul.f32 1.442695, %v1182_v58  ;;  %v1434_v5 = vsel %vm1114_vm13, %v2959_v30, %v2025_v52  ;;  %vm1118_vm5 = vcmp.gt.f32.partialorder %v3015_v62, 0.0 }
 0x148   : > { %v2573_v60 = vpop.eup %2572  ;;  %v1994_v63 = vadd.f32 -1.0, %v2571_v57  ;;  %v1151_v4 = vmin.f32 %v3025_v59, 0.0  ;;  %v1183_v50 = vmin.f32 %v3029_v1, 0.0  ;;  %vm1087_vm6 = vcmp.gt.f32.partialorder %v3025_v59, 0.0 }
 0x149   : > { %v2026_v3 = vadd.f32 -1.0, %v2573_v60  ;;  %2582 = vpow2.f32 %v1224_v0  ;;  %vm1119_vm7 = vcmp.gt.f32.partialorder %v3029_v1, 0.0 }
 0x14a   : > { %v1403_v6 = vsel %vm1083_vm14, %v2969_v48, %v1994_v63  ;;  %2584 = vpow2.f32 %v1288_v40  ;;  %v1226_v10 = vmul.f32 1.442695, %v1151_v4  ;;  %v869_v51 = vpop.f32.mrb[24].mxu0  ;;  %v997_v34 = vpop.f32.mrb[24].mxu1  ;;  %v1290_v14 = vmul.f32 1.442695, %v1183_v50 }
 0x14b   : > { %v2200_v8 = vpack.c.bf16 %v1403_v6, %v1402_v2  ;;  %v1435_v9 = vsel %vm1115_vm15, %v2973_v54, %v2026_v3  ;;  %v2575_v12 = vpop.eup %2574  ;;  %v3040_v16 = vadd.f32 %v2889_v17, %v869_v51  ;;  %v3043_v30 = vadd.f32 %v2889_v17, %v997_v34  ;;  %v871_v48 = vpop.f32.mrb[25].mxu0 }
 0x14c   : > { %v2280_v13 = vpack.c.bf16 %v1435_v9, %v1434_v5  ;;  %v999_v18 = vpop.f32.mrb[25].mxu1  ;;  %v2577_v19 = vpop.eup %2576  ;;  %v1995_v22 = vadd.f32 -1.0, %v2575_v12  ;;  %2586 = vpow2.f32 %v1226_v10 }
 0x14d   : > { %2344 = vst [vmem:[%s2950_s7 + $0x18] sm:$0xff] %v2200_v8   ;;  %v872_v54 = vpop.f32.mrb[26].mxu0  ;;  %v1000_v24 = vpop.f32.mrb[26].mxu1  ;;  %v2027_v25 = vadd.f32 -1.0, %v2577_v19  ;;  %2588 = vpow2.f32 %v1290_v14  ;;  %v1152_v26 = vmin.f32 %v3040_v16, 0.0  ;;  %v1184_v21 = vmin.f32 %v3043_v30, 0.0 }
 0x14e   : > { %2360 = vst [vmem:[%s2950_s7 + $0x98] sm:$0xff] %v2280_v13   ;;  %v874_v27 = vpop.f32.mrb[27].mxu0  ;;  %v1002_v28 = vpop.f32.mrb[27].mxu1  ;;  %v3053_v32 = vadd.f32 %v2889_v17, %v872_v54  ;;  %v3057_v37 = vadd.f32 %v2889_v17, %v1000_v24  ;;  %v1404_v38 = vsel %vm1084_vm0, %v2984_v7, %v1995_v22  ;;  %vm1088_vm8 = vcmp.gt.f32.partialorder %v3040_v16, 0.0 }
 0x14f   : > { %v2579_v29 = vpop.eup %2578  ;;  %v1228_v36 = vmul.f32 1.442695, %v1152_v26  ;;  %v1292_v61 = vmul.f32 1.442695, %v1184_v21  ;;  %v1436_v42 = vsel %vm1116_vm1, %v2987_v41, %v2027_v25  ;;  %vm1120_vm9 = vcmp.gt.f32.partialorder %v3043_v30, 0.0 }
 0x150   : > { %v2581_v33 = vpop.eup %2580  ;;  %v1996_v35 = vadd.f32 -1.0, %v2579_v29  ;;  %v1153_v39 = vmin.f32 %v3053_v32, 0.0  ;;  %v1185_v11 = vmin.f32 %v3057_v37, 0.0  ;;  %vm1089_vm10 = vcmp.gt.f32.partialorder %v3053_v32, 0.0 }
 0x151   : > { %v2028_v31 = vadd.f32 -1.0, %v2581_v33  ;;  %2590 = vpow2.f32 %v1228_v36  ;;  %vm1121_vm11 = vcmp.gt.f32.partialorder %v3057_v37, 0.0 }
 0x152   : > { %v1405_v43 = vsel %vm1085_vm2, %v2997_v23, %v1996_v35  ;;  %2592 = vpow2.f32 %v1292_v61  ;;  %v1230_v47 = vmul.f32 1.442695, %v1153_v39  ;;  %v877_v15 = vpop.f32.mrb[28].mxu0  ;;  %v1005_v7 = vpop.f32.mrb[28].mxu1  ;;  %v1294_v53 = vmul.f32 1.442695, %v1185_v11 }
 0x153   : > { %v2205_v45 = vpack.c.bf16 %v1405_v43, %v1404_v38  ;;  %v1437_v46 = vsel %vm1117_vm3, %v3001_v20, %v2028_v31  ;;  %v2583_v49 = vpop.eup %2582  ;;  %v3068_v55 = vadd.f32 %v2889_v17, %v877_v15  ;;  %v3071_v41 = vadd.f32 %v2889_v17, %v1005_v7  ;;  %v879_v23 = vpop.f32.mrb[29].mxu0 }
 0x154   : > { %v2285_v52 = vpack.c.bf16 %v1437_v46, %v1436_v42  ;;  %v1007_v56 = vpop.f32.mrb[29].mxu1  ;;  %v2585_v57 = vpop.eup %2584  ;;  %v1997_v58 = vadd.f32 -1.0, %v2583_v49  ;;  %2594 = vpow2.f32 %v1230_v47 }
 0x155   : > { %2345 = vst [vmem:[%s2950_s7 + $0x20] sm:$0xff] %v2205_v45   ;;  %v880_v20 = vpop.f32.mrb[30].mxu0  ;;  %v1008_v60 = vpop.f32.mrb[30].mxu1  ;;  %v2029_v63 = vadd.f32 -1.0, %v2585_v57  ;;  %2596 = vpow2.f32 %v1294_v53  ;;  %v1154_v0 = vmin.f32 %v3068_v55, 0.0  ;;  %v1186_v4 = vmin.f32 %v3071_v41, 0.0 }
 0x156   : > { %2361 = vst [vmem:[%s2950_s7 + $0xa0] sm:$0xff] %v2285_v52   ;;  %v882_v2 = vpop.f32.mrb[31].mxu0  ;;  %v1010_v3 = vpop.f32.mrb[31].mxu1  ;;  %v3081_v5 = vadd.f32 %v2889_v17, %v880_v20  ;;  %v3085_v9 = vadd.f32 %v2889_v17, %v1008_v60  ;;  %v1406_v10 = vsel %vm1086_vm4, %v3012_v44, %v1997_v58  ;;  %vm1090_vm12 = vcmp.gt.f32.partialorder %v3068_v55, 0.0 }
 0x157   : > { %v2587_v40 = vpop.eup %2586  ;;  %v1232_v8 = vmul.f32 1.442695, %v1154_v0  ;;  %v1296_v34 = vmul.f32 1.442695, %v1186_v4  ;;  %v1438_v13 = vsel %vm1118_vm5, %v3015_v62, %v2029_v63  ;;  %vm1122_vm13 = vcmp.gt.f32.partialorder %v3071_v41, 0.0 }
 0x158   : > { %v2589_v6 = vpop.eup %2588  ;;  %v1998_v50 = vadd.f32 -1.0, %v2587_v40  ;;  %v1155_v12 = vmin.f32 %v3081_v5, 0.0  ;;  %v1187_v48 = vmin.f32 %v3085_v9, 0.0  ;;  %vm1091_vm14 = vcmp.gt.f32.partialorder %v3081_v5, 0.0 }
 0x159   : > { %v2030_v51 = vadd.f32 -1.0, %v2589_v6  ;;  %2598 = vpow2.f32 %v1232_v8  ;;  %vm1123_vm15 = vcmp.gt.f32.partialorder %v3085_v9, 0.0 }
 0x15a   : > { %v1407_v14 = vsel %vm1087_vm6, %v3025_v59, %v1998_v50  ;;  %2600 = vpow2.f32 %v1296_v34  ;;  %v1234_v22 = vmul.f32 1.442695, %v1155_v12  ;;  %v885_v54 = vpop.f32.mrb[32].mxu0  ;;  %v1013_v44 = vpop.f32.mrb[32].mxu1  ;;  %v1298_v26 = vmul.f32 1.442695, %v1187_v48 }
 0x15b   : > { %v2210_v18 = vpack.c.bf16 %v1407_v14, %v1406_v10  ;;  %v1439_v19 = vsel %vm1119_vm7, %v3029_v1, %v2030_v51  ;;  %v2591_v24 = vpop.eup %2590  ;;  %v3096_v27 = vadd.f32 %v2889_v17, %v885_v54  ;;  %v3099_v62 = vadd.f32 %v2889_v17, %v1013_v44  ;;  %v887_v59 = vpop.f32.mrb[33].mxu0 }
 0x15c   : > { %v2290_v25 = vpack.c.bf16 %v1439_v19, %v1438_v13  ;;  %v1015_v28 = vpop.f32.mrb[33].mxu1  ;;  %v2593_v29 = vpop.eup %2592  ;;  %v1999_v21 = vadd.f32 -1.0, %v2591_v24  ;;  %2602 = vpow2.f32 %v1234_v22 }
 0x15d   : > { %2346 = vst [vmem:[%s2950_s7 + $0x28] sm:$0xff] %v2210_v18   ;;  %v888_v1 = vpop.f32.mrb[34].mxu0  ;;  %v1016_v33 = vpop.f32.mrb[34].mxu1  ;;  %v2031_v35 = vadd.f32 -1.0, %v2593_v29  ;;  %2604 = vpow2.f32 %v1298_v26  ;;  %v1156_v36 = vmin.f32 %v3096_v27, 0.0  ;;  %v1188_v39 = vmin.f32 %v3099_v62, 0.0 }
 0x15e   : > { %2362 = vst [vmem:[%s2950_s7 + $0xa8] sm:$0xff] %v2290_v25   ;;  %v890_v38 = vpop.f32.mrb[35].mxu0  ;;  %v1018_v31 = vpop.f32.mrb[35].mxu1  ;;  %v3109_v42 = vadd.f32 %v2889_v17, %v888_v1  ;;  %v3113_v46 = vadd.f32 %v2889_v17, %v1016_v33  ;;  %v1408_v47 = vsel %vm1088_vm8, %v3040_v16, %v1999_v21  ;;  %vm1092_vm0 = vcmp.gt.f32.partialorder %v3096_v27, 0.0 }
 0x15f   : > { %v2595_v61 = vpop.eup %2594  ;;  %v1236_v45 = vmul.f32 1.442695, %v1156_v36  ;;  %v1300_v7 = vmul.f32 1.442695, %v1188_v39  ;;  %v1440_v52 = vsel %vm1120_vm9, %v3043_v30, %v2031_v35  ;;  %vm1124_vm1 = vcmp.gt.f32.partialorder %v3099_v62, 0.0 }
 0x160   : > { %v2597_v43 = vpop.eup %2596  ;;  %v2000_v11 = vadd.f32 -1.0, %v2595_v61  ;;  %v1157_v49 = vmin.f32 %v3109_v42, 0.0  ;;  %v1189_v23 = vmin.f32 %v3113_v46, 0.0  ;;  %vm1093_vm2 = vcmp.gt.f32.partialorder %v3109_v42, 0.0 }
 0x161   : > { %v2032_v15 = vadd.f32 -1.0, %v2597_v43  ;;  %2606 = vpow2.f32 %v1236_v45  ;;  %vm1125_vm3 = vcmp.gt.f32.partialorder %v3113_v46, 0.0 }
 0x162   : > { %v1409_v53 = vsel %vm1089_vm10, %v3053_v32, %v2000_v11  ;;  %2608 = vpow2.f32 %v1300_v7  ;;  %v1238_v58 = vmul.f32 1.442695, %v1157_v49  ;;  %v893_v20 = vpop.f32.mrb[36].mxu0  ;;  %v1021_v16 = vpop.f32.mrb[36].mxu1  ;;  %v1302_v0 = vmul.f32 1.442695, %v1189_v23 }
 0x163   : > { %v2215_v56 = vpack.c.bf16 %v1409_v53, %v1408_v47  ;;  %v1441_v57 = vsel %vm1121_vm11, %v3057_v37, %v2032_v15  ;;  %v2599_v60 = vpop.eup %2598  ;;  %v3124_v2 = vadd.f32 %v2889_v17, %v893_v20  ;;  %v3127_v30 = vadd.f32 %v2889_v17, %v1021_v16  ;;  %v895_v32 = vpop.f32.mrb[37].mxu0 }
 0x164   : > { %v2295_v63 = vpack.c.bf16 %v1441_v57, %v1440_v52  ;;  %v1023_v3 = vpop.f32.mrb[37].mxu1  ;;  %v2601_v40 = vpop.eup %2600  ;;  %v2001_v4 = vadd.f32 -1.0, %v2599_v60  ;;  %2610 = vpow2.f32 %v1238_v58 }
 0x165   : > { %2347 = vst [vmem:[%s2950_s7 + $0x30] sm:$0xff] %v2215_v56   ;;  %v896_v37 = vpop.f32.mrb[38].mxu0  ;;  %v1024_v6 = vpop.f32.mrb[38].mxu1  ;;  %v2033_v50 = vadd.f32 -1.0, %v2601_v40  ;;  %2612 = vpow2.f32 %v1302_v0  ;;  %v1158_v8 = vmin.f32 %v3124_v2, 0.0  ;;  %v1190_v12 = vmin.f32 %v3127_v30, 0.0 }
 0x166   : > { %2363 = vst [vmem:[%s2950_s7 + $0xb0] sm:$0xff] %v2295_v63   ;;  %v898_v10 = vpop.f32.mrb[39].mxu0  ;;  %v1026_v51 = vpop.f32.mrb[39].mxu1  ;;  %v3137_v13 = vadd.f32 %v2889_v17, %v896_v37  ;;  %v3141_v19 = vadd.f32 %v2889_v17, %v1024_v6  ;;  %v1410_v22 = vsel %vm1090_vm12, %v3068_v55, %v2001_v4  ;;  %vm1094_vm4 = vcmp.gt.f32.partialorder %v3124_v2, 0.0 }
 0x167   : > { %v2603_v34 = vpop.eup %2602  ;;  %v1240_v18 = vmul.f32 1.442695, %v1158_v8  ;;  %v1304_v44 = vmul.f32 1.442695, %v1190_v12  ;;  %v1442_v25 = vsel %vm1122_vm13, %v3071_v41, %v2033_v50  ;;  %vm1126_vm5 = vcmp.gt.f32.partialorder %v3127_v30, 0.0 }
 0x168   : > { %v2605_v14 = vpop.eup %2604  ;;  %v2002_v48 = vadd.f32 -1.0, %v2603_v34  ;;  %v1159_v24 = vmin.f32 %v3137_v13, 0.0  ;;  %v1191_v59 = vmin.f32 %v3141_v19, 0.0  ;;  %vm1095_vm6 = vcmp.gt.f32.partialorder %v3137_v13, 0.0 }
 0x169   : > { %v2034_v54 = vadd.f32 -1.0, %v2605_v14  ;;  %2614 = vpow2.f32 %v1240_v18  ;;  %vm1127_vm7 = vcmp.gt.f32.partialorder %v3141_v19, 0.0 }
 0x16a   : > { %v1411_v26 = vsel %vm1091_vm14, %v3081_v5, %v2002_v48  ;;  %2616 = vpow2.f32 %v1304_v44  ;;  %v1242_v21 = vmul.f32 1.442695, %v1159_v24  ;;  %v901_v1 = vpop.f32.mrb[40].mxu0  ;;  %v1029_v55 = vpop.f32.mrb[40].mxu1  ;;  %v1306_v36 = vmul.f32 1.442695, %v1191_v59 }
 0x16b   : > { %v2220_v28 = vpack.c.bf16 %v1411_v26, %v1410_v22  ;;  %v1443_v29 = vsel %vm1123_vm15, %v3085_v9, %v2034_v54  ;;  %v2607_v33 = vpop.eup %2606  ;;  %v3152_v38 = vadd.f32 %v2889_v17, %v901_v1  ;;  %v3155_v41 = vadd.f32 %v2889_v17, %v1029_v55  ;;  %v903_v5 = vpop.f32.mrb[41].mxu0 }
 0x16c   : > { %v2300_v35 = vpack.c.bf16 %v1443_v29, %v1442_v25  ;;  %v1031_v31 = vpop.f32.mrb[41].mxu1  ;;  %v2609_v61 = vpop.eup %2608  ;;  %v2003_v39 = vadd.f32 -1.0, %v2607_v33  ;;  %2618 = vpow2.f32 %v1242_v21 }
 0x16d   : > { %2348 = vst [vmem:[%s2950_s7 + $0x38] sm:$0xff] %v2220_v28   ;;  %v904_v9 = vpop.f32.mrb[42].mxu0  ;;  %v1032_v43 = vpop.f32.mrb[42].mxu1  ;;  %v2035_v11 = vadd.f32 -1.0, %v2609_v61  ;;  %2620 = vpow2.f32 %v1306_v36  ;;  %v1160_v45 = vmin.f32 %v3152_v38, 0.0  ;;  %v1192_v49 = vmin.f32 %v3155_v41, 0.0 }
 0x16e   : > { %2364 = vst [vmem:[%s2950_s7 + $0xb8] sm:$0xff] %v2300_v35   ;;  %v906_v47 = vpop.f32.mrb[43].mxu0  ;;  %v1034_v15 = vpop.f32.mrb[43].mxu1  ;;  %v3165_v52 = vadd.f32 %v2889_v17, %v904_v9  ;;  %v3169_v57 = vadd.f32 %v2889_v17, %v1032_v43  ;;  %v1412_v58 = vsel %vm1092_vm0, %v3096_v27, %v2003_v39  ;;  %vm1096_vm8 = vcmp.gt.f32.partialorder %v3152_v38, 0.0 }
 0x16f   : > { %v2611_v7 = vpop.eup %2610  ;;  %v1244_v56 = vmul.f32 1.442695, %v1160_v45  ;;  %v1308_v16 = vmul.f32 1.442695, %v1192_v49  ;;  %v1444_v63 = vsel %vm1124_vm1, %v3099_v62, %v2035_v11  ;;  %vm1128_vm9 = vcmp.gt.f32.partialorder %v3155_v41, 0.0 }
 0x170   : > { %v2613_v53 = vpop.eup %2612  ;;  %v2004_v23 = vadd.f32 -1.0, %v2611_v7  ;;  %v1161_v60 = vmin.f32 %v3165_v52, 0.0  ;;  %v1193_v32 = vmin.f32 %v3169_v57, 0.0  ;;  %vm1097_vm10 = vcmp.gt.f32.partialorder %v3165_v52, 0.0 }
 0x171   : > { %v2036_v20 = vadd.f32 -1.0, %v2613_v53  ;;  %2622 = vpow2.f32 %v1244_v56  ;;  %vm1129_vm11 = vcmp.gt.f32.partialorder %v3169_v57, 0.0 }
 0x172   : > { %v1413_v0 = vsel %vm1093_vm2, %v3109_v42, %v2004_v23  ;;  %2624 = vpow2.f32 %v1308_v16  ;;  %v1246_v4 = vmul.f32 1.442695, %v1161_v60  ;;  %v909_v37 = vpop.f32.mrb[44].mxu0  ;;  %v1037_v27 = vpop.f32.mrb[44].mxu1  ;;  %v1310_v8 = vmul.f32 1.442695, %v1193_v32 }
 0x173   : > { %v2225_v3 = vpack.c.bf16 %v1413_v0, %v1412_v58  ;;  %v1445_v40 = vsel %vm1125_vm3, %v3113_v46, %v2036_v20  ;;  %v2615_v6 = vpop.eup %2614  ;;  %v3180_v10 = vadd.f32 %v2889_v17, %v909_v37  ;;  %v3183_v62 = vadd.f32 %v2889_v17, %v1037_v27  ;;  %v911_v42 = vpop.f32.mrb[45].mxu0 }
 0x174   : > { %v2305_v50 = vpack.c.bf16 %v1445_v40, %v1444_v63  ;;  %v1039_v51 = vpop.f32.mrb[45].mxu1  ;;  %v2617_v34 = vpop.eup %2616  ;;  %v2005_v12 = vadd.f32 -1.0, %v2615_v6  ;;  %2626 = vpow2.f32 %v1246_v4  ;;  %v3227_v40 = vld [vmem:[%s3347_s2] ss:$0 sm:$0xff] }
 0x175   : > { %2349 = vst [vmem:[%s2950_s7 + $0x40] sm:$0xff] %v2225_v3   ;;  %v912_v46 = vpop.f32.mrb[46].mxu0  ;;  %v1040_v14 = vpop.f32.mrb[46].mxu1  ;;  %v2037_v48 = vadd.f32 -1.0, %v2617_v34  ;;  %2628 = vpow2.f32 %v1310_v8  ;;  %v1162_v18 = vmin.f32 %v3180_v10, 0.0  ;;  %v1194_v24 = vmin.f32 %v3183_v62, 0.0 }
 0x176   : > { %2365 = vst [vmem:[%s2950_s7 + $0xc0] sm:$0xff] %v2305_v50   ;;  %v914_v22 = vpop.f32.mrb[47].mxu0  ;;  %v1042_v54 = vpop.f32.mrb[47].mxu1  ;;  %v3193_v25 = vadd.f32 %v2889_v17, %v912_v46  ;;  %v3197_v29 = vadd.f32 %v2889_v17, %v1040_v14  ;;  %v1414_v21 = vsel %vm1094_vm4, %v3124_v2, %v2005_v12  ;;  %vm1098_vm12 = vcmp.gt.f32.partialorder %v3180_v10, 0.0 }
 0x177   : > { %v2619_v44 = vpop.eup %2618  ;;  %v1248_v28 = vmul.f32 1.442695, %v1162_v18  ;;  %v1312_v55 = vmul.f32 1.442695, %v1194_v24  ;;  %v1446_v35 = vsel %vm1126_vm5, %v3127_v30, %v2037_v48  ;;  %vm1130_vm13 = vcmp.gt.f32.partialorder %v3183_v62, 0.0 }
 0x178   : > { %v2621_v26 = vpop.eup %2620  ;;  %v2006_v59 = vadd.f32 -1.0, %v2619_v44  ;;  %v1163_v33 = vmin.f32 %v3193_v25, 0.0  ;;  %v1195_v5 = vmin.f32 %v3197_v29, 0.0  ;;  %vm1099_vm14 = vcmp.gt.f32.partialorder %v3193_v25, 0.0 }
 0x179   : > { %v2038_v1 = vadd.f32 -1.0, %v2621_v26  ;;  %2630 = vpow2.f32 %v1248_v28  ;;  %vm1131_vm15 = vcmp.gt.f32.partialorder %v3197_v29, 0.0 }
 0x17a   : > { %v1415_v36 = vsel %vm1095_vm6, %v3137_v13, %v2006_v59  ;;  %2632 = vpow2.f32 %v1312_v55  ;;  %v1250_v39 = vmul.f32 1.442695, %v1163_v33  ;;  %v917_v9 = vpop.f32.mrb[48].mxu0  ;;  %v1045_v2 = vpop.f32.mrb[48].mxu1  ;;  %v1314_v45 = vmul.f32 1.442695, %v1195_v5 }
 0x17b   : > { %v2230_v31 = vpack.c.bf16 %v1415_v36, %v1414_v21  ;;  %v1447_v61 = vsel %vm1127_vm7, %v3141_v19, %v2038_v1  ;;  %v2623_v43 = vpop.eup %2622  ;;  %v3208_v47 = vadd.f32 %v2889_v17, %v917_v9  ;;  %v3211_v30 = vadd.f32 %v2889_v17, %v1045_v2  ;;  %v919_v13 = vpop.f32.mrb[49].mxu0 }
 0x17c   : > { %v2310_v11 = vpack.c.bf16 %v1447_v61, %v1446_v35  ;;  %v1047_v15 = vpop.f32.mrb[49].mxu1  ;;  %v2625_v7 = vpop.eup %2624  ;;  %v2007_v49 = vadd.f32 -1.0, %v2623_v43  ;;  %2634 = vpow2.f32 %v1250_v39 }
 0x17d   : > { %2350 = vst [vmem:[%s2950_s7 + $0x48] sm:$0xff] %v2230_v31   ;;  %v920_v19 = vpop.f32.mrb[50].mxu0  ;;  %v1048_v53 = vpop.f32.mrb[50].mxu1  ;;  %v2039_v23 = vadd.f32 -1.0, %v2625_v7  ;;  %2636 = vpow2.f32 %v1314_v45  ;;  %v1164_v56 = vmin.f32 %v3208_v47, 0.0  ;;  %v1196_v60 = vmin.f32 %v3211_v30, 0.0 }
 0x17e   : > { %2366 = vst [vmem:[%s2950_s7 + $0xc8] sm:$0xff] %v2310_v11   ;;  %v922_v58 = vpop.f32.mrb[51].mxu0  ;;  %v1050_v20 = vpop.f32.mrb[51].mxu1  ;;  %v3221_v63 = vadd.f32 %v2889_v17, %v920_v19  ;;  %v3230_v4 = vadd.f32 %v3227_v40, %v1048_v53  ;;  %v1416_v37 = vsel %vm1096_vm8, %v3152_v38, %v2007_v49  ;;  %vm1100_vm0 = vcmp.gt.f32.partialorder %v3208_v47, 0.0 }
 0x17f   : > { %v2627_v16 = vpop.eup %2626  ;;  %v1252_v3 = vmul.f32 1.442695, %v1164_v56  ;;  %v1316_v17 = vmul.f32 1.442695, %v1196_v60  ;;  %v1448_v50 = vsel %vm1128_vm9, %v3155_v41, %v2039_v23  ;;  %vm1132_vm1 = vcmp.gt.f32.partialorder %v3211_v30, 0.0 }
 0x180   : > { %v2629_v0 = vpop.eup %2628  ;;  %v2008_v32 = vadd.f32 -1.0, %v2627_v16  ;;  %v1165_v6 = vmin.f32 %v3221_v63, 0.0  ;;  %v1197_v42 = vmin.f32 %v3230_v4, 0.0  ;;  %vm1101_vm2 = vcmp.gt.f32.partialorder %v3221_v63, 0.0 }
 0x181   : > { %v2040_v27 = vadd.f32 -1.0, %v2629_v0  ;;  %2638 = vpow2.f32 %v1252_v3  ;;  %vm1133_vm3 = vcmp.gt.f32.partialorder %v3230_v4, 0.0 }
 0x182   : > { %v1417_v8 = vsel %vm1097_vm10, %v3165_v52, %v2008_v32  ;;  %2640 = vpow2.f32 %v1316_v17  ;;  %v1254_v12 = vmul.f32 1.442695, %v1165_v6  ;;  %v925_v46 = vpop.f32.mrb[52].mxu0  ;;  %v1053_v38 = vpop.f32.mrb[52].mxu1  ;;  %v1318_v18 = vmul.f32 1.442695, %v1197_v42 }
 0x183   : > { %v2235_v51 = vpack.c.bf16 %v1417_v8, %v1416_v37  ;;  %v1449_v34 = vsel %vm1129_vm11, %v3169_v57, %v2040_v27  ;;  %v2631_v14 = vpop.eup %2630  ;;  %v3241_v22 = vadd.f32 %v3227_v40, %v925_v46  ;;  %v3244_v41 = vadd.f32 %v3227_v40, %v1053_v38  ;;  %v927_v52 = vpop.f32.mrb[53].mxu0 }
 0x184   : > { %v2315_v48 = vpack.c.bf16 %v1449_v34, %v1448_v50  ;;  %v1055_v54 = vpop.f32.mrb[53].mxu1  ;;  %v2633_v44 = vpop.eup %2632  ;;  %v2009_v24 = vadd.f32 -1.0, %v2631_v14  ;;  %2642 = vpow2.f32 %v1254_v12 }
 0x185   : > { %2351 = vst [vmem:[%s2950_s7 + $0x50] sm:$0xff] %v2235_v51   ;;  %v928_v57 = vpop.f32.mrb[54].mxu0  ;;  %v1056_v26 = vpop.f32.mrb[54].mxu1  ;;  %v2041_v59 = vadd.f32 -1.0, %v2633_v44  ;;  %2644 = vpow2.f32 %v1318_v18  ;;  %v1166_v28 = vmin.f32 %v3241_v22, 0.0  ;;  %v1198_v33 = vmin.f32 %v3244_v41, 0.0 }
 0x186   : > { %2367 = vst [vmem:[%s2950_s7 + $0xd0] sm:$0xff] %v2315_v48   ;;  %v930_v21 = vpop.f32.mrb[55].mxu0  ;;  %v1058_v1 = vpop.f32.mrb[55].mxu1  ;;  %v3254_v35 = vadd.f32 %v3227_v40, %v928_v57  ;;  %v3258_v61 = vadd.f32 %v3227_v40, %v1056_v26  ;;  %v1418_v39 = vsel %vm1098_vm12, %v3180_v10, %v2009_v24  ;;  %vm1102_vm4 = vcmp.gt.f32.partialorder %v3241_v22, 0.0 }
 0x187   : > { %v2635_v55 = vpop.eup %2634  ;;  %v1256_v31 = vmul.f32 1.442695, %v1166_v28  ;;  %v1320_v2 = vmul.f32 1.442695, %v1198_v33  ;;  %v1450_v11 = vsel %vm1130_vm13, %v3183_v62, %v2041_v59  ;;  %vm1134_vm5 = vcmp.gt.f32.partialorder %v3244_v41, 0.0 }
 0x188   : > { %v2637_v36 = vpop.eup %2636  ;;  %v2010_v5 = vadd.f32 -1.0, %v2635_v55  ;;  %v1167_v43 = vmin.f32 %v3254_v35, 0.0  ;;  %v1199_v13 = vmin.f32 %v3258_v61, 0.0  ;;  %vm1103_vm6 = vcmp.gt.f32.partialorder %v3254_v35, 0.0 }
 0x189   : > { %v2042_v9 = vadd.f32 -1.0, %v2637_v36  ;;  %2646 = vpow2.f32 %v1256_v31  ;;  %vm1135_vm7 = vcmp.gt.f32.partialorder %v3258_v61, 0.0 }
 0x18a   : > { %v1419_v45 = vsel %vm1099_vm14, %v3193_v25, %v2010_v5  ;;  %2648 = vpow2.f32 %v1320_v2  ;;  %v1258_v49 = vmul.f32 1.442695, %v1167_v43  ;;  %v933_v19 = vpop.f32.mrb[56].mxu0  ;;  %v1061_v10 = vpop.f32.mrb[56].mxu1  ;;  %v1322_v56 = vmul.f32 1.442695, %v1199_v13 }
 0x18b   : > { %v2240_v15 = vpack.c.bf16 %v1419_v45, %v1418_v39  ;;  %v1451_v7 = vsel %vm1131_vm15, %v3197_v29, %v2042_v9  ;;  %v2639_v53 = vpop.eup %2638  ;;  %v3269_v58 = vadd.f32 %v3227_v40, %v933_v19  ;;  %v3272_v62 = vadd.f32 %v3227_v40, %v1061_v10  ;;  %v935_v25 = vpop.f32.mrb[57].mxu0 }
 0x18c   : > { %v2320_v23 = vpack.c.bf16 %v1451_v7, %v1450_v11  ;;  %v1063_v20 = vpop.f32.mrb[57].mxu1  ;;  %v2641_v16 = vpop.eup %2640  ;;  %v2011_v60 = vadd.f32 -1.0, %v2639_v53  ;;  %2650 = vpow2.f32 %v1258_v49 }
 0x18d   : > { %2352 = vst [vmem:[%s2950_s7 + $0x58] sm:$0xff] %v2240_v15   ;;  %v936_v29 = vpop.f32.mrb[58].mxu0  ;;  %v1064_v0 = vpop.f32.mrb[58].mxu1  ;;  %v2043_v32 = vadd.f32 -1.0, %v2641_v16  ;;  %2652 = vpow2.f32 %v1322_v56  ;;  %v1168_v3 = vmin.f32 %v3269_v58, 0.0  ;;  %v1200_v6 = vmin.f32 %v3272_v62, 0.0 }
 0x18e   : > { %2368 = vst [vmem:[%s2950_s7 + $0xd8] sm:$0xff] %v2320_v23   ;;  %v938_v37 = vpop.f32.mrb[59].mxu0  ;;  %v1066_v27 = vpop.f32.mrb[59].mxu1  ;;  %v3282_v50 = vadd.f32 %v3227_v40, %v936_v29  ;;  %v3286_v34 = vadd.f32 %v3227_v40, %v1064_v0  ;;  %v1420_v12 = vsel %vm1100_vm0, %v3208_v47, %v2011_v60  ;;  %vm1104_vm8 = vcmp.gt.f32.partialorder %v3269_v58, 0.0 }
 0x18f   : > { %v2643_v17 = vpop.eup %2642  ;;  %v1260_v51 = vmul.f32 1.442695, %v1168_v3  ;;  %v1324_v38 = vmul.f32 1.442695, %v1200_v6  ;;  %v1452_v48 = vsel %vm1132_vm1, %v3211_v30, %v2043_v32  ;;  %vm1136_vm10 = vcmp.gt.f32.partialorder %v3272_v62, 0.0 }
 0x190   : > { %v2645_v8 = vpop.eup %2644  ;;  %v2012_v42 = vadd.f32 -1.0, %v2643_v17  ;;  %v1169_v14 = vmin.f32 %v3282_v50, 0.0  ;;  %v1201_v52 = vmin.f32 %v3286_v34, 0.0  ;;  %vm1105_vm9 = vcmp.gt.f32.partialorder %v3282_v50, 0.0 }
 0x191   : > { %v2044_v46 = vadd.f32 -1.0, %v2645_v8  ;;  %2654 = vpow2.f32 %v1260_v51  ;;  %vm1137_vm11 = vcmp.gt.f32.partialorder %v3286_v34, 0.0 }
 0x192   : > { %v1421_v18 = vsel %vm1101_vm2, %v3221_v63, %v2012_v42  ;;  %2656 = vpow2.f32 %v1324_v38  ;;  %v1262_v24 = vmul.f32 1.442695, %v1169_v14  ;;  %v941_v57 = vpop.f32.mrb[60].mxu0  ;;  %v1069_v47 = vpop.f32.mrb[60].mxu1  ;;  %v1326_v28 = vmul.f32 1.442695, %v1201_v52 }
 0x193   : > { %v2245_v54 = vpack.c.bf16 %v1421_v18, %v1420_v12  ;;  %v1453_v44 = vsel %vm1133_vm3, %v3230_v4, %v2044_v46  ;;  %v2647_v26 = vpop.eup %2646  ;;  %v3297_v21 = vadd.f32 %v3227_v40, %v941_v57  ;;  %v3300_v30 = vadd.f32 %v3227_v40, %v1069_v47  ;;  %v943_v63 = vpop.f32.mrb[61].mxu0 }
 0x194   : > { %v2325_v59 = vpack.c.bf16 %v1453_v44, %v1452_v48  ;;  %v1071_v1 = vpop.f32.mrb[61].mxu1  ;;  %v2649_v55 = vpop.eup %2648  ;;  %v2013_v33 = vadd.f32 -1.0, %v2647_v26  ;;  %2658 = vpow2.f32 %v1262_v24 }
 0x195   : > { %2353 = vst [vmem:[%s2950_s7 + $0x60] sm:$0xff] %v2245_v54   ;;  %v944_v4 = vpop.f32.mrb[62].mxu0  ;;  %v1072_v36 = vpop.f32.mrb[62].mxu1  ;;  %v2045_v5 = vadd.f32 -1.0, %v2649_v55  ;;  %2660 = vpow2.f32 %v1326_v28  ;;  %v1170_v31 = vmin.f32 %v3297_v21, 0.0  ;;  %v1202_v43 = vmin.f32 %v3300_v30, 0.0 }
 0x196   : > { %2369 = vst [vmem:[%s2950_s7 + $0xe0] sm:$0xff] %v2325_v59   ;;  %v946_v39 = vpop.f32.mrb[63].mxu0  ;;  %v1074_v9 = vpop.f32.mrb[63].mxu1  ;;  %v945_v11 = vadd.f32 %v3227_v40, %v944_v4  ;;  %v1073_v7 = vadd.f32 %v3227_v40, %v1072_v36  ;;  %v1422_v49 = vsel %vm1102_vm4, %v3241_v22, %v2013_v33  ;;  %vm1106_vm12 = vcmp.gt.f32.partialorder %v3297_v21, 0.0 }
 0x197   : > { %v2651_v2 = vpop.eup %2650  ;;  %v1264_v15 = vmul.f32 1.442695, %v1170_v31  ;;  %v1328_v10 = vmul.f32 1.442695, %v1202_v43  ;;  %v1454_v23 = vsel %vm1134_vm5, %v3244_v41, %v2045_v5  ;;  %vm1138_vm14 = vcmp.gt.f32.partialorder %v3300_v30, 0.0 }
 0x198   : > { %v2653_v45 = vpop.eup %2652  ;;  %v2014_v13 = vadd.f32 -1.0, %v2651_v2  ;;  %v1171_v53 = vmin.f32 %v945_v11, 0.0  ;;  %v1203_v25 = vmin.f32 %v1073_v7, 0.0  ;;  %vm1107_vm13 = vcmp.gt.f32.partialorder %v945_v11, 0.0 }
 0x199   : > { %v2046_v19 = vadd.f32 -1.0, %v2653_v45  ;;  %2662 = vpow2.f32 %v1264_v15  ;;  %vm1139_vm15 = vcmp.gt.f32.partialorder %v1073_v7, 0.0 }
 0x19a   : > { %v1423_v56 = vsel %vm1103_vm6, %v3254_v35, %v2014_v13  ;;  %2664 = vpow2.f32 %v1328_v10  ;;  %v1266_v40 = vmul.f32 1.442695, %v1171_v53  ;;  %v1330_v0 = vmul.f32 1.442695, %v1203_v25 }
 0x19b   : > { %v2250_v20 = vpack.c.bf16 %v1423_v56, %v1422_v49  ;;  %v1455_v16 = vsel %vm1135_vm7, %v3258_v61, %v2046_v19  ;;  %v2655_v60 = vpop.eup %2654 }
 0x19c   : > { %v2330_v29 = vpack.c.bf16 %v1455_v16, %v1454_v23  ;;  %v2657_v22 = vpop.eup %2656  ;;  %2666 = vpow2.f32 %v1266_v40  ;;  %v2015_v32 = vadd.f32 -1.0, %v2655_v60 }
 0x19d   : > { %2354 = vst [vmem:[%s2950_s7 + $0x68] sm:$0xff] %v2250_v20   ;;  %2668 = vpow2.f32 %v1330_v0  ;;  %v2047_v41 = vadd.f32 -1.0, %v2657_v22 }
 0x19e   : > { %2370 = vst [vmem:[%s2950_s7 + $0xe8] sm:$0xff] %v2330_v29   ;;  %v2659_v3 = vpop.eup %2658  ;;  %v1424_v27 = vsel %vm1104_vm8, %v3269_v58, %v2015_v32 }
 0x19f   : > { %v2661_v35 = vpop.eup %2660  ;;  %v2016_v37 = vadd.f32 -1.0, %v2659_v3  ;;  %v1456_v6 = vsel %vm1136_vm10, %v3272_v62, %v2047_v41 }
 0x1a0   : > { %v2048_v61 = vadd.f32 -1.0, %v2661_v35 }
 0x1a1   : > { %v1425_v17 = vsel %vm1105_vm9, %v3282_v50, %v2016_v37 }
 0x1a2   : > { %v2255_v8 = vpack.c.bf16 %v1425_v17, %v1424_v27  ;;  %v1457_v42 = vsel %vm1137_vm11, %v3286_v34, %v2048_v61 }
 0x1a3   : > { %v2663_v51 = vpop.eup %2662  ;;  %v2335_v12 = vpack.c.bf16 %v1457_v42, %v1456_v6 }
 0x1a4   : > { %v2665_v46 = vpop.eup %2664  ;;  %2355 = vst [vmem:[%s2950_s7 + $0x70] sm:$0xff] %v2255_v8   ;;  %v2017_v38 = vadd.f32 -1.0, %v2663_v51 }
 0x1a5   : > { %2371 = vst [vmem:[%s2950_s7 + $0xf0] sm:$0xff] %v2335_v12   ;;  %v2049_v58 = vadd.f32 -1.0, %v2665_v46 }
 0x1a6   : > { %v2667_v14 = vpop.eup %2666  ;;  %v1426_v62 = vsel %vm1106_vm12, %v3297_v21, %v2017_v38 }
 0x1a7   : > { %v2669_v48 = vpop.eup %2668  ;;  %v2018_v18 = vadd.f32 -1.0, %v2667_v14  ;;  %v1458_v52 = vsel %vm1138_vm14, %v3300_v30, %v2049_v58 }
 0x1a8   : > { %v2050_v50 = vadd.f32 -1.0, %v2669_v48 }
 0x1a9   : > { %v1427_v34 = vsel %vm1107_vm13, %v945_v11, %v2018_v18 }
 0x1aa   : > { %v2260_v54 = vpack.c.bf16 %v1427_v34, %v1426_v62  ;;  %v1459_v44 = vsel %vm1139_vm15, %v1073_v7, %v2050_v50 }
 0x1ab   : > { %v2340_v24 = vpack.c.bf16 %v1459_v44, %v1458_v52 }
 0x1ac   : > { %2356 = vst [vmem:[%s2950_s7 + $0x78] sm:$0xff] %v2260_v54  }
 0x1ad   : > { %2372 = vst [vmem:[%s2950_s7 + $0xf8] sm:$0xff] %v2340_v24  }
 0x1ae PF: > { %s13_s14 = sadd.s32 1, %s2693_s14   ;;  %s3349_s12 = smov %s2689_s13 }
 0x1af   : > { %p10_p5 = scmp.ge.s32.totalorder %s13_s14, 18   ;;  %s3350_s13 = smov %s3352_s15 }
 0x1b1   :  { %12 = sbr.rel (!%p10_p5) target bundleno = 2 (0x2), region = 68 }

// kernel: image_autoencoder_forward.9
= control target key start
LH: loop header
LB: loop body
LE: loop exit
PB: predicated region body
PF: predicated region fallthrough
CT: control target
= control target key end

     0   :  { %s2716_s12 = smov 0   ;;  %s2718_s13 = smov 0   ;;  %s3345_s0 = inlined_call_operand.vmem [shape: bf16[2048,256], index: 0, kind: input, shape index: {}]   ;;  %s3346_s1 = inlined_call_operand.vmem [shape: bf16[256,128], index: 1, kind: input, shape index: {}]   ;;  %s3347_s2 = inlined_call_operand.vmem [shape: f32[1,128], index: 2, kind: input, shape index: {}]   ;;  %s3348_s3 = inlined_call_operand.vmem [shape: bf16[2048,128], index: 3, kind: output, shape index: {}]  }
   0x1   :  { %s2720_s14 = smov 0  }
   0x2 LB: > { %s32_s15 = sadd.s32 1, %s2689_s13  ;;  %p1900_p0 = scmp.ge.s32.totalorder %s2693_s14, 1  ;;  %s2693_s14 = sphi %s2720_s14, %s13_s14   ;;  %s2689_s13 = sphi %s2718_s13, %s3350_s13   ;;  %s2685_s12 = sphi %s2716_s12, %s3349_s12  }
   0x3   : > { %p34_p1 = scmp.ge.s32.totalorder %s32_s15, 4  ;;  %p191_p2 = scmp.lt.s32.totalorder %s2693_s14, 5 }
   0x5   : > { %s3352_s15 = smov (%p34_p1, %s32_s15), 0  ;;  %p192_p3 = pnand %p1900_p0, %p191_p2 }
   0x6   : > { %v2430_v0 = vld [vmem:[%s3346_s1] sm:$0xff] (!%p192_p3)   ;;  %v2695_v1 = vmov (!%p192_p3), 0   ;;  %s1901_s18 = sshll.u32 (!%p192_p3), %s2685_s12, 6  ;;  %v2431_v2 = vld [vmem:[%s3346_s1 + $0x8] sm:$0xff] (!%p192_p3)   ;;  %v2432_v3 = vld [vmem:[%s3346_s1 + $0x10] sm:$0xff] (!%p192_p3)  }
   0x7   : > { %195 = sbr.rel (%p192_p3) target bundleno = 430 (0x1ae), region = 32  ;;  %787 = vmatprep.subr.bf16.mxu0 (!%p192_p3), %v2695_v1  ;;  %2373 = vmatprep.subr.bf16.mxu1 (!%p192_p3), %v2695_v1  ;;  %p236_p4 = scmp.lt.s32.totalorder (!%p192_p3), %s1901_s18, 255  ;;  %v2433_v4 = vld [vmem:[%s3346_s1 + $0x18] sm:$0xff] (!%p192_p3)   ;;  %v2434_v5 = vld [vmem:[%s3346_s1 + $0x20] sm:$0xff] (!%p192_p3)   ;;  %v2435_v7 = vld [vmem:[%s3346_s1 + $0x28] sm:$0xff] (!%p192_p3)  }
   0x8   : > { %788 = vmatpush1.bf16.msra.mxu0 (!%p192_p3), %v2430_v0  ;;  %2389 = vmatpush1.bf16.msra.mxu1 (!%p192_p3), %v2430_v0  ;;  %v2436_v9 = vld [vmem:[%s3346_s1 + $0x30] sm:$0xff] (!%p192_p3)   ;;  %v2437_v10 = vld [vmem:[%s3346_s1 + $0x38] sm:$0xff] (!%p192_p3)   ;;  %v2438_v11 = vld [vmem:[%s3346_s1 + $0x40] sm:$0xff] (!%p192_p3)  }
   0x9   : > { %789 = vmatprep.subr.bf16.mxu0 (!%p192_p3), %v2695_v1  ;;  %2374 = vmatprep.subr.bf16.mxu1 (!%p192_p3), %v2695_v1  ;;  %v2439_v12 = vld [vmem:[%s3346_s1 + $0x48] sm:$0xff] (!%p192_p3)   ;;  %v2440_v13 = vld [vmem:[%s3346_s1 + $0x50] sm:$0xff] (!%p192_p3)   ;;  %v2441_v14 = vld [vmem:[%s3346_s1 + $0x58] sm:$0xff] (!%p192_p3)  }
   0xa   : > { %v2442_v15 = vld [vmem:[%s3346_s1 + $0x60] sm:$0xff] (!%p192_p3)   ;;  %v2443_v16 = vld [vmem:[%s3346_s1 + $0x68] sm:$0xff] (!%p192_p3)   ;;  %v2444_v17 = vld [vmem:[%s3346_s1 + $0x70] sm:$0xff] (!%p192_p3)  }
   0xb   : > { %v2445_v18 = vld [vmem:[%s3346_s1 + $0x78] sm:$0xff] (!%p192_p3)  }
   0xc   : > { %790 = vmatpush1.bf16.msra.mxu0 (!%p192_p3), %v2431_v2  ;;  %2390 = vmatpush1.bf16.msra.mxu1 (!%p192_p3), %v2431_v2 }
   0xd   : > { %791 = vmatprep.subr.bf16.mxu0 (!%p192_p3), %v2695_v1  ;;  %2375 = vmatprep.subr.bf16.mxu1 (!%p192_p3), %v2695_v1 }
   0xe   : > { %s3354_s18 = smov (!%p236_p4, %s1901_s18), 255 }
   0xf   : > { %s2117_s25 = sshll.u32 %s3354_s18, 3 }
  0x10   : > { %792 = vmatpush1.bf16.msra.mxu0 %v2432_v3  ;;  %2391 = vmatpush1.bf16.msra.mxu1 %v2432_v3  ;;  %s2763_s30 = scalar_lea.vmem %s3345_s0, %s2117_s25 }
  0x11   : > { %793 = vmatprep.subr.bf16.mxu0 %v2695_v1  ;;  %2376 = vmatprep.subr.bf16.mxu1 %v2695_v1  ;;  %v2448_v6 = vld [vmem:[%s2763_s30 + $0x4] ss:$8 sps:$4 sm:$0xff]   ;;  %v2446_v19 = vld [vmem:[%s2763_s30] ss:$8 sps:$4 sm:$0xff]   ;;  %v2452_v21 = vld [vmem:[%s2763_s30 + $0x14] ss:$8 sps:$4 sm:$0xff]  }
  0x12   : > { %v2451_v8 = vld [vmem:[%s2763_s30 + $0x104] ss:$8 sps:$4 sm:$0xff]   ;;  %819 = vmatprep.mubr.bf16.mxu0 %v2448_v6  ;;  %v2449_v20 = vld [vmem:[%s2763_s30 + $0x100] ss:$8 sps:$4 sm:$0xff]   ;;  %v2454_v22 = vld [vmem:[%s2763_s30 + $0x114] ss:$8 sps:$4 sm:$0xff]  }
  0x13   : > { %947 = vmatprep.mubr.bf16.mxu1 %v2451_v8  ;;  %v2456_v23 = vld [vmem:[%s2763_s30 + $0x10] ss:$8 sps:$4 sm:$0xff]   ;;  %v2458_v25 = vld [vmem:[%s2763_s30 + $0x24] ss:$8 sps:$4 sm:$0xff]   ;;  %v2462_v27 = vld [vmem:[%s2763_s30 + $0x20] ss:$8 sps:$4 sm:$0xff]  }
  0x14   : > { %794 = vmatpush1.bf16.msra.mxu0 %v2433_v4  ;;  %2392 = vmatpush1.bf16.msra.mxu1 %v2433_v4  ;;  %v2457_v24 = vld [vmem:[%s2763_s30 + $0x110] ss:$8 sps:$4 sm:$0xff]   ;;  %v2460_v26 = vld [vmem:[%s2763_s30 + $0x124] ss:$8 sps:$4 sm:$0xff]   ;;  %v2463_v28 = vld [vmem:[%s2763_s30 + $0x120] ss:$8 sps:$4 sm:$0xff]  }
  0x15   : > { %795 = vmatprep.subr.bf16.mxu0 %v2695_v1  ;;  %2377 = vmatprep.subr.bf16.mxu1 %v2695_v1  ;;  %v2464_v29 = vld [vmem:[%s2763_s30 + $0x34] ss:$8 sps:$4 sm:$0xff]   ;;  %v2468_v31 = vld [vmem:[%s2763_s30 + $0x30] ss:$8 sps:$4 sm:$0xff]   ;;  %v2470_v33 = vld [vmem:[%s2763_s30 + $0x44] ss:$8 sps:$4 sm:$0xff]  }
  0x16   : > { %v2466_v30 = vld [vmem:[%s2763_s30 + $0x134] ss:$8 sps:$4 sm:$0xff]   ;;  %v2469_v32 = vld [vmem:[%s2763_s30 + $0x130] ss:$8 sps:$4 sm:$0xff]   ;;  %v2472_v34 = vld [vmem:[%s2763_s30 + $0x144] ss:$8 sps:$4 sm:$0xff]  }
  0x17   : > { %v2474_v35 = vld [vmem:[%s2763_s30 + $0x40] ss:$8 sps:$4 sm:$0xff]   ;;  %v2476_v37 = vld [vmem:[%s2763_s30 + $0x54] ss:$8 sps:$4 sm:$0xff]   ;;  %v2480_v39 = vld [vmem:[%s2763_s30 + $0x50] ss:$8 sps:$4 sm:$0xff]  }
  0x18   : > { %796 = vmatpush1.bf16.msra.mxu0 %v2434_v5  ;;  %2393 = vmatpush1.bf16.msra.mxu1 %v2434_v5  ;;  %v2475_v36 = vld [vmem:[%s2763_s30 + $0x140] ss:$8 sps:$4 sm:$0xff]   ;;  %v2478_v38 = vld [vmem:[%s2763_s30 + $0x154] ss:$8 sps:$4 sm:$0xff]   ;;  %v2481_v40 = vld [vmem:[%s2763_s30 + $0x150] ss:$8 sps:$4 sm:$0xff]  }
  0x19   : > { %797 = vmatprep.subr.bf16.mxu0 %v2695_v1  ;;  %2378 = vmatprep.subr.bf16.mxu1 %v2695_v1  ;;  %v2482_v41 = vld [vmem:[%s2763_s30 + $0x64] ss:$8 sps:$4 sm:$0xff]   ;;  %v2486_v43 = vld [vmem:[%s2763_s30 + $0x60] ss:$8 sps:$4 sm:$0xff]   ;;  %v2488_v45 = vld [vmem:[%s2763_s30 + $0x74] ss:$8 sps:$4 sm:$0xff]  }
  0x1a   : > { %v2484_v42 = vld [vmem:[%s2763_s30 + $0x164] ss:$8 sps:$4 sm:$0xff]   ;;  %v2487_v44 = vld [vmem:[%s2763_s30 + $0x160] ss:$8 sps:$4 sm:$0xff]   ;;  %v2490_v46 = vld [vmem:[%s2763_s30 + $0x174] ss:$8 sps:$4 sm:$0xff]  }
  0x1b   : > { %v2492_v47 = vld [vmem:[%s2763_s30 + $0x70] ss:$8 sps:$4 sm:$0xff]   ;;  %v2494_v49 = vld [vmem:[%s2763_s30 + $0x84] ss:$8 sps:$4 sm:$0xff]   ;;  %v2498_v51 = vld [vmem:[%s2763_s30 + $0x80] ss:$8 sps:$4 sm:$0xff]  }
  0x1c   : > { %798 = vmatpush1.bf16.msra.mxu0 %v2435_v7  ;;  %2394 = vmatpush1.bf16.msra.mxu1 %v2435_v7  ;;  %v2493_v48 = vld [vmem:[%s2763_s30 + $0x170] ss:$8 sps:$4 sm:$0xff]   ;;  %v2496_v50 = vld [vmem:[%s2763_s30 + $0x184] ss:$8 sps:$4 sm:$0xff]   ;;  %v2499_v52 = vld [vmem:[%s2763_s30 + $0x180] ss:$8 sps:$4 sm:$0xff]  }
  0x1d   : > { %799 = vmatprep.subr.bf16.mxu0 %v2695_v1  ;;  %2379 = vmatprep.subr.bf16.mxu1 %v2695_v1  ;;  %v2500_v53 = vld [vmem:[%s2763_s30 + $0x94] ss:$8 sps:$4 sm:$0xff]   ;;  %v2504_v55 = vld [vmem:[%s2763_s30 + $0x90] ss:$8 sps:$4 sm:$0xff]   ;;  %v2506_v57 = vld [vmem:[%s2763_s30 + $0xa4] ss:$8 sps:$4 sm:$0xff]  }
  0x1e   : > { %v2502_v54 = vld [vmem:[%s2763_s30 + $0x194] ss:$8 sps:$4 sm:$0xff]   ;;  %v2505_v56 = vld [vmem:[%s2763_s30 + $0x190] ss:$8 sps:$4 sm:$0xff]   ;;  %v2508_v58 = vld [vmem:[%s2763_s30 + $0x1a4] ss:$8 sps:$4 sm:$0xff]  }
  0x1f   : > { %v2510_v59 = vld [vmem:[%s2763_s30 + $0xa0] ss:$8 sps:$4 sm:$0xff]   ;;  %v2512_v61 = vld [vmem:[%s2763_s30 + $0xb4] ss:$8 sps:$4 sm:$0xff]   ;;  %v2516_v63 = vld [vmem:[%s2763_s30 + $0xb0] ss:$8 sps:$4 sm:$0xff]  }
  0x20   : > { %800 = vmatpush1.bf16.msra.mxu0 %v2436_v9  ;;  %2395 = vmatpush1.bf16.msra.mxu1 %v2436_v9  ;;  %v2511_v60 = vld [vmem:[%s2763_s30 + $0x1a0] ss:$8 sps:$4 sm:$0xff]   ;;  %v2514_v62 = vld [vmem:[%s2763_s30 + $0x1b4] ss:$8 sps:$4 sm:$0xff]   ;;  %v2517_v0 = vld [vmem:[%s2763_s30 + $0x1b0] ss:$8 sps:$4 sm:$0xff]  }
  0x21   : > { %801 = vmatprep.subr.bf16.mxu0 %v2695_v1  ;;  %2380 = vmatprep.subr.bf16.mxu1 %v2695_v1  ;;  %v2520_v2 = vld [vmem:[%s2763_s30 + $0x1c4] ss:$8 sps:$4 sm:$0xff]   ;;  %v2522_v3 = vld [vmem:[%s2763_s30 + $0xc0] ss:$8 sps:$4 sm:$0xff]   ;;  %v2524_v5 = vld [vmem:[%s2763_s30 + $0xd4] ss:$8 sps:$4 sm:$0xff]  }
  0x22   : > { %v2523_v4 = vld [vmem:[%s2763_s30 + $0x1c0] ss:$8 sps:$4 sm:$0xff]   ;;  %v2526_v6 = vld [vmem:[%s2763_s30 + $0x1d4] ss:$8 sps:$4 sm:$0xff]   ;;  %v2528_v7 = vld [vmem:[%s2763_s30 + $0xd0] ss:$8 sps:$4 sm:$0xff]  }
  0x23   : > { %v2529_v8 = vld [vmem:[%s2763_s30 + $0x1d0] ss:$8 sps:$4 sm:$0xff]   ;;  %v2530_v9 = vld [vmem:[%s2763_s30 + $0xe4] ss:$8 sps:$4 sm:$0xff]  }
  0x24   : > { %802 = vmatpush1.bf16.msra.mxu0 %v2437_v10  ;;  %2396 = vmatpush1.bf16.msra.mxu1 %v2437_v10  ;;  %v2532_v10 = vld [vmem:[%s2763_s30 + $0x1e4] ss:$8 sps:$4 sm:$0xff]  }
  0x25   : > { %803 = vmatprep.subr.bf16.mxu0 %v2695_v1  ;;  %2381 = vmatprep.subr.bf16.mxu1 %v2695_v1 }
  0x28   : > { %804 = vmatpush1.bf16.msra.mxu0 %v2438_v11  ;;  %2397 = vmatpush1.bf16.msra.mxu1 %v2438_v11  ;;  %v2534_v11 = vld [vmem:[%s2763_s30 + $0xe0] ss:$8 sps:$4 sm:$0xff]  }
  0x29   : > { %805 = vmatprep.subr.bf16.mxu0 %v2695_v1  ;;  %2382 = vmatprep.subr.bf16.mxu1 %v2695_v1 }
  0x2c   : > { %806 = vmatpush1.bf16.msra.mxu0 %v2439_v12  ;;  %2398 = vmatpush1.bf16.msra.mxu1 %v2439_v12  ;;  %v2535_v12 = vld [vmem:[%s2763_s30 + $0x1e0] ss:$8 sps:$4 sm:$0xff]  }
  0x2d   : > { %807 = vmatprep.subr.bf16.mxu0 %v2695_v1  ;;  %2383 = vmatprep.subr.bf16.mxu1 %v2695_v1 }
  0x30   : > { %808 = vmatpush1.bf16.msra.mxu0 %v2440_v13  ;;  %2399 = vmatpush1.bf16.msra.mxu1 %v2440_v13  ;;  %v2536_v13 = vld [vmem:[%s2763_s30 + $0xf4] ss:$8 sps:$4 sm:$0xff]  }
  0x31   : > { %809 = vmatprep.subr.bf16.mxu0 %v2695_v1  ;;  %2384 = vmatprep.subr.bf16.mxu1 %v2695_v1 }
  0x34   : > { %810 = vmatpush1.bf16.msra.mxu0 %v2441_v14  ;;  %2400 = vmatpush1.bf16.msra.mxu1 %v2441_v14  ;;  %v2538_v14 = vld [vmem:[%s2763_s30 + $0x1f4] ss:$8 sps:$4 sm:$0xff]  }
  0x35   : > { %811 = vmatprep.subr.bf16.mxu0 %v2695_v1  ;;  %2385 = vmatprep.subr.bf16.mxu1 %v2695_v1 }
  0x38   : > { %812 = vmatpush1.bf16.msra.mxu0 %v2442_v15  ;;  %2401 = vmatpush1.bf16.msra.mxu1 %v2442_v15  ;;  %v2540_v15 = vld [vmem:[%s2763_s30 + $0xf0] ss:$8 sps:$4 sm:$0xff]  }
  0x39   : > { %813 = vmatprep.subr.bf16.mxu0 %v2695_v1  ;;  %2386 = vmatprep.subr.bf16.mxu1 %v2695_v1 }
  0x3c   : > { %814 = vmatpush1.bf16.msra.mxu0 %v2443_v16  ;;  %2402 = vmatpush1.bf16.msra.mxu1 %v2443_v16  ;;  %v2541_v16 = vld [vmem:[%s2763_s30 + $0x1f0] ss:$8 sps:$4 sm:$0xff]  }
  0x3d   : > { %815 = vmatprep.subr.bf16.mxu0 %v2695_v1  ;;  %2387 = vmatprep.subr.bf16.mxu1 %v2695_v1 }
  0x40   : > { %816 = vmatpush1.bf16.msra.mxu0 %v2444_v17  ;;  %2403 = vmatpush1.bf16.msra.mxu1 %v2444_v17  ;;  %v2889_v17 = vld [vmem:[%s3347_s2] ss:$0 sm:$0xff] }
  0x41   : > { %817 = vmatprep.subr.bf16.mxu0 %v2695_v1  ;;  %2388 = vmatprep.subr.bf16.mxu1 %v2695_v1  ;;  %v2518_v1 = vld [vmem:[%s2763_s30 + $0xc4] ss:$8 sps:$4 sm:$0xff]   ;;  %s1905_s30 = sshll.u32 %s3354_s18, 2 }
  0x42   : > { %s2950_s7 = scalar_lea.vmem %s3348_s3, %s1905_s30 }
  0x44   : > { %818 = vmatpush1.bf16.msra.mxu0 %v2445_v18  ;;  %2404 = vmatpush1.bf16.msra.mxu1 %v2445_v18 }
  0x47   : > { %820 = vmatmul.mubr.bf16.vlgmr.msra.gmra.mrb[0].mxu0 %v2446_v19  ;;  %948 = vmatmul.mubr.bf16.vlgmr.msra.gmra.mrb[0].mxu1 %v2449_v20 }
  0x48   : > { %827 = vmatprep.mubr.bf16.mxu0 %v2452_v21  ;;  %955 = vmatprep.mubr.bf16.mxu1 %v2454_v22 }
  0x4f   : > { %828 = vmatmul.mubr.bf16.gmra.mrb[4].mxu0 %v2456_v23  ;;  %956 = vmatmul.mubr.bf16.gmra.mrb[4].mxu1 %v2457_v24 }
  0x50   : > { %835 = vmatprep.mubr.bf16.mxu0 %v2458_v25  ;;  %963 = vmatprep.mubr.bf16.mxu1 %v2460_v26 }
  0x57   : > { %836 = vmatmul.mubr.bf16.gmra.mrb[8].mxu0 %v2462_v27  ;;  %964 = vmatmul.mubr.bf16.gmra.mrb[8].mxu1 %v2463_v28 }
  0x58   : > { %843 = vmatprep.mubr.bf16.mxu0 %v2464_v29  ;;  %971 = vmatprep.mubr.bf16.mxu1 %v2466_v30 }
  0x5f   : > { %844 = vmatmul.mubr.bf16.gmra.mrb[12].mxu0 %v2468_v31  ;;  %972 = vmatmul.mubr.bf16.gmra.mrb[12].mxu1 %v2469_v32 }
  0x60   : > { %851 = vmatprep.mubr.bf16.mxu0 %v2470_v33  ;;  %979 = vmatprep.mubr.bf16.mxu1 %v2472_v34 }
  0x67   : > { %852 = vmatmul.mubr.bf16.gmra.mrb[16].mxu0 %v2474_v35  ;;  %980 = vmatmul.mubr.bf16.gmra.mrb[16].mxu1 %v2475_v36 }
  0x68   : > { %859 = vmatprep.mubr.bf16.mxu0 %v2476_v37  ;;  %987 = vmatprep.mubr.bf16.mxu1 %v2478_v38 }
  0x6f   : > { %860 = vmatmul.mubr.bf16.gmra.mrb[20].mxu0 %v2480_v39  ;;  %988 = vmatmul.mubr.bf16.gmra.mrb[20].mxu1 %v2481_v40 }
  0x70   : > { %867 = vmatprep.mubr.bf16.mxu0 %v2482_v41  ;;  %995 = vmatprep.mubr.bf16.mxu1 %v2484_v42 }
  0x77   : > { %868 = vmatmul.mubr.bf16.gmra.mrb[24].mxu0 %v2486_v43  ;;  %996 = vmatmul.mubr.bf16.gmra.mrb[24].mxu1 %v2487_v44 }
  0x78   : > { %875 = vmatprep.mubr.bf16.mxu0 %v2488_v45  ;;  %1003 = vmatprep.mubr.bf16.mxu1 %v2490_v46 }
  0x7f   : > { %876 = vmatmul.mubr.bf16.gmra.mrb[28].mxu0 %v2492_v47  ;;  %1004 = vmatmul.mubr.bf16.gmra.mrb[28].mxu1 %v2493_v48 }
  0x80   : > { %883 = vmatprep.mubr.bf16.mxu0 %v2494_v49  ;;  %1011 = vmatprep.mubr.bf16.mxu1 %v2496_v50 }
  0x87   : > { %884 = vmatmul.mubr.bf16.gmra.mrb[32].mxu0 %v2498_v51  ;;  %1012 = vmatmul.mubr.bf16.gmra.mrb[32].mxu1 %v2499_v52 }
  0x88   : > { %891 = vmatprep.mubr.bf16.mxu0 %v2500_v53  ;;  %1019 = vmatprep.mubr.bf16.mxu1 %v2502_v54 }
  0x8f   : > { %892 = vmatmul.mubr.bf16.gmra.mrb[36].mxu0 %v2504_v55  ;;  %1020 = vmatmul.mubr.bf16.gmra.mrb[36].mxu1 %v2505_v56 }
  0x90   : > { %899 = vmatprep.mubr.bf16.mxu0 %v2506_v57  ;;  %1027 = vmatprep.mubr.bf16.mxu1 %v2508_v58 }
  0x97   : > { %900 = vmatmul.mubr.bf16.gmra.mrb[40].mxu0 %v2510_v59  ;;  %1028 = vmatmul.mubr.bf16.gmra.mrb[40].mxu1 %v2511_v60 }
  0x98   : > { %907 = vmatprep.mubr.bf16.mxu0 %v2512_v61  ;;  %1035 = vmatprep.mubr.bf16.mxu1 %v2514_v62 }
  0x9f   : > { %908 = vmatmul.mubr.bf16.gmra.mrb[44].mxu0 %v2516_v63  ;;  %1036 = vmatmul.mubr.bf16.gmra.mrb[44].mxu1 %v2517_v0 }
  0xa0   : > { %915 = vmatprep.mubr.bf16.mxu0 %v2518_v1  ;;  %1043 = vmatprep.mubr.bf16.mxu1 %v2520_v2 }
  0xa7   : > { %916 = vmatmul.mubr.bf16.gmra.mrb[48].mxu0 %v2522_v3  ;;  %1044 = vmatmul.mubr.bf16.gmra.mrb[48].mxu1 %v2523_v4 }
  0xa8   : > { %923 = vmatprep.mubr.bf16.mxu0 %v2524_v5  ;;  %1051 = vmatprep.mubr.bf16.mxu1 %v2526_v6 }
  0xaf   : > { %924 = vmatmul.mubr.bf16.gmra.mrb[52].mxu0 %v2528_v7  ;;  %1052 = vmatmul.mubr.bf16.gmra.mrb[52].mxu1 %v2529_v8 }
  0xb0   : > { %931 = vmatprep.mubr.bf16.mxu0 %v2530_v9  ;;  %1059 = vmatprep.mubr.bf16.mxu1 %v2532_v10 }
  0xb7   : > { %932 = vmatmul.mubr.bf16.gmra.mrb[56].mxu0 %v2534_v11  ;;  %1060 = vmatmul.mubr.bf16.gmra.mrb[56].mxu1 %v2535_v12 }
  0xb8   : > { %939 = vmatprep.mubr.bf16.mxu0 %v2536_v13  ;;  %1067 = vmatprep.mubr.bf16.mxu1 %v2538_v14 }
  0xbf   : > { %940 = vmatmul.mubr.bf16.gmra.mrb[60].mxu0 %v2540_v15  ;;  %1068 = vmatmul.mubr.bf16.gmra.mrb[60].mxu1 %v2541_v16 }
 0x11a   : > { %v821_v18 = vpop.f32.mrb[0].mxu0  ;;  %v949_v19 = vpop.f32.mrb[0].mxu1 }
 0x11b   : > { %v2892_v20 = vadd.f32 %v2889_v17, %v821_v18  ;;  %v2895_v21 = vadd.f32 %v2889_v17, %v949_v19  ;;  %v823_v22 = vpop.f32.mrb[1].mxu0  ;;  %v951_v23 = vpop.f32.mrb[1].mxu1 }
 0x11c   : > { %v824_v24 = vpop.f32.mrb[2].mxu0  ;;  %v952_v25 = vpop.f32.mrb[2].mxu1 }
 0x11d   : > { %v1140_v26 = vmin.f32 %v2892_v20, 0.0  ;;  %v1172_v27 = vmin.f32 %v2895_v21, 0.0  ;;  %v826_v28 = vpop.f32.mrb[3].mxu0  ;;  %v954_v29 = vpop.f32.mrb[3].mxu1  ;;  %v2900_v30 = vadd.f32 %v2889_v17, %v824_v24  ;;  %v2903_v31 = vadd.f32 %v2889_v17, %v952_v25 }
 0x11e   : > { %vm1076_vm0 = vcmp.gt.f32.partialorder %v2892_v20, 0.0  ;;  %vm1108_vm1 = vcmp.gt.f32.partialorder %v2895_v21, 0.0 }
 0x11f   : > { %v1204_v32 = vmul.f32 1.442695, %v1140_v26  ;;  %v1268_v33 = vmul.f32 1.442695, %v1172_v27  ;;  %v1141_v34 = vmin.f32 %v2900_v30, 0.0  ;;  %v1173_v35 = vmin.f32 %v2903_v31, 0.0 }
 0x120   : > { %vm1077_vm2 = vcmp.gt.f32.partialorder %v2900_v30, 0.0  ;;  %vm1109_vm3 = vcmp.gt.f32.partialorder %v2903_v31, 0.0 }
 0x121   : > { %2542 = vpow2.f32 %v1204_v32  ;;  %v1206_v36 = vmul.f32 1.442695, %v1141_v34  ;;  %v1270_v37 = vmul.f32 1.442695, %v1173_v35 }
 0x122   : > { %2544 = vpow2.f32 %v1268_v33  ;;  %v829_v38 = vpop.f32.mrb[4].mxu0  ;;  %v957_v39 = vpop.f32.mrb[4].mxu1 }
 0x123   : > { %v2908_v40 = vadd.f32 %v2889_v17, %v829_v38  ;;  %v2911_v41 = vadd.f32 %v2889_v17, %v957_v39  ;;  %v831_v42 = vpop.f32.mrb[5].mxu0  ;;  %v959_v43 = vpop.f32.mrb[5].mxu1  ;;  %2546 = vpow2.f32 %v1206_v36 }
 0x124   : > { %v832_v44 = vpop.f32.mrb[6].mxu0  ;;  %v960_v45 = vpop.f32.mrb[6].mxu1  ;;  %2548 = vpow2.f32 %v1270_v37 }
 0x125   : > { %v1142_v46 = vmin.f32 %v2908_v40, 0.0  ;;  %v834_v47 = vpop.f32.mrb[7].mxu0  ;;  %v962_v48 = vpop.f32.mrb[7].mxu1  ;;  %v1174_v49 = vmin.f32 %v2911_v41, 0.0  ;;  %v2916_v50 = vadd.f32 %v2889_v17, %v832_v44  ;;  %v2919_v51 = vadd.f32 %v2889_v17, %v960_v45 }
 0x126   : > { %vm1078_vm4 = vcmp.gt.f32.partialorder %v2908_v40, 0.0  ;;  %vm1110_vm5 = vcmp.gt.f32.partialorder %v2911_v41, 0.0 }
 0x127   : > { %v1208_v52 = vmul.f32 1.442695, %v1142_v46  ;;  %v1272_v53 = vmul.f32 1.442695, %v1174_v49  ;;  %v1143_v54 = vmin.f32 %v2916_v50, 0.0  ;;  %v1175_v55 = vmin.f32 %v2919_v51, 0.0 }
 0x128   : > { %vm1079_vm6 = vcmp.gt.f32.partialorder %v2916_v50, 0.0  ;;  %vm1111_vm7 = vcmp.gt.f32.partialorder %v2919_v51, 0.0 }
 0x129   : > { %2550 = vpow2.f32 %v1208_v52  ;;  %v1210_v56 = vmul.f32 1.442695, %v1143_v54  ;;  %v1274_v60 = vmul.f32 1.442695, %v1175_v55 }
 0x12a   : > { %2552 = vpow2.f32 %v1272_v53  ;;  %v837_v57 = vpop.f32.mrb[8].mxu0  ;;  %v965_v58 = vpop.f32.mrb[8].mxu1 }
 0x12b   : > { %v2543_v59 = vpop.eup %2542  ;;  %v2924_v61 = vadd.f32 %v2889_v17, %v837_v57  ;;  %v2927_v62 = vadd.f32 %v2889_v17, %v965_v58  ;;  %v839_v63 = vpop.f32.mrb[9].mxu0  ;;  %2554 = vpow2.f32 %v1210_v56 }
 0x12c   : > { %v967_v0 = vpop.f32.mrb[9].mxu1  ;;  %v2545_v1 = vpop.eup %2544  ;;  %v1987_v2 = vadd.f32 -1.0, %v2543_v59  ;;  %2556 = vpow2.f32 %v1274_v60 }
 0x12d   : > { %v840_v3 = vpop.f32.mrb[10].mxu0  ;;  %v968_v4 = vpop.f32.mrb[10].mxu1  ;;  %v2019_v5 = vadd.f32 -1.0, %v2545_v1  ;;  %v1144_v6 = vmin.f32 %v2924_v61, 0.0  ;;  %v1176_v10 = vmin.f32 %v2927_v62, 0.0  ;;  %vm1080_vm8 = vcmp.gt.f32.partialorder %v2924_v61, 0.0 }
 0x12e   : > { %v842_v7 = vpop.f32.mrb[11].mxu0  ;;  %v970_v8 = vpop.f32.mrb[11].mxu1  ;;  %v2936_v11 = vadd.f32 %v2889_v17, %v840_v3  ;;  %v2940_v15 = vadd.f32 %v2889_v17, %v968_v4  ;;  %v1396_v16 = vsel %vm1076_vm0, %v2892_v20, %v1987_v2  ;;  %vm1112_vm9 = vcmp.gt.f32.partialorder %v2927_v62, 0.0 }
 0x12f   : > { %v2547_v9 = vpop.eup %2546  ;;  %v1212_v14 = vmul.f32 1.442695, %v1144_v6  ;;  %v1276_v19 = vmul.f32 1.442695, %v1176_v10  ;;  %v1428_v23 = vsel %vm1108_vm1, %v2895_v21, %v2019_v5 }
 0x130   : > { %v2549_v12 = vpop.eup %2548  ;;  %v1988_v13 = vadd.f32 -1.0, %v2547_v9  ;;  %v1145_v22 = vmin.f32 %v2936_v11, 0.0  ;;  %v1177_v25 = vmin.f32 %v2940_v15, 0.0  ;;  %vm1081_vm10 = vcmp.gt.f32.partialorder %v2936_v11, 0.0 }
 0x131   : > { %v2020_v18 = vadd.f32 -1.0, %v2549_v12  ;;  %2558 = vpow2.f32 %v1212_v14  ;;  %vm1113_vm11 = vcmp.gt.f32.partialorder %v2940_v15, 0.0 }
 0x132   : > { %v1397_v24 = vsel %vm1077_vm2, %v2900_v30, %v1988_v13  ;;  %2560 = vpow2.f32 %v1276_v19  ;;  %v1214_v27 = vmul.f32 1.442695, %v1145_v22  ;;  %v845_v28 = vpop.f32.mrb[12].mxu0  ;;  %v973_v29 = vpop.f32.mrb[12].mxu1  ;;  %v1278_v33 = vmul.f32 1.442695, %v1177_v25 }
 0x133   : > { %v2185_v26 = vpack.c.bf16 %v1397_v24, %v1396_v16  ;;  %v1429_v20 = vsel %vm1109_vm3, %v2903_v31, %v2020_v18  ;;  %v2551_v21 = vpop.eup %2550  ;;  %v2956_v34 = vadd.f32 %v2889_v17, %v845_v28  ;;  %v2959_v30 = vadd.f32 %v2889_v17, %v973_v29  ;;  %v847_v35 = vpop.f32.mrb[13].mxu0 }
 0x134   : > { %v2265_v32 = vpack.c.bf16 %v1429_v20, %v1428_v23  ;;  %v975_v36 = vpop.f32.mrb[13].mxu1  ;;  %v2553_v37 = vpop.eup %2552  ;;  %v1989_v38 = vadd.f32 -1.0, %v2551_v21  ;;  %2562 = vpow2.f32 %v1214_v27 }
 0x135   : > { %2186 = vst [vmem:[%s2950_s7] sm:$0xff] %v2185_v26   ;;  %v848_v31 = vpop.f32.mrb[14].mxu0  ;;  %v976_v39 = vpop.f32.mrb[14].mxu1  ;;  %v2021_v42 = vadd.f32 -1.0, %v2553_v37  ;;  %2564 = vpow2.f32 %v1278_v33  ;;  %v1146_v43 = vmin.f32 %v2956_v34, 0.0  ;;  %v1178_v47 = vmin.f32 %v2959_v30, 0.0 }
 0x136   : > { %2357 = vst [vmem:[%s2950_s7 + $0x80] sm:$0xff] %v2265_v32   ;;  %v850_v44 = vpop.f32.mrb[15].mxu0  ;;  %v978_v45 = vpop.f32.mrb[15].mxu1  ;;  %v2969_v48 = vadd.f32 %v2889_v17, %v848_v31  ;;  %v2973_v54 = vadd.f32 %v2889_v17, %v976_v39  ;;  %v1398_v55 = vsel %vm1078_vm4, %v2908_v40, %v1989_v38  ;;  %vm1082_vm12 = vcmp.gt.f32.partialorder %v2956_v34, 0.0 }
 0x137   : > { %v2555_v46 = vpop.eup %2554  ;;  %v1216_v53 = vmul.f32 1.442695, %v1146_v43  ;;  %v1280_v57 = vmul.f32 1.442695, %v1178_v47  ;;  %v1430_v59 = vsel %vm1110_vm5, %v2911_v41, %v2021_v42  ;;  %vm1114_vm13 = vcmp.gt.f32.partialorder %v2959_v30, 0.0 }
 0x138   : > { %v2557_v49 = vpop.eup %2556  ;;  %v1990_v52 = vadd.f32 -1.0, %v2555_v46  ;;  %v1147_v58 = vmin.f32 %v2969_v48, 0.0  ;;  %v1179_v63 = vmin.f32 %v2973_v54, 0.0  ;;  %vm1083_vm14 = vcmp.gt.f32.partialorder %v2969_v48, 0.0 }
 0x139   : > { %v2022_v56 = vadd.f32 -1.0, %v2557_v49  ;;  %2566 = vpow2.f32 %v1216_v53  ;;  %vm1115_vm15 = vcmp.gt.f32.partialorder %v2973_v54, 0.0 }
 0x13a   : > { %v1399_v60 = vsel %vm1079_vm6, %v2916_v50, %v1990_v52  ;;  %2568 = vpow2.f32 %v1280_v57  ;;  %v1218_v2 = vmul.f32 1.442695, %v1147_v58  ;;  %v853_v3 = vpop.f32.mrb[16].mxu0  ;;  %v981_v40 = vpop.f32.mrb[16].mxu1  ;;  %v1282_v6 = vmul.f32 1.442695, %v1179_v63 }
 0x13b   : > { %v2190_v0 = vpack.c.bf16 %v1399_v60, %v1398_v55  ;;  %v1431_v1 = vsel %vm1111_vm7, %v2919_v51, %v2022_v56  ;;  %v2559_v4 = vpop.eup %2558  ;;  %v2984_v7 = vadd.f32 %v2889_v17, %v853_v3  ;;  %v2987_v41 = vadd.f32 %v2889_v17, %v981_v40  ;;  %v855_v50 = vpop.f32.mrb[17].mxu0 }
 0x13c   : > { %v2270_v5 = vpack.c.bf16 %v1431_v1, %v1430_v59  ;;  %v983_v8 = vpop.f32.mrb[17].mxu1  ;;  %v2561_v9 = vpop.eup %2560  ;;  %v1991_v10 = vadd.f32 -1.0, %v2559_v4  ;;  %2570 = vpow2.f32 %v1218_v2 }
 0x13d   : > { %2342 = vst [vmem:[%s2950_s7 + $0x8] sm:$0xff] %v2190_v0   ;;  %v856_v51 = vpop.f32.mrb[18].mxu0  ;;  %v984_v12 = vpop.f32.mrb[18].mxu1  ;;  %v2023_v13 = vadd.f32 -1.0, %v2561_v9  ;;  %2572 = vpow2.f32 %v1282_v6  ;;  %v1148_v14 = vmin.f32 %v2984_v7, 0.0  ;;  %v1180_v22 = vmin.f32 %v2987_v41, 0.0 }
 0x13e   : > { %2358 = vst [vmem:[%s2950_s7 + $0x88] sm:$0xff] %v2270_v5   ;;  %v858_v16 = vpop.f32.mrb[19].mxu0  ;;  %v986_v18 = vpop.f32.mrb[19].mxu1  ;;  %v2997_v23 = vadd.f32 %v2889_v17, %v856_v51  ;;  %v3001_v20 = vadd.f32 %v2889_v17, %v984_v12  ;;  %v1400_v27 = vsel %vm1080_vm8, %v2924_v61, %v1991_v10  ;;  %vm1084_vm0 = vcmp.gt.f32.partialorder %v2984_v7, 0.0 }
 0x13f   : > { %v2563_v19 = vpop.eup %2562  ;;  %v1220_v26 = vmul.f32 1.442695, %v1148_v14  ;;  %v1284_v29 = vmul.f32 1.442695, %v1180_v22  ;;  %v1432_v32 = vsel %vm1112_vm9, %v2927_v62, %v2023_v13  ;;  %vm1116_vm1 = vcmp.gt.f32.partialorder %v2987_v41, 0.0 }
 0x140   : > { %v2565_v24 = vpop.eup %2564  ;;  %v1992_v25 = vadd.f32 -1.0, %v2563_v19  ;;  %v1149_v21 = vmin.f32 %v2997_v23, 0.0  ;;  %v1181_v35 = vmin.f32 %v3001_v20, 0.0  ;;  %vm1085_vm2 = vcmp.gt.f32.partialorder %v2997_v23, 0.0 }
 0x141   : > { %v2024_v28 = vadd.f32 -1.0, %v2565_v24  ;;  %2574 = vpow2.f32 %v1220_v26  ;;  %vm1117_vm3 = vcmp.gt.f32.partialorder %v3001_v20, 0.0 }
 0x142   : > { %v1401_v33 = vsel %vm1081_vm10, %v2936_v11, %v1992_v25  ;;  %2576 = vpow2.f32 %v1284_v29  ;;  %v1222_v38 = vmul.f32 1.442695, %v1149_v21  ;;  %v861_v31 = vpop.f32.mrb[20].mxu0  ;;  %v989_v61 = vpop.f32.mrb[20].mxu1  ;;  %v1286_v43 = vmul.f32 1.442695, %v1181_v35 }
 0x143   : > { %v2195_v36 = vpack.c.bf16 %v1401_v33, %v1400_v27  ;;  %v1433_v37 = vsel %vm1113_vm11, %v2940_v15, %v2024_v28  ;;  %v2567_v39 = vpop.eup %2566  ;;  %v3012_v44 = vadd.f32 %v2889_v17, %v861_v31  ;;  %v3015_v62 = vadd.f32 %v2889_v17, %v989_v61  ;;  %v863_v11 = vpop.f32.mrb[21].mxu0 }
 0x144   : > { %v2275_v42 = vpack.c.bf16 %v1433_v37, %v1432_v32  ;;  %v991_v45 = vpop.f32.mrb[21].mxu1  ;;  %v2569_v46 = vpop.eup %2568  ;;  %v1993_v47 = vadd.f32 -1.0, %v2567_v39  ;;  %2578 = vpow2.f32 %v1222_v38 }
 0x145   : > { %2343 = vst [vmem:[%s2950_s7 + $0x10] sm:$0xff] %v2195_v36   ;;  %v864_v15 = vpop.f32.mrb[22].mxu0  ;;  %v992_v49 = vpop.f32.mrb[22].mxu1  ;;  %v2025_v52 = vadd.f32 -1.0, %v2569_v46  ;;  %2580 = vpow2.f32 %v1286_v43  ;;  %v1150_v53 = vmin.f32 %v3012_v44, 0.0  ;;  %v1182_v58 = vmin.f32 %v3015_v62, 0.0 }
 0x146   : > { %2359 = vst [vmem:[%s2950_s7 + $0x90] sm:$0xff] %v2275_v42   ;;  %v866_v55 = vpop.f32.mrb[23].mxu0  ;;  %v994_v56 = vpop.f32.mrb[23].mxu1  ;;  %v3025_v59 = vadd.f32 %v2889_v17, %v864_v15  ;;  %v3029_v1 = vadd.f32 %v2889_v17, %v992_v49  ;;  %v1402_v2 = vsel %vm1082_vm12, %v2956_v34, %v1993_v47  ;;  %vm1086_vm4 = vcmp.gt.f32.partialorder %v3012_v44, 0.0 }
 0x147   : > { %v2571_v57 = vpop.eup %2570  ;;  %v1224_v0 = vmul.f32 1.442695, %v1150_v53  ;;  %v1288_v40 = vmul.f32 1.442695, %v1182_v58  ;;  %v1434_v5 = vsel %vm1114_vm13, %v2959_v30, %v2025_v52  ;;  %vm1118_vm5 = vcmp.gt.f32.partialorder %v3015_v62, 0.0 }
 0x148   : > { %v2573_v60 = vpop.eup %2572  ;;  %v1994_v63 = vadd.f32 -1.0, %v2571_v57  ;;  %v1151_v4 = vmin.f32 %v3025_v59, 0.0  ;;  %v1183_v50 = vmin.f32 %v3029_v1, 0.0  ;;  %vm1087_vm6 = vcmp.gt.f32.partialorder %v3025_v59, 0.0 }
 0x149   : > { %v2026_v3 = vadd.f32 -1.0, %v2573_v60  ;;  %2582 = vpow2.f32 %v1224_v0  ;;  %vm1119_vm7 = vcmp.gt.f32.partialorder %v3029_v1, 0.0 }
 0x14a   : > { %v1403_v6 = vsel %vm1083_vm14, %v2969_v48, %v1994_v63  ;;  %2584 = vpow2.f32 %v1288_v40  ;;  %v1226_v10 = vmul.f32 1.442695, %v1151_v4  ;;  %v869_v51 = vpop.f32.mrb[24].mxu0  ;;  %v997_v34 = vpop.f32.mrb[24].mxu1  ;;  %v1290_v14 = vmul.f32 1.442695, %v1183_v50 }
 0x14b   : > { %v2200_v8 = vpack.c.bf16 %v1403_v6, %v1402_v2  ;;  %v1435_v9 = vsel %vm1115_vm15, %v2973_v54, %v2026_v3  ;;  %v2575_v12 = vpop.eup %2574  ;;  %v3040_v16 = vadd.f32 %v2889_v17, %v869_v51  ;;  %v3043_v30 = vadd.f32 %v2889_v17, %v997_v34  ;;  %v871_v48 = vpop.f32.mrb[25].mxu0 }
 0x14c   : > { %v2280_v13 = vpack.c.bf16 %v1435_v9, %v1434_v5  ;;  %v999_v18 = vpop.f32.mrb[25].mxu1  ;;  %v2577_v19 = vpop.eup %2576  ;;  %v1995_v22 = vadd.f32 -1.0, %v2575_v12  ;;  %2586 = vpow2.f32 %v1226_v10 }
 0x14d   : > { %2344 = vst [vmem:[%s2950_s7 + $0x18] sm:$0xff] %v2200_v8   ;;  %v872_v54 = vpop.f32.mrb[26].mxu0  ;;  %v1000_v24 = vpop.f32.mrb[26].mxu1  ;;  %v2027_v25 = vadd.f32 -1.0, %v2577_v19  ;;  %2588 = vpow2.f32 %v1290_v14  ;;  %v1152_v26 = vmin.f32 %v3040_v16, 0.0  ;;  %v1184_v21 = vmin.f32 %v3043_v30, 0.0 }
 0x14e   : > { %2360 = vst [vmem:[%s2950_s7 + $0x98] sm:$0xff] %v2280_v13   ;;  %v874_v27 = vpop.f32.mrb[27].mxu0  ;;  %v1002_v28 = vpop.f32.mrb[27].mxu1  ;;  %v3053_v32 = vadd.f32 %v2889_v17, %v872_v54  ;;  %v3057_v37 = vadd.f32 %v2889_v17, %v1000_v24  ;;  %v1404_v38 = vsel %vm1084_vm0, %v2984_v7, %v1995_v22  ;;  %vm1088_vm8 = vcmp.gt.f32.partialorder %v3040_v16, 0.0 }
 0x14f   : > { %v2579_v29 = vpop.eup %2578  ;;  %v1228_v36 = vmul.f32 1.442695, %v1152_v26  ;;  %v1292_v61 = vmul.f32 1.442695, %v1184_v21  ;;  %v1436_v42 = vsel %vm1116_vm1, %v2987_v41, %v2027_v25  ;;  %vm1120_vm9 = vcmp.gt.f32.partialorder %v3043_v30, 0.0 }
 0x150   : > { %v2581_v33 = vpop.eup %2580  ;;  %v1996_v35 = vadd.f32 -1.0, %v2579_v29  ;;  %v1153_v39 = vmin.f32 %v3053_v32, 0.0  ;;  %v1185_v11 = vmin.f32 %v3057_v37, 0.0  ;;  %vm1089_vm10 = vcmp.gt.f32.partialorder %v3053_v32, 0.0 }
 0x151   : > { %v2028_v31 = vadd.f32 -1.0, %v2581_v33  ;;  %2590 = vpow2.f32 %v1228_v36  ;;  %vm1121_vm11 = vcmp.gt.f32.partialorder %v3057_v37, 0.0 }
 0x152   : > { %v1405_v43 = vsel %vm1085_vm2, %v2997_v23, %v1996_v35  ;;  %2592 = vpow2.f32 %v1292_v61  ;;  %v1230_v47 = vmul.f32 1.442695, %v1153_v39  ;;  %v877_v15 = vpop.f32.mrb[28].mxu0  ;;  %v1005_v7 = vpop.f32.mrb[28].mxu1  ;;  %v1294_v53 = vmul.f32 1.442695, %v1185_v11 }
 0x153   : > { %v2205_v45 = vpack.c.bf16 %v1405_v43, %v1404_v38  ;;  %v1437_v46 = vsel %vm1117_vm3, %v3001_v20, %v2028_v31  ;;  %v2583_v49 = vpop.eup %2582  ;;  %v3068_v55 = vadd.f32 %v2889_v17, %v877_v15  ;;  %v3071_v41 = vadd.f32 %v2889_v17, %v1005_v7  ;;  %v879_v23 = vpop.f32.mrb[29].mxu0 }
 0x154   : > { %v2285_v52 = vpack.c.bf16 %v1437_v46, %v1436_v42  ;;  %v1007_v56 = vpop.f32.mrb[29].mxu1  ;;  %v2585_v57 = vpop.eup %2584  ;;  %v1997_v58 = vadd.f32 -1.0, %v2583_v49  ;;  %2594 = vpow2.f32 %v1230_v47 }
 0x155   : > { %2345 = vst [vmem:[%s2950_s7 + $0x20] sm:$0xff] %v2205_v45   ;;  %v880_v20 = vpop.f32.mrb[30].mxu0  ;;  %v1008_v60 = vpop.f32.mrb[30].mxu1  ;;  %v2029_v63 = vadd.f32 -1.0, %v2585_v57  ;;  %2596 = vpow2.f32 %v1294_v53  ;;  %v1154_v0 = vmin.f32 %v3068_v55, 0.0  ;;  %v1186_v4 = vmin.f32 %v3071_v41, 0.0 }
 0x156   : > { %2361 = vst [vmem:[%s2950_s7 + $0xa0] sm:$0xff] %v2285_v52   ;;  %v882_v2 = vpop.f32.mrb[31].mxu0  ;;  %v1010_v3 = vpop.f32.mrb[31].mxu1  ;;  %v3081_v5 = vadd.f32 %v2889_v17, %v880_v20  ;;  %v3085_v9 = vadd.f32 %v2889_v17, %v1008_v60  ;;  %v1406_v10 = vsel %vm1086_vm4, %v3012_v44, %v1997_v58  ;;  %vm1090_vm12 = vcmp.gt.f32.partialorder %v3068_v55, 0.0 }
 0x157   : > { %v2587_v40 = vpop.eup %2586  ;;  %v1232_v8 = vmul.f32 1.442695, %v1154_v0  ;;  %v1296_v34 = vmul.f32 1.442695, %v1186_v4  ;;  %v1438_v13 = vsel %vm1118_vm5, %v3015_v62, %v2029_v63  ;;  %vm1122_vm13 = vcmp.gt.f32.partialorder %v3071_v41, 0.0 }
 0x158   : > { %v2589_v6 = vpop.eup %2588  ;;  %v1998_v50 = vadd.f32 -1.0, %v2587_v40  ;;  %v1155_v12 = vmin.f32 %v3081_v5, 0.0  ;;  %v1187_v48 = vmin.f32 %v3085_v9, 0.0  ;;  %vm1091_vm14 = vcmp.gt.f32.partialorder %v3081_v5, 0.0 }
 0x159   : > { %v2030_v51 = vadd.f32 -1.0, %v2589_v6  ;;  %2598 = vpow2.f32 %v1232_v8  ;;  %vm1123_vm15 = vcmp.gt.f32.partialorder %v3085_v9, 0.0 }
 0x15a   : > { %v1407_v14 = vsel %vm1087_vm6, %v3025_v59, %v1998_v50  ;;  %2600 = vpow2.f32 %v1296_v34  ;;  %v1234_v22 = vmul.f32 1.442695, %v1155_v12  ;;  %v885_v54 = vpop.f32.mrb[32].mxu0  ;;  %v1013_v44 = vpop.f32.mrb[32].mxu1  ;;  %v1298_v26 = vmul.f32 1.442695, %v1187_v48 }
 0x15b   : > { %v2210_v18 = vpack.c.bf16 %v1407_v14, %v1406_v10  ;;  %v1439_v19 = vsel %vm1119_vm7, %v3029_v1, %v2030_v51  ;;  %v2591_v24 = vpop.eup %2590  ;;  %v3096_v27 = vadd.f32 %v2889_v17, %v885_v54  ;;  %v3099_v62 = vadd.f32 %v2889_v17, %v1013_v44  ;;  %v887_v59 = vpop.f32.mrb[33].mxu0 }
 0x15c   : > { %v2290_v25 = vpack.c.bf16 %v1439_v19, %v1438_v13  ;;  %v1015_v28 = vpop.f32.mrb[33].mxu1  ;;  %v2593_v29 = vpop.eup %2592  ;;  %v1999_v21 = vadd.f32 -1.0, %v2591_v24  ;;  %2602 = vpow2.f32 %v1234_v22 }
 0x15d   : > { %2346 = vst [vmem:[%s2950_s7 + $0x28] sm:$0xff] %v2210_v18   ;;  %v888_v1 = vpop.f32.mrb[34].mxu0  ;;  %v1016_v33 = vpop.f32.mrb[34].mxu1  ;;  %v2031_v35 = vadd.f32 -1.0, %v2593_v29  ;;  %2604 = vpow2.f32 %v1298_v26  ;;  %v1156_v36 = vmin.f32 %v3096_v27, 0.0  ;;  %v1188_v39 = vmin.f32 %v3099_v62, 0.0 }
 0x15e   : > { %2362 = vst [vmem:[%s2950_s7 + $0xa8] sm:$0xff] %v2290_v25   ;;  %v890_v38 = vpop.f32.mrb[35].mxu0  ;;  %v1018_v31 = vpop.f32.mrb[35].mxu1  ;;  %v3109_v42 = vadd.f32 %v2889_v17, %v888_v1  ;;  %v3113_v46 = vadd.f32 %v2889_v17, %v1016_v33  ;;  %v1408_v47 = vsel %vm1088_vm8, %v3040_v16, %v1999_v21  ;;  %vm1092_vm0 = vcmp.gt.f32.partialorder %v3096_v27, 0.0 }
 0x15f   : > { %v2595_v61 = vpop.eup %2594  ;;  %v1236_v45 = vmul.f32 1.442695, %v1156_v36  ;;  %v1300_v7 = vmul.f32 1.442695, %v1188_v39  ;;  %v1440_v52 = vsel %vm1120_vm9, %v3043_v30, %v2031_v35  ;;  %vm1124_vm1 = vcmp.gt.f32.partialorder %v3099_v62, 0.0 }
 0x160   : > { %v2597_v43 = vpop.eup %2596  ;;  %v2000_v11 = vadd.f32 -1.0, %v2595_v61  ;;  %v1157_v49 = vmin.f32 %v3109_v42, 0.0  ;;  %v1189_v23 = vmin.f32 %v3113_v46, 0.0  ;;  %vm1093_vm2 = vcmp.gt.f32.partialorder %v3109_v42, 0.0 }
 0x161   : > { %v2032_v15 = vadd.f32 -1.0, %v2597_v43  ;;  %2606 = vpow2.f32 %v1236_v45  ;;  %vm1125_vm3 = vcmp.gt.f32.partialorder %v3113_v46, 0.0 }
 0x162   : > { %v1409_v53 = vsel %vm1089_vm10, %v3053_v32, %v2000_v11  ;;  %2608 = vpow2.f32 %v1300_v7  ;;  %v1238_v58 = vmul.f32 1.442695, %v1157_v49  ;;  %v893_v20 = vpop.f32.mrb[36].mxu0  ;;  %v1021_v16 = vpop.f32.mrb[36].mxu1  ;;  %v1302_v0 = vmul.f32 1.442695, %v1189_v23 }
 0x163   : > { %v2215_v56 = vpack.c.bf16 %v1409_v53, %v1408_v47  ;;  %v1441_v57 = vsel %vm1121_vm11, %v3057_v37, %v2032_v15  ;;  %v2599_v60 = vpop.eup %2598  ;;  %v3124_v2 = vadd.f32 %v2889_v17, %v893_v20  ;;  %v3127_v30 = vadd.f32 %v2889_v17, %v1021_v16  ;;  %v895_v32 = vpop.f32.mrb[37].mxu0 }
 0x164   : > { %v2295_v63 = vpack.c.bf16 %v1441_v57, %v1440_v52  ;;  %v1023_v3 = vpop.f32.mrb[37].mxu1  ;;  %v2601_v40 = vpop.eup %2600  ;;  %v2001_v4 = vadd.f32 -1.0, %v2599_v60  ;;  %2610 = vpow2.f32 %v1238_v58 }
 0x165   : > { %2347 = vst [vmem:[%s2950_s7 + $0x30] sm:$0xff] %v2215_v56   ;;  %v896_v37 = vpop.f32.mrb[38].mxu0  ;;  %v1024_v6 = vpop.f32.mrb[38].mxu1  ;;  %v2033_v50 = vadd.f32 -1.0, %v2601_v40  ;;  %2612 = vpow2.f32 %v1302_v0  ;;  %v1158_v8 = vmin.f32 %v3124_v2, 0.0  ;;  %v1190_v12 = vmin.f32 %v3127_v30, 0.0 }
 0x166   : > { %2363 = vst [vmem:[%s2950_s7 + $0xb0] sm:$0xff] %v2295_v63   ;;  %v898_v10 = vpop.f32.mrb[39].mxu0  ;;  %v1026_v51 = vpop.f32.mrb[39].mxu1  ;;  %v3137_v13 = vadd.f32 %v2889_v17, %v896_v37  ;;  %v3141_v19 = vadd.f32 %v2889_v17, %v1024_v6  ;;  %v1410_v22 = vsel %vm1090_vm12, %v3068_v55, %v2001_v4  ;;  %vm1094_vm4 = vcmp.gt.f32.partialorder %v3124_v2, 0.0 }
 0x167   : > { %v2603_v34 = vpop.eup %2602  ;;  %v1240_v18 = vmul.f32 1.442695, %v1158_v8  ;;  %v1304_v44 = vmul.f32 1.442695, %v1190_v12  ;;  %v1442_v25 = vsel %vm1122_vm13, %v3071_v41, %v2033_v50  ;;  %vm1126_vm5 = vcmp.gt.f32.partialorder %v3127_v30, 0.0 }
 0x168   : > { %v2605_v14 = vpop.eup %2604  ;;  %v2002_v48 = vadd.f32 -1.0, %v2603_v34  ;;  %v1159_v24 = vmin.f32 %v3137_v13, 0.0  ;;  %v1191_v59 = vmin.f32 %v3141_v19, 0.0  ;;  %vm1095_vm6 = vcmp.gt.f32.partialorder %v3137_v13, 0.0 }
 0x169   : > { %v2034_v54 = vadd.f32 -1.0, %v2605_v14  ;;  %2614 = vpow2.f32 %v1240_v18  ;;  %vm1127_vm7 = vcmp.gt.f32.partialorder %v3141_v19, 0.0 }
 0x16a   : > { %v1411_v26 = vsel %vm1091_vm14, %v3081_v5, %v2002_v48  ;;  %2616 = vpow2.f32 %v1304_v44  ;;  %v1242_v21 = vmul.f32 1.442695, %v1159_v24  ;;  %v901_v1 = vpop.f32.mrb[40].mxu0  ;;  %v1029_v55 = vpop.f32.mrb[40].mxu1  ;;  %v1306_v36 = vmul.f32 1.442695, %v1191_v59 }
 0x16b   : > { %v2220_v28 = vpack.c.bf16 %v1411_v26, %v1410_v22  ;;  %v1443_v29 = vsel %vm1123_vm15, %v3085_v9, %v2034_v54  ;;  %v2607_v33 = vpop.eup %2606  ;;  %v3152_v38 = vadd.f32 %v2889_v17, %v901_v1  ;;  %v3155_v41 = vadd.f32 %v2889_v17, %v1029_v55  ;;  %v903_v5 = vpop.f32.mrb[41].mxu0 }
 0x16c   : > { %v2300_v35 = vpack.c.bf16 %v1443_v29, %v1442_v25  ;;  %v1031_v31 = vpop.f32.mrb[41].mxu1  ;;  %v2609_v61 = vpop.eup %2608  ;;  %v2003_v39 = vadd.f32 -1.0, %v2607_v33  ;;  %2618 = vpow2.f32 %v1242_v21 }
 0x16d   : > { %2348 = vst [vmem:[%s2950_s7 + $0x38] sm:$0xff] %v2220_v28   ;;  %v904_v9 = vpop.f32.mrb[42].mxu0  ;;  %v1032_v43 = vpop.f32.mrb[42].mxu1  ;;  %v2035_v11 = vadd.f32 -1.0, %v2609_v61  ;;  %2620 = vpow2.f32 %v1306_v36  ;;  %v1160_v45 = vmin.f32 %v3152_v38, 0.0  ;;  %v1192_v49 = vmin.f32 %v3155_v41, 0.0 }
 0x16e   : > { %2364 = vst [vmem:[%s2950_s7 + $0xb8] sm:$0xff] %v2300_v35   ;;  %v906_v47 = vpop.f32.mrb[43].mxu0  ;;  %v1034_v15 = vpop.f32.mrb[43].mxu1  ;;  %v3165_v52 = vadd.f32 %v2889_v17, %v904_v9  ;;  %v3169_v57 = vadd.f32 %v2889_v17, %v1032_v43  ;;  %v1412_v58 = vsel %vm1092_vm0, %v3096_v27, %v2003_v39  ;;  %vm1096_vm8 = vcmp.gt.f32.partialorder %v3152_v38, 0.0 }
 0x16f   : > { %v2611_v7 = vpop.eup %2610  ;;  %v1244_v56 = vmul.f32 1.442695, %v1160_v45  ;;  %v1308_v16 = vmul.f32 1.442695, %v1192_v49  ;;  %v1444_v63 = vsel %vm1124_vm1, %v3099_v62, %v2035_v11  ;;  %vm1128_vm9 = vcmp.gt.f32.partialorder %v3155_v41, 0.0 }
 0x170   : > { %v2613_v53 = vpop.eup %2612  ;;  %v2004_v23 = vadd.f32 -1.0, %v2611_v7  ;;  %v1161_v60 = vmin.f32 %v3165_v52, 0.0  ;;  %v1193_v32 = vmin.f32 %v3169_v57, 0.0  ;;  %vm1097_vm10 = vcmp.gt.f32.partialorder %v3165_v52, 0.0 }
 0x171   : > { %v2036_v20 = vadd.f32 -1.0, %v2613_v53  ;;  %2622 = vpow2.f32 %v1244_v56  ;;  %vm1129_vm11 = vcmp.gt.f32.partialorder %v3169_v57, 0.0 }
 0x172   : > { %v1413_v0 = vsel %vm1093_vm2, %v3109_v42, %v2004_v23  ;;  %2624 = vpow2.f32 %v1308_v16  ;;  %v1246_v4 = vmul.f32 1.442695, %v1161_v60  ;;  %v909_v37 = vpop.f32.mrb[44].mxu0  ;;  %v1037_v27 = vpop.f32.mrb[44].mxu1  ;;  %v1310_v8 = vmul.f32 1.442695, %v1193_v32 }
 0x173   : > { %v2225_v3 = vpack.c.bf16 %v1413_v0, %v1412_v58  ;;  %v1445_v40 = vsel %vm1125_vm3, %v3113_v46, %v2036_v20  ;;  %v2615_v6 = vpop.eup %2614  ;;  %v3180_v10 = vadd.f32 %v2889_v17, %v909_v37  ;;  %v3183_v62 = vadd.f32 %v2889_v17, %v1037_v27  ;;  %v911_v42 = vpop.f32.mrb[45].mxu0 }
 0x174   : > { %v2305_v50 = vpack.c.bf16 %v1445_v40, %v1444_v63  ;;  %v1039_v51 = vpop.f32.mrb[45].mxu1  ;;  %v2617_v34 = vpop.eup %2616  ;;  %v2005_v12 = vadd.f32 -1.0, %v2615_v6  ;;  %2626 = vpow2.f32 %v1246_v4  ;;  %v3227_v40 = vld [vmem:[%s3347_s2] ss:$0 sm:$0xff] }
 0x175   : > { %2349 = vst [vmem:[%s2950_s7 + $0x40] sm:$0xff] %v2225_v3   ;;  %v912_v46 = vpop.f32.mrb[46].mxu0  ;;  %v1040_v14 = vpop.f32.mrb[46].mxu1  ;;  %v2037_v48 = vadd.f32 -1.0, %v2617_v34  ;;  %2628 = vpow2.f32 %v1310_v8  ;;  %v1162_v18 = vmin.f32 %v3180_v10, 0.0  ;;  %v1194_v24 = vmin.f32 %v3183_v62, 0.0 }
 0x176   : > { %2365 = vst [vmem:[%s2950_s7 + $0xc0] sm:$0xff] %v2305_v50   ;;  %v914_v22 = vpop.f32.mrb[47].mxu0  ;;  %v1042_v54 = vpop.f32.mrb[47].mxu1  ;;  %v3193_v25 = vadd.f32 %v2889_v17, %v912_v46  ;;  %v3197_v29 = vadd.f32 %v2889_v17, %v1040_v14  ;;  %v1414_v21 = vsel %vm1094_vm4, %v3124_v2, %v2005_v12  ;;  %vm1098_vm12 = vcmp.gt.f32.partialorder %v3180_v10, 0.0 }
 0x177   : > { %v2619_v44 = vpop.eup %2618  ;;  %v1248_v28 = vmul.f32 1.442695, %v1162_v18  ;;  %v1312_v55 = vmul.f32 1.442695, %v1194_v24  ;;  %v1446_v35 = vsel %vm1126_vm5, %v3127_v30, %v2037_v48  ;;  %vm1130_vm13 = vcmp.gt.f32.partialorder %v3183_v62, 0.0 }
 0x178   : > { %v2621_v26 = vpop.eup %2620  ;;  %v2006_v59 = vadd.f32 -1.0, %v2619_v44  ;;  %v1163_v33 = vmin.f32 %v3193_v25, 0.0  ;;  %v1195_v5 = vmin.f32 %v3197_v29, 0.0  ;;  %vm1099_vm14 = vcmp.gt.f32.partialorder %v3193_v25, 0.0 }
 0x179   : > { %v2038_v1 = vadd.f32 -1.0, %v2621_v26  ;;  %2630 = vpow2.f32 %v1248_v28  ;;  %vm1131_vm15 = vcmp.gt.f32.partialorder %v3197_v29, 0.0 }
 0x17a   : > { %v1415_v36 = vsel %vm1095_vm6, %v3137_v13, %v2006_v59  ;;  %2632 = vpow2.f32 %v1312_v55  ;;  %v1250_v39 = vmul.f32 1.442695, %v1163_v33  ;;  %v917_v9 = vpop.f32.mrb[48].mxu0  ;;  %v1045_v2 = vpop.f32.mrb[48].mxu1  ;;  %v1314_v45 = vmul.f32 1.442695, %v1195_v5 }
 0x17b   : > { %v2230_v31 = vpack.c.bf16 %v1415_v36, %v1414_v21  ;;  %v1447_v61 = vsel %vm1127_vm7, %v3141_v19, %v2038_v1  ;;  %v2623_v43 = vpop.eup %2622  ;;  %v3208_v47 = vadd.f32 %v2889_v17, %v917_v9  ;;  %v3211_v30 = vadd.f32 %v2889_v17, %v1045_v2  ;;  %v919_v13 = vpop.f32.mrb[49].mxu0 }
 0x17c   : > { %v2310_v11 = vpack.c.bf16 %v1447_v61, %v1446_v35  ;;  %v1047_v15 = vpop.f32.mrb[49].mxu1  ;;  %v2625_v7 = vpop.eup %2624  ;;  %v2007_v49 = vadd.f32 -1.0, %v2623_v43  ;;  %2634 = vpow2.f32 %v1250_v39 }
 0x17d   : > { %2350 = vst [vmem:[%s2950_s7 + $0x48] sm:$0xff] %v2230_v31   ;;  %v920_v19 = vpop.f32.mrb[50].mxu0  ;;  %v1048_v53 = vpop.f32.mrb[50].mxu1  ;;  %v2039_v23 = vadd.f32 -1.0, %v2625_v7  ;;  %2636 = vpow2.f32 %v1314_v45  ;;  %v1164_v56 = vmin.f32 %v3208_v47, 0.0  ;;  %v1196_v60 = vmin.f32 %v3211_v30, 0.0 }
 0x17e   : > { %2366 = vst [vmem:[%s2950_s7 + $0xc8] sm:$0xff] %v2310_v11   ;;  %v922_v58 = vpop.f32.mrb[51].mxu0  ;;  %v1050_v20 = vpop.f32.mrb[51].mxu1  ;;  %v3221_v63 = vadd.f32 %v2889_v17, %v920_v19  ;;  %v3230_v4 = vadd.f32 %v3227_v40, %v1048_v53  ;;  %v1416_v37 = vsel %vm1096_vm8, %v3152_v38, %v2007_v49  ;;  %vm1100_vm0 = vcmp.gt.f32.partialorder %v3208_v47, 0.0 }
 0x17f   : > { %v2627_v16 = vpop.eup %2626  ;;  %v1252_v3 = vmul.f32 1.442695, %v1164_v56  ;;  %v1316_v17 = vmul.f32 1.442695, %v1196_v60  ;;  %v1448_v50 = vsel %vm1128_vm9, %v3155_v41, %v2039_v23  ;;  %vm1132_vm1 = vcmp.gt.f32.partialorder %v3211_v30, 0.0 }
 0x180   : > { %v2629_v0 = vpop.eup %2628  ;;  %v2008_v32 = vadd.f32 -1.0, %v2627_v16  ;;  %v1165_v6 = vmin.f32 %v3221_v63, 0.0  ;;  %v1197_v42 = vmin.f32 %v3230_v4, 0.0  ;;  %vm1101_vm2 = vcmp.gt.f32.partialorder %v3221_v63, 0.0 }
 0x181   : > { %v2040_v27 = vadd.f32 -1.0, %v2629_v0  ;;  %2638 = vpow2.f32 %v1252_v3  ;;  %vm1133_vm3 = vcmp.gt.f32.partialorder %v3230_v4, 0.0 }
 0x182   : > { %v1417_v8 = vsel %vm1097_vm10, %v3165_v52, %v2008_v32  ;;  %2640 = vpow2.f32 %v1316_v17  ;;  %v1254_v12 = vmul.f32 1.442695, %v1165_v6  ;;  %v925_v46 = vpop.f32.mrb[52].mxu0  ;;  %v1053_v38 = vpop.f32.mrb[52].mxu1  ;;  %v1318_v18 = vmul.f32 1.442695, %v1197_v42 }
 0x183   : > { %v2235_v51 = vpack.c.bf16 %v1417_v8, %v1416_v37  ;;  %v1449_v34 = vsel %vm1129_vm11, %v3169_v57, %v2040_v27  ;;  %v2631_v14 = vpop.eup %2630  ;;  %v3241_v22 = vadd.f32 %v3227_v40, %v925_v46  ;;  %v3244_v41 = vadd.f32 %v3227_v40, %v1053_v38  ;;  %v927_v52 = vpop.f32.mrb[53].mxu0 }
 0x184   : > { %v2315_v48 = vpack.c.bf16 %v1449_v34, %v1448_v50  ;;  %v1055_v54 = vpop.f32.mrb[53].mxu1  ;;  %v2633_v44 = vpop.eup %2632  ;;  %v2009_v24 = vadd.f32 -1.0, %v2631_v14  ;;  %2642 = vpow2.f32 %v1254_v12 }
 0x185   : > { %2351 = vst [vmem:[%s2950_s7 + $0x50] sm:$0xff] %v2235_v51   ;;  %v928_v57 = vpop.f32.mrb[54].mxu0  ;;  %v1056_v26 = vpop.f32.mrb[54].mxu1  ;;  %v2041_v59 = vadd.f32 -1.0, %v2633_v44  ;;  %2644 = vpow2.f32 %v1318_v18  ;;  %v1166_v28 = vmin.f32 %v3241_v22, 0.0  ;;  %v1198_v33 = vmin.f32 %v3244_v41, 0.0 }
 0x186   : > { %2367 = vst [vmem:[%s2950_s7 + $0xd0] sm:$0xff] %v2315_v48   ;;  %v930_v21 = vpop.f32.mrb[55].mxu0  ;;  %v1058_v1 = vpop.f32.mrb[55].mxu1  ;;  %v3254_v35 = vadd.f32 %v3227_v40, %v928_v57  ;;  %v3258_v61 = vadd.f32 %v3227_v40, %v1056_v26  ;;  %v1418_v39 = vsel %vm1098_vm12, %v3180_v10, %v2009_v24  ;;  %vm1102_vm4 = vcmp.gt.f32.partialorder %v3241_v22, 0.0 }
 0x187   : > { %v2635_v55 = vpop.eup %2634  ;;  %v1256_v31 = vmul.f32 1.442695, %v1166_v28  ;;  %v1320_v2 = vmul.f32 1.442695, %v1198_v33  ;;  %v1450_v11 = vsel %vm1130_vm13, %v3183_v62, %v2041_v59  ;;  %vm1134_vm5 = vcmp.gt.f32.partialorder %v3244_v41, 0.0 }
 0x188   : > { %v2637_v36 = vpop.eup %2636  ;;  %v2010_v5 = vadd.f32 -1.0, %v2635_v55  ;;  %v1167_v43 = vmin.f32 %v3254_v35, 0.0  ;;  %v1199_v13 = vmin.f32 %v3258_v61, 0.0  ;;  %vm1103_vm6 = vcmp.gt.f32.partialorder %v3254_v35, 0.0 }
 0x189   : > { %v2042_v9 = vadd.f32 -1.0, %v2637_v36  ;;  %2646 = vpow2.f32 %v1256_v31  ;;  %vm1135_vm7 = vcmp.gt.f32.partialorder %v3258_v61, 0.0 }
 0x18a   : > { %v1419_v45 = vsel %vm1099_vm14, %v3193_v25, %v2010_v5  ;;  %2648 = vpow2.f32 %v1320_v2  ;;  %v1258_v49 = vmul.f32 1.442695, %v1167_v43  ;;  %v933_v19 = vpop.f32.mrb[56].mxu0  ;;  %v1061_v10 = vpop.f32.mrb[56].mxu1  ;;  %v1322_v56 = vmul.f32 1.442695, %v1199_v13 }
 0x18b   : > { %v2240_v15 = vpack.c.bf16 %v1419_v45, %v1418_v39  ;;  %v1451_v7 = vsel %vm1131_vm15, %v3197_v29, %v2042_v9  ;;  %v2639_v53 = vpop.eup %2638  ;;  %v3269_v58 = vadd.f32 %v3227_v40, %v933_v19  ;;  %v3272_v62 = vadd.f32 %v3227_v40, %v1061_v10  ;;  %v935_v25 = vpop.f32.mrb[57].mxu0 }
 0x18c   : > { %v2320_v23 = vpack.c.bf16 %v1451_v7, %v1450_v11  ;;  %v1063_v20 = vpop.f32.mrb[57].mxu1  ;;  %v2641_v16 = vpop.eup %2640  ;;  %v2011_v60 = vadd.f32 -1.0, %v2639_v53  ;;  %2650 = vpow2.f32 %v1258_v49 }
 0x18d   : > { %2352 = vst [vmem:[%s2950_s7 + $0x58] sm:$0xff] %v2240_v15   ;;  %v936_v29 = vpop.f32.mrb[58].mxu0  ;;  %v1064_v0 = vpop.f32.mrb[58].mxu1  ;;  %v2043_v32 = vadd.f32 -1.0, %v2641_v16  ;;  %2652 = vpow2.f32 %v1322_v56  ;;  %v1168_v3 = vmin.f32 %v3269_v58, 0.0  ;;  %v1200_v6 = vmin.f32 %v3272_v62, 0.0 }
 0x18e   : > { %2368 = vst [vmem:[%s2950_s7 + $0xd8] sm:$0xff] %v2320_v23   ;;  %v938_v37 = vpop.f32.mrb[59].mxu0  ;;  %v1066_v27 = vpop.f32.mrb[59].mxu1  ;;  %v3282_v50 = vadd.f32 %v3227_v40, %v936_v29  ;;  %v3286_v34 = vadd.f32 %v3227_v40, %v1064_v0  ;;  %v1420_v12 = vsel %vm1100_vm0, %v3208_v47, %v2011_v60  ;;  %vm1104_vm8 = vcmp.gt.f32.partialorder %v3269_v58, 0.0 }
 0x18f   : > { %v2643_v17 = vpop.eup %2642  ;;  %v1260_v51 = vmul.f32 1.442695, %v1168_v3  ;;  %v1324_v38 = vmul.f32 1.442695, %v1200_v6  ;;  %v1452_v48 = vsel %vm1132_vm1, %v3211_v30, %v2043_v32  ;;  %vm1136_vm10 = vcmp.gt.f32.partialorder %v3272_v62, 0.0 }
 0x190   : > { %v2645_v8 = vpop.eup %2644  ;;  %v2012_v42 = vadd.f32 -1.0, %v2643_v17  ;;  %v1169_v14 = vmin.f32 %v3282_v50, 0.0  ;;  %v1201_v52 = vmin.f32 %v3286_v34, 0.0  ;;  %vm1105_vm9 = vcmp.gt.f32.partialorder %v3282_v50, 0.0 }
 0x191   : > { %v2044_v46 = vadd.f32 -1.0, %v2645_v8  ;;  %2654 = vpow2.f32 %v1260_v51  ;;  %vm1137_vm11 = vcmp.gt.f32.partialorder %v3286_v34, 0.0 }
 0x192   : > { %v1421_v18 = vsel %vm1101_vm2, %v3221_v63, %v2012_v42  ;;  %2656 = vpow2.f32 %v1324_v38  ;;  %v1262_v24 = vmul.f32 1.442695, %v1169_v14  ;;  %v941_v57 = vpop.f32.mrb[60].mxu0  ;;  %v1069_v47 = vpop.f32.mrb[60].mxu1  ;;  %v1326_v28 = vmul.f32 1.442695, %v1201_v52 }
 0x193   : > { %v2245_v54 = vpack.c.bf16 %v1421_v18, %v1420_v12  ;;  %v1453_v44 = vsel %vm1133_vm3, %v3230_v4, %v2044_v46  ;;  %v2647_v26 = vpop.eup %2646  ;;  %v3297_v21 = vadd.f32 %v3227_v40, %v941_v57  ;;  %v3300_v30 = vadd.f32 %v3227_v40, %v1069_v47  ;;  %v943_v63 = vpop.f32.mrb[61].mxu0 }
 0x194   : > { %v2325_v59 = vpack.c.bf16 %v1453_v44, %v1452_v48  ;;  %v1071_v1 = vpop.f32.mrb[61].mxu1  ;;  %v2649_v55 = vpop.eup %2648  ;;  %v2013_v33 = vadd.f32 -1.0, %v2647_v26  ;;  %2658 = vpow2.f32 %v1262_v24 }
 0x195   : > { %2353 = vst [vmem:[%s2950_s7 + $0x60] sm:$0xff] %v2245_v54   ;;  %v944_v4 = vpop.f32.mrb[62].mxu0  ;;  %v1072_v36 = vpop.f32.mrb[62].mxu1  ;;  %v2045_v5 = vadd.f32 -1.0, %v2649_v55  ;;  %2660 = vpow2.f32 %v1326_v28  ;;  %v1170_v31 = vmin.f32 %v3297_v21, 0.0  ;;  %v1202_v43 = vmin.f32 %v3300_v30, 0.0 }
 0x196   : > { %2369 = vst [vmem:[%s2950_s7 + $0xe0] sm:$0xff] %v2325_v59   ;;  %v946_v39 = vpop.f32.mrb[63].mxu0  ;;  %v1074_v9 = vpop.f32.mrb[63].mxu1  ;;  %v945_v11 = vadd.f32 %v3227_v40, %v944_v4  ;;  %v1073_v7 = vadd.f32 %v3227_v40, %v1072_v36  ;;  %v1422_v49 = vsel %vm1102_vm4, %v3241_v22, %v2013_v33  ;;  %vm1106_vm12 = vcmp.gt.f32.partialorder %v3297_v21, 0.0 }
 0x197   : > { %v2651_v2 = vpop.eup %2650  ;;  %v1264_v15 = vmul.f32 1.442695, %v1170_v31  ;;  %v1328_v10 = vmul.f32 1.442695, %v1202_v43  ;;  %v1454_v23 = vsel %vm1134_vm5, %v3244_v41, %v2045_v5  ;;  %vm1138_vm14 = vcmp.gt.f32.partialorder %v3300_v30, 0.0 }
 0x198   : > { %v2653_v45 = vpop.eup %2652  ;;  %v2014_v13 = vadd.f32 -1.0, %v2651_v2  ;;  %v1171_v53 = vmin.f32 %v945_v11, 0.0  ;;  %v1203_v25 = vmin.f32 %v1073_v7, 0.0  ;;  %vm1107_vm13 = vcmp.gt.f32.partialorder %v945_v11, 0.0 }
 0x199   : > { %v2046_v19 = vadd.f32 -1.0, %v2653_v45  ;;  %2662 = vpow2.f32 %v1264_v15  ;;  %vm1139_vm15 = vcmp.gt.f32.partialorder %v1073_v7, 0.0 }
 0x19a   : > { %v1423_v56 = vsel %vm1103_vm6, %v3254_v35, %v2014_v13  ;;  %2664 = vpow2.f32 %v1328_v10  ;;  %v1266_v40 = vmul.f32 1.442695, %v1171_v53  ;;  %v1330_v0 = vmul.f32 1.442695, %v1203_v25 }
 0x19b   : > { %v2250_v20 = vpack.c.bf16 %v1423_v56, %v1422_v49  ;;  %v1455_v16 = vsel %vm1135_vm7, %v3258_v61, %v2046_v19  ;;  %v2655_v60 = vpop.eup %2654 }
 0x19c   : > { %v2330_v29 = vpack.c.bf16 %v1455_v16, %v1454_v23  ;;  %v2657_v22 = vpop.eup %2656  ;;  %2666 = vpow2.f32 %v1266_v40  ;;  %v2015_v32 = vadd.f32 -1.0, %v2655_v60 }
 0x19d   : > { %2354 = vst [vmem:[%s2950_s7 + $0x68] sm:$0xff] %v2250_v20   ;;  %2668 = vpow2.f32 %v1330_v0  ;;  %v2047_v41 = vadd.f32 -1.0, %v2657_v22 }
 0x19e   : > { %2370 = vst [vmem:[%s2950_s7 + $0xe8] sm:$0xff] %v2330_v29   ;;  %v2659_v3 = vpop.eup %2658  ;;  %v1424_v27 = vsel %vm1104_vm8, %v3269_v58, %v2015_v32 }
 0x19f   : > { %v2661_v35 = vpop.eup %2660  ;;  %v2016_v37 = vadd.f32 -1.0, %v2659_v3  ;;  %v1456_v6 = vsel %vm1136_vm10, %v3272_v62, %v2047_v41 }
 0x1a0   : > { %v2048_v61 = vadd.f32 -1.0, %v2661_v35 }
 0x1a1   : > { %v1425_v17 = vsel %vm1105_vm9, %v3282_v50, %v2016_v37 }
 0x1a2   : > { %v2255_v8 = vpack.c.bf16 %v1425_v17, %v1424_v27  ;;  %v1457_v42 = vsel %vm1137_vm11, %v3286_v34, %v2048_v61 }
 0x1a3   : > { %v2663_v51 = vpop.eup %2662  ;;  %v2335_v12 = vpack.c.bf16 %v1457_v42, %v1456_v6 }
 0x1a4   : > { %v2665_v46 = vpop.eup %2664  ;;  %2355 = vst [vmem:[%s2950_s7 + $0x70] sm:$0xff] %v2255_v8   ;;  %v2017_v38 = vadd.f32 -1.0, %v2663_v51 }
 0x1a5   : > { %2371 = vst [vmem:[%s2950_s7 + $0xf0] sm:$0xff] %v2335_v12   ;;  %v2049_v58 = vadd.f32 -1.0, %v2665_v46 }
 0x1a6   : > { %v2667_v14 = vpop.eup %2666  ;;  %v1426_v62 = vsel %vm1106_vm12, %v3297_v21, %v2017_v38 }
 0x1a7   : > { %v2669_v48 = vpop.eup %2668  ;;  %v2018_v18 = vadd.f32 -1.0, %v2667_v14  ;;  %v1458_v52 = vsel %vm1138_vm14, %v3300_v30, %v2049_v58 }
 0x1a8   : > { %v2050_v50 = vadd.f32 -1.0, %v2669_v48 }
 0x1a9   : > { %v1427_v34 = vsel %vm1107_vm13, %v945_v11, %v2018_v18 }
 0x1aa   : > { %v2260_v54 = vpack.c.bf16 %v1427_v34, %v1426_v62  ;;  %v1459_v44 = vsel %vm1139_vm15, %v1073_v7, %v2050_v50 }
 0x1ab   : > { %v2340_v24 = vpack.c.bf16 %v1459_v44, %v1458_v52 }
 0x1ac   : > { %2356 = vst [vmem:[%s2950_s7 + $0x78] sm:$0xff] %v2260_v54  }
 0x1ad   : > { %2372 = vst [vmem:[%s2950_s7 + $0xf8] sm:$0xff] %v2340_v24  }
 0x1ae PF: > { %s13_s14 = sadd.s32 1, %s2693_s14   ;;  %s3349_s12 = smov %s2689_s13 }
 0x1af   : > { %p10_p5 = scmp.ge.s32.totalorder %s13_s14, 6   ;;  %s3350_s13 = smov %s3352_s15 }
 0x1b1   :  { %12 = sbr.rel (!%p10_p5) target bundleno = 2 (0x2), region = 68 }

// kernel: image_autoencoder_forward.10
= control target key start
LH: loop header
LB: loop body
LE: loop exit
PB: predicated region body
PF: predicated region fallthrough
CT: control target
= control target key end

     0   :  { %s6102_s12 = smov 0   ;;  %s6104_s13 = smov 0   ;;  %s6731_s0 = inlined_call_operand.vmem [shape: bf16[16,28800], index: 0, kind: input, shape index: {}]   ;;  %s6732_s1 = inlined_call_operand.vmem [shape: bf16[28800,128], index: 1, kind: input, shape index: {}]   ;;  %s6733_s2 = inlined_call_operand.vmem [shape: f32[1,128], index: 2, kind: input, shape index: {}]   ;;  %s6734_s3 = inlined_call_operand.vmem [shape: f32[16,128], index: 3, kind: output, shape index: {}]  }
   0x1   :  { %s6106_s14 = smov 0   ;;  %s6108_s15 = smov 0  }
   0x2   :  { %s6110_s16 = smov 0  }
   0x3 LB: > { %s25_s17 = sadd.s32 1, %s6073_s15  ;;  %p48_p1 = scmp.ne.s32.totalorder %s6065_s13, %s6061_s12  ;;  %s6077_s16 = sphi %s6110_s16, %s13_s16   ;;  %s6073_s15 = sphi %s6108_s15, %s6738_s15   ;;  %s6069_s14 = sphi %s6106_s14, %s6737_s14   ;;  %s6065_s13 = sphi %s6104_s13, %s6736_s13   ;;  %s6061_s12 = sphi %s6102_s12, %s6735_s12  }
   0x4   : > { %p26_p0 = scmp.ge.s32.totalorder %s25_s17, 5  ;;  %p49_p2 = scmp.eq.s32.totalorder %s6077_s16, 0 }
   0x5   : > { %s41_s19 = sadd.s32 1, %s6065_s13  ;;  %p4627_p5 = scmp.ge.s32.totalorder %s6077_s16, 5 }
   0x6   : > { %s6740_s17 = smov (%p26_p0, %s25_s17), 0  ;;  %p50_p3 = por %p49_p2, %p48_p1 }
   0x7   : > { %s37_s18 = ssub.s32 %s6073_s15, %s6740_s17  ;;  %162 = sbr.rel (%p4627_p5) target bundleno = 42 (0x2a), region = 20 }
   0x8   : > { %p39_p4 = scmp.eq.s32.totalorder %s37_s18, 0 }
   0xa   : > { %s6137_s20 = scalar_select %p39_p4, %s6065_s13, %s41_s19  }
   0xe   : > { %165 = sbr.rel (!%p50_p3) target bundleno = 42 (0x2a), region = 24  ;;  %s167_s21 = sand.u32 (%p50_p3), 1, %s6065_s13  }
   0xf   : > { %s5049_s22 = smul.u32 (%p50_p3), 180, %s6073_s15 }
  0x10   : > { %s5563_s23 = smul.u32 (%p50_p3), 360, %s167_s21 }
  0x11   : > { %s6145_s26 = scalar_lea.vmem (%p50_p3), %s6731_s0, %s5049_s22 }
  0x12   : > { %v190_v0 = vld [vmem:[%s6145_s26] sm:$0xff] (%p50_p3)  ;;  %v192_v1 = vld [vmem:[%s6145_s26 + $0x8] sm:$0xff] (%p50_p3)  ;;  %v194_v2 = vld [vmem:[%s6145_s26 + $0x10] sm:$0xff] (%p50_p3)  ;;  %s6150_s27 = scalar_lea.vmem (%p50_p3), [#allocation2], %s5563_s23 }
  0x13   : > { %191 = vst [vmem:[%s6150_s27] sm:$0xff] (%p50_p3), %v190_v0  ;;  %193 = vst [vmem:[%s6150_s27 + $0x8] sm:$0xff] (%p50_p3), %v192_v1  ;;  %v196_v3 = vld [vmem:[%s6145_s26 + $0x18] sm:$0xff] (%p50_p3)  ;;  %v198_v4 = vld [vmem:[%s6145_s26 + $0x20] sm:$0xff] (%p50_p3) }
  0x14   : > { %195 = vst [vmem:[%s6150_s27 + $0x10] sm:$0xff] (%p50_p3), %v194_v2  ;;  %v200_v5 = vld [vmem:[%s6145_s26 + $0x28] sm:$0xff] (%p50_p3)  ;;  %197 = vst [vmem:[%s6150_s27 + $0x18] sm:$0xff] (%p50_p3), %v196_v3  ;;  %v202_v6 = vld [vmem:[%s6145_s26 + $0x30] sm:$0xff] (%p50_p3) }
  0x15   : > { %199 = vst [vmem:[%s6150_s27 + $0x20] sm:$0xff] %v198_v4  ;;  %201 = vst [vmem:[%s6150_s27 + $0x28] sm:$0xff] %v200_v5  ;;  %v204_v7 = vld [vmem:[%s6145_s26 + $0x38] sm:$0xff]  ;;  %v206_v8 = vld [vmem:[%s6145_s26 + $0x40] sm:$0xff] }
  0x16   : > { %203 = vst [vmem:[%s6150_s27 + $0x30] sm:$0xff] %v202_v6  ;;  %205 = vst [vmem:[%s6150_s27 + $0x38] sm:$0xff] %v204_v7  ;;  %v208_v9 = vld [vmem:[%s6145_s26 + $0x48] sm:$0xff]  ;;  %v210_v10 = vld [vmem:[%s6145_s26 + $0x50] sm:$0xff] }
  0x17   : > { %207 = vst [vmem:[%s6150_s27 + $0x40] sm:$0xff] %v206_v8  ;;  %v212_v11 = vld [vmem:[%s6145_s26 + $0x58] sm:$0xff]  ;;  %209 = vst [vmem:[%s6150_s27 + $0x48] sm:$0xff] %v208_v9  ;;  %v214_v12 = vld [vmem:[%s6145_s26 + $0x60] sm:$0xff] }
  0x18   : > { %211 = vst [vmem:[%s6150_s27 + $0x50] sm:$0xff] %v210_v10  ;;  %213 = vst [vmem:[%s6150_s27 + $0x58] sm:$0xff] %v212_v11  ;;  %v216_v13 = vld [vmem:[%s6145_s26 + $0x68] sm:$0xff]  ;;  %v218_v14 = vld [vmem:[%s6145_s26 + $0x70] sm:$0xff] }
  0x19   : > { %215 = vst [vmem:[%s6150_s27 + $0x60] sm:$0xff] %v214_v12  ;;  %217 = vst [vmem:[%s6150_s27 + $0x68] sm:$0xff] %v216_v13  ;;  %v220_v15 = vld [vmem:[%s6145_s26 + $0x78] sm:$0xff]  ;;  %v222_v16 = vld [vmem:[%s6145_s26 + $0x80] sm:$0xff] }
  0x1a   : > { %219 = vst [vmem:[%s6150_s27 + $0x70] sm:$0xff] %v218_v14  ;;  %v224_v17 = vld [vmem:[%s6145_s26 + $0x88] sm:$0xff]  ;;  %221 = vst [vmem:[%s6150_s27 + $0x78] sm:$0xff] %v220_v15  ;;  %v226_v18 = vld [vmem:[%s6145_s26 + $0x90] sm:$0xff] }
  0x1b   : > { %223 = vst [vmem:[%s6150_s27 + $0x80] sm:$0xff] %v222_v16  ;;  %225 = vst [vmem:[%s6150_s27 + $0x88] sm:$0xff] %v224_v17  ;;  %v228_v19 = vld [vmem:[%s6145_s26 + $0x98] sm:$0xff]  ;;  %v230_v20 = vld [vmem:[%s6145_s26 + $0xa0] sm:$0xff] }
  0x1c   : > { %227 = vst [vmem:[%s6150_s27 + $0x90] sm:$0xff] %v226_v18  ;;  %229 = vst [vmem:[%s6150_s27 + $0x98] sm:$0xff] %v228_v19  ;;  %v232_v21 = vld [vmem:[%s6145_s26 + $0xa8] sm:$0xff]  ;;  %v238_v24 = vld [vmem:[%s6145_s26 + $0x394] sm:$0xff] }
  0x1d   : > { %231 = vst [vmem:[%s6150_s27 + $0xa0] sm:$0xff] %v230_v20  ;;  %v234_v22 = vld [vmem:[%s6145_s26 + $0x384] sm:$0xff]  ;;  %v236_v23 = vld [vmem:[%s6145_s26 + $0x38c] sm:$0xff]  ;;  %233 = vst [vmem:[%s6150_s27 + $0xa8] sm:$0xff] %v232_v21 }
  0x1e   : > { %235 = vst [vmem:[%s6150_s27 + $0xb4] sm:$0xff] %v234_v22  ;;  %237 = vst [vmem:[%s6150_s27 + $0xbc] sm:$0xff] %v236_v23  ;;  %v240_v25 = vld [vmem:[%s6145_s26 + $0x39c] sm:$0xff]  ;;  %v242_v26 = vld [vmem:[%s6145_s26 + $0x3a4] sm:$0xff] }
  0x1f   : > { %239 = vst [vmem:[%s6150_s27 + $0xc4] sm:$0xff] %v238_v24  ;;  %241 = vst [vmem:[%s6150_s27 + $0xcc] sm:$0xff] %v240_v25  ;;  %v244_v27 = vld [vmem:[%s6145_s26 + $0x3ac] sm:$0xff]  ;;  %v246_v28 = vld [vmem:[%s6145_s26 + $0x3b4] sm:$0xff] }
  0x20   : > { %243 = vst [vmem:[%s6150_s27 + $0xd4] sm:$0xff] %v242_v26  ;;  %v248_v29 = vld [vmem:[%s6145_s26 + $0x3bc] sm:$0xff]  ;;  %245 = vst [vmem:[%s6150_s27 + $0xdc] sm:$0xff] %v244_v27  ;;  %v250_v30 = vld [vmem:[%s6145_s26 + $0x3c4] sm:$0xff] }
  0x21   : > { %247 = vst [vmem:[%s6150_s27 + $0xe4] sm:$0xff] %v246_v28  ;;  %249 = vst [vmem:[%s6150_s27 + $0xec] sm:$0xff] %v248_v29  ;;  %v252_v31 = vld [vmem:[%s6145_s26 + $0x3cc] sm:$0xff]  ;;  %v254_v32 = vld [vmem:[%s6145_s26 + $0x3d4] sm:$0xff] }
  0x22   : > { %251 = vst [vmem:[%s6150_s27 + $0xf4] sm:$0xff] %v250_v30  ;;  %253 = vst [vmem:[%s6150_s27 + $0xfc] sm:$0xff] %v252_v31  ;;  %v256_v33 = vld [vmem:[%s6145_s26 + $0x3dc] sm:$0xff]  ;;  %v258_v34 = vld [vmem:[%s6145_s26 + $0x3e4] sm:$0xff] }
  0x23   : > { %255 = vst [vmem:[%s6150_s27 + $0x104] sm:$0xff] %v254_v32  ;;  %v260_v35 = vld [vmem:[%s6145_s26 + $0x3ec] sm:$0xff]  ;;  %257 = vst [vmem:[%s6150_s27 + $0x10c] sm:$0xff] %v256_v33  ;;  %v262_v36 = vld [vmem:[%s6145_s26 + $0x3f4] sm:$0xff] }
  0x24   : > { %259 = vst [vmem:[%s6150_s27 + $0x114] sm:$0xff] %v258_v34  ;;  %261 = vst [vmem:[%s6150_s27 + $0x11c] sm:$0xff] %v260_v35  ;;  %v264_v37 = vld [vmem:[%s6145_s26 + $0x3fc] sm:$0xff]  ;;  %v266_v38 = vld [vmem:[%s6145_s26 + $0x404] sm:$0xff] }
  0x25   : > { %263 = vst [vmem:[%s6150_s27 + $0x124] sm:$0xff] %v262_v36  ;;  %265 = vst [vmem:[%s6150_s27 + $0x12c] sm:$0xff] %v264_v37  ;;  %v268_v39 = vld [vmem:[%s6145_s26 + $0x40c] sm:$0xff]  ;;  %v270_v40 = vld [vmem:[%s6145_s26 + $0x414] sm:$0xff] }
  0x26   : > { %267 = vst [vmem:[%s6150_s27 + $0x134] sm:$0xff] %v266_v38  ;;  %v272_v41 = vld [vmem:[%s6145_s26 + $0x41c] sm:$0xff]  ;;  %269 = vst [vmem:[%s6150_s27 + $0x13c] sm:$0xff] %v268_v39  ;;  %v274_v42 = vld [vmem:[%s6145_s26 + $0x424] sm:$0xff] }
  0x27   : > { %271 = vst [vmem:[%s6150_s27 + $0x144] sm:$0xff] %v270_v40  ;;  %273 = vst [vmem:[%s6150_s27 + $0x14c] sm:$0xff] %v272_v41  ;;  %v276_v43 = vld [vmem:[%s6145_s26 + $0x42c] sm:$0xff]  ;;  %v4631_v45 = vld [vmem:[%s6145_s26 + $0x434] sm:$0xf] }
  0x28   : > { %v4629_v44 = vld [vmem:[%s6145_s26 + $0xb0] sm:$0xf]  ;;  %275 = vst [vmem:[%s6150_s27 + $0x154] sm:$0xff] %v274_v42  ;;  %277 = vst [vmem:[%s6150_s27 + $0x15c] sm:$0xff] %v276_v43 }
  0x29   : > { %4630 = vst [vmem:[%s6150_s27 + $0xb0] sm:$0xf] %v4629_v44  ;;  %4632 = vst [vmem:[%s6150_s27 + $0x164] sm:$0xf] %v4631_v45 }
  0x2a PF: > { %p4633_p6 = scmp.ge.s32.totalorder %s6077_s16, 1  ;;  %p305_p7 = scmp.lt.s32.totalorder %s6077_s16, 6 }
  0x2c   : > { %p306_p8 = pnand %p4633_p6, %p305_p7 }
  0x2d   : > { %s312_s28 = sand.u32 (!%p306_p8), 1, %s6061_s12   ;;  %s351_s29 = smul.u32 (!%p306_p8), 720, %s6069_s14 }
  0x2e   : > { %309 = sbr.rel (%p306_p8) target bundleno = 700 (0x2bc), region = 54  ;;  %p4635_p10 = scmp.ne.s32.totalorder (!%p306_p8), %s6069_s14, 0 }
  0x2f   : > { %s5564_s30 = smul.u32 (!%p306_p8), 360, %s312_s28  ;;  %p352_p9 = scmp.lt.s32.totalorder (!%p306_p8), %s351_s29, 3599 }
  0x31   : > { %s6250_s8 = scalar_lea.vmem (!%p306_p8), [#allocation2], %s5564_s30 }
  0x35   : > { %s6742_s29 = smov (!%p352_p9, %s351_s29), 3599  ;;  %376 = sbr.rel (%p4635_p10) target bundleno = 60 (0x3c), region = 62 }
  0x36   : > { %s4634_s4 = sshll.u32 %s6742_s29, 2  ;;  %v6079_v46 = vmov (!%p4635_p10), 0.0  }
  0x37   : > { %s6248_s7 = scalar_lea.vmem %s6732_s1, %s4634_s4  ;;  %377 = vst [vmem:[%s6734_s3] sm:$0xff] (!%p4635_p10), %v6079_v46  ;;  %378 = vst [vmem:[%s6734_s3 + $0x8] sm:$0xff] (!%p4635_p10), %v6079_v46 }
  0x3c PF: > { %v5608_v47 = vld [vmem:[%s6248_s7 + $0x40] sm:$0xff]   ;;  %v5612_v51 = vld [vmem:[%s6248_s7 + $0x48] sm:$0xff]   ;;  %v5616_v55 = vld [vmem:[%s6248_s7 + $0x50] sm:$0xff]   ;;  %vm6081_vm0 = vmmov 0   ;;  %p5041_p11 = scmp.ne.s32.totalorder %s6069_s14, 4 }
  0x3d   : > { %v5609_v48 = vld [vmem:[%s6248_s7 + $0xc0] sm:$0xff]   ;;  %5050 = vmatprep.subr.bf16.mxu0 %v5608_v47  ;;  %v5613_v52 = vld [vmem:[%s6248_s7 + $0xc8] sm:$0xff]   ;;  %v5617_v56 = vld [vmem:[%s6248_s7 + $0xd0] sm:$0xff]  }
  0x3e   : > { %v5610_v49 = vld [vmem:[%s6248_s7] sm:$0xff]   ;;  %5072 = vmatprep.subr.bf16.mxu1 %v5609_v48  ;;  %v5614_v53 = vld [vmem:[%s6248_s7 + $0x8] sm:$0xff]   ;;  %v5618_v57 = vld [vmem:[%s6248_s7 + $0x10] sm:$0xff]  }
  0x3f   : > { %v5611_v50 = vld [vmem:[%s6248_s7 + $0x80] sm:$0xff]   ;;  %5051 = vmatpush3.bf16.msra.mxu0 %v5610_v49  ;;  %v5615_v54 = vld [vmem:[%s6248_s7 + $0x88] sm:$0xff]   ;;  %v5619_v58 = vld [vmem:[%s6248_s7 + $0x90] sm:$0xff]  }
  0x40   : > { %5073 = vmatpush3.bf16.msra.mxu1 %v5611_v50  ;;  %5052 = vmatprep.subr.bf16.mxu0 %v5612_v51  ;;  %v5620_v59 = vld [vmem:[%s6248_s7 + $0x58] sm:$0xff]   ;;  %v5624_v63 = vld [vmem:[%s6248_s7 + $0x60] sm:$0xff]   ;;  %v5628_v3 = vld [vmem:[%s6248_s7 + $0x68] sm:$0xff]  }
  0x41   : > { %5074 = vmatprep.subr.bf16.mxu1 %v5613_v52  ;;  %v5621_v60 = vld [vmem:[%s6248_s7 + $0xd8] sm:$0xff]   ;;  %v5625_v0 = vld [vmem:[%s6248_s7 + $0xe0] sm:$0xff]   ;;  %v5629_v4 = vld [vmem:[%s6248_s7 + $0xe8] sm:$0xff]  }
  0x42   : > { %v5622_v61 = vld [vmem:[%s6248_s7 + $0x18] sm:$0xff]   ;;  %v5626_v1 = vld [vmem:[%s6248_s7 + $0x20] sm:$0xff]   ;;  %v5630_v5 = vld [vmem:[%s6248_s7 + $0x28] sm:$0xff]  }
  0x43   : > { %5053 = vmatpush3.bf16.msra.mxu0 %v5614_v53  ;;  %v5623_v62 = vld [vmem:[%s6248_s7 + $0x98] sm:$0xff]   ;;  %v5627_v2 = vld [vmem:[%s6248_s7 + $0xa0] sm:$0xff]   ;;  %v5631_v6 = vld [vmem:[%s6248_s7 + $0xa8] sm:$0xff]  }
  0x44   : > { %5075 = vmatpush3.bf16.msra.mxu1 %v5615_v54  ;;  %5054 = vmatprep.subr.bf16.mxu0 %v5616_v55  ;;  %v5632_v7 = vld [vmem:[%s6248_s7 + $0x70] sm:$0xff]   ;;  %v5636_v11 = vld [vmem:[%s6248_s7 + $0x78] sm:$0xff]   ;;  %v5646_v19 = vld [vmem:[%s6248_s7 + $0x140] sm:$0xff]  }
  0x45   : > { %5076 = vmatprep.subr.bf16.mxu1 %v5617_v56  ;;  %v5633_v8 = vld [vmem:[%s6248_s7 + $0xf0] sm:$0xff]   ;;  %v5637_v12 = vld [vmem:[%s6248_s7 + $0xf8] sm:$0xff]   ;;  %v5647_v20 = vld [vmem:[%s6248_s7 + $0x100] sm:$0xff]  }
  0x46   : > { %v5634_v9 = vld [vmem:[%s6248_s7 + $0x30] sm:$0xff]   ;;  %v5638_v13 = vld [vmem:[%s6248_s7 + $0x38] sm:$0xff]   ;;  %v5648_v21 = vld [vmem:[%s6248_s7 + $0x1c0] sm:$0xff]  }
  0x47   : > { %5055 = vmatpush3.bf16.msra.mxu0 %v5618_v57  ;;  %v5635_v10 = vld [vmem:[%s6248_s7 + $0xb0] sm:$0xff]   ;;  %v5639_v14 = vld [vmem:[%s6248_s7 + $0xb8] sm:$0xff]   ;;  %v5649_v22 = vld [vmem:[%s6248_s7 + $0x180] sm:$0xff]  }
  0x48   : > { %5077 = vmatpush3.bf16.msra.mxu1 %v5619_v58  ;;  %5056 = vmatprep.subr.bf16.mxu0 %v5620_v59  ;;  %v5640_v15 = vld [vmem:[%s6250_s8] ss:$180 sps:$4 sm:$0xff]   ;;  %v5642_v16 = vld [vmem:[%s6250_s8 + $0x4] ss:$180 sps:$4 sm:$0xff]   ;;  %v5643_v17 = vld [vmem:[%s6250_s8 + $0x8] ss:$180 sps:$4 sm:$0xff]  }
  0x49   : > { %5078 = vmatprep.subr.bf16.mxu1 %v5621_v60  ;;  %v5645_v18 = vld [vmem:[%s6250_s8 + $0xc] ss:$180 sps:$4 sm:$0xff]   ;;  %3565 = vmatprep.mubr.bf16.mxu0 %v5642_v16  ;;  %v5658_v31 = vld [vmem:[%s6248_s7 + $0x158] sm:$0xff]  }
  0x4a   : > { %3606 = vmatprep.mubr.bf16.mxu1 %v5645_v18  ;;  %v5650_v23 = vld [vmem:[%s6248_s7 + $0x148] sm:$0xff]   ;;  %v5654_v27 = vld [vmem:[%s6248_s7 + $0x150] sm:$0xff]   ;;  %v5659_v32 = vld [vmem:[%s6248_s7 + $0x118] sm:$0xff]  }
  0x4b   : > { %5057 = vmatpush3.bf16.msra.mxu0 %v5622_v61  ;;  %v5651_v24 = vld [vmem:[%s6248_s7 + $0x108] sm:$0xff]   ;;  %v5655_v28 = vld [vmem:[%s6248_s7 + $0x110] sm:$0xff]   ;;  %v5660_v33 = vld [vmem:[%s6248_s7 + $0x1d8] sm:$0xff]  }
  0x4c   : > { %5079 = vmatpush3.bf16.msra.mxu1 %v5623_v62  ;;  %5058 = vmatprep.subr.bf16.mxu0 %v5624_v63  ;;  %v5652_v25 = vld [vmem:[%s6248_s7 + $0x1c8] sm:$0xff]   ;;  %v5656_v29 = vld [vmem:[%s6248_s7 + $0x1d0] sm:$0xff]   ;;  %v5661_v34 = vld [vmem:[%s6248_s7 + $0x198] sm:$0xff]  }
  0x4d   : > { %5080 = vmatprep.subr.bf16.mxu1 %v5625_v0  ;;  %v5653_v26 = vld [vmem:[%s6248_s7 + $0x188] sm:$0xff]   ;;  %v5657_v30 = vld [vmem:[%s6248_s7 + $0x190] sm:$0xff]   ;;  %v5662_v35 = vld [vmem:[%s6248_s7 + $0x160] sm:$0xff]  }
  0x4e   : > { %v5663_v36 = vld [vmem:[%s6248_s7 + $0x120] sm:$0xff]   ;;  %v5666_v39 = vld [vmem:[%s6248_s7 + $0x168] sm:$0xff]   ;;  %v5670_v43 = vld [vmem:[%s6248_s7 + $0x170] sm:$0xff]  }
  0x4f   : > { %5059 = vmatpush3.bf16.msra.mxu0 %v5626_v1  ;;  %v5664_v37 = vld [vmem:[%s6248_s7 + $0x1e0] sm:$0xff]   ;;  %v5667_v40 = vld [vmem:[%s6248_s7 + $0x128] sm:$0xff]   ;;  %v5671_v44 = vld [vmem:[%s6248_s7 + $0x130] sm:$0xff]  }
  0x50   : > { %5081 = vmatpush3.bf16.msra.mxu1 %v5627_v2  ;;  %5060 = vmatprep.subr.bf16.mxu0 %v5628_v3  ;;  %v5665_v38 = vld [vmem:[%s6248_s7 + $0x1a0] sm:$0xff]   ;;  %v5668_v41 = vld [vmem:[%s6248_s7 + $0x1e8] sm:$0xff]   ;;  %v5672_v45 = vld [vmem:[%s6248_s7 + $0x1f0] sm:$0xff]  }
  0x51   : > { %5082 = vmatprep.subr.bf16.mxu1 %v5629_v4  ;;  %v5669_v42 = vld [vmem:[%s6248_s7 + $0x1a8] sm:$0xff]   ;;  %v5673_v46 = vld [vmem:[%s6248_s7 + $0x1b0] sm:$0xff]   ;;  %v5674_v47 = vld [vmem:[%s6248_s7 + $0x178] sm:$0xff]  }
  0x52   : > { %v5675_v48 = vld [vmem:[%s6248_s7 + $0x138] sm:$0xff]   ;;  %v5681_v53 = vld [vmem:[%s6248_s7 + $0x240] sm:$0xff]   ;;  %v5688_v59 = vld [vmem:[%s6248_s7 + $0x248] sm:$0xff]  }
  0x53   : > { %5061 = vmatpush3.bf16.msra.mxu0 %v5630_v5  ;;  %v5676_v49 = vld [vmem:[%s6248_s7 + $0x1f8] sm:$0xff]   ;;  %v5685_v56 = vld [vmem:[%s6248_s7 + $0x200] sm:$0xff]   ;;  %v5689_v60 = vld [vmem:[%s6248_s7 + $0x208] sm:$0xff]  }
  0x54   : > { %5083 = vmatpush3.bf16.msra.mxu1 %v5631_v6  ;;  %5062 = vmatprep.subr.bf16.mxu0 %v5632_v7  ;;  %v5677_v50 = vld [vmem:[%s6250_s8 + $0x10] ss:$180 sps:$4 sm:$0xff]   ;;  %v5679_v51 = vld [vmem:[%s6250_s8 + $0x14] ss:$180 sps:$4 sm:$0xff]   ;;  %v5682_v54 = vld [vmem:[%s6250_s8 + $0x18] ss:$180 sps:$4 sm:$0xff]  }
  0x55   : > { %5084 = vmatprep.subr.bf16.mxu1 %v5633_v8  ;;  %v5680_v52 = vld [vmem:[%s6248_s7 + $0x1b8] sm:$0xff]   ;;  %v5686_v57 = vld [vmem:[%s6248_s7 + $0x2c0] sm:$0xff]   ;;  %v5690_v61 = vld [vmem:[%s6248_s7 + $0x2c8] sm:$0xff]  }
  0x56   : > { %v5684_v55 = vld [vmem:[%s6250_s8 + $0x1c] ss:$180 sps:$4 sm:$0xff]   ;;  %v5691_v62 = vld [vmem:[%s6248_s7 + $0x288] sm:$0xff]  }
  0x57   : > { %5063 = vmatpush3.bf16.msra.mxu0 %v5634_v9  ;;  %v5687_v58 = vld [vmem:[%s6248_s7 + $0x280] sm:$0xff]   ;;  %v5692_v63 = vld [vmem:[%s6248_s7 + $0x250] sm:$0xff]   ;;  %v5696_v3 = vld [vmem:[%s6248_s7 + $0x258] sm:$0xff]  }
  0x58   : > { %5085 = vmatpush3.bf16.msra.mxu1 %v5635_v10  ;;  %5064 = vmatprep.subr.bf16.mxu0 %v5636_v11  ;;  %v5693_v0 = vld [vmem:[%s6248_s7 + $0x210] sm:$0xff]   ;;  %v5697_v4 = vld [vmem:[%s6248_s7 + $0x218] sm:$0xff]   ;;  %v5700_v7 = vld [vmem:[%s6248_s7 + $0x260] sm:$0xff]  }
  0x59   : > { %5086 = vmatprep.subr.bf16.mxu1 %v5637_v12  ;;  %v5694_v1 = vld [vmem:[%s6248_s7 + $0x2d0] sm:$0xff]   ;;  %v5698_v5 = vld [vmem:[%s6248_s7 + $0x2d8] sm:$0xff]   ;;  %v5701_v8 = vld [vmem:[%s6248_s7 + $0x220] sm:$0xff]  }
  0x5a   : > { %v5695_v2 = vld [vmem:[%s6248_s7 + $0x290] sm:$0xff]   ;;  %v5699_v6 = vld [vmem:[%s6248_s7 + $0x298] sm:$0xff]   ;;  %v5702_v9 = vld [vmem:[%s6248_s7 + $0x2e0] sm:$0xff]  }
  0x5b   : > { %5065 = vmatpush3.bf16.msra.mxu0 %v5638_v13  ;;  %v5703_v10 = vld [vmem:[%s6248_s7 + $0x2a0] sm:$0xff]   ;;  %v5704_v11 = vld [vmem:[%s6248_s7 + $0x268] sm:$0xff]   ;;  %v5709_v16 = vld [vmem:[%s6248_s7 + $0x230] sm:$0xff]  }
  0x5c   : > { %5087 = vmatpush3.bf16.msra.mxu1 %v5639_v14  ;;  %5094 = vmatprep.subr.bf16.mxu0 %v5646_v19  ;;  %v5705_v12 = vld [vmem:[%s6248_s7 + $0x228] sm:$0xff]   ;;  %v5711_v18 = vld [vmem:[%s6248_s7 + $0x2b0] sm:$0xff]   ;;  %v5712_v19 = vld [vmem:[%s6248_s7 + $0x278] sm:$0xff]  }
  0x5d   : > { %5116 = vmatprep.subr.bf16.mxu1 %v5648_v21  ;;  %v5706_v13 = vld [vmem:[%s6248_s7 + $0x2e8] sm:$0xff]   ;;  %v5714_v21 = vld [vmem:[%s6248_s7 + $0x2f8] sm:$0xff]  }
  0x5e   : > { %3566 = vmatmul.mubr.bf16.vlgmr.msra.gmra.mrb[0].mxu0 %v5640_v15  ;;  %v5707_v14 = vld [vmem:[%s6248_s7 + $0x2a8] sm:$0xff]   ;;  %v5708_v15 = vld [vmem:[%s6248_s7 + $0x270] sm:$0xff]  }
  0x5f   : > { %3607 = vmatmul.mubr.bf16.vlgmr.msra.gmra.mrb[0].mxu1 %v5643_v17  ;;  %5095 = vmatpush3.bf16.msra.mxu0 %v5647_v20  ;;  %v5710_v17 = vld [vmem:[%s6248_s7 + $0x2f0] sm:$0xff]   ;;  %v5713_v20 = vld [vmem:[%s6248_s7 + $0x238] sm:$0xff]  }
  0x60   : > { %5117 = vmatpush3.bf16.msra.mxu1 %v5649_v22  ;;  %5096 = vmatprep.subr.bf16.mxu0 %v5650_v23  ;;  %v5715_v22 = vld [vmem:[%s6250_s8 + $0x20] ss:$180 sps:$4 sm:$0xff]   ;;  %v5717_v23 = vld [vmem:[%s6250_s8 + $0x24] ss:$180 sps:$4 sm:$0xff]  }
  0x61   : > { %5118 = vmatprep.subr.bf16.mxu1 %v5652_v25  ;;  %3647 = vmatprep.mubr.bf16.mxu0 %v5679_v51  ;;  %v5719_v25 = vld [vmem:[%s6248_s7 + $0x340] sm:$0xff]   ;;  %v5746_v51 = vld [vmem:[%s6248_s7 + $0x370] sm:$0xff]  }
  0x62   : > { %3688 = vmatprep.mubr.bf16.mxu1 %v5684_v55  ;;  %v5750_v55 = vld [vmem:[%s6248_s7 + $0x378] sm:$0xff]  }
  0x63   : > { %5097 = vmatpush3.bf16.msra.mxu0 %v5651_v24  ;;  %v5718_v24 = vld [vmem:[%s6248_s7 + $0x2b8] sm:$0xff]  }
  0x64   : > { %5119 = vmatpush3.bf16.msra.mxu1 %v5653_v26  ;;  %5098 = vmatprep.subr.bf16.mxu0 %v5654_v27  ;;  %v5720_v26 = vld [vmem:[%s6250_s8 + $0x28] ss:$180 sps:$4 sm:$0xff]   ;;  %v5722_v27 = vld [vmem:[%s6250_s8 + $0x2c] ss:$180 sps:$4 sm:$0xff]  }
  0x65   : > { %5120 = vmatprep.subr.bf16.mxu1 %v5656_v29  ;;  %v5724_v29 = vld [vmem:[%s6248_s7 + $0x3c0] sm:$0xff]  }
  0x67   : > { %5099 = vmatpush3.bf16.msra.mxu0 %v5655_v28  ;;  %v5723_v28 = vld [vmem:[%s6248_s7 + $0x300] sm:$0xff]  }
  0x68   : > { %5121 = vmatpush3.bf16.msra.mxu1 %v5657_v30  ;;  %5100 = vmatprep.subr.bf16.mxu0 %v5658_v31  ;;  %v5725_v30 = vld [vmem:[%s6248_s7 + $0x380] sm:$0xff]   ;;  %v5726_v31 = vld [vmem:[%s6248_s7 + $0x348] sm:$0xff]  }
  0x69   : > { %5122 = vmatprep.subr.bf16.mxu1 %v5660_v33  ;;  %v5728_v33 = vld [vmem:[%s6248_s7 + $0x3c8] sm:$0xff]  }
  0x6b   : > { %5101 = vmatpush3.bf16.msra.mxu0 %v5659_v32  ;;  %v5727_v32 = vld [vmem:[%s6248_s7 + $0x308] sm:$0xff]  }
  0x6c   : > { %5123 = vmatpush3.bf16.msra.mxu1 %v5661_v34  ;;  %5102 = vmatprep.subr.bf16.mxu0 %v5662_v35  ;;  %v5729_v34 = vld [vmem:[%s6248_s7 + $0x388] sm:$0xff]   ;;  %v5730_v35 = vld [vmem:[%s6248_s7 + $0x350] sm:$0xff]  }
  0x6d   : > { %5124 = vmatprep.subr.bf16.mxu1 %v5664_v37  ;;  %v5732_v37 = vld [vmem:[%s6248_s7 + $0x3d0] sm:$0xff]  }
  0x6f   : > { %5103 = vmatpush3.bf16.msra.mxu0 %v5663_v36  ;;  %v5731_v36 = vld [vmem:[%s6248_s7 + $0x310] sm:$0xff]  }
  0x70   : > { %5125 = vmatpush3.bf16.msra.mxu1 %v5665_v38  ;;  %5104 = vmatprep.subr.bf16.mxu0 %v5666_v39  ;;  %v5733_v38 = vld [vmem:[%s6248_s7 + $0x390] sm:$0xff]   ;;  %v5734_v39 = vld [vmem:[%s6248_s7 + $0x358] sm:$0xff]  }
  0x71   : > { %5126 = vmatprep.subr.bf16.mxu1 %v5668_v41  ;;  %v5736_v41 = vld [vmem:[%s6248_s7 + $0x3d8] sm:$0xff]  }
  0x73   : > { %5105 = vmatpush3.bf16.msra.mxu0 %v5667_v40  ;;  %v5735_v40 = vld [vmem:[%s6248_s7 + $0x318] sm:$0xff]  }
  0x74   : > { %5127 = vmatpush3.bf16.msra.mxu1 %v5669_v42  ;;  %5106 = vmatprep.subr.bf16.mxu0 %v5670_v43  ;;  %v5737_v42 = vld [vmem:[%s6248_s7 + $0x398] sm:$0xff]   ;;  %v5738_v43 = vld [vmem:[%s6248_s7 + $0x360] sm:$0xff]  }
  0x75   : > { %5128 = vmatprep.subr.bf16.mxu1 %v5672_v45  ;;  %v5740_v45 = vld [vmem:[%s6248_s7 + $0x3e0] sm:$0xff]  }
  0x77   : > { %5107 = vmatpush3.bf16.msra.mxu0 %v5671_v44  ;;  %v5739_v44 = vld [vmem:[%s6248_s7 + $0x320] sm:$0xff]  }
  0x78   : > { %5129 = vmatpush3.bf16.msra.mxu1 %v5673_v46  ;;  %5108 = vmatprep.subr.bf16.mxu0 %v5674_v47  ;;  %v5741_v46 = vld [vmem:[%s6248_s7 + $0x3a0] sm:$0xff]   ;;  %v5742_v47 = vld [vmem:[%s6248_s7 + $0x368] sm:$0xff]  }
  0x79   : > { %5130 = vmatprep.subr.bf16.mxu1 %v5676_v49  ;;  %v5744_v49 = vld [vmem:[%s6248_s7 + $0x3e8] sm:$0xff]  }
  0x7b   : > { %5109 = vmatpush3.bf16.msra.mxu0 %v5675_v48  ;;  %v5743_v48 = vld [vmem:[%s6248_s7 + $0x328] sm:$0xff]  }
  0x7c   : > { %5131 = vmatpush3.bf16.msra.mxu1 %v5680_v52  ;;  %5138 = vmatprep.subr.bf16.mxu0 %v5681_v53  ;;  %v5747_v52 = vld [vmem:[%s6248_s7 + $0x330] sm:$0xff]  }
  0x7d   : > { %5160 = vmatprep.subr.bf16.mxu1 %v5686_v57  ;;  %v5748_v53 = vld [vmem:[%s6248_s7 + $0x3f0] sm:$0xff]   ;;  %v5752_v57 = vld [vmem:[%s6248_s7 + $0x3f8] sm:$0xff]  }
  0x7e   : > { %3648 = vmatmul.mubr.bf16.vlgmr.msra.gmra.mrb[4].mxu0 %v5677_v50  ;;  %v5745_v50 = vld [vmem:[%s6248_s7 + $0x3a8] sm:$0xff]  }
  0x7f   : > { %5139 = vmatpush3.bf16.msra.mxu0 %v5685_v56  ;;  %3689 = vmatmul.mubr.bf16.vlgmr.msra.gmra.mrb[4].mxu1 %v5682_v54  ;;  %v5749_v54 = vld [vmem:[%s6248_s7 + $0x3b0] sm:$0xff]   ;;  %v5751_v56 = vld [vmem:[%s6248_s7 + $0x338] sm:$0xff]  }
  0x80   : > { %5161 = vmatpush3.bf16.msra.mxu1 %v5687_v58  ;;  %5140 = vmatprep.subr.bf16.mxu0 %v5688_v59  ;;  %v5753_v58 = vld [vmem:[%s6250_s8 + $0x30] ss:$180 sps:$4 sm:$0xff]   ;;  %v5755_v59 = vld [vmem:[%s6250_s8 + $0x34] ss:$180 sps:$4 sm:$0xff]  }
  0x81   : > { %5162 = vmatprep.subr.bf16.mxu1 %v5690_v61  ;;  %3729 = vmatprep.mubr.bf16.mxu0 %v5717_v23  ;;  %v5757_v61 = vld [vmem:[%s6248_s7 + $0x440] sm:$0xff]   ;;  %v5784_v23 = vld [vmem:[%s6248_s7 + $0x470] sm:$0xff]  }
  0x82   : > { %3770 = vmatprep.mubr.bf16.mxu1 %v5722_v27  ;;  %v5788_v27 = vld [vmem:[%s6248_s7 + $0x478] sm:$0xff]  }
  0x83   : > { %5141 = vmatpush3.bf16.msra.mxu0 %v5689_v60  ;;  %v5756_v60 = vld [vmem:[%s6248_s7 + $0x3b8] sm:$0xff]  }
  0x84   : > { %5163 = vmatpush3.bf16.msra.mxu1 %v5691_v62  ;;  %5142 = vmatprep.subr.bf16.mxu0 %v5692_v63  ;;  %v5758_v62 = vld [vmem:[%s6250_s8 + $0x38] ss:$180 sps:$4 sm:$0xff]   ;;  %v5760_v63 = vld [vmem:[%s6250_s8 + $0x3c] ss:$180 sps:$4 sm:$0xff]  }
  0x85   : > { %5164 = vmatprep.subr.bf16.mxu1 %v5694_v1  ;;  %v5762_v1 = vld [vmem:[%s6248_s7 + $0x4c0] sm:$0xff]  }
  0x87   : > { %5143 = vmatpush3.bf16.msra.mxu0 %v5693_v0  ;;  %v5761_v0 = vld [vmem:[%s6248_s7 + $0x400] sm:$0xff]  }
  0x88   : > { %5165 = vmatpush3.bf16.msra.mxu1 %v5695_v2  ;;  %5144 = vmatprep.subr.bf16.mxu0 %v5696_v3  ;;  %v5763_v2 = vld [vmem:[%s6248_s7 + $0x480] sm:$0xff]   ;;  %v5764_v3 = vld [vmem:[%s6248_s7 + $0x448] sm:$0xff]  }
  0x89   : > { %5166 = vmatprep.subr.bf16.mxu1 %v5698_v5  ;;  %v5766_v5 = vld [vmem:[%s6248_s7 + $0x4c8] sm:$0xff]  }
  0x8b   : > { %5145 = vmatpush3.bf16.msra.mxu0 %v5697_v4  ;;  %v5765_v4 = vld [vmem:[%s6248_s7 + $0x408] sm:$0xff]  }
  0x8c   : > { %5167 = vmatpush3.bf16.msra.mxu1 %v5699_v6  ;;  %5146 = vmatprep.subr.bf16.mxu0 %v5700_v7  ;;  %v5767_v6 = vld [vmem:[%s6248_s7 + $0x488] sm:$0xff]   ;;  %v5768_v7 = vld [vmem:[%s6248_s7 + $0x450] sm:$0xff]  }
  0x8d   : > { %5168 = vmatprep.subr.bf16.mxu1 %v5702_v9  ;;  %v5770_v9 = vld [vmem:[%s6248_s7 + $0x4d0] sm:$0xff]  }
  0x8f   : > { %5147 = vmatpush3.bf16.msra.mxu0 %v5701_v8  ;;  %v5769_v8 = vld [vmem:[%s6248_s7 + $0x410] sm:$0xff]  }
  0x90   : > { %5169 = vmatpush3.bf16.msra.mxu1 %v5703_v10  ;;  %5148 = vmatprep.subr.bf16.mxu0 %v5704_v11  ;;  %v5771_v10 = vld [vmem:[%s6248_s7 + $0x490] sm:$0xff]   ;;  %v5772_v11 = vld [vmem:[%s6248_s7 + $0x458] sm:$0xff]  }
  0x91   : > { %5170 = vmatprep.subr.bf16.mxu1 %v5706_v13  ;;  %v5774_v13 = vld [vmem:[%s6248_s7 + $0x4d8] sm:$0xff]  }
  0x93   : > { %5149 = vmatpush3.bf16.msra.mxu0 %v5705_v12  ;;  %v5773_v12 = vld [vmem:[%s6248_s7 + $0x418] sm:$0xff]  }
  0x94   : > { %5171 = vmatpush3.bf16.msra.mxu1 %v5707_v14  ;;  %5150 = vmatprep.subr.bf16.mxu0 %v5708_v15  ;;  %v5775_v14 = vld [vmem:[%s6248_s7 + $0x498] sm:$0xff]   ;;  %v5776_v15 = vld [vmem:[%s6248_s7 + $0x460] sm:$0xff]  }
  0x95   : > { %5172 = vmatprep.subr.bf16.mxu1 %v5710_v17  ;;  %v5778_v17 = vld [vmem:[%s6248_s7 + $0x4e0] sm:$0xff]  }
  0x97   : > { %5151 = vmatpush3.bf16.msra.mxu0 %v5709_v16  ;;  %v5777_v16 = vld [vmem:[%s6248_s7 + $0x420] sm:$0xff]  }
  0x98   : > { %5173 = vmatpush3.bf16.msra.mxu1 %v5711_v18  ;;  %5152 = vmatprep.subr.bf16.mxu0 %v5712_v19  ;;  %v5779_v18 = vld [vmem:[%s6248_s7 + $0x4a0] sm:$0xff]   ;;  %v5780_v19 = vld [vmem:[%s6248_s7 + $0x468] sm:$0xff]  }
  0x99   : > { %5174 = vmatprep.subr.bf16.mxu1 %v5714_v21  ;;  %v5782_v21 = vld [vmem:[%s6248_s7 + $0x4e8] sm:$0xff]  }
  0x9b   : > { %5153 = vmatpush3.bf16.msra.mxu0 %v5713_v20  ;;  %v5781_v20 = vld [vmem:[%s6248_s7 + $0x428] sm:$0xff]  }
  0x9c   : > { %5175 = vmatpush3.bf16.msra.mxu1 %v5718_v24  ;;  %5182 = vmatprep.subr.bf16.mxu0 %v5719_v25  ;;  %v5785_v24 = vld [vmem:[%s6248_s7 + $0x430] sm:$0xff]  }
  0x9d   : > { %5204 = vmatprep.subr.bf16.mxu1 %v5724_v29  ;;  %v5786_v25 = vld [vmem:[%s6248_s7 + $0x4f0] sm:$0xff]   ;;  %v5790_v29 = vld [vmem:[%s6248_s7 + $0x4f8] sm:$0xff]  }
  0x9e   : > { %3730 = vmatmul.mubr.bf16.vlgmr.msra.gmra.mrb[8].mxu0 %v5715_v22  ;;  %v5783_v22 = vld [vmem:[%s6248_s7 + $0x4a8] sm:$0xff]  }
  0x9f   : > { %5183 = vmatpush3.bf16.msra.mxu0 %v5723_v28  ;;  %3771 = vmatmul.mubr.bf16.vlgmr.msra.gmra.mrb[8].mxu1 %v5720_v26  ;;  %v5787_v26 = vld [vmem:[%s6248_s7 + $0x4b0] sm:$0xff]   ;;  %v5789_v28 = vld [vmem:[%s6248_s7 + $0x438] sm:$0xff]  }
  0xa0   : > { %5205 = vmatpush3.bf16.msra.mxu1 %v5725_v30  ;;  %5184 = vmatprep.subr.bf16.mxu0 %v5726_v31  ;;  %v5791_v30 = vld [vmem:[%s6250_s8 + $0x40] ss:$180 sps:$4 sm:$0xff]   ;;  %v5793_v31 = vld [vmem:[%s6250_s8 + $0x44] ss:$180 sps:$4 sm:$0xff]  }
  0xa1   : > { %5206 = vmatprep.subr.bf16.mxu1 %v5728_v33  ;;  %3811 = vmatprep.mubr.bf16.mxu0 %v5755_v59  ;;  %v5795_v33 = vld [vmem:[%s6248_s7 + $0x540] sm:$0xff]   ;;  %v5822_v59 = vld [vmem:[%s6248_s7 + $0x570] sm:$0xff]  }
  0xa2   : > { %3852 = vmatprep.mubr.bf16.mxu1 %v5760_v63  ;;  %v5826_v63 = vld [vmem:[%s6248_s7 + $0x578] sm:$0xff]  }
  0xa3   : > { %5185 = vmatpush3.bf16.msra.mxu0 %v5727_v32  ;;  %v5794_v32 = vld [vmem:[%s6248_s7 + $0x4b8] sm:$0xff]  }
  0xa4   : > { %5207 = vmatpush3.bf16.msra.mxu1 %v5729_v34  ;;  %5186 = vmatprep.subr.bf16.mxu0 %v5730_v35  ;;  %v5796_v34 = vld [vmem:[%s6250_s8 + $0x48] ss:$180 sps:$4 sm:$0xff]   ;;  %v5798_v35 = vld [vmem:[%s6250_s8 + $0x4c] ss:$180 sps:$4 sm:$0xff]  }
  0xa5   : > { %5208 = vmatprep.subr.bf16.mxu1 %v5732_v37  ;;  %v5800_v37 = vld [vmem:[%s6248_s7 + $0x5c0] sm:$0xff]  }
  0xa7   : > { %5187 = vmatpush3.bf16.msra.mxu0 %v5731_v36  ;;  %v5799_v36 = vld [vmem:[%s6248_s7 + $0x500] sm:$0xff]  }
  0xa8   : > { %5209 = vmatpush3.bf16.msra.mxu1 %v5733_v38  ;;  %5188 = vmatprep.subr.bf16.mxu0 %v5734_v39  ;;  %v5801_v38 = vld [vmem:[%s6248_s7 + $0x580] sm:$0xff]   ;;  %v5802_v39 = vld [vmem:[%s6248_s7 + $0x548] sm:$0xff]  }
  0xa9   : > { %5210 = vmatprep.subr.bf16.mxu1 %v5736_v41  ;;  %v5804_v41 = vld [vmem:[%s6248_s7 + $0x5c8] sm:$0xff]  }
  0xab   : > { %5189 = vmatpush3.bf16.msra.mxu0 %v5735_v40  ;;  %v5803_v40 = vld [vmem:[%s6248_s7 + $0x508] sm:$0xff]  }
  0xac   : > { %5211 = vmatpush3.bf16.msra.mxu1 %v5737_v42  ;;  %5190 = vmatprep.subr.bf16.mxu0 %v5738_v43  ;;  %v5805_v42 = vld [vmem:[%s6248_s7 + $0x588] sm:$0xff]   ;;  %v5806_v43 = vld [vmem:[%s6248_s7 + $0x550] sm:$0xff]  }
  0xad   : > { %5212 = vmatprep.subr.bf16.mxu1 %v5740_v45  ;;  %v5808_v45 = vld [vmem:[%s6248_s7 + $0x5d0] sm:$0xff]  }
  0xaf   : > { %5191 = vmatpush3.bf16.msra.mxu0 %v5739_v44  ;;  %v5807_v44 = vld [vmem:[%s6248_s7 + $0x510] sm:$0xff]  }
  0xb0   : > { %5213 = vmatpush3.bf16.msra.mxu1 %v5741_v46  ;;  %5192 = vmatprep.subr.bf16.mxu0 %v5742_v47  ;;  %v5809_v46 = vld [vmem:[%s6248_s7 + $0x590] sm:$0xff]   ;;  %v5810_v47 = vld [vmem:[%s6248_s7 + $0x558] sm:$0xff]  }
  0xb1   : > { %5214 = vmatprep.subr.bf16.mxu1 %v5744_v49  ;;  %v5812_v49 = vld [vmem:[%s6248_s7 + $0x5d8] sm:$0xff]  }
  0xb3   : > { %5193 = vmatpush3.bf16.msra.mxu0 %v5743_v48  ;;  %v5811_v48 = vld [vmem:[%s6248_s7 + $0x518] sm:$0xff]  }
  0xb4   : > { %5215 = vmatpush3.bf16.msra.mxu1 %v5745_v50  ;;  %5194 = vmatprep.subr.bf16.mxu0 %v5746_v51  ;;  %v5813_v50 = vld [vmem:[%s6248_s7 + $0x598] sm:$0xff]   ;;  %v5814_v51 = vld [vmem:[%s6248_s7 + $0x560] sm:$0xff]  }
  0xb5   : > { %5216 = vmatprep.subr.bf16.mxu1 %v5748_v53  ;;  %v5816_v53 = vld [vmem:[%s6248_s7 + $0x5e0] sm:$0xff]  }
  0xb7   : > { %5195 = vmatpush3.bf16.msra.mxu0 %v5747_v52  ;;  %v5815_v52 = vld [vmem:[%s6248_s7 + $0x520] sm:$0xff]  }
  0xb8   : > { %5217 = vmatpush3.bf16.msra.mxu1 %v5749_v54  ;;  %5196 = vmatprep.subr.bf16.mxu0 %v5750_v55  ;;  %v5817_v54 = vld [vmem:[%s6248_s7 + $0x5a0] sm:$0xff]   ;;  %v5818_v55 = vld [vmem:[%s6248_s7 + $0x568] sm:$0xff]  }
  0xb9   : > { %5218 = vmatprep.subr.bf16.mxu1 %v5752_v57  ;;  %v5820_v57 = vld [vmem:[%s6248_s7 + $0x5e8] sm:$0xff]  }
  0xbb   : > { %5197 = vmatpush3.bf16.msra.mxu0 %v5751_v56  ;;  %v5819_v56 = vld [vmem:[%s6248_s7 + $0x528] sm:$0xff]  }
  0xbc   : > { %5219 = vmatpush3.bf16.msra.mxu1 %v5756_v60  ;;  %5226 = vmatprep.subr.bf16.mxu0 %v5757_v61  ;;  %v5823_v60 = vld [vmem:[%s6248_s7 + $0x530] sm:$0xff]  }
  0xbd   : > { %5248 = vmatprep.subr.bf16.mxu1 %v5762_v1  ;;  %v5824_v61 = vld [vmem:[%s6248_s7 + $0x5f0] sm:$0xff]   ;;  %v5828_v1 = vld [vmem:[%s6248_s7 + $0x5f8] sm:$0xff]  }
  0xbe   : > { %3812 = vmatmul.mubr.bf16.vlgmr.msra.gmra.mrb[12].mxu0 %v5753_v58  ;;  %v5821_v58 = vld [vmem:[%s6248_s7 + $0x5a8] sm:$0xff]  }
  0xbf   : > { %5227 = vmatpush3.bf16.msra.mxu0 %v5761_v0  ;;  %3853 = vmatmul.mubr.bf16.vlgmr.msra.gmra.mrb[12].mxu1 %v5758_v62  ;;  %v5825_v62 = vld [vmem:[%s6248_s7 + $0x5b0] sm:$0xff]   ;;  %v5827_v0 = vld [vmem:[%s6248_s7 + $0x538] sm:$0xff]  }
  0xc0   : > { %5249 = vmatpush3.bf16.msra.mxu1 %v5763_v2  ;;  %5228 = vmatprep.subr.bf16.mxu0 %v5764_v3  ;;  %v5829_v2 = vld [vmem:[%s6250_s8 + $0x50] ss:$180 sps:$4 sm:$0xff]   ;;  %v5831_v3 = vld [vmem:[%s6250_s8 + $0x54] ss:$180 sps:$4 sm:$0xff]  }
  0xc1   : > { %5250 = vmatprep.subr.bf16.mxu1 %v5766_v5  ;;  %3893 = vmatprep.mubr.bf16.mxu0 %v5793_v31  ;;  %v5833_v5 = vld [vmem:[%s6248_s7 + $0x640] sm:$0xff]   ;;  %v5860_v31 = vld [vmem:[%s6248_s7 + $0x670] sm:$0xff]  }
  0xc2   : > { %3934 = vmatprep.mubr.bf16.mxu1 %v5798_v35  ;;  %v5864_v35 = vld [vmem:[%s6248_s7 + $0x678] sm:$0xff]  }
  0xc3   : > { %5229 = vmatpush3.bf16.msra.mxu0 %v5765_v4  ;;  %v5832_v4 = vld [vmem:[%s6248_s7 + $0x5b8] sm:$0xff]  }
  0xc4   : > { %5251 = vmatpush3.bf16.msra.mxu1 %v5767_v6  ;;  %5230 = vmatprep.subr.bf16.mxu0 %v5768_v7  ;;  %v5834_v6 = vld [vmem:[%s6250_s8 + $0x58] ss:$180 sps:$4 sm:$0xff]   ;;  %v5836_v7 = vld [vmem:[%s6250_s8 + $0x5c] ss:$180 sps:$4 sm:$0xff]  }
  0xc5   : > { %5252 = vmatprep.subr.bf16.mxu1 %v5770_v9  ;;  %v5838_v9 = vld [vmem:[%s6248_s7 + $0x6c0] sm:$0xff]  }
  0xc7   : > { %5231 = vmatpush3.bf16.msra.mxu0 %v5769_v8  ;;  %v5837_v8 = vld [vmem:[%s6248_s7 + $0x600] sm:$0xff]  }
  0xc8   : > { %5253 = vmatpush3.bf16.msra.mxu1 %v5771_v10  ;;  %5232 = vmatprep.subr.bf16.mxu0 %v5772_v11  ;;  %v5839_v10 = vld [vmem:[%s6248_s7 + $0x680] sm:$0xff]   ;;  %v5840_v11 = vld [vmem:[%s6248_s7 + $0x648] sm:$0xff]  }
  0xc9   : > { %5254 = vmatprep.subr.bf16.mxu1 %v5774_v13  ;;  %v5842_v13 = vld [vmem:[%s6248_s7 + $0x6c8] sm:$0xff]  }
  0xcb   : > { %5233 = vmatpush3.bf16.msra.mxu0 %v5773_v12  ;;  %v5841_v12 = vld [vmem:[%s6248_s7 + $0x608] sm:$0xff]  }
  0xcc   : > { %5255 = vmatpush3.bf16.msra.mxu1 %v5775_v14  ;;  %5234 = vmatprep.subr.bf16.mxu0 %v5776_v15  ;;  %v5843_v14 = vld [vmem:[%s6248_s7 + $0x688] sm:$0xff]   ;;  %v5844_v15 = vld [vmem:[%s6248_s7 + $0x650] sm:$0xff]  }
  0xcd   : > { %5256 = vmatprep.subr.bf16.mxu1 %v5778_v17  ;;  %v5846_v17 = vld [vmem:[%s6248_s7 + $0x6d0] sm:$0xff]  }
  0xcf   : > { %5235 = vmatpush3.bf16.msra.mxu0 %v5777_v16  ;;  %v5845_v16 = vld [vmem:[%s6248_s7 + $0x610] sm:$0xff]  }
  0xd0   : > { %5257 = vmatpush3.bf16.msra.mxu1 %v5779_v18  ;;  %5236 = vmatprep.subr.bf16.mxu0 %v5780_v19  ;;  %v5847_v18 = vld [vmem:[%s6248_s7 + $0x690] sm:$0xff]   ;;  %v5848_v19 = vld [vmem:[%s6248_s7 + $0x658] sm:$0xff]  }
  0xd1   : > { %5258 = vmatprep.subr.bf16.mxu1 %v5782_v21  ;;  %v5850_v21 = vld [vmem:[%s6248_s7 + $0x6d8] sm:$0xff]  }
  0xd3   : > { %5237 = vmatpush3.bf16.msra.mxu0 %v5781_v20  ;;  %v5849_v20 = vld [vmem:[%s6248_s7 + $0x618] sm:$0xff]  }
  0xd4   : > { %5259 = vmatpush3.bf16.msra.mxu1 %v5783_v22  ;;  %5238 = vmatprep.subr.bf16.mxu0 %v5784_v23  ;;  %v5851_v22 = vld [vmem:[%s6248_s7 + $0x698] sm:$0xff]   ;;  %v5852_v23 = vld [vmem:[%s6248_s7 + $0x660] sm:$0xff]  }
  0xd5   : > { %5260 = vmatprep.subr.bf16.mxu1 %v5786_v25  ;;  %v5854_v25 = vld [vmem:[%s6248_s7 + $0x6e0] sm:$0xff]  }
  0xd7   : > { %5239 = vmatpush3.bf16.msra.mxu0 %v5785_v24  ;;  %v5853_v24 = vld [vmem:[%s6248_s7 + $0x620] sm:$0xff]  }
  0xd8   : > { %5261 = vmatpush3.bf16.msra.mxu1 %v5787_v26  ;;  %5240 = vmatprep.subr.bf16.mxu0 %v5788_v27  ;;  %v5855_v26 = vld [vmem:[%s6248_s7 + $0x6a0] sm:$0xff]   ;;  %v5856_v27 = vld [vmem:[%s6248_s7 + $0x668] sm:$0xff]  }
  0xd9   : > { %5262 = vmatprep.subr.bf16.mxu1 %v5790_v29  ;;  %v5858_v29 = vld [vmem:[%s6248_s7 + $0x6e8] sm:$0xff]  }
  0xdb   : > { %5241 = vmatpush3.bf16.msra.mxu0 %v5789_v28  ;;  %v5857_v28 = vld [vmem:[%s6248_s7 + $0x628] sm:$0xff]  }
  0xdc   : > { %5263 = vmatpush3.bf16.msra.mxu1 %v5794_v32  ;;  %5270 = vmatprep.subr.bf16.mxu0 %v5795_v33  ;;  %v5861_v32 = vld [vmem:[%s6248_s7 + $0x630] sm:$0xff]  }
  0xdd   : > { %5292 = vmatprep.subr.bf16.mxu1 %v5800_v37  ;;  %v5862_v33 = vld [vmem:[%s6248_s7 + $0x6f0] sm:$0xff]   ;;  %v5866_v37 = vld [vmem:[%s6248_s7 + $0x6f8] sm:$0xff]  }
  0xde   : > { %3894 = vmatmul.mubr.bf16.vlgmr.msra.gmra.mrb[16].mxu0 %v5791_v30  ;;  %v5859_v30 = vld [vmem:[%s6248_s7 + $0x6a8] sm:$0xff]  }
  0xdf   : > { %5271 = vmatpush3.bf16.msra.mxu0 %v5799_v36  ;;  %3935 = vmatmul.mubr.bf16.vlgmr.msra.gmra.mrb[16].mxu1 %v5796_v34  ;;  %v5863_v34 = vld [vmem:[%s6248_s7 + $0x6b0] sm:$0xff]   ;;  %v5865_v36 = vld [vmem:[%s6248_s7 + $0x638] sm:$0xff]  }
  0xe0   : > { %5293 = vmatpush3.bf16.msra.mxu1 %v5801_v38  ;;  %5272 = vmatprep.subr.bf16.mxu0 %v5802_v39  ;;  %v5867_v38 = vld [vmem:[%s6250_s8 + $0x60] ss:$180 sps:$4 sm:$0xff]   ;;  %v5869_v39 = vld [vmem:[%s6250_s8 + $0x64] ss:$180 sps:$4 sm:$0xff]  }
  0xe1   : > { %5294 = vmatprep.subr.bf16.mxu1 %v5804_v41  ;;  %3975 = vmatprep.mubr.bf16.mxu0 %v5831_v3  ;;  %v5871_v41 = vld [vmem:[%s6248_s7 + $0x740] sm:$0xff]   ;;  %v5886_v3 = vld [vmem:[%s6248_s7 + $0x758] sm:$0xff]  }
  0xe2   : > { %4016 = vmatprep.mubr.bf16.mxu1 %v5836_v7 }
  0xe3   : > { %5273 = vmatpush3.bf16.msra.mxu0 %v5803_v40  ;;  %v5870_v40 = vld [vmem:[%s6248_s7 + $0x6b8] sm:$0xff]  }
  0xe4   : > { %5295 = vmatpush3.bf16.msra.mxu1 %v5805_v42  ;;  %5274 = vmatprep.subr.bf16.mxu0 %v5806_v43  ;;  %v5872_v42 = vld [vmem:[%s6250_s8 + $0x68] ss:$180 sps:$4 sm:$0xff]   ;;  %v5874_v43 = vld [vmem:[%s6250_s8 + $0x6c] ss:$180 sps:$4 sm:$0xff]  }
  0xe5   : > { %5296 = vmatprep.subr.bf16.mxu1 %v5808_v45  ;;  %v5876_v45 = vld [vmem:[%s6248_s7 + $0x7c0] sm:$0xff]  }
  0xe7   : > { %5275 = vmatpush3.bf16.msra.mxu0 %v5807_v44  ;;  %v5875_v44 = vld [vmem:[%s6248_s7 + $0x700] sm:$0xff]  }
  0xe8   : > { %5297 = vmatpush3.bf16.msra.mxu1 %v5809_v46  ;;  %5276 = vmatprep.subr.bf16.mxu0 %v5810_v47  ;;  %v5877_v46 = vld [vmem:[%s6248_s7 + $0x780] sm:$0xff]   ;;  %v5878_v47 = vld [vmem:[%s6248_s7 + $0x748] sm:$0xff]  }
  0xe9   : > { %5298 = vmatprep.subr.bf16.mxu1 %v5812_v49  ;;  %v5879_v49 = vld [vmem:[%s6248_s7 + $0x708] sm:$0xff]  }
  0xeb   : > { %5277 = vmatpush3.bf16.msra.mxu0 %v5811_v48 }
  0xec   : > { %5299 = vmatpush3.bf16.msra.mxu1 %v5813_v50  ;;  %5278 = vmatprep.subr.bf16.mxu0 %v5814_v51  ;;  %v5880_v51 = vld [vmem:[%s6248_s7 + $0x7c8] sm:$0xff]  }
  0xed   : > { %5300 = vmatprep.subr.bf16.mxu1 %v5816_v53  ;;  %v5881_v53 = vld [vmem:[%s6248_s7 + $0x788] sm:$0xff]  }
  0xef   : > { %5279 = vmatpush3.bf16.msra.mxu0 %v5815_v52 }
  0xf0   : > { %5301 = vmatpush3.bf16.msra.mxu1 %v5817_v54  ;;  %5280 = vmatprep.subr.bf16.mxu0 %v5818_v55 }
  0xf1   : > { %5302 = vmatprep.subr.bf16.mxu1 %v5820_v57 }
  0xf3   : > { %5281 = vmatpush3.bf16.msra.mxu0 %v5819_v56  ;;  %v5882_v56 = vld [vmem:[%s6248_s7 + $0x750] sm:$0xff]  }
  0xf4   : > { %5303 = vmatpush3.bf16.msra.mxu1 %v5821_v58  ;;  %5282 = vmatprep.subr.bf16.mxu0 %v5822_v59  ;;  %v5883_v59 = vld [vmem:[%s6248_s7 + $0x710] sm:$0xff]  }
  0xf5   : > { %5304 = vmatprep.subr.bf16.mxu1 %v5824_v61  ;;  %v5884_v61 = vld [vmem:[%s6248_s7 + $0x7d0] sm:$0xff]  }
  0xf7   : > { %5283 = vmatpush3.bf16.msra.mxu0 %v5823_v60 }
  0xf8   : > { %5305 = vmatpush3.bf16.msra.mxu1 %v5825_v62  ;;  %5284 = vmatprep.subr.bf16.mxu0 %v5826_v63 }
  0xf9   : > { %5306 = vmatprep.subr.bf16.mxu1 %v5828_v1 }
  0xfb   : > { %5285 = vmatpush3.bf16.msra.mxu0 %v5827_v0  ;;  %v5885_v0 = vld [vmem:[%s6248_s7 + $0x790] sm:$0xff]  }
  0xfc   : > { %5307 = vmatpush3.bf16.msra.mxu1 %v5832_v4  ;;  %5314 = vmatprep.subr.bf16.mxu0 %v5833_v5  ;;  %v5887_v5 = vld [vmem:[%s6248_s7 + $0x718] sm:$0xff]  }
  0xfd   : > { %5336 = vmatprep.subr.bf16.mxu1 %v5838_v9  ;;  %v5890_v9 = vld [vmem:[%s6248_s7 + $0x760] sm:$0xff]  }
  0xfe   : > { %3976 = vmatmul.mubr.bf16.vlgmr.msra.gmra.mrb[20].mxu0 %v5829_v2 }
  0xff   : > { %5315 = vmatpush3.bf16.msra.mxu0 %v5837_v8  ;;  %4017 = vmatmul.mubr.bf16.vlgmr.msra.gmra.mrb[20].mxu1 %v5834_v6  ;;  %v5888_v6 = vld [vmem:[%s6248_s7 + $0x7d8] sm:$0xff]  }
 0x100   : > { %5337 = vmatpush3.bf16.msra.mxu1 %v5839_v10  ;;  %5316 = vmatprep.subr.bf16.mxu0 %v5840_v11  ;;  %v5889_v8 = vld [vmem:[%s6248_s7 + $0x798] sm:$0xff]   ;;  %v5891_v10 = vld [vmem:[%s6248_s7 + $0x720] sm:$0xff]  }
 0x101   : > { %5338 = vmatprep.subr.bf16.mxu1 %v5842_v13  ;;  %4057 = vmatprep.mubr.bf16.mxu0 %v5869_v39  ;;  %v5892_v11 = vld [vmem:[%s6248_s7 + $0x7e0] sm:$0xff]   ;;  %v5894_v13 = vld [vmem:[%s6248_s7 + $0x768] sm:$0xff]  }
 0x102   : > { %4098 = vmatprep.mubr.bf16.mxu1 %v5874_v43 }
 0x103   : > { %5317 = vmatpush3.bf16.msra.mxu0 %v5841_v12  ;;  %v5893_v12 = vld [vmem:[%s6248_s7 + $0x7a0] sm:$0xff]  }
 0x104   : > { %5339 = vmatpush3.bf16.msra.mxu1 %v5843_v14  ;;  %5318 = vmatprep.subr.bf16.mxu0 %v5844_v15  ;;  %v5895_v14 = vld [vmem:[%s6248_s7 + $0x728] sm:$0xff]  }
 0x105   : > { %5340 = vmatprep.subr.bf16.mxu1 %v5846_v17  ;;  %v5896_v15 = vld [vmem:[%s6248_s7 + $0x7e8] sm:$0xff]   ;;  %v5898_v17 = vld [vmem:[%s6248_s7 + $0x770] sm:$0xff]  }
 0x107   : > { %5319 = vmatpush3.bf16.msra.mxu0 %v5845_v16  ;;  %v5897_v16 = vld [vmem:[%s6248_s7 + $0x7a8] sm:$0xff]  }
 0x108   : > { %5341 = vmatpush3.bf16.msra.mxu1 %v5847_v18  ;;  %5320 = vmatprep.subr.bf16.mxu0 %v5848_v19  ;;  %v5899_v18 = vld [vmem:[%s6248_s7 + $0x730] sm:$0xff]  }
 0x109   : > { %5342 = vmatprep.subr.bf16.mxu1 %v5850_v21  ;;  %v5900_v19 = vld [vmem:[%s6248_s7 + $0x7f0] sm:$0xff]   ;;  %v5902_v21 = vld [vmem:[%s6248_s7 + $0x778] sm:$0xff]  }
 0x10b   : > { %5321 = vmatpush3.bf16.msra.mxu0 %v5849_v20  ;;  %v5901_v20 = vld [vmem:[%s6248_s7 + $0x7b0] sm:$0xff]  }
 0x10c   : > { %5343 = vmatpush3.bf16.msra.mxu1 %v5851_v22  ;;  %5322 = vmatprep.subr.bf16.mxu0 %v5852_v23  ;;  %v5903_v22 = vld [vmem:[%s6248_s7 + $0x738] sm:$0xff]  }
 0x10d   : > { %5344 = vmatprep.subr.bf16.mxu1 %v5854_v25  ;;  %v5904_v23 = vld [vmem:[%s6248_s7 + $0x7f8] sm:$0xff]  }
 0x10e   : > { %v5907_v25 = vld [vmem:[%s6250_s8 + $0x74] ss:$180 sps:$4 sm:$0xff]  }
 0x10f   : > { %5323 = vmatpush3.bf16.msra.mxu0 %v5853_v24  ;;  %v5905_v24 = vld [vmem:[%s6250_s8 + $0x70] ss:$180 sps:$4 sm:$0xff]  }
 0x110   : > { %5345 = vmatpush3.bf16.msra.mxu1 %v5855_v26  ;;  %5324 = vmatprep.subr.bf16.mxu0 %v5856_v27  ;;  %v5908_v26 = vld [vmem:[%s6248_s7 + $0x7b8] sm:$0xff]   ;;  %v5909_v27 = vld [vmem:[%s6248_s7 + $0x840] sm:$0xff]  }
 0x111   : > { %5346 = vmatprep.subr.bf16.mxu1 %v5858_v29  ;;  %v5912_v29 = vld [vmem:[%s6250_s8 + $0x7c] ss:$180 sps:$4 sm:$0xff]  }
 0x113   : > { %5325 = vmatpush3.bf16.msra.mxu0 %v5857_v28  ;;  %v5910_v28 = vld [vmem:[%s6250_s8 + $0x78] ss:$180 sps:$4 sm:$0xff]  }
 0x114   : > { %5347 = vmatpush3.bf16.msra.mxu1 %v5859_v30  ;;  %5326 = vmatprep.subr.bf16.mxu0 %v5860_v31  ;;  %v5913_v30 = vld [vmem:[%s6248_s7 + $0x800] sm:$0xff]  }
 0x115   : > { %5348 = vmatprep.subr.bf16.mxu1 %v5862_v33  ;;  %v5914_v31 = vld [vmem:[%s6248_s7 + $0x8c0] sm:$0xff]  }
 0x116   : > { %v5915_v33 = vld [vmem:[%s6248_s7 + $0x880] sm:$0xff]  }
 0x117   : > { %5327 = vmatpush3.bf16.msra.mxu0 %v5861_v32 }
 0x118   : > { %5349 = vmatpush3.bf16.msra.mxu1 %v5863_v34  ;;  %5328 = vmatprep.subr.bf16.mxu0 %v5864_v35  ;;  %v5916_v35 = vld [vmem:[%s6248_s7 + $0x848] sm:$0xff]  }
 0x119   : > { %5350 = vmatprep.subr.bf16.mxu1 %v5866_v37 }
 0x11b   : > { %5329 = vmatpush3.bf16.msra.mxu0 %v5865_v36 }
 0x11c   : > { %5351 = vmatpush3.bf16.msra.mxu1 %v5870_v40  ;;  %5358 = vmatprep.subr.bf16.mxu0 %v5871_v41  ;;  %v5918_v40 = vld [vmem:[%s6248_s7 + $0x8c8] sm:$0xff]  }
 0x11d   : > { %5380 = vmatprep.subr.bf16.mxu1 %v5876_v45 }
 0x11e   : > { %4058 = vmatmul.mubr.bf16.vlgmr.msra.gmra.mrb[24].mxu0 %v5867_v38  ;;  %v5917_v38 = vld [vmem:[%s6248_s7 + $0x808] sm:$0xff]  }
 0x11f   : > { %5359 = vmatpush3.bf16.msra.mxu0 %v5875_v44  ;;  %4099 = vmatmul.mubr.bf16.vlgmr.msra.gmra.mrb[24].mxu1 %v5872_v42  ;;  %v5919_v44 = vld [vmem:[%s6248_s7 + $0x888] sm:$0xff]  }
 0x120   : > { %5381 = vmatpush3.bf16.msra.mxu1 %v5877_v46  ;;  %5360 = vmatprep.subr.bf16.mxu0 %v5878_v47  ;;  %v5920_v46 = vld [vmem:[%s6248_s7 + $0x850] sm:$0xff]  }
 0x121   : > { %5382 = vmatprep.subr.bf16.mxu1 %v5880_v51  ;;  %4139 = vmatprep.mubr.bf16.mxu0 %v5907_v25 }
 0x122   : > { %4180 = vmatprep.mubr.bf16.mxu1 %v5912_v29  ;;  %v5957_v29 = vld [vmem:[%s6248_s7 + $0x988] sm:$0xff]  }
 0x123   : > { %5361 = vmatpush3.bf16.msra.mxu0 %v5879_v49 }
 0x124   : > { %5383 = vmatpush3.bf16.msra.mxu1 %v5881_v53  ;;  %5362 = vmatprep.subr.bf16.mxu0 %v5882_v56  ;;  %v5924_v56 = vld [vmem:[%s6248_s7 + $0x858] sm:$0xff]  }
 0x125   : > { %5384 = vmatprep.subr.bf16.mxu1 %v5884_v61  ;;  %v5928_v61 = vld [vmem:[%s6248_s7 + $0x860] sm:$0xff]  }
 0x127   : > { %5363 = vmatpush3.bf16.msra.mxu0 %v5883_v59  ;;  %v5926_v59 = vld [vmem:[%s6248_s7 + $0x8d8] sm:$0xff]  }
 0x128   : > { %5385 = vmatpush3.bf16.msra.mxu1 %v5885_v0  ;;  %5364 = vmatprep.subr.bf16.mxu0 %v5886_v3  ;;  %v5931_v0 = vld [vmem:[%s6248_s7 + $0x8a0] sm:$0xff]   ;;  %v5934_v3 = vld [vmem:[%s6248_s7 + $0x8e8] sm:$0xff]  }
 0x129   : > { %5386 = vmatprep.subr.bf16.mxu1 %v5888_v6  ;;  %v5937_v6 = vld [vmem:[%s6248_s7 + $0x830] sm:$0xff]  }
 0x12b   : > { %5365 = vmatpush3.bf16.msra.mxu0 %v5887_v5  ;;  %v5936_v5 = vld [vmem:[%s6248_s7 + $0x870] sm:$0xff]  }
 0x12c   : > { %5387 = vmatpush3.bf16.msra.mxu1 %v5889_v8  ;;  %5366 = vmatprep.subr.bf16.mxu0 %v5890_v9  ;;  %v5939_v8 = vld [vmem:[%s6248_s7 + $0x8b0] sm:$0xff]   ;;  %v5940_v9 = vld [vmem:[%s6248_s7 + $0x878] sm:$0xff]  }
 0x12d   : > { %5388 = vmatprep.subr.bf16.mxu1 %v5892_v11  ;;  %v5942_v11 = vld [vmem:[%s6248_s7 + $0x8f8] sm:$0xff]  }
 0x12f   : > { %5367 = vmatpush3.bf16.msra.mxu0 %v5891_v10  ;;  %v5941_v10 = vld [vmem:[%s6248_s7 + $0x838] sm:$0xff]  }
 0x130   : > { %5389 = vmatpush3.bf16.msra.mxu1 %v5893_v12  ;;  %5368 = vmatprep.subr.bf16.mxu0 %v5894_v13  ;;  %v5943_v12 = vld [vmem:[%s6250_s8 + $0x80] ss:$180 sps:$4 sm:$0xff]   ;;  %v5945_v13 = vld [vmem:[%s6250_s8 + $0x84] ss:$180 sps:$4 sm:$0xff]  }
 0x131   : > { %v5066_v48 = vpop.f32.mrb[0].mxu0  ;;  %5390 = vmatprep.subr.bf16.mxu1 %v5896_v15  ;;  %v5947_v15 = vld [vmem:[%s6248_s7 + $0x940] sm:$0xff]  }
 0x132   : > { %v5088_v50 = vpop.f32.mrb[0].mxu1  ;;  %v5067_v52 = vpop.f32.mrb[1].mxu0 }
 0x133   : > { %v5068_v54 = vadd.f32 %v5067_v52, %v5066_v48  ;;  %v5089_v55 = vpop.f32.mrb[1].mxu1  ;;  %v5069_v58 = vpop.f32.mrb[2].mxu0  ;;  %5369 = vmatpush3.bf16.msra.mxu0 %v5895_v14  ;;  %v5922_v52 = vld [vmem:[%s6248_s7 + $0x8d0] sm:$0xff]   ;;  %v5946_v14 = vld [vmem:[%s6248_s7 + $0x8b8] sm:$0xff]  }
 0x134   : > { %v5090_v57 = vadd.f32 %v5089_v55, %v5088_v50  ;;  %v5091_v60 = vpop.f32.mrb[2].mxu1  ;;  %v5070_v63 = vpop.f32.mrb[3].mxu0  ;;  %5391 = vmatpush3.bf16.msra.mxu1 %v5897_v16  ;;  %5370 = vmatprep.subr.bf16.mxu0 %v5898_v17  ;;  %v5921_v50 = vld [vmem:[%s6248_s7 + $0x810] sm:$0xff]  }
 0x135   : > { %v5071_v1 = vadd.f32 %v5070_v63, %v5069_v58  ;;  %v5092_v2 = vpop.f32.mrb[3].mxu1  ;;  %5392 = vmatprep.subr.bf16.mxu1 %v5900_v19  ;;  %v5923_v55 = vld [vmem:[%s6248_s7 + $0x890] sm:$0xff]   ;;  %v5925_v58 = vld [vmem:[%s6248_s7 + $0x818] sm:$0xff]   ;;  %v5930_v63 = vld [vmem:[%s6248_s7 + $0x8e0] sm:$0xff]  }
 0x136   : > { %v6522_v62 = vadd.f32 %v5090_v57, %v5068_v54  ;;  %v5093_v4 = vadd.f32 %v5092_v2, %v5091_v60  ;;  %v5927_v60 = vld [vmem:[%s6248_s7 + $0x898] sm:$0xff]   ;;  %v5933_v2 = vld [vmem:[%s6248_s7 + $0x828] sm:$0xff]   ;;  %v5952_v19 = vld [vmem:[%s6248_s7 + $0x9c0] sm:$0xff]  }
 0x137   : > { %5371 = vmatpush3.bf16.msra.mxu0 %v5899_v18  ;;  %v5948_v16 = vld [vmem:[%s6250_s8 + $0x88] ss:$180 sps:$4 sm:$0xff]   ;;  %v5950_v17 = vld [vmem:[%s6250_s8 + $0x8c] ss:$180 sps:$4 sm:$0xff]  }
 0x138   : > { %v6528_v7 = vadd.f32 %v5093_v4, %v5071_v1  ;;  %5393 = vmatpush3.bf16.msra.mxu1 %v5901_v20  ;;  %5372 = vmatprep.subr.bf16.mxu0 %v5902_v21  ;;  %v5932_v1 = vld [vmem:[%s6248_s7 + $0x868] sm:$0xff]   ;;  %v5951_v18 = vld [vmem:[%s6248_s7 + $0x900] sm:$0xff]  }
 0x139   : > { %5394 = vmatprep.subr.bf16.mxu1 %v5904_v23  ;;  %v5935_v4 = vld [vmem:[%s6248_s7 + $0x8a8] sm:$0xff]   ;;  %v5953_v20 = vld [vmem:[%s6248_s7 + $0x980] sm:$0xff]  }
 0x13b   : > { %5373 = vmatpush3.bf16.msra.mxu0 %v5903_v22  ;;  %v5954_v22 = vld [vmem:[%s6248_s7 + $0x948] sm:$0xff]  }
 0x13c   : > { %5395 = vmatpush3.bf16.msra.mxu1 %v5908_v26  ;;  %5402 = vmatprep.subr.bf16.mxu0 %v5909_v27  ;;  %v5956_v27 = vld [vmem:[%s6248_s7 + $0x9c8] sm:$0xff]  }
 0x13d   : > { %5424 = vmatprep.subr.bf16.mxu1 %v5914_v31 }
 0x13e   : > { %4140 = vmatmul.mubr.bf16.vlgmr.msra.gmra.mrb[28].mxu0 %v5905_v24  ;;  %v5955_v24 = vld [vmem:[%s6248_s7 + $0x908] sm:$0xff]  }
 0x13f   : > { %5403 = vmatpush3.bf16.msra.mxu0 %v5913_v30  ;;  %4181 = vmatmul.mubr.bf16.vlgmr.msra.gmra.mrb[28].mxu1 %v5910_v28 }
 0x140   : > { %5425 = vmatpush3.bf16.msra.mxu1 %v5915_v33  ;;  %5404 = vmatprep.subr.bf16.mxu0 %v5916_v35  ;;  %v5959_v35 = vld [vmem:[%s6248_s7 + $0x910] sm:$0xff]  }
 0x141   : > { %5426 = vmatprep.subr.bf16.mxu1 %v5918_v40  ;;  %4221 = vmatprep.mubr.bf16.mxu0 %v5945_v13 }
 0x142   : > { %4262 = vmatprep.mubr.bf16.mxu1 %v5950_v17  ;;  %v5995_v17 = vld [vmem:[%s6248_s7 + $0xa88] sm:$0xff]  }
 0x143   : > { %5405 = vmatpush3.bf16.msra.mxu0 %v5917_v38  ;;  %v5960_v38 = vld [vmem:[%s6248_s7 + $0x9d0] sm:$0xff]  }
 0x144   : > { %5427 = vmatpush3.bf16.msra.mxu1 %v5919_v44  ;;  %5406 = vmatprep.subr.bf16.mxu0 %v5920_v46  ;;  %v5962_v44 = vld [vmem:[%s6248_s7 + $0x958] sm:$0xff]  }
 0x145   : > { %5428 = vmatprep.subr.bf16.mxu1 %v5922_v52  ;;  %v5969_v52 = vld [vmem:[%s6248_s7 + $0x9a0] sm:$0xff]  }
 0x147   : > { %5407 = vmatpush3.bf16.msra.mxu0 %v5921_v50  ;;  %v5967_v50 = vld [vmem:[%s6248_s7 + $0x920] sm:$0xff]  }
 0x148   : > { %5429 = vmatpush3.bf16.msra.mxu1 %v5923_v55  ;;  %5408 = vmatprep.subr.bf16.mxu0 %v5924_v56  ;;  %v5972_v55 = vld [vmem:[%s6248_s7 + $0x9e8] sm:$0xff]  }
 0x149   : > { %5430 = vmatprep.subr.bf16.mxu1 %v5926_v59  ;;  %v5973_v56 = vld [vmem:[%s6248_s7 + $0x9a8] sm:$0xff]   ;;  %v5976_v59 = vld [vmem:[%s6248_s7 + $0x9f0] sm:$0xff]  }
 0x14b   : > { %5409 = vmatpush3.bf16.msra.mxu0 %v5925_v58  ;;  %v5975_v58 = vld [vmem:[%s6248_s7 + $0x930] sm:$0xff]  }
 0x14c   : > { %5431 = vmatpush3.bf16.msra.mxu1 %v5927_v60  ;;  %5410 = vmatprep.subr.bf16.mxu0 %v5928_v61  ;;  %v5977_v60 = vld [vmem:[%s6248_s7 + $0x9b0] sm:$0xff]   ;;  %v5978_v61 = vld [vmem:[%s6248_s7 + $0x978] sm:$0xff]  }
 0x14d   : > { %5432 = vmatprep.subr.bf16.mxu1 %v5930_v63  ;;  %v5980_v63 = vld [vmem:[%s6248_s7 + $0x9f8] sm:$0xff]  }
 0x150   : > { %5433 = vmatpush3.bf16.msra.mxu1 %v5931_v0  ;;  %v5981_v0 = vld [vmem:[%s6250_s8 + $0x90] ss:$180 sps:$4 sm:$0xff]  }
 0x151   : > { %v5110_v32 = vpop.f32.mrb[4].mxu0  ;;  %5434 = vmatprep.subr.bf16.mxu1 %v5934_v3  ;;  %v5985_v3 = vld [vmem:[%s6248_s7 + $0xa40] sm:$0xff]  }
 0x152   : > { %v5111_v34 = vpop.f32.mrb[5].mxu0  ;;  %v5132_v42 = vpop.f32.mrb[4].mxu1 }
 0x153   : > { %v5112_v36 = vadd.f32 %v5111_v34, %v5110_v32  ;;  %v5113_v37 = vpop.f32.mrb[6].mxu0  ;;  %v5133_v45 = vpop.f32.mrb[5].mxu1  ;;  %v5958_v32 = vld [vmem:[%s6248_s7 + $0x950] sm:$0xff]  }
 0x154   : > { %v5114_v39 = vpop.f32.mrb[7].mxu0  ;;  %v5134_v48 = vadd.f32 %v5133_v45, %v5132_v42  ;;  %v5135_v49 = vpop.f32.mrb[6].mxu1  ;;  %5435 = vmatpush3.bf16.msra.mxu1 %v5935_v4  ;;  %v5963_v45 = vld [vmem:[%s6248_s7 + $0x918] sm:$0xff]  }
 0x155   : > { %v3650_v41 = vadd.f32 %v5112_v36, %v6522_v62  ;;  %v5115_v43 = vadd.f32 %v5114_v39, %v5113_v37  ;;  %v5136_v51 = vpop.f32.mrb[7].mxu1  ;;  %v5929_v62 = vld [vmem:[%s6248_s7 + $0x820] sm:$0xff]  }
 0x156   : > { %v5137_v54 = vadd.f32 %v5136_v51, %v5135_v49  ;;  %5411 = vmatpush3.bf16.msra.mxu0 %v5929_v62  ;;  %v5966_v49 = vld [vmem:[%s6248_s7 + $0x960] sm:$0xff]   ;;  %v5979_v62 = vld [vmem:[%s6248_s7 + $0x938] sm:$0xff]  }
 0x157   : > { %v3653_v47 = vadd.f32 %v5115_v43, %v6528_v7  ;;  %v6564_v53 = vadd.f32 %v5134_v48, %v3650_v41  ;;  %5412 = vmatprep.subr.bf16.mxu0 %v5932_v1  ;;  %v5938_v7 = vld [vmem:[%s6248_s7 + $0x8f0] sm:$0xff]   ;;  %v5965_v48 = vld [vmem:[%s6248_s7 + $0x998] sm:$0xff]   ;;  %v5968_v51 = vld [vmem:[%s6248_s7 + $0x9e0] sm:$0xff]  }
 0x158   : > { %5436 = vmatprep.subr.bf16.mxu1 %v5938_v7  ;;  %v5961_v41 = vld [vmem:[%s6248_s7 + $0x990] sm:$0xff]   ;;  %v5990_v7 = vld [vmem:[%s6248_s7 + $0xac0] sm:$0xff]  }
 0x159   : > { %v6568_v57 = vadd.f32 %v5137_v54, %v3653_v47  ;;  %5437 = vmatpush3.bf16.msra.mxu1 %v5939_v8  ;;  %v5964_v47 = vld [vmem:[%s6248_s7 + $0x9d8] sm:$0xff]   ;;  %v5971_v54 = vld [vmem:[%s6248_s7 + $0x928] sm:$0xff]   ;;  %v5991_v8 = vld [vmem:[%s6248_s7 + $0xa80] sm:$0xff]  }
 0x15a   : > { %5413 = vmatpush3.bf16.msra.mxu0 %v5933_v2  ;;  %5438 = vmatprep.subr.bf16.mxu1 %v5942_v11  ;;  %v5983_v1 = vld [vmem:[%s6250_s8 + $0x94] ss:$180 sps:$4 sm:$0xff]   ;;  %v5986_v4 = vld [vmem:[%s6250_s8 + $0x98] ss:$180 sps:$4 sm:$0xff]  }
 0x15b   : > { %5414 = vmatprep.subr.bf16.mxu0 %v5936_v5  ;;  %v5984_v2 = vld [vmem:[%s6248_s7 + $0x9b8] sm:$0xff]  }
 0x15c   : > { %v5988_v5 = vld [vmem:[%s6250_s8 + $0x9c] ss:$180 sps:$4 sm:$0xff]  }
 0x15d   : > { %5439 = vmatpush3.bf16.msra.mxu1 %v5946_v14 }
 0x15e   : > { %5415 = vmatpush3.bf16.msra.mxu0 %v5937_v6  ;;  %5468 = vmatprep.subr.bf16.mxu1 %v5952_v19  ;;  %v5989_v6 = vld [vmem:[%s6248_s7 + $0xa00] sm:$0xff]  }
 0x15f   : > { %5416 = vmatprep.subr.bf16.mxu0 %v5940_v9 }
 0x160   : > { %4263 = vmatmul.mubr.bf16.vlgmr.msra.gmra.mrb[32].mxu1 %v5948_v16 }
 0x161   : > { %5469 = vmatpush3.bf16.msra.mxu1 %v5953_v20  ;;  %4344 = vmatprep.mubr.bf16.mxu1 %v5988_v5  ;;  %v5996_v20 = vld [vmem:[%s6248_s7 + $0xa50] sm:$0xff]  }
 0x162   : > { %5417 = vmatpush3.bf16.msra.mxu0 %v5941_v10  ;;  %5470 = vmatprep.subr.bf16.mxu1 %v5956_v27  ;;  %v5992_v10 = vld [vmem:[%s6248_s7 + $0xa48] sm:$0xff]  }
 0x163   : > { %5446 = vmatprep.subr.bf16.mxu0 %v5947_v15  ;;  %v5994_v15 = vld [vmem:[%s6248_s7 + $0xac8] sm:$0xff]  }
 0x165   : > { %4222 = vmatmul.mubr.bf16.vlgmr.msra.gmra.mrb[32].mxu0 %v5943_v12  ;;  %5471 = vmatpush3.bf16.msra.mxu1 %v5957_v29  ;;  %v5993_v12 = vld [vmem:[%s6248_s7 + $0xa08] sm:$0xff]   ;;  %v5999_v29 = vld [vmem:[%s6248_s7 + $0xa90] sm:$0xff]  }
 0x166   : > { %5447 = vmatpush3.bf16.msra.mxu0 %v5951_v18  ;;  %5472 = vmatprep.subr.bf16.mxu1 %v5960_v38  ;;  %v6005_v38 = vld [vmem:[%s6248_s7 + $0xa20] sm:$0xff]  }
 0x167   : > { %5448 = vmatprep.subr.bf16.mxu0 %v5954_v22  ;;  %4303 = vmatprep.mubr.bf16.mxu0 %v5983_v1  ;;  %v6028_v1 = vld [vmem:[%s6248_s7 + $0xb10] sm:$0xff]  }
 0x169   : > { %5473 = vmatpush3.bf16.msra.mxu1 %v5961_v41  ;;  %v6008_v41 = vld [vmem:[%s6248_s7 + $0xa68] sm:$0xff]  }
 0x16a   : > { %5449 = vmatpush3.bf16.msra.mxu0 %v5955_v24  ;;  %5474 = vmatprep.subr.bf16.mxu1 %v5964_v47  ;;  %v6014_v47 = vld [vmem:[%s6248_s7 + $0xaf0] sm:$0xff]  }
 0x16b   : > { %5450 = vmatprep.subr.bf16.mxu0 %v5958_v32  ;;  %v6000_v32 = vld [vmem:[%s6248_s7 + $0xa58] sm:$0xff]  }
 0x16d   : > { %5475 = vmatpush3.bf16.msra.mxu1 %v5965_v48  ;;  %v6015_v48 = vld [vmem:[%s6248_s7 + $0xab0] sm:$0xff]  }
 0x16e   : > { %5451 = vmatpush3.bf16.msra.mxu0 %v5959_v35  ;;  %5476 = vmatprep.subr.bf16.mxu1 %v5968_v51  ;;  %v6002_v35 = vld [vmem:[%s6248_s7 + $0xad8] sm:$0xff]  }
 0x16f   : > { %5452 = vmatprep.subr.bf16.mxu0 %v5962_v44  ;;  %v6011_v44 = vld [vmem:[%s6248_s7 + $0xaa8] sm:$0xff]   ;;  %v6018_v51 = vld [vmem:[%s6248_s7 + $0xaf8] sm:$0xff]  }
 0x171   : > { %v5154_v21 = vpop.f32.mrb[8].mxu0  ;;  %5477 = vmatpush3.bf16.msra.mxu1 %v5969_v52  ;;  %v6019_v52 = vld [vmem:[%s6250_s8 + $0xa0] ss:$180 sps:$4 sm:$0xff]  }
 0x172   : > { %v5155_v23 = vpop.f32.mrb[9].mxu0  ;;  %v5176_v28 = vpop.f32.mrb[8].mxu1  ;;  %5453 = vmatpush3.bf16.msra.mxu0 %v5963_v45  ;;  %5478 = vmatprep.subr.bf16.mxu1 %v5972_v55  ;;  %v6012_v45 = vld [vmem:[%s6248_s7 + $0xa70] sm:$0xff]   ;;  %v6080_v55 = vmov 0.0  }
 0x173   : > { %v5156_v25 = vadd.f32 %v5155_v23, %v5154_v21  ;;  %v5157_v26 = vpop.f32.mrb[10].mxu0  ;;  %v5177_v34 = vpop.f32.mrb[9].mxu1  ;;  %5454 = vmatprep.subr.bf16.mxu0 %v5966_v49  ;;  %v5997_v23 = vld [vmem:[%s6248_s7 + $0xa10] sm:$0xff]   ;;  %v6016_v49 = vld [vmem:[%s6248_s7 + $0xa78] sm:$0xff]  }
 0x174   : > { %v5158_v31 = vpop.f32.mrb[11].mxu0  ;;  %v5178_v36 = vadd.f32 %v5177_v34, %v5176_v28  ;;  %v5179_v37 = vpop.f32.mrb[10].mxu1 }
 0x175   : > { %v3732_v30 = vadd.f32 %v5156_v25, %v6564_v53  ;;  %v5159_v33 = vadd.f32 %v5158_v31, %v5157_v26  ;;  %v5180_v40 = vpop.f32.mrb[11].mxu1  ;;  %v5970_v53 = vld [vmem:[%s6248_s7 + $0x968] sm:$0xff]   ;;  %5479 = vmatpush3.bf16.msra.mxu1 %v5973_v56  ;;  %v5998_v26 = vld [vmem:[%s6248_s7 + $0xad0] sm:$0xff]  }
 0x176   : > { %v5181_v43 = vadd.f32 %v5180_v40, %v5179_v37  ;;  %5455 = vmatpush3.bf16.msra.mxu0 %v5967_v50  ;;  %5480 = vmatprep.subr.bf16.mxu1 %v5976_v59  ;;  %v6004_v37 = vld [vmem:[%s6248_s7 + $0xa60] sm:$0xff]   ;;  %v6017_v50 = vld [vmem:[%s6248_s7 + $0xa38] sm:$0xff]   ;;  %v6027_v59 = vld [vmem:[%s6248_s7 + $0xb08] sm:$0xff]  }
 0x177   : > { %v3735_v39 = vadd.f32 %v5159_v33, %v6568_v57  ;;  %v6607_v42 = vadd.f32 %v5178_v36, %v3732_v30  ;;  %5456 = vmatprep.subr.bf16.mxu0 %v5970_v53  ;;  %v5974_v57 = vld [vmem:[%s6248_s7 + $0x970] sm:$0xff]   ;;  %v6001_v33 = vld [vmem:[%s6248_s7 + $0xa18] sm:$0xff]   ;;  %v6007_v40 = vld [vmem:[%s6248_s7 + $0xaa0] sm:$0xff]  }
 0x178   : > { %v6003_v36 = vld [vmem:[%s6248_s7 + $0xa98] sm:$0xff]  }
 0x179   : > { %v6611_v46 = vadd.f32 %v5181_v43, %v3735_v39  ;;  %5481 = vmatpush3.bf16.msra.mxu1 %v5977_v60  ;;  %v6006_v39 = vld [vmem:[%s6248_s7 + $0xae0] sm:$0xff]   ;;  %v6010_v43 = vld [vmem:[%s6248_s7 + $0xae8] sm:$0xff]  }
 0x17a   : > { %5457 = vmatpush3.bf16.msra.mxu0 %v5971_v54  ;;  %5482 = vmatprep.subr.bf16.mxu1 %v5980_v63  ;;  %v6021_v53 = vld [vmem:[%s6250_s8 + $0xa4] ss:$180 sps:$4 sm:$0xff]   ;;  %v6023_v56 = vld [vmem:[%s6250_s8 + $0xa8] ss:$180 sps:$4 sm:$0xff]  }
 0x17b   : > { %5458 = vmatprep.subr.bf16.mxu0 %v5974_v57  ;;  %v6022_v54 = vld [vmem:[%s6248_s7 + $0xab8] sm:$0xff]   ;;  %v6025_v57 = vld [vmem:[%s6250_s8 + $0xac] ss:$180 sps:$4 sm:$0xff]  }
 0x17d   : > { %5483 = vmatpush3.bf16.msra.mxu1 %v5984_v2 }
 0x17e   : > { %5459 = vmatpush3.bf16.msra.mxu0 %v5975_v58  ;;  %5512 = vmatprep.subr.bf16.mxu1 %v5990_v7  ;;  %v6026_v58 = vld [vmem:[%s6248_s7 + $0xb00] sm:$0xff]  }
 0x17f   : > { %5460 = vmatprep.subr.bf16.mxu0 %v5978_v61 }
 0x180   : > { %4345 = vmatmul.mubr.bf16.vlgmr.msra.gmra.mrb[36].mxu1 %v5986_v4 }
 0x181   : > { %5513 = vmatpush3.bf16.msra.mxu1 %v5991_v8  ;;  %4426 = vmatprep.mubr.bf16.mxu1 %v6025_v57 }
 0x182   : > { %5461 = vmatpush3.bf16.msra.mxu0 %v5979_v62  ;;  %5514 = vmatprep.subr.bf16.mxu1 %v5994_v15  ;;  %v6031_v15 = vld [vmem:[%s6248_s7 + $0xb28] sm:$0xff]  }
 0x183   : > { %5490 = vmatprep.subr.bf16.mxu0 %v5985_v3 }
 0x185   : > { %4304 = vmatmul.mubr.bf16.vlgmr.msra.gmra.mrb[36].mxu0 %v5981_v0  ;;  %5515 = vmatpush3.bf16.msra.mxu1 %v5995_v17  ;;  %v6033_v17 = vld [vmem:[%s6248_s7 + $0xb38] sm:$0xff]  }
 0x186   : > { %5491 = vmatpush3.bf16.msra.mxu0 %v5989_v6  ;;  %5516 = vmatprep.subr.bf16.mxu1 %v5998_v26 }
 0x187   : > { %5492 = vmatprep.subr.bf16.mxu0 %v5992_v10  ;;  %4385 = vmatprep.mubr.bf16.mxu0 %v6021_v53  ;;  %v6029_v10 = vld [vmem:[%s6248_s7 + $0xb18] sm:$0xff]  }
 0x189   : > { %5517 = vmatpush3.bf16.msra.mxu1 %v5999_v29 }
 0x18a   : > { %5493 = vmatpush3.bf16.msra.mxu0 %v5993_v12  ;;  %5518 = vmatprep.subr.bf16.mxu1 %v6002_v35 }
 0x18b   : > { %5494 = vmatprep.subr.bf16.mxu0 %v5996_v20 }
 0x18d   : > { %5519 = vmatpush3.bf16.msra.mxu1 %v6003_v36 }
 0x18e   : > { %5495 = vmatpush3.bf16.msra.mxu0 %v5997_v23  ;;  %5520 = vmatprep.subr.bf16.mxu1 %v6006_v39 }
 0x18f   : > { %5496 = vmatprep.subr.bf16.mxu0 %v6000_v32 }
 0x191   : > { %v5198_v9 = vpop.f32.mrb[12].mxu0  ;;  %5521 = vmatpush3.bf16.msra.mxu1 %v6007_v40 }
 0x192   : > { %v5199_v11 = vpop.f32.mrb[13].mxu0  ;;  %v5220_v16 = vpop.f32.mrb[12].mxu1  ;;  %5497 = vmatpush3.bf16.msra.mxu0 %v6001_v33  ;;  %5522 = vmatprep.subr.bf16.mxu1 %v6010_v43 }
 0x193   : > { %v5200_v13 = vadd.f32 %v5199_v11, %v5198_v9  ;;  %v5201_v14 = vpop.f32.mrb[14].mxu0  ;;  %v5221_v22 = vpop.f32.mrb[13].mxu1  ;;  %5498 = vmatprep.subr.bf16.mxu0 %v6004_v37 }
 0x194   : > { %v5202_v19 = vpop.f32.mrb[15].mxu0  ;;  %v5222_v24 = vadd.f32 %v5221_v22, %v5220_v16  ;;  %v5223_v25 = vpop.f32.mrb[14].mxu1  ;;  %v6032_v16 = vld [vmem:[%s6248_s7 + $0xb30] sm:$0xff]  }
 0x195   : > { %v3814_v18 = vadd.f32 %v5200_v13, %v6607_v42  ;;  %v5203_v21 = vadd.f32 %v5202_v19, %v5201_v14  ;;  %v5224_v28 = vpop.f32.mrb[15].mxu1  ;;  %v6009_v42 = vld [vmem:[%s6248_s7 + $0xa28] sm:$0xff]   ;;  %5523 = vmatpush3.bf16.msra.mxu1 %v6011_v44  ;;  %v6030_v14 = vld [vmem:[%s6248_s7 + $0xb20] sm:$0xff]  }
 0x196   : > { %v5225_v31 = vadd.f32 %v5224_v28, %v5223_v25  ;;  %5499 = vmatpush3.bf16.msra.mxu0 %v6005_v38  ;;  %5524 = vmatprep.subr.bf16.mxu1 %v6014_v47 }
 0x197   : > { %v3817_v27 = vadd.f32 %v5203_v21, %v6611_v46  ;;  %v6649_v30 = vadd.f32 %v5222_v24, %v3814_v18  ;;  %5500 = vmatprep.subr.bf16.mxu0 %v6008_v41  ;;  %v6013_v46 = vld [vmem:[%s6248_s7 + $0xa30] sm:$0xff]  }
 0x198   : > { %v6034_v18 = vld [vmem:[%s6250_s8 + $0xb0] ss:$180 sps:$4 sm:$0xff]  }
 0x199   : > { %v6653_v34 = vadd.f32 %v5225_v31, %v3817_v27  ;;  %5525 = vmatpush3.bf16.msra.mxu1 %v6015_v48 }
 0x19a   : > { %5501 = vmatpush3.bf16.msra.mxu0 %v6009_v42  ;;  %5526 = vmatprep.subr.bf16.mxu1 %v6018_v51 }
 0x19b   : > { %5502 = vmatprep.subr.bf16.mxu0 %v6012_v45 }
 0x19d   : > { %5527 = vmatpush3.bf16.msra.mxu1 %v6022_v54 }
 0x19e   : > { %5503 = vmatpush3.bf16.msra.mxu0 %v6013_v46 }
 0x19f   : > { %5504 = vmatprep.subr.bf16.mxu0 %v6016_v49 }
 0x1a0   : > { %4427 = vmatmul.mubr.bf16.vlgmr.msra.gmra.mrb[40].mxu1 %v6023_v56 }
 0x1a2   : > { %5505 = vmatpush3.bf16.msra.mxu0 %v6017_v50 }
 0x1a3   : > { %5543 = vmatprep.subr.bf16.mxu0 %v6080_v55 }
 0x1a5   : > { %4386 = vmatmul.mubr.bf16.vlgmr.msra.gmra.mrb[40].mxu0 %v6019_v52 }
 0x1a6   : > { %5559 = vmatprep.mubr.msk.bf16.mxu0 %vm6081_vm0, %v6080_v55  ;;  %5544 = vmatpush3.bf16.msra.mxu0 %v6026_v58 }
 0x1a7   : > { %5545 = vmatprep.subr.bf16.mxu0 %v6080_v55 }
 0x1aa   : > { %5546 = vmatpush3.bf16.msra.mxu0 %v6027_v59 }
 0x1ab   : > { %5547 = vmatprep.subr.bf16.mxu0 %v6080_v55 }
 0x1ae   : > { %5548 = vmatpush3.bf16.msra.mxu0 %v6028_v1 }
 0x1af   : > { %5549 = vmatprep.subr.bf16.mxu0 %v6080_v55 }
 0x1b1   : > { %v5242_v60 = vpop.f32.mrb[16].mxu0 }
 0x1b2   : > { %v5243_v61 = vpop.f32.mrb[17].mxu0  ;;  %v5264_v3 = vpop.f32.mrb[16].mxu1  ;;  %5550 = vmatpush3.bf16.msra.mxu0 %v6029_v10 }
 0x1b3   : > { %v5244_v62 = vadd.f32 %v5243_v61, %v5242_v60  ;;  %v5245_v63 = vpop.f32.mrb[18].mxu0  ;;  %v5265_v5 = vpop.f32.mrb[17].mxu1  ;;  %5551 = vmatprep.subr.bf16.mxu0 %v6080_v55 }
 0x1b4   : > { %v5246_v0 = vpop.f32.mrb[19].mxu0  ;;  %v5266_v7 = vadd.f32 %v5265_v5, %v5264_v3  ;;  %v5267_v8 = vpop.f32.mrb[18].mxu1 }
 0x1b5   : > { %v3896_v2 = vadd.f32 %v5244_v62, %v6649_v30  ;;  %v5247_v4 = vadd.f32 %v5246_v0, %v5245_v63  ;;  %v5268_v9 = vpop.f32.mrb[19].mxu1 }
 0x1b6   : > { %v5269_v12 = vadd.f32 %v5268_v9, %v5267_v8  ;;  %5552 = vmatpush3.bf16.msra.mxu0 %v6030_v14 }
 0x1b7   : > { %v3899_v6 = vadd.f32 %v5247_v4, %v6653_v34  ;;  %v3937_v11 = vadd.f32 %v5266_v7, %v3896_v2  ;;  %5553 = vmatprep.subr.bf16.mxu0 %v6080_v55 }
 0x1b9   : > { %v3940_v13 = vadd.f32 %v5269_v12, %v3899_v6 }
 0x1ba   : > { %5554 = vmatpush3.bf16.msra.mxu0 %v6031_v15 }
 0x1bb   : > { %5555 = vmatprep.subr.bf16.mxu0 %v6080_v55 }
 0x1be   : > { %5556 = vmatpush3.bf16.msra.mxu0 %v6032_v16 }
 0x1bf   : > { %5557 = vmatprep.subr.bf16.mxu0 %v6080_v55 }
 0x1c2   : > { %5558 = vmatpush3.bf16.msra.mxu0 %v6033_v17 }
 0x1c5   : > { %5560 = vmatmul.mubr.bf16.vlgmr.msra.gmra.mrb[44].mxu0 %v6034_v18 }
 0x1d1   : > { %v5286_v19 = vpop.f32.mrb[20].mxu0 }
 0x1d2   : > { %v5287_v20 = vpop.f32.mrb[21].mxu0  ;;  %v5308_v23 = vpop.f32.mrb[20].mxu1 }
 0x1d3   : > { %v5288_v21 = vadd.f32 %v5287_v20, %v5286_v19  ;;  %v5289_v22 = vpop.f32.mrb[22].mxu0  ;;  %v5309_v27 = vpop.f32.mrb[21].mxu1 }
 0x1d4   : > { %v5290_v24 = vpop.f32.mrb[23].mxu0  ;;  %v5310_v28 = vadd.f32 %v5309_v27, %v5308_v23  ;;  %v5311_v29 = vpop.f32.mrb[22].mxu1 }
 0x1d5   : > { %v3978_v25 = vadd.f32 %v5288_v21, %v3937_v11  ;;  %v5291_v26 = vadd.f32 %v5290_v24, %v5289_v22  ;;  %v5312_v31 = vpop.f32.mrb[23].mxu1 }
 0x1d6   : > { %v5313_v33 = vadd.f32 %v5312_v31, %v5311_v29 }
 0x1d7   : > { %v3981_v30 = vadd.f32 %v5291_v26, %v3940_v13  ;;  %v4019_v32 = vadd.f32 %v5310_v28, %v3978_v25 }
 0x1d9   : > { %v4022_v34 = vadd.f32 %v5313_v33, %v3981_v30 }
 0x1f1   : > { %v5330_v35 = vpop.f32.mrb[24].mxu0 }
 0x1f2   : > { %v5331_v36 = vpop.f32.mrb[25].mxu0  ;;  %v5352_v39 = vpop.f32.mrb[24].mxu1 }
 0x1f3   : > { %v5332_v37 = vadd.f32 %v5331_v36, %v5330_v35  ;;  %v5333_v38 = vpop.f32.mrb[26].mxu0  ;;  %v5353_v43 = vpop.f32.mrb[25].mxu1 }
 0x1f4   : > { %v5334_v40 = vpop.f32.mrb[27].mxu0  ;;  %v5354_v44 = vadd.f32 %v5353_v43, %v5352_v39  ;;  %v5355_v45 = vpop.f32.mrb[26].mxu1 }
 0x1f5   : > { %v4060_v41 = vadd.f32 %v5332_v37, %v4019_v32  ;;  %v5335_v42 = vadd.f32 %v5334_v40, %v5333_v38  ;;  %v5356_v47 = vpop.f32.mrb[27].mxu1 }
 0x1f6   : > { %v5357_v49 = vadd.f32 %v5356_v47, %v5355_v45 }
 0x1f7   : > { %v4063_v46 = vadd.f32 %v5335_v42, %v4022_v34  ;;  %v4101_v48 = vadd.f32 %v5354_v44, %v4060_v41 }
 0x1f9   : > { %v4104_v50 = vadd.f32 %v5357_v49, %v4063_v46 }
 0x211   : > { %v5374_v51 = vpop.f32.mrb[28].mxu0 }
 0x212   : > { %v5375_v52 = vpop.f32.mrb[29].mxu0  ;;  %v5396_v57 = vpop.f32.mrb[28].mxu1 }
 0x213   : > { %v5376_v53 = vadd.f32 %v5375_v52, %v5374_v51  ;;  %v5377_v54 = vpop.f32.mrb[30].mxu0  ;;  %v5397_v59 = vpop.f32.mrb[29].mxu1  ;;  %v379_v51 = vld [vmem:[%s6734_s3] sm:$0xff] }
 0x214   : > { %v5378_v55 = vpop.f32.mrb[31].mxu0  ;;  %v5398_v61 = vadd.f32 %v5397_v59, %v5396_v57  ;;  %v5399_v62 = vpop.f32.mrb[30].mxu1 }
 0x215   : > { %v4142_v56 = vadd.f32 %v5376_v53, %v4101_v48  ;;  %v5379_v58 = vadd.f32 %v5378_v55, %v5377_v54  ;;  %v5400_v63 = vpop.f32.mrb[31].mxu1  ;;  %v380_v55 = vld [vmem:[%s6734_s3 + $0x8] sm:$0xff] }
 0x216   : > { %v5401_v1 = vadd.f32 %v5400_v63, %v5399_v62  ;;  %v5042_v62 = vld [vmem:[%s6733_s2] ss:$0 sm:$0xff] (!%p5041_p11) }
 0x217   : > { %v4145_v60 = vadd.f32 %v5379_v58, %v4104_v50  ;;  %v4183_v0 = vadd.f32 %v5398_v61, %v4142_v56 }
 0x219   : > { %v4186_v2 = vadd.f32 %v5401_v1, %v4145_v60 }
 0x233   : > { %v5440_v7 = vpop.f32.mrb[32].mxu1 }
 0x234   : > { %v5441_v11 = vpop.f32.mrb[33].mxu1 }
 0x235   : > { %v5442_v12 = vadd.f32 %v5441_v11, %v5440_v7  ;;  %v5443_v13 = vpop.f32.mrb[34].mxu1 }
 0x236   : > { %v5444_v15 = vpop.f32.mrb[35].mxu1 }
 0x237   : > { %v5445_v17 = vadd.f32 %v5444_v15, %v5443_v13 }
 0x238   : > { %v5418_v3 = vpop.f32.mrb[32].mxu0 }
 0x239   : > { %v5419_v4 = vpop.f32.mrb[33].mxu0 }
 0x23a   : > { %v5420_v5 = vadd.f32 %v5419_v4, %v5418_v3  ;;  %v5421_v6 = vpop.f32.mrb[34].mxu0 }
 0x23b   : > { %v5422_v8 = vpop.f32.mrb[35].mxu0 }
 0x23c   : > { %v4224_v9 = vadd.f32 %v5420_v5, %v4183_v0  ;;  %v5423_v10 = vadd.f32 %v5422_v8, %v5421_v6 }
 0x23e   : > { %v4227_v14 = vadd.f32 %v5423_v10, %v4186_v2  ;;  %v4265_v16 = vadd.f32 %v5442_v12, %v4224_v9 }
 0x240   : > { %v4268_v18 = vadd.f32 %v5445_v17, %v4227_v14 }
 0x253   : > { %v5484_v23 = vpop.f32.mrb[36].mxu1 }
 0x254   : > { %v5485_v27 = vpop.f32.mrb[37].mxu1 }
 0x255   : > { %v5486_v28 = vadd.f32 %v5485_v27, %v5484_v23  ;;  %v5487_v29 = vpop.f32.mrb[38].mxu1 }
 0x256   : > { %v5488_v31 = vpop.f32.mrb[39].mxu1 }
 0x257   : > { %v5489_v33 = vadd.f32 %v5488_v31, %v5487_v29 }
 0x258   : > { %v5462_v19 = vpop.f32.mrb[36].mxu0 }
 0x259   : > { %v5463_v20 = vpop.f32.mrb[37].mxu0 }
 0x25a   : > { %v5464_v21 = vadd.f32 %v5463_v20, %v5462_v19  ;;  %v5465_v22 = vpop.f32.mrb[38].mxu0 }
 0x25b   : > { %v5466_v24 = vpop.f32.mrb[39].mxu0 }
 0x25c   : > { %v4306_v25 = vadd.f32 %v5464_v21, %v4265_v16  ;;  %v5467_v26 = vadd.f32 %v5466_v24, %v5465_v22 }
 0x25e   : > { %v4309_v30 = vadd.f32 %v5467_v26, %v4268_v18  ;;  %v4347_v32 = vadd.f32 %v5486_v28, %v4306_v25 }
 0x260   : > { %v4350_v34 = vadd.f32 %v5489_v33, %v4309_v30 }
 0x273   : > { %v5528_v39 = vpop.f32.mrb[40].mxu1 }
 0x274   : > { %v5529_v43 = vpop.f32.mrb[41].mxu1 }
 0x275   : > { %v5530_v44 = vadd.f32 %v5529_v43, %v5528_v39  ;;  %v5531_v45 = vpop.f32.mrb[42].mxu1 }
 0x276   : > { %v5532_v47 = vpop.f32.mrb[43].mxu1 }
 0x277   : > { %v5533_v48 = vadd.f32 %v5532_v47, %v5531_v45 }
 0x278   : > { %v5506_v35 = vpop.f32.mrb[40].mxu0 }
 0x279   : > { %v5507_v36 = vpop.f32.mrb[41].mxu0 }
 0x27a   : > { %v5508_v37 = vadd.f32 %v5507_v36, %v5506_v35  ;;  %v5509_v38 = vpop.f32.mrb[42].mxu0 }
 0x27b   : > { %v5510_v40 = vpop.f32.mrb[43].mxu0 }
 0x27c   : > { %v4388_v41 = vadd.f32 %v5508_v37, %v4347_v32  ;;  %v5511_v42 = vadd.f32 %v5510_v40, %v5509_v38 }
 0x27e   : > { %v4391_v46 = vadd.f32 %v5511_v42, %v4350_v34  ;;  %v4429_v49 = vadd.f32 %v5530_v44, %v4388_v41 }
 0x280   : > { %v4432_v50 = vadd.f32 %v5533_v48, %v4391_v46 }
 0x298   : > { %v4469_v52 = vpop.f32.mrb[44].mxu0 }
 0x299   : > { %v4470_v53 = vadd.f32 %v4469_v52, %v4429_v49  ;;  %v5561_v54 = vpop.f32.mrb[45].mxu0  ;;  %4483 = sbr.rel (%p5041_p11) target bundleno = 700 (0x2bc), region = 66 }
 0x29a   : > { %v4472_v56 = vpop.f32.mrb[46].mxu0 }
 0x29b   : > { %v4476_v57 = vadd.f32 %v4470_v53, %v379_v51  ;;  %v4473_v58 = vadd.f32 %v4472_v56, %v4432_v50  ;;  %v5562_v59 = vpop.f32.mrb[47].mxu0 }
 0x29d   : > { %4478 = vst [vmem:[%s6734_s3] sm:$0xff] %v4476_v57  ;;  %v4477_v60 = vadd.f32 %v4473_v58, %v380_v55 }
 0x29f   : > { %4479 = vst [vmem:[%s6734_s3 + $0x8] sm:$0xff] %v4477_v60 }
 0x2a4   : > { %v4484_v61 = vld [vmem:[%s6734_s3] sm:$0xff] }
 0x2a5   : > { %v4493_v0 = vadd.f32 %v5042_v62, %v4484_v61 }
 0x2a6   : > { %v4485_v63 = vld [vmem:[%s6734_s3 + $0x8] sm:$0xff] }
 0x2a7   : > { %v4494_v1 = vadd.f32 %v5042_v62, %v4485_v63  ;;  %v4497_v2 = vmin.f32 %v4493_v0, 0.0  ;;  %vm4495_vm1 = vcmp.gt.f32.partialorder %v4493_v0, 0.0 }
 0x2a9   : > { %v4498_v3 = vmin.f32 %v4494_v1, 0.0  ;;  %v4499_v4 = vmul.f32 1.442695, %v4497_v2  ;;  %vm4496_vm2 = vcmp.gt.f32.partialorder %v4494_v1, 0.0 }
 0x2ab   : > { %v4501_v5 = vmul.f32 1.442695, %v4498_v3  ;;  %6035 = vpow2.f32 %v4499_v4 }
 0x2ad   : > { %6037 = vpow2.f32 %v4501_v5 }
 0x2b5   : > { %v6036_v6 = vpop.eup %6035 }
 0x2b6   : > { %v5043_v8 = vadd.f32 -1.0, %v6036_v6 }
 0x2b7   : > { %v6038_v7 = vpop.eup %6037 }
 0x2b8   : > { %v5044_v9 = vadd.f32 -1.0, %v6038_v7  ;;  %v4505_v10 = vsel %vm4495_vm1, %v4493_v0, %v5043_v8 }
 0x2b9   : > { %4507 = vst [vmem:[%s6734_s3] sm:$0xff] %v4505_v10 }
 0x2ba   : > { %v4506_v11 = vsel %vm4496_vm2, %v4494_v1, %v5044_v9 }
 0x2bb   : > { %4508 = vst [vmem:[%s6734_s3 + $0x8] sm:$0xff] %v4506_v11 }
 0x2bc PF: > { %s13_s16 = sadd.s32 1, %s6077_s16   ;;  %s6735_s12 = smov %s6065_s13 }
 0x2bd   : > { %p10_p12 = scmp.ge.s32.totalorder %s13_s16, 7   ;;  %s6736_s13 = smov %s6137_s20 }
 0x2be   : > { %s6737_s14 = smov %s6073_s15  ;;  %s6738_s15 = smov %s6740_s17 }
 0x2bf   :  { %12 = sbr.rel (!%p10_p12) target bundleno = 3 (0x3), region = 113 }

// kernel: image_autoencoder_forward.11
= control target key start
LH: loop header
LB: loop body
LE: loop exit
PB: predicated region body
PF: predicated region fallthrough
CT: control target
= control target key end

     0   :  { %v418_v1 = vmov 0   ;;  %v51_v34 = vlaneseq  ;;  %s565_s1 = inlined_call_operand.vmem [shape: bf16[128,512], index: 1, kind: input, shape index: {}]   ;;  %s566_s0 = inlined_call_operand.vmem [shape: bf16[16,128], index: 0, kind: input, shape index: {}]   ;;  %s567_s2 = inlined_call_operand.vmem [shape: f32[1,512], index: 2, kind: input, shape index: {}]   ;;  %s568_s3 = inlined_call_operand.vmem [shape: f32[16,512], index: 3, kind: output, shape index: {}]  }
   0x1   :  { %v369_v0 = vld [vmem:[%s565_s1 + $0x4] ss:$16 sps:$4 sm:$0xff]   ;;  %269 = vmatprep.mubr.bf16.mxu0 %v418_v1  ;;  %312 = vmatprep.mubr.bf16.mxu1 %v418_v1  ;;  %v371_v2 = vld [vmem:[%s565_s1 + $0xc] ss:$16 sps:$4 sm:$0xff]   ;;  %v373_v3 = vld [vmem:[%s565_s1] ss:$16 sps:$4 sm:$0xff]  }
   0x2   :  { %237 = vmatprep.subr.bf16.mxu0 %v369_v0  ;;  %v374_v4 = vld [vmem:[%s565_s1 + $0x8] ss:$16 sps:$4 sm:$0xff]   ;;  %280 = vmatprep.subr.bf16.mxu1 %v371_v2  ;;  %v375_v5 = vld [vmem:[%s565_s1 + $0x24] ss:$16 sps:$4 sm:$0xff]   ;;  %v377_v6 = vld [vmem:[%s565_s1 + $0x2c] ss:$16 sps:$4 sm:$0xff]  }
   0x3   :  { %238 = vmatpush1.bf16.msra.mxu0 %v373_v3  ;;  %281 = vmatpush1.bf16.msra.mxu1 %v374_v4  ;;  %v379_v7 = vld [vmem:[%s565_s1 + $0x20] ss:$16 sps:$4 sm:$0xff]   ;;  %v380_v8 = vld [vmem:[%s565_s1 + $0x28] ss:$16 sps:$4 sm:$0xff]   ;;  %v381_v9 = vld [vmem:[%s565_s1 + $0x44] ss:$16 sps:$4 sm:$0xff]  }
   0x4   :  { %239 = vmatprep.subr.bf16.mxu0 %v375_v5  ;;  %282 = vmatprep.subr.bf16.mxu1 %v377_v6  ;;  %v383_v10 = vld [vmem:[%s565_s1 + $0x4c] ss:$16 sps:$4 sm:$0xff]   ;;  %v385_v11 = vld [vmem:[%s565_s1 + $0x40] ss:$16 sps:$4 sm:$0xff]   ;;  %v386_v12 = vld [vmem:[%s565_s1 + $0x48] ss:$16 sps:$4 sm:$0xff]  }
   0x5   :  { %v387_v13 = vld [vmem:[%s565_s1 + $0x64] ss:$16 sps:$4 sm:$0xff]   ;;  %v389_v14 = vld [vmem:[%s565_s1 + $0x6c] ss:$16 sps:$4 sm:$0xff]   ;;  %v391_v15 = vld [vmem:[%s565_s1 + $0x60] ss:$16 sps:$4 sm:$0xff]  }
   0x6   :  { %v392_v16 = vld [vmem:[%s565_s1 + $0x68] ss:$16 sps:$4 sm:$0xff]   ;;  %v393_v17 = vld [vmem:[%s565_s1 + $0x84] ss:$16 sps:$4 sm:$0xff]   ;;  %v395_v18 = vld [vmem:[%s565_s1 + $0x8c] ss:$16 sps:$4 sm:$0xff]  }
   0x7   :  { %240 = vmatpush1.bf16.msra.mxu0 %v379_v7  ;;  %283 = vmatpush1.bf16.msra.mxu1 %v380_v8  ;;  %v397_v19 = vld [vmem:[%s565_s1 + $0x80] ss:$16 sps:$4 sm:$0xff]   ;;  %v398_v20 = vld [vmem:[%s565_s1 + $0x88] ss:$16 sps:$4 sm:$0xff]   ;;  %v399_v21 = vld [vmem:[%s565_s1 + $0xa4] ss:$16 sps:$4 sm:$0xff]  }
   0x8   :  { %241 = vmatprep.subr.bf16.mxu0 %v381_v9  ;;  %284 = vmatprep.subr.bf16.mxu1 %v383_v10  ;;  %v401_v22 = vld [vmem:[%s565_s1 + $0xac] ss:$16 sps:$4 sm:$0xff]   ;;  %v403_v23 = vld [vmem:[%s565_s1 + $0xa0] ss:$16 sps:$4 sm:$0xff]   ;;  %v404_v24 = vld [vmem:[%s565_s1 + $0xa8] ss:$16 sps:$4 sm:$0xff]  }
   0x9   :  { %v405_v25 = vld [vmem:[%s565_s1 + $0xc4] ss:$16 sps:$4 sm:$0xff]   ;;  %v407_v26 = vld [vmem:[%s565_s1 + $0xcc] ss:$16 sps:$4 sm:$0xff]   ;;  %v409_v27 = vld [vmem:[%s565_s1 + $0xc0] ss:$16 sps:$4 sm:$0xff]  }
   0xa   :  { %v410_v28 = vld [vmem:[%s565_s1 + $0xc8] ss:$16 sps:$4 sm:$0xff]   ;;  %v411_v29 = vld [vmem:[%s565_s1 + $0xe4] ss:$16 sps:$4 sm:$0xff]   ;;  %v413_v30 = vld [vmem:[%s565_s1 + $0xec] ss:$16 sps:$4 sm:$0xff]  }
   0xb   :  { %242 = vmatpush1.bf16.msra.mxu0 %v385_v11  ;;  %285 = vmatpush1.bf16.msra.mxu1 %v386_v12  ;;  %v415_v31 = vld [vmem:[%s565_s1 + $0xe0] ss:$16 sps:$4 sm:$0xff]   ;;  %v416_v32 = vld [vmem:[%s565_s1 + $0xe8] ss:$16 sps:$4 sm:$0xff]   ;;  %v52_v35 = vshrl.u32 %v51_v34, 7 }
   0xc   :  { %243 = vmatprep.subr.bf16.mxu0 %v387_v13  ;;  %286 = vmatprep.subr.bf16.mxu1 %v389_v14  ;;  %v417_v33 = vld [vmem:[%s566_s0] sm:$0xff]  }
   0xd   :  { %v53_v36 = vsub.s32 0, %v52_v35  ;;  %v61_v37 = vsub.s32 2, %v52_v35  ;;  %v49_v38 = vld [vmem:[%s567_s2] sm:$0xf]  ;;  %v57_v39 = vsub.s32 1, %v52_v35  ;;  %v65_v40 = vsub.s32 3, %v52_v35 }
   0xf   :  { %244 = vmatpush1.bf16.msra.mxu0 %v391_v15  ;;  %287 = vmatpush1.bf16.msra.mxu1 %v392_v16  ;;  %v54_v41 = vrot.slane %v49_v38, %v53_v36  ;;  %v62_v42 = vrot.slane %v49_v38, %v61_v37  ;;  %v58_v43 = vrot.slane %v49_v38, %v57_v39 }
  0x10   :  { %245 = vmatprep.subr.bf16.mxu0 %v393_v17  ;;  %288 = vmatprep.subr.bf16.mxu1 %v395_v18  ;;  %v66_v44 = vrot.slane %v49_v38, %v65_v40 }
  0x13   :  { %246 = vmatpush1.bf16.msra.mxu0 %v397_v19  ;;  %289 = vmatpush1.bf16.msra.mxu1 %v398_v20 }
  0x14   :  { %247 = vmatprep.subr.bf16.mxu0 %v399_v21  ;;  %290 = vmatprep.subr.bf16.mxu1 %v401_v22 }
  0x17   :  { %248 = vmatpush1.bf16.msra.mxu0 %v403_v23  ;;  %291 = vmatpush1.bf16.msra.mxu1 %v404_v24 }
  0x18   :  { %249 = vmatprep.subr.bf16.mxu0 %v405_v25  ;;  %292 = vmatprep.subr.bf16.mxu1 %v407_v26 }
  0x1b   :  { %250 = vmatpush1.bf16.msra.mxu0 %v409_v27  ;;  %293 = vmatpush1.bf16.msra.mxu1 %v410_v28 }
  0x1c   :  { %251 = vmatprep.subr.bf16.mxu0 %v411_v29  ;;  %294 = vmatprep.subr.bf16.mxu1 %v413_v30 }
  0x1f   :  { %252 = vmatpush1.bf16.msra.mxu0 %v415_v31  ;;  %295 = vmatpush1.bf16.msra.mxu1 %v416_v32 }
  0x22   :  { %270 = vmatmul.mubr.bf16.vlgmr.msra.gmra.mrb[0].mxu0 %v417_v33  ;;  %313 = vmatmul.mubr.bf16.vlgmr.msra.gmra.mrb[0].mxu1 %v417_v33 }
  0xf5   :  { %v271_v45 = vpop.f32.mrb[0].mxu0  ;;  %v314_v46 = vpop.f32.mrb[0].mxu1 }
  0xf6   :  { %v272_v47 = vadd.f32 %v271_v45, %v54_v41  ;;  %v315_v48 = vadd.f32 %v314_v46, %v62_v42  ;;  %v273_v49 = vpop.f32.mrb[1].mxu0  ;;  %v316_v50 = vpop.f32.mrb[1].mxu1 }
  0xf7   :  { %v274_v51 = vadd.f32 %v273_v49, %v58_v43  ;;  %v317_v52 = vadd.f32 %v316_v50, %v66_v44  ;;  %v275_v53 = vpop.f32.mrb[2].mxu0  ;;  %v318_v54 = vpop.f32.mrb[2].mxu1 }
  0xf8   :  { %323 = vst [vmem:[%s568_s3] sm:$0xff] %v272_v47  ;;  %325 = vst [vmem:[%s568_s3 + $0x10] sm:$0xff] %v315_v48  ;;  %v276_v55 = vadd.f32 %v275_v53, %v54_v41  ;;  %v319_v56 = vadd.f32 %v318_v54, %v62_v42  ;;  %v277_v57 = vpop.f32.mrb[3].mxu0  ;;  %v320_v58 = vpop.f32.mrb[3].mxu1 }
  0xf9   :  { %324 = vst [vmem:[%s568_s3 + $0x8] sm:$0xff] %v274_v51  ;;  %326 = vst [vmem:[%s568_s3 + $0x18] sm:$0xff] %v317_v52  ;;  %v278_v59 = vadd.f32 %v277_v57, %v58_v43  ;;  %v321_v60 = vadd.f32 %v320_v58, %v66_v44 }
  0xfa   :  { %327 = vst [vmem:[%s568_s3 + $0x20] sm:$0xff] %v276_v55  ;;  %329 = vst [vmem:[%s568_s3 + $0x30] sm:$0xff] %v319_v56 }
  0xfb   :  { %328 = vst [vmem:[%s568_s3 + $0x28] sm:$0xff] %v278_v59  ;;  %330 = vst [vmem:[%s568_s3 + $0x38] sm:$0xff] %v321_v60 }

// kernel: image_autoencoder_forward.12
= control target key start
LH: loop header
LB: loop body
LE: loop exit
PB: predicated region body
PF: predicated region fallthrough
CT: control target
= control target key end

     0   :  { %s664_s1 = inlined_call_operand.vmem [shape: bf16[512,128], index: 1, kind: input, shape index: {}]   ;;  %s665_s0 = inlined_call_operand.vmem [shape: bf16[16,512], index: 0, kind: input, shape index: {}]   ;;  %s666_s2 = inlined_call_operand.vmem [shape: f32[1,128], index: 2, kind: input, shape index: {}]   ;;  %s667_s3 = inlined_call_operand.vmem [shape: f32[16,128], index: 3, kind: output, shape index: {}]  }
   0x1   :  { %v485_v0 = vld [vmem:[%s664_s1 + $0x40] sm:$0xff]   ;;  %v489_v4 = vld [vmem:[%s664_s1 + $0x48] sm:$0xff]   ;;  %v493_v8 = vld [vmem:[%s664_s1 + $0x50] sm:$0xff]  }
   0x2   :  { %v486_v1 = vld [vmem:[%s664_s1 + $0xc0] sm:$0xff]   ;;  %441 = vmatprep.subr.bf16.mxu0 %v485_v0  ;;  %v490_v5 = vld [vmem:[%s664_s1 + $0xc8] sm:$0xff]   ;;  %v494_v9 = vld [vmem:[%s664_s1 + $0xd0] sm:$0xff]  }
   0x3   :  { %v487_v2 = vld [vmem:[%s664_s1] sm:$0xff]   ;;  %463 = vmatprep.subr.bf16.mxu1 %v486_v1  ;;  %v491_v6 = vld [vmem:[%s664_s1 + $0x8] sm:$0xff]   ;;  %v495_v10 = vld [vmem:[%s664_s1 + $0x10] sm:$0xff]  }
   0x4   :  { %v488_v3 = vld [vmem:[%s664_s1 + $0x80] sm:$0xff]   ;;  %442 = vmatpush3.bf16.msra.mxu0 %v487_v2  ;;  %v492_v7 = vld [vmem:[%s664_s1 + $0x88] sm:$0xff]   ;;  %v496_v11 = vld [vmem:[%s664_s1 + $0x90] sm:$0xff]  }
   0x5   :  { %464 = vmatpush3.bf16.msra.mxu1 %v488_v3  ;;  %443 = vmatprep.subr.bf16.mxu0 %v489_v4  ;;  %v497_v12 = vld [vmem:[%s664_s1 + $0x58] sm:$0xff]   ;;  %v501_v16 = vld [vmem:[%s664_s1 + $0x60] sm:$0xff]   ;;  %v505_v20 = vld [vmem:[%s664_s1 + $0x68] sm:$0xff]  }
   0x6   :  { %465 = vmatprep.subr.bf16.mxu1 %v490_v5  ;;  %v498_v13 = vld [vmem:[%s664_s1 + $0xd8] sm:$0xff]   ;;  %v502_v17 = vld [vmem:[%s664_s1 + $0xe0] sm:$0xff]   ;;  %v506_v21 = vld [vmem:[%s664_s1 + $0xe8] sm:$0xff]  }
   0x7   :  { %v499_v14 = vld [vmem:[%s664_s1 + $0x18] sm:$0xff]   ;;  %v503_v18 = vld [vmem:[%s664_s1 + $0x20] sm:$0xff]   ;;  %v507_v22 = vld [vmem:[%s664_s1 + $0x28] sm:$0xff]  }
   0x8   :  { %444 = vmatpush3.bf16.msra.mxu0 %v491_v6  ;;  %v500_v15 = vld [vmem:[%s664_s1 + $0x98] sm:$0xff]   ;;  %v504_v19 = vld [vmem:[%s664_s1 + $0xa0] sm:$0xff]   ;;  %v508_v23 = vld [vmem:[%s664_s1 + $0xa8] sm:$0xff]  }
   0x9   :  { %466 = vmatpush3.bf16.msra.mxu1 %v492_v7  ;;  %445 = vmatprep.subr.bf16.mxu0 %v493_v8  ;;  %v509_v24 = vld [vmem:[%s664_s1 + $0x70] sm:$0xff]   ;;  %v513_v28 = vld [vmem:[%s664_s1 + $0x78] sm:$0xff]   ;;  %v402_v38 = vld [vmem:[%s666_s2] ss:$0 sm:$0xff] }
   0xa   :  { %467 = vmatprep.subr.bf16.mxu1 %v494_v9  ;;  %v510_v25 = vld [vmem:[%s664_s1 + $0xf0] sm:$0xff]   ;;  %v514_v29 = vld [vmem:[%s664_s1 + $0xf8] sm:$0xff]  }
   0xb   :  { %v511_v26 = vld [vmem:[%s664_s1 + $0x30] sm:$0xff]   ;;  %v515_v30 = vld [vmem:[%s664_s1 + $0x38] sm:$0xff]  }
   0xc   :  { %446 = vmatpush3.bf16.msra.mxu0 %v495_v10  ;;  %v512_v27 = vld [vmem:[%s664_s1 + $0xb0] sm:$0xff]   ;;  %v516_v31 = vld [vmem:[%s664_s1 + $0xb8] sm:$0xff]  }
   0xd   :  { %468 = vmatpush3.bf16.msra.mxu1 %v496_v11  ;;  %447 = vmatprep.subr.bf16.mxu0 %v497_v12  ;;  %v517_v32 = vld [vmem:[%s665_s0] ss:$16 sps:$4 sm:$0xff]   ;;  %v519_v33 = vld [vmem:[%s665_s0 + $0x4] ss:$16 sps:$4 sm:$0xff]   ;;  %v520_v34 = vld [vmem:[%s665_s0 + $0x8] ss:$16 sps:$4 sm:$0xff]  }
   0xe   :  { %469 = vmatprep.subr.bf16.mxu1 %v498_v13  ;;  %v522_v35 = vld [vmem:[%s665_s0 + $0xc] ss:$16 sps:$4 sm:$0xff]   ;;  %334 = vmatprep.mubr.bf16.mxu0 %v519_v33 }
   0xf   :  { %375 = vmatprep.mubr.bf16.mxu1 %v522_v35 }
  0x10   :  { %448 = vmatpush3.bf16.msra.mxu0 %v499_v14 }
  0x11   :  { %470 = vmatpush3.bf16.msra.mxu1 %v500_v15  ;;  %449 = vmatprep.subr.bf16.mxu0 %v501_v16 }
  0x12   :  { %471 = vmatprep.subr.bf16.mxu1 %v502_v17 }
  0x14   :  { %450 = vmatpush3.bf16.msra.mxu0 %v503_v18 }
  0x15   :  { %472 = vmatpush3.bf16.msra.mxu1 %v504_v19  ;;  %451 = vmatprep.subr.bf16.mxu0 %v505_v20 }
  0x16   :  { %473 = vmatprep.subr.bf16.mxu1 %v506_v21 }
  0x18   :  { %452 = vmatpush3.bf16.msra.mxu0 %v507_v22 }
  0x19   :  { %474 = vmatpush3.bf16.msra.mxu1 %v508_v23  ;;  %453 = vmatprep.subr.bf16.mxu0 %v509_v24 }
  0x1a   :  { %475 = vmatprep.subr.bf16.mxu1 %v510_v25 }
  0x1c   :  { %454 = vmatpush3.bf16.msra.mxu0 %v511_v26 }
  0x1d   :  { %476 = vmatpush3.bf16.msra.mxu1 %v512_v27  ;;  %455 = vmatprep.subr.bf16.mxu0 %v513_v28 }
  0x1e   :  { %477 = vmatprep.subr.bf16.mxu1 %v514_v29 }
  0x20   :  { %456 = vmatpush3.bf16.msra.mxu0 %v515_v30 }
  0x21   :  { %478 = vmatpush3.bf16.msra.mxu1 %v516_v31 }
  0x23   :  { %335 = vmatmul.mubr.bf16.vlgmr.msra.gmra.mrb[0].mxu0 %v517_v32 }
  0x24   :  { %376 = vmatmul.mubr.bf16.vlgmr.msra.gmra.mrb[0].mxu1 %v520_v34 }
  0xf6   :  { %v457_v36 = vpop.f32.mrb[0].mxu0 }
  0xf7   :  { %v479_v37 = vpop.f32.mrb[0].mxu1  ;;  %v458_v39 = vpop.f32.mrb[1].mxu0 }
  0xf8   :  { %v459_v40 = vadd.f32 %v458_v39, %v457_v36  ;;  %v480_v41 = vpop.f32.mrb[1].mxu1  ;;  %v460_v42 = vpop.f32.mrb[2].mxu0 }
  0xf9   :  { %v481_v43 = vadd.f32 %v480_v41, %v479_v37  ;;  %v482_v44 = vpop.f32.mrb[2].mxu1  ;;  %v461_v45 = vpop.f32.mrb[3].mxu0 }
  0xfa   :  { %v337_v46 = vadd.f32 %v459_v40, %v402_v38  ;;  %v462_v47 = vadd.f32 %v461_v45, %v460_v42  ;;  %v483_v48 = vpop.f32.mrb[3].mxu1 }
  0xfb   :  { %v484_v49 = vadd.f32 %v483_v48, %v482_v44 }
  0xfc   :  { %v378_v50 = vadd.f32 %v481_v43, %v337_v46  ;;  %v340_v51 = vadd.f32 %v462_v47, %v402_v38 }
  0xfe   :  { %v386_v52 = vmin.f32 %v378_v50, 0.0  ;;  %v381_v53 = vadd.f32 %v484_v49, %v340_v51  ;;  %vm384_vm0 = vcmp.gt.f32.partialorder %v378_v50, 0.0 }
 0x100   :  { %v388_v54 = vmul.f32 1.442695, %v386_v52  ;;  %v387_v55 = vmin.f32 %v381_v53, 0.0  ;;  %vm385_vm1 = vcmp.gt.f32.partialorder %v381_v53, 0.0 }
 0x102   :  { %523 = vpow2.f32 %v388_v54  ;;  %v390_v56 = vmul.f32 1.442695, %v387_v55 }
 0x104   :  { %525 = vpow2.f32 %v390_v56 }
 0x10c   :  { %v524_v57 = vpop.eup %523 }
 0x10d   :  { %v439_v58 = vadd.f32 -1.0, %v524_v57 }
 0x10e   :  { %v526_v59 = vpop.eup %525 }
 0x10f   :  { %v394_v60 = vsel %vm384_vm0, %v378_v50, %v439_v58  ;;  %v440_v61 = vadd.f32 -1.0, %v526_v59 }
 0x110   :  { %396 = vst [vmem:[%s667_s3] sm:$0xff] %v394_v60 }
 0x111   :  { %v395_v62 = vsel %vm385_vm1, %v381_v53, %v440_v61 }
 0x112   :  { %397 = vst [vmem:[%s667_s3 + $0x8] sm:$0xff] %v395_v62 }

// kernel: image_autoencoder_forward.13
= control target key start
LH: loop header
LB: loop body
LE: loop exit
PB: predicated region body
PF: predicated region fallthrough
CT: control target
= control target key end

     0   :  { %s6963_s12 = smov 0   ;;  %s6965_s13 = smov 0   ;;  %s8665_s0 = inlined_call_operand.vmem [shape: bf16[16,128], index: 0, kind: input, shape index: {}]   ;;  %s8666_s1 = inlined_call_operand.vmem [shape: bf16[128,28800], index: 1, kind: input, shape index: {}]   ;;  %s8667_s2 = inlined_call_operand.vmem [shape: f32[1,28800], index: 2, kind: input, shape index: {}]   ;;  %s8668_s3 = inlined_call_operand.vmem [shape: bf16[16,28800], index: 3, kind: output, shape index: {}]  }
   0x1   :  { %s6967_s14 = smov 0   ;;  %s6969_s15 = smov 0  }
   0x2   :  { %s6971_s16 = smov 0  }
   0x3 LB: > { %s28_s17 = sadd.s32 1, %s6934_s15  ;;  %s5515_s18 = sadd.s32 4294967295, %s6938_s16   ;;  %s6938_s16 = sphi %s6971_s16, %s13_s16   ;;  %s6934_s15 = sphi %s6969_s15, %s8673_s15   ;;  %s6930_s14 = sphi %s6967_s14, %s8672_s14   ;;  %s6926_s13 = sphi %s6965_s13, %s8671_s13   ;;  %s6922_s12 = sphi %s6963_s12, %s8670_s12  }
   0x4   : > { %p30_p0 = scmp.ge.s32.totalorder %s28_s17, 5  ;;  %p76_p1 = scmp.ne.s32.totalorder %s6926_s13, %s6922_s12 }
   0x5   : > { %p77_p2 = scmp.eq.s32.totalorder %s6938_s16, 0  ;;  %p134_p4 = scmp.eq.s32.totalorder %s5515_s18, 4 }
   0x6   : > { %s8675_s17 = smov (%p30_p0, %s28_s17), 0  ;;  %s69_s20 = sadd.s32 1, %s6926_s13 }
   0x7   : > { %p78_p3 = por %p77_p2, %p76_p1  ;;  %s65_s19 = ssub.s32 %s6934_s15, %s8675_s17 }
   0x8   : > { %p67_p5 = scmp.eq.s32.totalorder %s65_s19, 0  ;;  %p6998_p6 = por %p134_p4, %p76_p1 }
   0x9   : > { %p5519_p7 = scmp.ge.s32.totalorder %s6938_s16, 5 }
   0xa   : > { %s7003_s22 = scalar_select %p67_p5, %s6926_s13, %s69_s20  }
   0xb   : > { %168 = sbr.rel (%p5519_p7) target bundleno = 209 (0xd1), region = 20 }
  0x12   : > { %171 = sbr.rel (!%p78_p3) target bundleno = 209 (0xd1), region = 24  ;;  %s173_s23 = sand.u32 (%p78_p3), 1, %s6926_s13  }
  0x13   : > { %s6058_s24 = smul.u32 (%p78_p3), 180, %s6934_s15 }
  0x14   : > { %s6135_s25 = smul.u32 (%p78_p3), 2880, %s173_s23 }
  0x15   : > { %s7011_s28 = scalar_lea.vmem (%p78_p3), %s8666_s1, %s6058_s24 }
  0x16   : > { %v196_v0 = vld [vmem:[%s7011_s28] sm:$0xff] (%p78_p3)  ;;  %v198_v1 = vld [vmem:[%s7011_s28 + $0x8] sm:$0xff] (%p78_p3)  ;;  %v200_v2 = vld [vmem:[%s7011_s28 + $0x10] sm:$0xff] (%p78_p3)  ;;  %s7016_s29 = scalar_lea.vmem (%p78_p3), [#allocation2], %s6135_s25 }
  0x17   : > { %197 = vst [vmem:[%s7016_s29] sm:$0xff] (%p78_p3), %v196_v0  ;;  %199 = vst [vmem:[%s7016_s29 + $0x8] sm:$0xff] (%p78_p3), %v198_v1  ;;  %v202_v3 = vld [vmem:[%s7011_s28 + $0x18] sm:$0xff] (%p78_p3)  ;;  %v204_v4 = vld [vmem:[%s7011_s28 + $0x20] sm:$0xff] (%p78_p3) }
  0x18   : > { %201 = vst [vmem:[%s7016_s29 + $0x10] sm:$0xff] (%p78_p3), %v200_v2  ;;  %v206_v5 = vld [vmem:[%s7011_s28 + $0x28] sm:$0xff] (%p78_p3)  ;;  %203 = vst [vmem:[%s7016_s29 + $0x18] sm:$0xff] (%p78_p3), %v202_v3  ;;  %v208_v6 = vld [vmem:[%s7011_s28 + $0x30] sm:$0xff] (%p78_p3) }
  0x19   : > { %205 = vst [vmem:[%s7016_s29 + $0x20] sm:$0xff] %v204_v4  ;;  %207 = vst [vmem:[%s7016_s29 + $0x28] sm:$0xff] %v206_v5  ;;  %v210_v7 = vld [vmem:[%s7011_s28 + $0x38] sm:$0xff]  ;;  %v212_v8 = vld [vmem:[%s7011_s28 + $0x40] sm:$0xff] }
  0x1a   : > { %209 = vst [vmem:[%s7016_s29 + $0x30] sm:$0xff] %v208_v6  ;;  %211 = vst [vmem:[%s7016_s29 + $0x38] sm:$0xff] %v210_v7  ;;  %v214_v9 = vld [vmem:[%s7011_s28 + $0x48] sm:$0xff]  ;;  %v216_v10 = vld [vmem:[%s7011_s28 + $0x50] sm:$0xff] }
  0x1b   : > { %213 = vst [vmem:[%s7016_s29 + $0x40] sm:$0xff] %v212_v8  ;;  %v218_v11 = vld [vmem:[%s7011_s28 + $0x58] sm:$0xff]  ;;  %215 = vst [vmem:[%s7016_s29 + $0x48] sm:$0xff] %v214_v9  ;;  %v220_v12 = vld [vmem:[%s7011_s28 + $0x60] sm:$0xff] }
  0x1c   : > { %217 = vst [vmem:[%s7016_s29 + $0x50] sm:$0xff] %v216_v10  ;;  %219 = vst [vmem:[%s7016_s29 + $0x58] sm:$0xff] %v218_v11  ;;  %v222_v13 = vld [vmem:[%s7011_s28 + $0x68] sm:$0xff]  ;;  %v224_v14 = vld [vmem:[%s7011_s28 + $0x70] sm:$0xff] }
  0x1d   : > { %221 = vst [vmem:[%s7016_s29 + $0x60] sm:$0xff] %v220_v12  ;;  %223 = vst [vmem:[%s7016_s29 + $0x68] sm:$0xff] %v222_v13  ;;  %v226_v15 = vld [vmem:[%s7011_s28 + $0x78] sm:$0xff]  ;;  %v228_v16 = vld [vmem:[%s7011_s28 + $0x80] sm:$0xff] }
  0x1e   : > { %225 = vst [vmem:[%s7016_s29 + $0x70] sm:$0xff] %v224_v14  ;;  %v230_v17 = vld [vmem:[%s7011_s28 + $0x88] sm:$0xff]  ;;  %227 = vst [vmem:[%s7016_s29 + $0x78] sm:$0xff] %v226_v15  ;;  %v232_v18 = vld [vmem:[%s7011_s28 + $0x90] sm:$0xff] }
  0x1f   : > { %229 = vst [vmem:[%s7016_s29 + $0x80] sm:$0xff] %v228_v16  ;;  %231 = vst [vmem:[%s7016_s29 + $0x88] sm:$0xff] %v230_v17  ;;  %v234_v19 = vld [vmem:[%s7011_s28 + $0x98] sm:$0xff]  ;;  %v236_v20 = vld [vmem:[%s7011_s28 + $0xa0] sm:$0xff] }
  0x20   : > { %233 = vst [vmem:[%s7016_s29 + $0x90] sm:$0xff] %v232_v18  ;;  %235 = vst [vmem:[%s7016_s29 + $0x98] sm:$0xff] %v234_v19  ;;  %v238_v21 = vld [vmem:[%s7011_s28 + $0xa8] sm:$0xff]  ;;  %v244_v24 = vld [vmem:[%s7011_s28 + $0x394] sm:$0xff] }
  0x21   : > { %237 = vst [vmem:[%s7016_s29 + $0xa0] sm:$0xff] %v236_v20  ;;  %v240_v22 = vld [vmem:[%s7011_s28 + $0x384] sm:$0xff]  ;;  %v242_v23 = vld [vmem:[%s7011_s28 + $0x38c] sm:$0xff]  ;;  %239 = vst [vmem:[%s7016_s29 + $0xa8] sm:$0xff] %v238_v21 }
  0x22   : > { %241 = vst [vmem:[%s7016_s29 + $0xb4] sm:$0xff] %v240_v22  ;;  %243 = vst [vmem:[%s7016_s29 + $0xbc] sm:$0xff] %v242_v23  ;;  %v246_v25 = vld [vmem:[%s7011_s28 + $0x39c] sm:$0xff]  ;;  %v248_v26 = vld [vmem:[%s7011_s28 + $0x3a4] sm:$0xff] }
  0x23   : > { %245 = vst [vmem:[%s7016_s29 + $0xc4] sm:$0xff] %v244_v24  ;;  %247 = vst [vmem:[%s7016_s29 + $0xcc] sm:$0xff] %v246_v25  ;;  %v250_v27 = vld [vmem:[%s7011_s28 + $0x3ac] sm:$0xff]  ;;  %v252_v28 = vld [vmem:[%s7011_s28 + $0x3b4] sm:$0xff] }
  0x24   : > { %249 = vst [vmem:[%s7016_s29 + $0xd4] sm:$0xff] %v248_v26  ;;  %v254_v29 = vld [vmem:[%s7011_s28 + $0x3bc] sm:$0xff]  ;;  %251 = vst [vmem:[%s7016_s29 + $0xdc] sm:$0xff] %v250_v27  ;;  %v256_v30 = vld [vmem:[%s7011_s28 + $0x3c4] sm:$0xff] }
  0x25   : > { %253 = vst [vmem:[%s7016_s29 + $0xe4] sm:$0xff] %v252_v28  ;;  %255 = vst [vmem:[%s7016_s29 + $0xec] sm:$0xff] %v254_v29  ;;  %v258_v31 = vld [vmem:[%s7011_s28 + $0x3cc] sm:$0xff]  ;;  %v260_v32 = vld [vmem:[%s7011_s28 + $0x3d4] sm:$0xff] }
  0x26   : > { %257 = vst [vmem:[%s7016_s29 + $0xf4] sm:$0xff] %v256_v30  ;;  %259 = vst [vmem:[%s7016_s29 + $0xfc] sm:$0xff] %v258_v31  ;;  %v262_v33 = vld [vmem:[%s7011_s28 + $0x3dc] sm:$0xff]  ;;  %v264_v34 = vld [vmem:[%s7011_s28 + $0x3e4] sm:$0xff] }
  0x27   : > { %261 = vst [vmem:[%s7016_s29 + $0x104] sm:$0xff] %v260_v32  ;;  %v266_v35 = vld [vmem:[%s7011_s28 + $0x3ec] sm:$0xff]  ;;  %263 = vst [vmem:[%s7016_s29 + $0x10c] sm:$0xff] %v262_v33  ;;  %v268_v36 = vld [vmem:[%s7011_s28 + $0x3f4] sm:$0xff] }
  0x28   : > { %265 = vst [vmem:[%s7016_s29 + $0x114] sm:$0xff] %v264_v34  ;;  %267 = vst [vmem:[%s7016_s29 + $0x11c] sm:$0xff] %v266_v35  ;;  %v270_v37 = vld [vmem:[%s7011_s28 + $0x3fc] sm:$0xff]  ;;  %v272_v38 = vld [vmem:[%s7011_s28 + $0x404] sm:$0xff] }
  0x29   : > { %269 = vst [vmem:[%s7016_s29 + $0x124] sm:$0xff] %v268_v36  ;;  %271 = vst [vmem:[%s7016_s29 + $0x12c] sm:$0xff] %v270_v37  ;;  %v274_v39 = vld [vmem:[%s7011_s28 + $0x40c] sm:$0xff]  ;;  %v276_v40 = vld [vmem:[%s7011_s28 + $0x414] sm:$0xff] }
  0x2a   : > { %273 = vst [vmem:[%s7016_s29 + $0x134] sm:$0xff] %v272_v38  ;;  %v278_v41 = vld [vmem:[%s7011_s28 + $0x41c] sm:$0xff]  ;;  %275 = vst [vmem:[%s7016_s29 + $0x13c] sm:$0xff] %v274_v39  ;;  %v280_v42 = vld [vmem:[%s7011_s28 + $0x424] sm:$0xff] }
  0x2b   : > { %277 = vst [vmem:[%s7016_s29 + $0x144] sm:$0xff] %v276_v40  ;;  %279 = vst [vmem:[%s7016_s29 + $0x14c] sm:$0xff] %v278_v41  ;;  %v282_v43 = vld [vmem:[%s7011_s28 + $0x42c] sm:$0xff]  ;;  %v288_v46 = vld [vmem:[%s7011_s28 + $0x718] sm:$0xff] }
  0x2c   : > { %v284_v44 = vld [vmem:[%s7011_s28 + $0x708] sm:$0xff]  ;;  %281 = vst [vmem:[%s7016_s29 + $0x154] sm:$0xff] %v280_v42  ;;  %283 = vst [vmem:[%s7016_s29 + $0x15c] sm:$0xff] %v282_v43  ;;  %v286_v45 = vld [vmem:[%s7011_s28 + $0x710] sm:$0xff] }
  0x2d   : > { %285 = vst [vmem:[%s7016_s29 + $0x168] sm:$0xff] %v284_v44  ;;  %v290_v47 = vld [vmem:[%s7011_s28 + $0x720] sm:$0xff]  ;;  %287 = vst [vmem:[%s7016_s29 + $0x170] sm:$0xff] %v286_v45  ;;  %v292_v48 = vld [vmem:[%s7011_s28 + $0x728] sm:$0xff] }
  0x2e   : > { %289 = vst [vmem:[%s7016_s29 + $0x178] sm:$0xff] %v288_v46  ;;  %291 = vst [vmem:[%s7016_s29 + $0x180] sm:$0xff] %v290_v47  ;;  %v294_v49 = vld [vmem:[%s7011_s28 + $0x730] sm:$0xff]  ;;  %v296_v50 = vld [vmem:[%s7011_s28 + $0x738] sm:$0xff] }
  0x2f   : > { %293 = vst [vmem:[%s7016_s29 + $0x188] sm:$0xff] %v292_v48  ;;  %295 = vst [vmem:[%s7016_s29 + $0x190] sm:$0xff] %v294_v49  ;;  %v298_v51 = vld [vmem:[%s7011_s28 + $0x740] sm:$0xff]  ;;  %v300_v52 = vld [vmem:[%s7011_s28 + $0x748] sm:$0xff] }
  0x30   : > { %297 = vst [vmem:[%s7016_s29 + $0x198] sm:$0xff] %v296_v50  ;;  %v302_v53 = vld [vmem:[%s7011_s28 + $0x750] sm:$0xff]  ;;  %299 = vst [vmem:[%s7016_s29 + $0x1a0] sm:$0xff] %v298_v51  ;;  %v304_v54 = vld [vmem:[%s7011_s28 + $0x758] sm:$0xff] }
  0x31   : > { %301 = vst [vmem:[%s7016_s29 + $0x1a8] sm:$0xff] %v300_v52  ;;  %303 = vst [vmem:[%s7016_s29 + $0x1b0] sm:$0xff] %v302_v53  ;;  %v306_v55 = vld [vmem:[%s7011_s28 + $0x760] sm:$0xff]  ;;  %v308_v56 = vld [vmem:[%s7011_s28 + $0x768] sm:$0xff] }
  0x32   : > { %305 = vst [vmem:[%s7016_s29 + $0x1b8] sm:$0xff] %v304_v54  ;;  %307 = vst [vmem:[%s7016_s29 + $0x1c0] sm:$0xff] %v306_v55  ;;  %v310_v57 = vld [vmem:[%s7011_s28 + $0x770] sm:$0xff]  ;;  %v312_v58 = vld [vmem:[%s7011_s28 + $0x778] sm:$0xff] }
  0x33   : > { %309 = vst [vmem:[%s7016_s29 + $0x1c8] sm:$0xff] %v308_v56  ;;  %v314_v59 = vld [vmem:[%s7011_s28 + $0x780] sm:$0xff]  ;;  %311 = vst [vmem:[%s7016_s29 + $0x1d0] sm:$0xff] %v310_v57  ;;  %v316_v60 = vld [vmem:[%s7011_s28 + $0x788] sm:$0xff] }
  0x34   : > { %313 = vst [vmem:[%s7016_s29 + $0x1d8] sm:$0xff] %v312_v58  ;;  %315 = vst [vmem:[%s7016_s29 + $0x1e0] sm:$0xff] %v314_v59  ;;  %v318_v61 = vld [vmem:[%s7011_s28 + $0x790] sm:$0xff]  ;;  %v320_v62 = vld [vmem:[%s7011_s28 + $0x798] sm:$0xff] }
  0x35   : > { %317 = vst [vmem:[%s7016_s29 + $0x1e8] sm:$0xff] %v316_v60  ;;  %319 = vst [vmem:[%s7016_s29 + $0x1f0] sm:$0xff] %v318_v61  ;;  %v322_v63 = vld [vmem:[%s7011_s28 + $0x7a0] sm:$0xff]  ;;  %v324_v0 = vld [vmem:[%s7011_s28 + $0x7a8] sm:$0xff] }
  0x36   : > { %321 = vst [vmem:[%s7016_s29 + $0x1f8] sm:$0xff] %v320_v62  ;;  %v326_v1 = vld [vmem:[%s7011_s28 + $0x7b0] sm:$0xff]  ;;  %323 = vst [vmem:[%s7016_s29 + $0x200] sm:$0xff] %v322_v63  ;;  %v332_v4 = vld [vmem:[%s7011_s28 + $0xa9c] sm:$0xff] }
  0x37   : > { %325 = vst [vmem:[%s7016_s29 + $0x208] sm:$0xff] %v324_v0  ;;  %327 = vst [vmem:[%s7016_s29 + $0x210] sm:$0xff] %v326_v1  ;;  %v328_v2 = vld [vmem:[%s7011_s28 + $0xa8c] sm:$0xff]  ;;  %v330_v3 = vld [vmem:[%s7011_s28 + $0xa94] sm:$0xff] }
  0x38   : > { %329 = vst [vmem:[%s7016_s29 + $0x21c] sm:$0xff] %v328_v2  ;;  %331 = vst [vmem:[%s7016_s29 + $0x224] sm:$0xff] %v330_v3  ;;  %v334_v5 = vld [vmem:[%s7011_s28 + $0xaa4] sm:$0xff]  ;;  %v336_v6 = vld [vmem:[%s7011_s28 + $0xaac] sm:$0xff] }
  0x39   : > { %333 = vst [vmem:[%s7016_s29 + $0x22c] sm:$0xff] %v332_v4  ;;  %v338_v7 = vld [vmem:[%s7011_s28 + $0xab4] sm:$0xff]  ;;  %335 = vst [vmem:[%s7016_s29 + $0x234] sm:$0xff] %v334_v5  ;;  %v340_v8 = vld [vmem:[%s7011_s28 + $0xabc] sm:$0xff] }
  0x3a   : > { %337 = vst [vmem:[%s7016_s29 + $0x23c] sm:$0xff] %v336_v6  ;;  %339 = vst [vmem:[%s7016_s29 + $0x244] sm:$0xff] %v338_v7  ;;  %v342_v9 = vld [vmem:[%s7011_s28 + $0xac4] sm:$0xff]  ;;  %v344_v10 = vld [vmem:[%s7011_s28 + $0xacc] sm:$0xff] }
  0x3b   : > { %341 = vst [vmem:[%s7016_s29 + $0x24c] sm:$0xff] %v340_v8  ;;  %343 = vst [vmem:[%s7016_s29 + $0x254] sm:$0xff] %v342_v9  ;;  %v346_v11 = vld [vmem:[%s7011_s28 + $0xad4] sm:$0xff]  ;;  %v348_v12 = vld [vmem:[%s7011_s28 + $0xadc] sm:$0xff] }
  0x3c   : > { %345 = vst [vmem:[%s7016_s29 + $0x25c] sm:$0xff] %v344_v10  ;;  %v350_v13 = vld [vmem:[%s7011_s28 + $0xae4] sm:$0xff]  ;;  %347 = vst [vmem:[%s7016_s29 + $0x264] sm:$0xff] %v346_v11  ;;  %v352_v14 = vld [vmem:[%s7011_s28 + $0xaec] sm:$0xff] }
  0x3d   : > { %349 = vst [vmem:[%s7016_s29 + $0x26c] sm:$0xff] %v348_v12  ;;  %351 = vst [vmem:[%s7016_s29 + $0x274] sm:$0xff] %v350_v13  ;;  %v354_v15 = vld [vmem:[%s7011_s28 + $0xaf4] sm:$0xff]  ;;  %v356_v16 = vld [vmem:[%s7011_s28 + $0xafc] sm:$0xff] }
  0x3e   : > { %353 = vst [vmem:[%s7016_s29 + $0x27c] sm:$0xff] %v352_v14  ;;  %355 = vst [vmem:[%s7016_s29 + $0x284] sm:$0xff] %v354_v15  ;;  %v358_v17 = vld [vmem:[%s7011_s28 + $0xb04] sm:$0xff]  ;;  %v360_v18 = vld [vmem:[%s7011_s28 + $0xb0c] sm:$0xff] }
  0x3f   : > { %357 = vst [vmem:[%s7016_s29 + $0x28c] sm:$0xff] %v356_v16  ;;  %v362_v19 = vld [vmem:[%s7011_s28 + $0xb14] sm:$0xff]  ;;  %359 = vst [vmem:[%s7016_s29 + $0x294] sm:$0xff] %v358_v17  ;;  %v364_v20 = vld [vmem:[%s7011_s28 + $0xb1c] sm:$0xff] }
  0x40   : > { %361 = vst [vmem:[%s7016_s29 + $0x29c] sm:$0xff] %v360_v18  ;;  %363 = vst [vmem:[%s7016_s29 + $0x2a4] sm:$0xff] %v362_v19  ;;  %v366_v21 = vld [vmem:[%s7011_s28 + $0xb24] sm:$0xff]  ;;  %v368_v22 = vld [vmem:[%s7011_s28 + $0xb2c] sm:$0xff] }
  0x41   : > { %365 = vst [vmem:[%s7016_s29 + $0x2ac] sm:$0xff] %v364_v20  ;;  %367 = vst [vmem:[%s7016_s29 + $0x2b4] sm:$0xff] %v366_v21  ;;  %v370_v23 = vld [vmem:[%s7011_s28 + $0xb34] sm:$0xff]  ;;  %v376_v26 = vld [vmem:[%s7011_s28 + $0xe20] sm:$0xff] }
  0x42   : > { %369 = vst [vmem:[%s7016_s29 + $0x2bc] sm:$0xff] %v368_v22  ;;  %v372_v24 = vld [vmem:[%s7011_s28 + $0xe10] sm:$0xff]  ;;  %v374_v25 = vld [vmem:[%s7011_s28 + $0xe18] sm:$0xff]  ;;  %371 = vst [vmem:[%s7016_s29 + $0x2c4] sm:$0xff] %v370_v23 }
  0x43   : > { %373 = vst [vmem:[%s7016_s29 + $0x2d0] sm:$0xff] %v372_v24  ;;  %375 = vst [vmem:[%s7016_s29 + $0x2d8] sm:$0xff] %v374_v25  ;;  %v378_v27 = vld [vmem:[%s7011_s28 + $0xe28] sm:$0xff]  ;;  %v380_v28 = vld [vmem:[%s7011_s28 + $0xe30] sm:$0xff] }
  0x44   : > { %377 = vst [vmem:[%s7016_s29 + $0x2e0] sm:$0xff] %v376_v26  ;;  %379 = vst [vmem:[%s7016_s29 + $0x2e8] sm:$0xff] %v378_v27  ;;  %v382_v29 = vld [vmem:[%s7011_s28 + $0xe38] sm:$0xff]  ;;  %v384_v30 = vld [vmem:[%s7011_s28 + $0xe40] sm:$0xff] }
  0x45   : > { %381 = vst [vmem:[%s7016_s29 + $0x2f0] sm:$0xff] %v380_v28  ;;  %v386_v31 = vld [vmem:[%s7011_s28 + $0xe48] sm:$0xff]  ;;  %383 = vst [vmem:[%s7016_s29 + $0x2f8] sm:$0xff] %v382_v29  ;;  %v388_v32 = vld [vmem:[%s7011_s28 + $0xe50] sm:$0xff] }
  0x46   : > { %385 = vst [vmem:[%s7016_s29 + $0x300] sm:$0xff] %v384_v30  ;;  %387 = vst [vmem:[%s7016_s29 + $0x308] sm:$0xff] %v386_v31  ;;  %v390_v33 = vld [vmem:[%s7011_s28 + $0xe58] sm:$0xff]  ;;  %v392_v34 = vld [vmem:[%s7011_s28 + $0xe60] sm:$0xff] }
  0x47   : > { %389 = vst [vmem:[%s7016_s29 + $0x310] sm:$0xff] %v388_v32  ;;  %391 = vst [vmem:[%s7016_s29 + $0x318] sm:$0xff] %v390_v33  ;;  %v394_v35 = vld [vmem:[%s7011_s28 + $0xe68] sm:$0xff]  ;;  %v396_v36 = vld [vmem:[%s7011_s28 + $0xe70] sm:$0xff] }
  0x48   : > { %393 = vst [vmem:[%s7016_s29 + $0x320] sm:$0xff] %v392_v34  ;;  %v398_v37 = vld [vmem:[%s7011_s28 + $0xe78] sm:$0xff]  ;;  %395 = vst [vmem:[%s7016_s29 + $0x328] sm:$0xff] %v394_v35  ;;  %v400_v38 = vld [vmem:[%s7011_s28 + $0xe80] sm:$0xff] }
  0x49   : > { %397 = vst [vmem:[%s7016_s29 + $0x330] sm:$0xff] %v396_v36  ;;  %399 = vst [vmem:[%s7016_s29 + $0x338] sm:$0xff] %v398_v37  ;;  %v402_v39 = vld [vmem:[%s7011_s28 + $0xe88] sm:$0xff]  ;;  %v404_v40 = vld [vmem:[%s7011_s28 + $0xe90] sm:$0xff] }
  0x4a   : > { %401 = vst [vmem:[%s7016_s29 + $0x340] sm:$0xff] %v400_v38  ;;  %403 = vst [vmem:[%s7016_s29 + $0x348] sm:$0xff] %v402_v39  ;;  %v406_v41 = vld [vmem:[%s7011_s28 + $0xe98] sm:$0xff]  ;;  %v408_v42 = vld [vmem:[%s7011_s28 + $0xea0] sm:$0xff] }
  0x4b   : > { %405 = vst [vmem:[%s7016_s29 + $0x350] sm:$0xff] %v404_v40  ;;  %v410_v43 = vld [vmem:[%s7011_s28 + $0xea8] sm:$0xff]  ;;  %407 = vst [vmem:[%s7016_s29 + $0x358] sm:$0xff] %v406_v41  ;;  %v412_v44 = vld [vmem:[%s7011_s28 + $0xeb0] sm:$0xff] }
  0x4c   : > { %409 = vst [vmem:[%s7016_s29 + $0x360] sm:$0xff] %v408_v42  ;;  %411 = vst [vmem:[%s7016_s29 + $0x368] sm:$0xff] %v410_v43  ;;  %v414_v45 = vld [vmem:[%s7011_s28 + $0xeb8] sm:$0xff]  ;;  %v420_v48 = vld [vmem:[%s7011_s28 + $0x11a4] sm:$0xff] }
  0x4d   : > { %v416_v46 = vld [vmem:[%s7011_s28 + $0x1194] sm:$0xff]  ;;  %413 = vst [vmem:[%s7016_s29 + $0x370] sm:$0xff] %v412_v44  ;;  %415 = vst [vmem:[%s7016_s29 + $0x378] sm:$0xff] %v414_v45  ;;  %v418_v47 = vld [vmem:[%s7011_s28 + $0x119c] sm:$0xff] }
  0x4e   : > { %417 = vst [vmem:[%s7016_s29 + $0x384] sm:$0xff] %v416_v46  ;;  %v422_v49 = vld [vmem:[%s7011_s28 + $0x11ac] sm:$0xff]  ;;  %419 = vst [vmem:[%s7016_s29 + $0x38c] sm:$0xff] %v418_v47  ;;  %v424_v50 = vld [vmem:[%s7011_s28 + $0x11b4] sm:$0xff] }
  0x4f   : > { %421 = vst [vmem:[%s7016_s29 + $0x394] sm:$0xff] %v420_v48  ;;  %423 = vst [vmem:[%s7016_s29 + $0x39c] sm:$0xff] %v422_v49  ;;  %v426_v51 = vld [vmem:[%s7011_s28 + $0x11bc] sm:$0xff]  ;;  %v428_v52 = vld [vmem:[%s7011_s28 + $0x11c4] sm:$0xff] }
  0x50   : > { %425 = vst [vmem:[%s7016_s29 + $0x3a4] sm:$0xff] %v424_v50  ;;  %427 = vst [vmem:[%s7016_s29 + $0x3ac] sm:$0xff] %v426_v51  ;;  %v430_v53 = vld [vmem:[%s7011_s28 + $0x11cc] sm:$0xff]  ;;  %v432_v54 = vld [vmem:[%s7011_s28 + $0x11d4] sm:$0xff] }
  0x51   : > { %429 = vst [vmem:[%s7016_s29 + $0x3b4] sm:$0xff] %v428_v52  ;;  %v434_v55 = vld [vmem:[%s7011_s28 + $0x11dc] sm:$0xff]  ;;  %431 = vst [vmem:[%s7016_s29 + $0x3bc] sm:$0xff] %v430_v53  ;;  %v436_v56 = vld [vmem:[%s7011_s28 + $0x11e4] sm:$0xff] }
  0x52   : > { %433 = vst [vmem:[%s7016_s29 + $0x3c4] sm:$0xff] %v432_v54  ;;  %435 = vst [vmem:[%s7016_s29 + $0x3cc] sm:$0xff] %v434_v55  ;;  %v438_v57 = vld [vmem:[%s7011_s28 + $0x11ec] sm:$0xff]  ;;  %v440_v58 = vld [vmem:[%s7011_s28 + $0x11f4] sm:$0xff] }
  0x53   : > { %437 = vst [vmem:[%s7016_s29 + $0x3d4] sm:$0xff] %v436_v56  ;;  %439 = vst [vmem:[%s7016_s29 + $0x3dc] sm:$0xff] %v438_v57  ;;  %v442_v59 = vld [vmem:[%s7011_s28 + $0x11fc] sm:$0xff]  ;;  %v444_v60 = vld [vmem:[%s7011_s28 + $0x1204] sm:$0xff] }
  0x54   : > { %441 = vst [vmem:[%s7016_s29 + $0x3e4] sm:$0xff] %v440_v58  ;;  %v446_v61 = vld [vmem:[%s7011_s28 + $0x120c] sm:$0xff]  ;;  %443 = vst [vmem:[%s7016_s29 + $0x3ec] sm:$0xff] %v442_v59  ;;  %v448_v62 = vld [vmem:[%s7011_s28 + $0x1214] sm:$0xff] }
  0x55   : > { %445 = vst [vmem:[%s7016_s29 + $0x3f4] sm:$0xff] %v444_v60  ;;  %447 = vst [vmem:[%s7016_s29 + $0x3fc] sm:$0xff] %v446_v61  ;;  %v450_v63 = vld [vmem:[%s7011_s28 + $0x121c] sm:$0xff]  ;;  %v452_v0 = vld [vmem:[%s7011_s28 + $0x1224] sm:$0xff] }
  0x56   : > { %449 = vst [vmem:[%s7016_s29 + $0x404] sm:$0xff] %v448_v62  ;;  %451 = vst [vmem:[%s7016_s29 + $0x40c] sm:$0xff] %v450_v63  ;;  %v454_v1 = vld [vmem:[%s7011_s28 + $0x122c] sm:$0xff]  ;;  %v456_v2 = vld [vmem:[%s7011_s28 + $0x1234] sm:$0xff] }
  0x57   : > { %453 = vst [vmem:[%s7016_s29 + $0x414] sm:$0xff] %v452_v0  ;;  %v458_v3 = vld [vmem:[%s7011_s28 + $0x123c] sm:$0xff]  ;;  %455 = vst [vmem:[%s7016_s29 + $0x41c] sm:$0xff] %v454_v1  ;;  %v464_v6 = vld [vmem:[%s7011_s28 + $0x1528] sm:$0xff] }
  0x58   : > { %457 = vst [vmem:[%s7016_s29 + $0x424] sm:$0xff] %v456_v2  ;;  %459 = vst [vmem:[%s7016_s29 + $0x42c] sm:$0xff] %v458_v3  ;;  %v460_v4 = vld [vmem:[%s7011_s28 + $0x1518] sm:$0xff]  ;;  %v462_v5 = vld [vmem:[%s7011_s28 + $0x1520] sm:$0xff] }
  0x59   : > { %461 = vst [vmem:[%s7016_s29 + $0x438] sm:$0xff] %v460_v4  ;;  %463 = vst [vmem:[%s7016_s29 + $0x440] sm:$0xff] %v462_v5  ;;  %v466_v7 = vld [vmem:[%s7011_s28 + $0x1530] sm:$0xff]  ;;  %v468_v8 = vld [vmem:[%s7011_s28 + $0x1538] sm:$0xff] }
  0x5a   : > { %465 = vst [vmem:[%s7016_s29 + $0x448] sm:$0xff] %v464_v6  ;;  %v470_v9 = vld [vmem:[%s7011_s28 + $0x1540] sm:$0xff]  ;;  %467 = vst [vmem:[%s7016_s29 + $0x450] sm:$0xff] %v466_v7  ;;  %v472_v10 = vld [vmem:[%s7011_s28 + $0x1548] sm:$0xff] }
  0x5b   : > { %469 = vst [vmem:[%s7016_s29 + $0x458] sm:$0xff] %v468_v8  ;;  %471 = vst [vmem:[%s7016_s29 + $0x460] sm:$0xff] %v470_v9  ;;  %v474_v11 = vld [vmem:[%s7011_s28 + $0x1550] sm:$0xff]  ;;  %v476_v12 = vld [vmem:[%s7011_s28 + $0x1558] sm:$0xff] }
  0x5c   : > { %473 = vst [vmem:[%s7016_s29 + $0x468] sm:$0xff] %v472_v10  ;;  %475 = vst [vmem:[%s7016_s29 + $0x470] sm:$0xff] %v474_v11  ;;  %v478_v13 = vld [vmem:[%s7011_s28 + $0x1560] sm:$0xff]  ;;  %v480_v14 = vld [vmem:[%s7011_s28 + $0x1568] sm:$0xff] }
  0x5d   : > { %477 = vst [vmem:[%s7016_s29 + $0x478] sm:$0xff] %v476_v12  ;;  %v482_v15 = vld [vmem:[%s7011_s28 + $0x1570] sm:$0xff]  ;;  %479 = vst [vmem:[%s7016_s29 + $0x480] sm:$0xff] %v478_v13  ;;  %v484_v16 = vld [vmem:[%s7011_s28 + $0x1578] sm:$0xff] }
  0x5e   : > { %481 = vst [vmem:[%s7016_s29 + $0x488] sm:$0xff] %v480_v14  ;;  %483 = vst [vmem:[%s7016_s29 + $0x490] sm:$0xff] %v482_v15  ;;  %v486_v17 = vld [vmem:[%s7011_s28 + $0x1580] sm:$0xff]  ;;  %v488_v18 = vld [vmem:[%s7011_s28 + $0x1588] sm:$0xff] }
  0x5f   : > { %485 = vst [vmem:[%s7016_s29 + $0x498] sm:$0xff] %v484_v16  ;;  %487 = vst [vmem:[%s7016_s29 + $0x4a0] sm:$0xff] %v486_v17  ;;  %v490_v19 = vld [vmem:[%s7011_s28 + $0x1590] sm:$0xff]  ;;  %v492_v20 = vld [vmem:[%s7011_s28 + $0x1598] sm:$0xff] }
  0x60   : > { %489 = vst [vmem:[%s7016_s29 + $0x4a8] sm:$0xff] %v488_v18  ;;  %v494_v21 = vld [vmem:[%s7011_s28 + $0x15a0] sm:$0xff]  ;;  %491 = vst [vmem:[%s7016_s29 + $0x4b0] sm:$0xff] %v490_v19  ;;  %v496_v22 = vld [vmem:[%s7011_s28 + $0x15a8] sm:$0xff] }
  0x61   : > { %493 = vst [vmem:[%s7016_s29 + $0x4b8] sm:$0xff] %v492_v20  ;;  %495 = vst [vmem:[%s7016_s29 + $0x4c0] sm:$0xff] %v494_v21  ;;  %v498_v23 = vld [vmem:[%s7011_s28 + $0x15b0] sm:$0xff]  ;;  %v500_v24 = vld [vmem:[%s7011_s28 + $0x15b8] sm:$0xff] }
  0x62   : > { %497 = vst [vmem:[%s7016_s29 + $0x4c8] sm:$0xff] %v496_v22  ;;  %499 = vst [vmem:[%s7016_s29 + $0x4d0] sm:$0xff] %v498_v23  ;;  %v502_v25 = vld [vmem:[%s7011_s28 + $0x15c0] sm:$0xff]  ;;  %v508_v28 = vld [vmem:[%s7011_s28 + $0x18ac] sm:$0xff] }
  0x63   : > { %501 = vst [vmem:[%s7016_s29 + $0x4d8] sm:$0xff] %v500_v24  ;;  %v504_v26 = vld [vmem:[%s7011_s28 + $0x189c] sm:$0xff]  ;;  %v506_v27 = vld [vmem:[%s7011_s28 + $0x18a4] sm:$0xff]  ;;  %503 = vst [vmem:[%s7016_s29 + $0x4e0] sm:$0xff] %v502_v25 }
  0x64   : > { %505 = vst [vmem:[%s7016_s29 + $0x4ec] sm:$0xff] %v504_v26  ;;  %507 = vst [vmem:[%s7016_s29 + $0x4f4] sm:$0xff] %v506_v27  ;;  %v510_v29 = vld [vmem:[%s7011_s28 + $0x18b4] sm:$0xff]  ;;  %v512_v30 = vld [vmem:[%s7011_s28 + $0x18bc] sm:$0xff] }
  0x65   : > { %509 = vst [vmem:[%s7016_s29 + $0x4fc] sm:$0xff] %v508_v28  ;;  %511 = vst [vmem:[%s7016_s29 + $0x504] sm:$0xff] %v510_v29  ;;  %v514_v31 = vld [vmem:[%s7011_s28 + $0x18c4] sm:$0xff]  ;;  %v516_v32 = vld [vmem:[%s7011_s28 + $0x18cc] sm:$0xff] }
  0x66   : > { %513 = vst [vmem:[%s7016_s29 + $0x50c] sm:$0xff] %v512_v30  ;;  %v518_v33 = vld [vmem:[%s7011_s28 + $0x18d4] sm:$0xff]  ;;  %515 = vst [vmem:[%s7016_s29 + $0x514] sm:$0xff] %v514_v31  ;;  %v520_v34 = vld [vmem:[%s7011_s28 + $0x18dc] sm:$0xff] }
  0x67   : > { %517 = vst [vmem:[%s7016_s29 + $0x51c] sm:$0xff] %v516_v32  ;;  %519 = vst [vmem:[%s7016_s29 + $0x524] sm:$0xff] %v518_v33  ;;  %v522_v35 = vld [vmem:[%s7011_s28 + $0x18e4] sm:$0xff]  ;;  %v524_v36 = vld [vmem:[%s7011_s28 + $0x18ec] sm:$0xff] }
  0x68   : > { %521 = vst [vmem:[%s7016_s29 + $0x52c] sm:$0xff] %v520_v34  ;;  %523 = vst [vmem:[%s7016_s29 + $0x534] sm:$0xff] %v522_v35  ;;  %v526_v37 = vld [vmem:[%s7011_s28 + $0x18f4] sm:$0xff]  ;;  %v528_v38 = vld [vmem:[%s7011_s28 + $0x18fc] sm:$0xff] }
  0x69   : > { %525 = vst [vmem:[%s7016_s29 + $0x53c] sm:$0xff] %v524_v36  ;;  %v530_v39 = vld [vmem:[%s7011_s28 + $0x1904] sm:$0xff]  ;;  %527 = vst [vmem:[%s7016_s29 + $0x544] sm:$0xff] %v526_v37  ;;  %v532_v40 = vld [vmem:[%s7011_s28 + $0x190c] sm:$0xff] }
  0x6a   : > { %529 = vst [vmem:[%s7016_s29 + $0x54c] sm:$0xff] %v528_v38  ;;  %531 = vst [vmem:[%s7016_s29 + $0x554] sm:$0xff] %v530_v39  ;;  %v534_v41 = vld [vmem:[%s7011_s28 + $0x1914] sm:$0xff]  ;;  %v536_v42 = vld [vmem:[%s7011_s28 + $0x191c] sm:$0xff] }
  0x6b   : > { %533 = vst [vmem:[%s7016_s29 + $0x55c] sm:$0xff] %v532_v40  ;;  %535 = vst [vmem:[%s7016_s29 + $0x564] sm:$0xff] %v534_v41  ;;  %v538_v43 = vld [vmem:[%s7011_s28 + $0x1924] sm:$0xff]  ;;  %v540_v44 = vld [vmem:[%s7011_s28 + $0x192c] sm:$0xff] }
  0x6c   : > { %537 = vst [vmem:[%s7016_s29 + $0x56c] sm:$0xff] %v536_v42  ;;  %v542_v45 = vld [vmem:[%s7011_s28 + $0x1934] sm:$0xff]  ;;  %539 = vst [vmem:[%s7016_s29 + $0x574] sm:$0xff] %v538_v43  ;;  %v544_v46 = vld [vmem:[%s7011_s28 + $0x193c] sm:$0xff] }
  0x6d   : > { %541 = vst [vmem:[%s7016_s29 + $0x57c] sm:$0xff] %v540_v44  ;;  %543 = vst [vmem:[%s7016_s29 + $0x584] sm:$0xff] %v542_v45  ;;  %v546_v47 = vld [vmem:[%s7011_s28 + $0x1944] sm:$0xff]  ;;  %v552_v50 = vld [vmem:[%s7011_s28 + $0x1c30] sm:$0xff] }
  0x6e   : > { %v548_v48 = vld [vmem:[%s7011_s28 + $0x1c20] sm:$0xff]  ;;  %545 = vst [vmem:[%s7016_s29 + $0x58c] sm:$0xff] %v544_v46  ;;  %547 = vst [vmem:[%s7016_s29 + $0x594] sm:$0xff] %v546_v47  ;;  %v550_v49 = vld [vmem:[%s7011_s28 + $0x1c28] sm:$0xff] }
  0x6f   : > { %549 = vst [vmem:[%s7016_s29 + $0x5a0] sm:$0xff] %v548_v48  ;;  %v554_v51 = vld [vmem:[%s7011_s28 + $0x1c38] sm:$0xff]  ;;  %551 = vst [vmem:[%s7016_s29 + $0x5a8] sm:$0xff] %v550_v49  ;;  %v556_v52 = vld [vmem:[%s7011_s28 + $0x1c40] sm:$0xff] }
  0x70   : > { %553 = vst [vmem:[%s7016_s29 + $0x5b0] sm:$0xff] %v552_v50  ;;  %555 = vst [vmem:[%s7016_s29 + $0x5b8] sm:$0xff] %v554_v51  ;;  %v558_v53 = vld [vmem:[%s7011_s28 + $0x1c48] sm:$0xff]  ;;  %v560_v54 = vld [vmem:[%s7011_s28 + $0x1c50] sm:$0xff] }
  0x71   : > { %557 = vst [vmem:[%s7016_s29 + $0x5c0] sm:$0xff] %v556_v52  ;;  %559 = vst [vmem:[%s7016_s29 + $0x5c8] sm:$0xff] %v558_v53  ;;  %v562_v55 = vld [vmem:[%s7011_s28 + $0x1c58] sm:$0xff]  ;;  %v564_v56 = vld [vmem:[%s7011_s28 + $0x1c60] sm:$0xff] }
  0x72   : > { %561 = vst [vmem:[%s7016_s29 + $0x5d0] sm:$0xff] %v560_v54  ;;  %v566_v57 = vld [vmem:[%s7011_s28 + $0x1c68] sm:$0xff]  ;;  %563 = vst [vmem:[%s7016_s29 + $0x5d8] sm:$0xff] %v562_v55  ;;  %v568_v58 = vld [vmem:[%s7011_s28 + $0x1c70] sm:$0xff] }
  0x73   : > { %565 = vst [vmem:[%s7016_s29 + $0x5e0] sm:$0xff] %v564_v56  ;;  %567 = vst [vmem:[%s7016_s29 + $0x5e8] sm:$0xff] %v566_v57  ;;  %v570_v59 = vld [vmem:[%s7011_s28 + $0x1c78] sm:$0xff]  ;;  %v572_v60 = vld [vmem:[%s7011_s28 + $0x1c80] sm:$0xff] }
  0x74   : > { %569 = vst [vmem:[%s7016_s29 + $0x5f0] sm:$0xff] %v568_v58  ;;  %571 = vst [vmem:[%s7016_s29 + $0x5f8] sm:$0xff] %v570_v59  ;;  %v574_v61 = vld [vmem:[%s7011_s28 + $0x1c88] sm:$0xff]  ;;  %v576_v62 = vld [vmem:[%s7011_s28 + $0x1c90] sm:$0xff] }
  0x75   : > { %573 = vst [vmem:[%s7016_s29 + $0x600] sm:$0xff] %v572_v60  ;;  %v578_v63 = vld [vmem:[%s7011_s28 + $0x1c98] sm:$0xff]  ;;  %575 = vst [vmem:[%s7016_s29 + $0x608] sm:$0xff] %v574_v61  ;;  %v580_v0 = vld [vmem:[%s7011_s28 + $0x1ca0] sm:$0xff] }
  0x76   : > { %577 = vst [vmem:[%s7016_s29 + $0x610] sm:$0xff] %v576_v62  ;;  %579 = vst [vmem:[%s7016_s29 + $0x618] sm:$0xff] %v578_v63  ;;  %v582_v1 = vld [vmem:[%s7011_s28 + $0x1ca8] sm:$0xff]  ;;  %v584_v2 = vld [vmem:[%s7011_s28 + $0x1cb0] sm:$0xff] }
  0x77   : > { %581 = vst [vmem:[%s7016_s29 + $0x620] sm:$0xff] %v580_v0  ;;  %583 = vst [vmem:[%s7016_s29 + $0x628] sm:$0xff] %v582_v1  ;;  %v586_v3 = vld [vmem:[%s7011_s28 + $0x1cb8] sm:$0xff]  ;;  %v588_v4 = vld [vmem:[%s7011_s28 + $0x1cc0] sm:$0xff] }
  0x78   : > { %585 = vst [vmem:[%s7016_s29 + $0x630] sm:$0xff] %v584_v2  ;;  %v590_v5 = vld [vmem:[%s7011_s28 + $0x1cc8] sm:$0xff]  ;;  %587 = vst [vmem:[%s7016_s29 + $0x638] sm:$0xff] %v586_v3  ;;  %v596_v8 = vld [vmem:[%s7011_s28 + $0x1fb4] sm:$0xff] }
  0x79   : > { %589 = vst [vmem:[%s7016_s29 + $0x640] sm:$0xff] %v588_v4  ;;  %591 = vst [vmem:[%s7016_s29 + $0x648] sm:$0xff] %v590_v5  ;;  %v592_v6 = vld [vmem:[%s7011_s28 + $0x1fa4] sm:$0xff]  ;;  %v594_v7 = vld [vmem:[%s7011_s28 + $0x1fac] sm:$0xff] }
  0x7a   : > { %593 = vst [vmem:[%s7016_s29 + $0x654] sm:$0xff] %v592_v6  ;;  %595 = vst [vmem:[%s7016_s29 + $0x65c] sm:$0xff] %v594_v7  ;;  %v598_v9 = vld [vmem:[%s7011_s28 + $0x1fbc] sm:$0xff]  ;;  %v600_v10 = vld [vmem:[%s7011_s28 + $0x1fc4] sm:$0xff] }
  0x7b   : > { %597 = vst [vmem:[%s7016_s29 + $0x664] sm:$0xff] %v596_v8  ;;  %v602_v11 = vld [vmem:[%s7011_s28 + $0x1fcc] sm:$0xff]  ;;  %599 = vst [vmem:[%s7016_s29 + $0x66c] sm:$0xff] %v598_v9  ;;  %v604_v12 = vld [vmem:[%s7011_s28 + $0x1fd4] sm:$0xff] }
  0x7c   : > { %601 = vst [vmem:[%s7016_s29 + $0x674] sm:$0xff] %v600_v10  ;;  %603 = vst [vmem:[%s7016_s29 + $0x67c] sm:$0xff] %v602_v11  ;;  %v606_v13 = vld [vmem:[%s7011_s28 + $0x1fdc] sm:$0xff]  ;;  %v608_v14 = vld [vmem:[%s7011_s28 + $0x1fe4] sm:$0xff] }
  0x7d   : > { %605 = vst [vmem:[%s7016_s29 + $0x684] sm:$0xff] %v604_v12  ;;  %607 = vst [vmem:[%s7016_s29 + $0x68c] sm:$0xff] %v606_v13  ;;  %v610_v15 = vld [vmem:[%s7011_s28 + $0x1fec] sm:$0xff]  ;;  %v612_v16 = vld [vmem:[%s7011_s28 + $0x1ff4] sm:$0xff] }
  0x7e   : > { %609 = vst [vmem:[%s7016_s29 + $0x694] sm:$0xff] %v608_v14  ;;  %v614_v17 = vld [vmem:[%s7011_s28 + $0x1ffc] sm:$0xff]  ;;  %611 = vst [vmem:[%s7016_s29 + $0x69c] sm:$0xff] %v610_v15  ;;  %v616_v18 = vld [vmem:[%s7011_s28 + $0x2004] sm:$0xff] }
  0x7f   : > { %613 = vst [vmem:[%s7016_s29 + $0x6a4] sm:$0xff] %v612_v16  ;;  %615 = vst [vmem:[%s7016_s29 + $0x6ac] sm:$0xff] %v614_v17  ;;  %v618_v19 = vld [vmem:[%s7011_s28 + $0x200c] sm:$0xff]  ;;  %v620_v20 = vld [vmem:[%s7011_s28 + $0x2014] sm:$0xff] }
  0x80   : > { %617 = vst [vmem:[%s7016_s29 + $0x6b4] sm:$0xff] %v616_v18  ;;  %619 = vst [vmem:[%s7016_s29 + $0x6bc] sm:$0xff] %v618_v19  ;;  %v622_v21 = vld [vmem:[%s7011_s28 + $0x201c] sm:$0xff]  ;;  %v624_v22 = vld [vmem:[%s7011_s28 + $0x2024] sm:$0xff] }
  0x81   : > { %621 = vst [vmem:[%s7016_s29 + $0x6c4] sm:$0xff] %v620_v20  ;;  %v626_v23 = vld [vmem:[%s7011_s28 + $0x202c] sm:$0xff]  ;;  %623 = vst [vmem:[%s7016_s29 + $0x6cc] sm:$0xff] %v622_v21  ;;  %v628_v24 = vld [vmem:[%s7011_s28 + $0x2034] sm:$0xff] }
  0x82   : > { %625 = vst [vmem:[%s7016_s29 + $0x6d4] sm:$0xff] %v624_v22  ;;  %627 = vst [vmem:[%s7016_s29 + $0x6dc] sm:$0xff] %v626_v23  ;;  %v630_v25 = vld [vmem:[%s7011_s28 + $0x203c] sm:$0xff]  ;;  %v632_v26 = vld [vmem:[%s7011_s28 + $0x2044] sm:$0xff] }
  0x83   : > { %629 = vst [vmem:[%s7016_s29 + $0x6e4] sm:$0xff] %v628_v24  ;;  %631 = vst [vmem:[%s7016_s29 + $0x6ec] sm:$0xff] %v630_v25  ;;  %v634_v27 = vld [vmem:[%s7011_s28 + $0x204c] sm:$0xff]  ;;  %v640_v30 = vld [vmem:[%s7011_s28 + $0x2338] sm:$0xff] }
  0x84   : > { %633 = vst [vmem:[%s7016_s29 + $0x6f4] sm:$0xff] %v632_v26  ;;  %v636_v28 = vld [vmem:[%s7011_s28 + $0x2328] sm:$0xff]  ;;  %v638_v29 = vld [vmem:[%s7011_s28 + $0x2330] sm:$0xff]  ;;  %635 = vst [vmem:[%s7016_s29 + $0x6fc] sm:$0xff] %v634_v27 }
  0x85   : > { %637 = vst [vmem:[%s7016_s29 + $0x708] sm:$0xff] %v636_v28  ;;  %639 = vst [vmem:[%s7016_s29 + $0x710] sm:$0xff] %v638_v29  ;;  %v642_v31 = vld [vmem:[%s7011_s28 + $0x2340] sm:$0xff]  ;;  %v644_v32 = vld [vmem:[%s7011_s28 + $0x2348] sm:$0xff] }
  0x86   : > { %641 = vst [vmem:[%s7016_s29 + $0x718] sm:$0xff] %v640_v30  ;;  %643 = vst [vmem:[%s7016_s29 + $0x720] sm:$0xff] %v642_v31  ;;  %v646_v33 = vld [vmem:[%s7011_s28 + $0x2350] sm:$0xff]  ;;  %v648_v34 = vld [vmem:[%s7011_s28 + $0x2358] sm:$0xff] }
  0x87   : > { %645 = vst [vmem:[%s7016_s29 + $0x728] sm:$0xff] %v644_v32  ;;  %v650_v35 = vld [vmem:[%s7011_s28 + $0x2360] sm:$0xff]  ;;  %647 = vst [vmem:[%s7016_s29 + $0x730] sm:$0xff] %v646_v33  ;;  %v652_v36 = vld [vmem:[%s7011_s28 + $0x2368] sm:$0xff] }
  0x88   : > { %649 = vst [vmem:[%s7016_s29 + $0x738] sm:$0xff] %v648_v34  ;;  %651 = vst [vmem:[%s7016_s29 + $0x740] sm:$0xff] %v650_v35  ;;  %v654_v37 = vld [vmem:[%s7011_s28 + $0x2370] sm:$0xff]  ;;  %v656_v38 = vld [vmem:[%s7011_s28 + $0x2378] sm:$0xff] }
  0x89   : > { %653 = vst [vmem:[%s7016_s29 + $0x748] sm:$0xff] %v652_v36  ;;  %655 = vst [vmem:[%s7016_s29 + $0x750] sm:$0xff] %v654_v37  ;;  %v658_v39 = vld [vmem:[%s7011_s28 + $0x2380] sm:$0xff]  ;;  %v660_v40 = vld [vmem:[%s7011_s28 + $0x2388] sm:$0xff] }
  0x8a   : > { %657 = vst [vmem:[%s7016_s29 + $0x758] sm:$0xff] %v656_v38  ;;  %v662_v41 = vld [vmem:[%s7011_s28 + $0x2390] sm:$0xff]  ;;  %659 = vst [vmem:[%s7016_s29 + $0x760] sm:$0xff] %v658_v39  ;;  %v664_v42 = vld [vmem:[%s7011_s28 + $0x2398] sm:$0xff] }
  0x8b   : > { %661 = vst [vmem:[%s7016_s29 + $0x768] sm:$0xff] %v660_v40  ;;  %663 = vst [vmem:[%s7016_s29 + $0x770] sm:$0xff] %v662_v41  ;;  %v666_v43 = vld [vmem:[%s7011_s28 + $0x23a0] sm:$0xff]  ;;  %v668_v44 = vld [vmem:[%s7011_s28 + $0x23a8] sm:$0xff] }
  0x8c   : > { %665 = vst [vmem:[%s7016_s29 + $0x778] sm:$0xff] %v664_v42  ;;  %667 = vst [vmem:[%s7016_s29 + $0x780] sm:$0xff] %v666_v43  ;;  %v670_v45 = vld [vmem:[%s7011_s28 + $0x23b0] sm:$0xff]  ;;  %v672_v46 = vld [vmem:[%s7011_s28 + $0x23b8] sm:$0xff] }
  0x8d   : > { %669 = vst [vmem:[%s7016_s29 + $0x788] sm:$0xff] %v668_v44  ;;  %v674_v47 = vld [vmem:[%s7011_s28 + $0x23c0] sm:$0xff]  ;;  %671 = vst [vmem:[%s7016_s29 + $0x790] sm:$0xff] %v670_v45  ;;  %v676_v48 = vld [vmem:[%s7011_s28 + $0x23c8] sm:$0xff] }
  0x8e   : > { %673 = vst [vmem:[%s7016_s29 + $0x798] sm:$0xff] %v672_v46  ;;  %675 = vst [vmem:[%s7016_s29 + $0x7a0] sm:$0xff] %v674_v47  ;;  %v678_v49 = vld [vmem:[%s7011_s28 + $0x23d0] sm:$0xff]  ;;  %v684_v52 = vld [vmem:[%s7011_s28 + $0x26bc] sm:$0xff] }
  0x8f   : > { %v680_v50 = vld [vmem:[%s7011_s28 + $0x26ac] sm:$0xff]  ;;  %677 = vst [vmem:[%s7016_s29 + $0x7a8] sm:$0xff] %v676_v48  ;;  %679 = vst [vmem:[%s7016_s29 + $0x7b0] sm:$0xff] %v678_v49  ;;  %v682_v51 = vld [vmem:[%s7011_s28 + $0x26b4] sm:$0xff] }
  0x90   : > { %681 = vst [vmem:[%s7016_s29 + $0x7bc] sm:$0xff] %v680_v50  ;;  %v686_v53 = vld [vmem:[%s7011_s28 + $0x26c4] sm:$0xff]  ;;  %683 = vst [vmem:[%s7016_s29 + $0x7c4] sm:$0xff] %v682_v51  ;;  %v688_v54 = vld [vmem:[%s7011_s28 + $0x26cc] sm:$0xff] }
  0x91   : > { %685 = vst [vmem:[%s7016_s29 + $0x7cc] sm:$0xff] %v684_v52  ;;  %687 = vst [vmem:[%s7016_s29 + $0x7d4] sm:$0xff] %v686_v53  ;;  %v690_v55 = vld [vmem:[%s7011_s28 + $0x26d4] sm:$0xff]  ;;  %v692_v56 = vld [vmem:[%s7011_s28 + $0x26dc] sm:$0xff] }
  0x92   : > { %689 = vst [vmem:[%s7016_s29 + $0x7dc] sm:$0xff] %v688_v54  ;;  %691 = vst [vmem:[%s7016_s29 + $0x7e4] sm:$0xff] %v690_v55  ;;  %v694_v57 = vld [vmem:[%s7011_s28 + $0x26e4] sm:$0xff]  ;;  %v696_v58 = vld [vmem:[%s7011_s28 + $0x26ec] sm:$0xff] }
  0x93   : > { %693 = vst [vmem:[%s7016_s29 + $0x7ec] sm:$0xff] %v692_v56  ;;  %v698_v59 = vld [vmem:[%s7011_s28 + $0x26f4] sm:$0xff]  ;;  %695 = vst [vmem:[%s7016_s29 + $0x7f4] sm:$0xff] %v694_v57  ;;  %v700_v60 = vld [vmem:[%s7011_s28 + $0x26fc] sm:$0xff] }
  0x94   : > { %697 = vst [vmem:[%s7016_s29 + $0x7fc] sm:$0xff] %v696_v58  ;;  %699 = vst [vmem:[%s7016_s29 + $0x804] sm:$0xff] %v698_v59  ;;  %v702_v61 = vld [vmem:[%s7011_s28 + $0x2704] sm:$0xff]  ;;  %v704_v62 = vld [vmem:[%s7011_s28 + $0x270c] sm:$0xff] }
  0x95   : > { %701 = vst [vmem:[%s7016_s29 + $0x80c] sm:$0xff] %v700_v60  ;;  %703 = vst [vmem:[%s7016_s29 + $0x814] sm:$0xff] %v702_v61  ;;  %v706_v63 = vld [vmem:[%s7011_s28 + $0x2714] sm:$0xff]  ;;  %v708_v0 = vld [vmem:[%s7011_s28 + $0x271c] sm:$0xff] }
  0x96   : > { %705 = vst [vmem:[%s7016_s29 + $0x81c] sm:$0xff] %v704_v62  ;;  %v710_v1 = vld [vmem:[%s7011_s28 + $0x2724] sm:$0xff]  ;;  %707 = vst [vmem:[%s7016_s29 + $0x824] sm:$0xff] %v706_v63  ;;  %v712_v2 = vld [vmem:[%s7011_s28 + $0x272c] sm:$0xff] }
  0x97   : > { %709 = vst [vmem:[%s7016_s29 + $0x82c] sm:$0xff] %v708_v0  ;;  %711 = vst [vmem:[%s7016_s29 + $0x834] sm:$0xff] %v710_v1  ;;  %v714_v3 = vld [vmem:[%s7011_s28 + $0x2734] sm:$0xff]  ;;  %v716_v4 = vld [vmem:[%s7011_s28 + $0x273c] sm:$0xff] }
  0x98   : > { %713 = vst [vmem:[%s7016_s29 + $0x83c] sm:$0xff] %v712_v2  ;;  %715 = vst [vmem:[%s7016_s29 + $0x844] sm:$0xff] %v714_v3  ;;  %v718_v5 = vld [vmem:[%s7011_s28 + $0x2744] sm:$0xff]  ;;  %v720_v6 = vld [vmem:[%s7011_s28 + $0x274c] sm:$0xff] }
  0x99   : > { %717 = vst [vmem:[%s7016_s29 + $0x84c] sm:$0xff] %v716_v4  ;;  %v722_v7 = vld [vmem:[%s7011_s28 + $0x2754] sm:$0xff]  ;;  %719 = vst [vmem:[%s7016_s29 + $0x854] sm:$0xff] %v718_v5  ;;  %v728_v10 = vld [vmem:[%s7011_s28 + $0x2a40] sm:$0xff] }
  0x9a   : > { %721 = vst [vmem:[%s7016_s29 + $0x85c] sm:$0xff] %v720_v6  ;;  %723 = vst [vmem:[%s7016_s29 + $0x864] sm:$0xff] %v722_v7  ;;  %v724_v8 = vld [vmem:[%s7011_s28 + $0x2a30] sm:$0xff]  ;;  %v726_v9 = vld [vmem:[%s7011_s28 + $0x2a38] sm:$0xff] }
  0x9b   : > { %725 = vst [vmem:[%s7016_s29 + $0x870] sm:$0xff] %v724_v8  ;;  %727 = vst [vmem:[%s7016_s29 + $0x878] sm:$0xff] %v726_v9  ;;  %v730_v11 = vld [vmem:[%s7011_s28 + $0x2a48] sm:$0xff]  ;;  %v732_v12 = vld [vmem:[%s7011_s28 + $0x2a50] sm:$0xff] }
  0x9c   : > { %729 = vst [vmem:[%s7016_s29 + $0x880] sm:$0xff] %v728_v10  ;;  %v734_v13 = vld [vmem:[%s7011_s28 + $0x2a58] sm:$0xff]  ;;  %731 = vst [vmem:[%s7016_s29 + $0x888] sm:$0xff] %v730_v11  ;;  %v736_v14 = vld [vmem:[%s7011_s28 + $0x2a60] sm:$0xff] }
  0x9d   : > { %733 = vst [vmem:[%s7016_s29 + $0x890] sm:$0xff] %v732_v12  ;;  %735 = vst [vmem:[%s7016_s29 + $0x898] sm:$0xff] %v734_v13  ;;  %v738_v15 = vld [vmem:[%s7011_s28 + $0x2a68] sm:$0xff]  ;;  %v740_v16 = vld [vmem:[%s7011_s28 + $0x2a70] sm:$0xff] }
  0x9e   : > { %737 = vst [vmem:[%s7016_s29 + $0x8a0] sm:$0xff] %v736_v14  ;;  %739 = vst [vmem:[%s7016_s29 + $0x8a8] sm:$0xff] %v738_v15  ;;  %v742_v17 = vld [vmem:[%s7011_s28 + $0x2a78] sm:$0xff]  ;;  %v744_v18 = vld [vmem:[%s7011_s28 + $0x2a80] sm:$0xff] }
  0x9f   : > { %741 = vst [vmem:[%s7016_s29 + $0x8b0] sm:$0xff] %v740_v16  ;;  %v746_v19 = vld [vmem:[%s7011_s28 + $0x2a88] sm:$0xff]  ;;  %743 = vst [vmem:[%s7016_s29 + $0x8b8] sm:$0xff] %v742_v17  ;;  %v748_v20 = vld [vmem:[%s7011_s28 + $0x2a90] sm:$0xff] }
  0xa0   : > { %745 = vst [vmem:[%s7016_s29 + $0x8c0] sm:$0xff] %v744_v18  ;;  %747 = vst [vmem:[%s7016_s29 + $0x8c8] sm:$0xff] %v746_v19  ;;  %v750_v21 = vld [vmem:[%s7011_s28 + $0x2a98] sm:$0xff]  ;;  %v752_v22 = vld [vmem:[%s7011_s28 + $0x2aa0] sm:$0xff] }
  0xa1   : > { %749 = vst [vmem:[%s7016_s29 + $0x8d0] sm:$0xff] %v748_v20  ;;  %751 = vst [vmem:[%s7016_s29 + $0x8d8] sm:$0xff] %v750_v21  ;;  %v754_v23 = vld [vmem:[%s7011_s28 + $0x2aa8] sm:$0xff]  ;;  %v756_v24 = vld [vmem:[%s7011_s28 + $0x2ab0] sm:$0xff] }
  0xa2   : > { %753 = vst [vmem:[%s7016_s29 + $0x8e0] sm:$0xff] %v752_v22  ;;  %v758_v25 = vld [vmem:[%s7011_s28 + $0x2ab8] sm:$0xff]  ;;  %755 = vst [vmem:[%s7016_s29 + $0x8e8] sm:$0xff] %v754_v23  ;;  %v760_v26 = vld [vmem:[%s7011_s28 + $0x2ac0] sm:$0xff] }
  0xa3   : > { %757 = vst [vmem:[%s7016_s29 + $0x8f0] sm:$0xff] %v756_v24  ;;  %759 = vst [vmem:[%s7016_s29 + $0x8f8] sm:$0xff] %v758_v25  ;;  %v762_v27 = vld [vmem:[%s7011_s28 + $0x2ac8] sm:$0xff]  ;;  %v764_v28 = vld [vmem:[%s7011_s28 + $0x2ad0] sm:$0xff] }
  0xa4   : > { %761 = vst [vmem:[%s7016_s29 + $0x900] sm:$0xff] %v760_v26  ;;  %763 = vst [vmem:[%s7016_s29 + $0x908] sm:$0xff] %v762_v27  ;;  %v766_v29 = vld [vmem:[%s7011_s28 + $0x2ad8] sm:$0xff]  ;;  %v772_v32 = vld [vmem:[%s7011_s28 + $0x2dc4] sm:$0xff] }
  0xa5   : > { %765 = vst [vmem:[%s7016_s29 + $0x910] sm:$0xff] %v764_v28  ;;  %v768_v30 = vld [vmem:[%s7011_s28 + $0x2db4] sm:$0xff]  ;;  %v770_v31 = vld [vmem:[%s7011_s28 + $0x2dbc] sm:$0xff]  ;;  %767 = vst [vmem:[%s7016_s29 + $0x918] sm:$0xff] %v766_v29 }
  0xa6   : > { %769 = vst [vmem:[%s7016_s29 + $0x924] sm:$0xff] %v768_v30  ;;  %771 = vst [vmem:[%s7016_s29 + $0x92c] sm:$0xff] %v770_v31  ;;  %v774_v33 = vld [vmem:[%s7011_s28 + $0x2dcc] sm:$0xff]  ;;  %v776_v34 = vld [vmem:[%s7011_s28 + $0x2dd4] sm:$0xff] }
  0xa7   : > { %773 = vst [vmem:[%s7016_s29 + $0x934] sm:$0xff] %v772_v32  ;;  %775 = vst [vmem:[%s7016_s29 + $0x93c] sm:$0xff] %v774_v33  ;;  %v778_v35 = vld [vmem:[%s7011_s28 + $0x2ddc] sm:$0xff]  ;;  %v780_v36 = vld [vmem:[%s7011_s28 + $0x2de4] sm:$0xff] }
  0xa8   : > { %777 = vst [vmem:[%s7016_s29 + $0x944] sm:$0xff] %v776_v34  ;;  %v782_v37 = vld [vmem:[%s7011_s28 + $0x2dec] sm:$0xff]  ;;  %779 = vst [vmem:[%s7016_s29 + $0x94c] sm:$0xff] %v778_v35  ;;  %v784_v38 = vld [vmem:[%s7011_s28 + $0x2df4] sm:$0xff] }
  0xa9   : > { %781 = vst [vmem:[%s7016_s29 + $0x954] sm:$0xff] %v780_v36  ;;  %783 = vst [vmem:[%s7016_s29 + $0x95c] sm:$0xff] %v782_v37  ;;  %v786_v39 = vld [vmem:[%s7011_s28 + $0x2dfc] sm:$0xff]  ;;  %v788_v40 = vld [vmem:[%s7011_s28 + $0x2e04] sm:$0xff] }
  0xaa   : > { %785 = vst [vmem:[%s7016_s29 + $0x964] sm:$0xff] %v784_v38  ;;  %787 = vst [vmem:[%s7016_s29 + $0x96c] sm:$0xff] %v786_v39  ;;  %v790_v41 = vld [vmem:[%s7011_s28 + $0x2e0c] sm:$0xff]  ;;  %v792_v42 = vld [vmem:[%s7011_s28 + $0x2e14] sm:$0xff] }
  0xab   : > { %789 = vst [vmem:[%s7016_s29 + $0x974] sm:$0xff] %v788_v40  ;;  %v794_v43 = vld [vmem:[%s7011_s28 + $0x2e1c] sm:$0xff]  ;;  %791 = vst [vmem:[%s7016_s29 + $0x97c] sm:$0xff] %v790_v41  ;;  %v796_v44 = vld [vmem:[%s7011_s28 + $0x2e24] sm:$0xff] }
  0xac   : > { %793 = vst [vmem:[%s7016_s29 + $0x984] sm:$0xff] %v792_v42  ;;  %795 = vst [vmem:[%s7016_s29 + $0x98c] sm:$0xff] %v794_v43  ;;  %v798_v45 = vld [vmem:[%s7011_s28 + $0x2e2c] sm:$0xff]  ;;  %v800_v46 = vld [vmem:[%s7011_s28 + $0x2e34] sm:$0xff] }
  0xad   : > { %797 = vst [vmem:[%s7016_s29 + $0x994] sm:$0xff] %v796_v44  ;;  %799 = vst [vmem:[%s7016_s29 + $0x99c] sm:$0xff] %v798_v45  ;;  %v802_v47 = vld [vmem:[%s7011_s28 + $0x2e3c] sm:$0xff]  ;;  %v804_v48 = vld [vmem:[%s7011_s28 + $0x2e44] sm:$0xff] }
  0xae   : > { %801 = vst [vmem:[%s7016_s29 + $0x9a4] sm:$0xff] %v800_v46  ;;  %v806_v49 = vld [vmem:[%s7011_s28 + $0x2e4c] sm:$0xff]  ;;  %803 = vst [vmem:[%s7016_s29 + $0x9ac] sm:$0xff] %v802_v47  ;;  %v808_v50 = vld [vmem:[%s7011_s28 + $0x2e54] sm:$0xff] }
  0xaf   : > { %805 = vst [vmem:[%s7016_s29 + $0x9b4] sm:$0xff] %v804_v48  ;;  %807 = vst [vmem:[%s7016_s29 + $0x9bc] sm:$0xff] %v806_v49  ;;  %v810_v51 = vld [vmem:[%s7011_s28 + $0x2e5c] sm:$0xff]  ;;  %v816_v54 = vld [vmem:[%s7011_s28 + $0x3148] sm:$0xff] }
  0xb0   : > { %v812_v52 = vld [vmem:[%s7011_s28 + $0x3138] sm:$0xff]  ;;  %809 = vst [vmem:[%s7016_s29 + $0x9c4] sm:$0xff] %v808_v50  ;;  %811 = vst [vmem:[%s7016_s29 + $0x9cc] sm:$0xff] %v810_v51  ;;  %v814_v53 = vld [vmem:[%s7011_s28 + $0x3140] sm:$0xff] }
  0xb1   : > { %813 = vst [vmem:[%s7016_s29 + $0x9d8] sm:$0xff] %v812_v52  ;;  %v818_v55 = vld [vmem:[%s7011_s28 + $0x3150] sm:$0xff]  ;;  %815 = vst [vmem:[%s7016_s29 + $0x9e0] sm:$0xff] %v814_v53  ;;  %v820_v56 = vld [vmem:[%s7011_s28 + $0x3158] sm:$0xff] }
  0xb2   : > { %817 = vst [vmem:[%s7016_s29 + $0x9e8] sm:$0xff] %v816_v54  ;;  %819 = vst [vmem:[%s7016_s29 + $0x9f0] sm:$0xff] %v818_v55  ;;  %v822_v57 = vld [vmem:[%s7011_s28 + $0x3160] sm:$0xff]  ;;  %v824_v58 = vld [vmem:[%s7011_s28 + $0x3168] sm:$0xff] }
  0xb3   : > { %821 = vst [vmem:[%s7016_s29 + $0x9f8] sm:$0xff] %v820_v56  ;;  %823 = vst [vmem:[%s7016_s29 + $0xa00] sm:$0xff] %v822_v57  ;;  %v826_v59 = vld [vmem:[%s7011_s28 + $0x3170] sm:$0xff]  ;;  %v828_v60 = vld [vmem:[%s7011_s28 + $0x3178] sm:$0xff] }
  0xb4   : > { %825 = vst [vmem:[%s7016_s29 + $0xa08] sm:$0xff] %v824_v58  ;;  %v830_v61 = vld [vmem:[%s7011_s28 + $0x3180] sm:$0xff]  ;;  %827 = vst [vmem:[%s7016_s29 + $0xa10] sm:$0xff] %v826_v59  ;;  %v832_v62 = vld [vmem:[%s7011_s28 + $0x3188] sm:$0xff] }
  0xb5   : > { %829 = vst [vmem:[%s7016_s29 + $0xa18] sm:$0xff] %v828_v60  ;;  %831 = vst [vmem:[%s7016_s29 + $0xa20] sm:$0xff] %v830_v61  ;;  %v834_v63 = vld [vmem:[%s7011_s28 + $0x3190] sm:$0xff]  ;;  %v836_v0 = vld [vmem:[%s7011_s28 + $0x3198] sm:$0xff] }
  0xb6   : > { %833 = vst [vmem:[%s7016_s29 + $0xa28] sm:$0xff] %v832_v62  ;;  %835 = vst [vmem:[%s7016_s29 + $0xa30] sm:$0xff] %v834_v63  ;;  %v838_v1 = vld [vmem:[%s7011_s28 + $0x31a0] sm:$0xff]  ;;  %v840_v2 = vld [vmem:[%s7011_s28 + $0x31a8] sm:$0xff] }
  0xb7   : > { %837 = vst [vmem:[%s7016_s29 + $0xa38] sm:$0xff] %v836_v0  ;;  %v842_v3 = vld [vmem:[%s7011_s28 + $0x31b0] sm:$0xff]  ;;  %839 = vst [vmem:[%s7016_s29 + $0xa40] sm:$0xff] %v838_v1  ;;  %v844_v4 = vld [vmem:[%s7011_s28 + $0x31b8] sm:$0xff] }
  0xb8   : > { %841 = vst [vmem:[%s7016_s29 + $0xa48] sm:$0xff] %v840_v2  ;;  %843 = vst [vmem:[%s7016_s29 + $0xa50] sm:$0xff] %v842_v3  ;;  %v846_v5 = vld [vmem:[%s7011_s28 + $0x31c0] sm:$0xff]  ;;  %v848_v6 = vld [vmem:[%s7011_s28 + $0x31c8] sm:$0xff] }
  0xb9   : > { %845 = vst [vmem:[%s7016_s29 + $0xa58] sm:$0xff] %v844_v4  ;;  %847 = vst [vmem:[%s7016_s29 + $0xa60] sm:$0xff] %v846_v5  ;;  %v850_v7 = vld [vmem:[%s7011_s28 + $0x31d0] sm:$0xff]  ;;  %v852_v8 = vld [vmem:[%s7011_s28 + $0x31d8] sm:$0xff] }
  0xba   : > { %849 = vst [vmem:[%s7016_s29 + $0xa68] sm:$0xff] %v848_v6  ;;  %v854_v9 = vld [vmem:[%s7011_s28 + $0x31e0] sm:$0xff]  ;;  %851 = vst [vmem:[%s7016_s29 + $0xa70] sm:$0xff] %v850_v7  ;;  %v860_v12 = vld [vmem:[%s7011_s28 + $0x34cc] sm:$0xff] }
  0xbb   : > { %853 = vst [vmem:[%s7016_s29 + $0xa78] sm:$0xff] %v852_v8  ;;  %855 = vst [vmem:[%s7016_s29 + $0xa80] sm:$0xff] %v854_v9  ;;  %v856_v10 = vld [vmem:[%s7011_s28 + $0x34bc] sm:$0xff]  ;;  %v858_v11 = vld [vmem:[%s7011_s28 + $0x34c4] sm:$0xff] }
  0xbc   : > { %857 = vst [vmem:[%s7016_s29 + $0xa8c] sm:$0xff] %v856_v10  ;;  %859 = vst [vmem:[%s7016_s29 + $0xa94] sm:$0xff] %v858_v11  ;;  %v862_v13 = vld [vmem:[%s7011_s28 + $0x34d4] sm:$0xff]  ;;  %v864_v14 = vld [vmem:[%s7011_s28 + $0x34dc] sm:$0xff] }
  0xbd   : > { %861 = vst [vmem:[%s7016_s29 + $0xa9c] sm:$0xff] %v860_v12  ;;  %v866_v15 = vld [vmem:[%s7011_s28 + $0x34e4] sm:$0xff]  ;;  %863 = vst [vmem:[%s7016_s29 + $0xaa4] sm:$0xff] %v862_v13  ;;  %v868_v16 = vld [vmem:[%s7011_s28 + $0x34ec] sm:$0xff] }
  0xbe   : > { %865 = vst [vmem:[%s7016_s29 + $0xaac] sm:$0xff] %v864_v14  ;;  %867 = vst [vmem:[%s7016_s29 + $0xab4] sm:$0xff] %v866_v15  ;;  %v870_v17 = vld [vmem:[%s7011_s28 + $0x34f4] sm:$0xff]  ;;  %v872_v18 = vld [vmem:[%s7011_s28 + $0x34fc] sm:$0xff] }
  0xbf   : > { %869 = vst [vmem:[%s7016_s29 + $0xabc] sm:$0xff] %v868_v16  ;;  %871 = vst [vmem:[%s7016_s29 + $0xac4] sm:$0xff] %v870_v17  ;;  %v874_v19 = vld [vmem:[%s7011_s28 + $0x3504] sm:$0xff]  ;;  %v876_v20 = vld [vmem:[%s7011_s28 + $0x350c] sm:$0xff] }
  0xc0   : > { %873 = vst [vmem:[%s7016_s29 + $0xacc] sm:$0xff] %v872_v18  ;;  %v878_v21 = vld [vmem:[%s7011_s28 + $0x3514] sm:$0xff]  ;;  %875 = vst [vmem:[%s7016_s29 + $0xad4] sm:$0xff] %v874_v19  ;;  %v880_v22 = vld [vmem:[%s7011_s28 + $0x351c] sm:$0xff] }
  0xc1   : > { %877 = vst [vmem:[%s7016_s29 + $0xadc] sm:$0xff] %v876_v20  ;;  %879 = vst [vmem:[%s7016_s29 + $0xae4] sm:$0xff] %v878_v21  ;;  %v882_v23 = vld [vmem:[%s7011_s28 + $0x3524] sm:$0xff]  ;;  %v884_v24 = vld [vmem:[%s7011_s28 + $0x352c] sm:$0xff] }
  0xc2   : > { %881 = vst [vmem:[%s7016_s29 + $0xaec] sm:$0xff] %v880_v22  ;;  %883 = vst [vmem:[%s7016_s29 + $0xaf4] sm:$0xff] %v882_v23  ;;  %v886_v25 = vld [vmem:[%s7011_s28 + $0x3534] sm:$0xff]  ;;  %v888_v26 = vld [vmem:[%s7011_s28 + $0x353c] sm:$0xff] }
  0xc3   : > { %885 = vst [vmem:[%s7016_s29 + $0xafc] sm:$0xff] %v884_v24  ;;  %v890_v27 = vld [vmem:[%s7011_s28 + $0x3544] sm:$0xff]  ;;  %887 = vst [vmem:[%s7016_s29 + $0xb04] sm:$0xff] %v886_v25  ;;  %v892_v28 = vld [vmem:[%s7011_s28 + $0x354c] sm:$0xff] }
  0xc4   : > { %889 = vst [vmem:[%s7016_s29 + $0xb0c] sm:$0xff] %v888_v26  ;;  %891 = vst [vmem:[%s7016_s29 + $0xb14] sm:$0xff] %v890_v27  ;;  %v894_v29 = vld [vmem:[%s7011_s28 + $0x3554] sm:$0xff]  ;;  %v896_v30 = vld [vmem:[%s7011_s28 + $0x355c] sm:$0xff] }
  0xc5   : > { %893 = vst [vmem:[%s7016_s29 + $0xb1c] sm:$0xff] %v892_v28  ;;  %895 = vst [vmem:[%s7016_s29 + $0xb24] sm:$0xff] %v894_v29  ;;  %v898_v31 = vld [vmem:[%s7011_s28 + $0x3564] sm:$0xff]  ;;  %v5521_v32 = vld [vmem:[%s7011_s28 + $0xb0] sm:$0xf] }
  0xc6   : > { %897 = vst [vmem:[%s7016_s29 + $0xb2c] sm:$0xff] %v896_v30  ;;  %v5523_v33 = vld [vmem:[%s7011_s28 + $0x434] sm:$0xf]  ;;  %899 = vst [vmem:[%s7016_s29 + $0xb34] sm:$0xff] %v898_v31  ;;  %v5525_v34 = vld [vmem:[%s7011_s28 + $0x7b8] sm:$0xf] }
  0xc7   : > { %5522 = vst [vmem:[%s7016_s29 + $0xb0] sm:$0xf] %v5521_v32  ;;  %5524 = vst [vmem:[%s7016_s29 + $0x164] sm:$0xf] %v5523_v33  ;;  %v5527_v35 = vld [vmem:[%s7011_s28 + $0xb3c] sm:$0xf] }
  0xc8   : > { %v5529_v36 = vld [vmem:[%s7011_s28 + $0xec0] sm:$0xf]  ;;  %5526 = vst [vmem:[%s7016_s29 + $0x218] sm:$0xf] %v5525_v34  ;;  %5528 = vst [vmem:[%s7016_s29 + $0x2cc] sm:$0xf] %v5527_v35 }
  0xc9   : > { %5530 = vst [vmem:[%s7016_s29 + $0x380] sm:$0xf] %v5529_v36  ;;  %v5531_v37 = vld [vmem:[%s7011_s28 + $0x1244] sm:$0xf]  ;;  %v5533_v38 = vld [vmem:[%s7011_s28 + $0x15c8] sm:$0xf] }
  0xca   : > { %v5535_v39 = vld [vmem:[%s7011_s28 + $0x194c] sm:$0xf]  ;;  %5532 = vst [vmem:[%s7016_s29 + $0x434] sm:$0xf] %v5531_v37  ;;  %5534 = vst [vmem:[%s7016_s29 + $0x4e8] sm:$0xf] %v5533_v38 }
  0xcb   : > { %5536 = vst [vmem:[%s7016_s29 + $0x59c] sm:$0xf] %v5535_v39  ;;  %v5537_v40 = vld [vmem:[%s7011_s28 + $0x1cd0] sm:$0xf]  ;;  %v5539_v41 = vld [vmem:[%s7011_s28 + $0x2054] sm:$0xf] }
  0xcc   : > { %v5541_v42 = vld [vmem:[%s7011_s28 + $0x23d8] sm:$0xf]  ;;  %5538 = vst [vmem:[%s7016_s29 + $0x650] sm:$0xf] %v5537_v40  ;;  %5540 = vst [vmem:[%s7016_s29 + $0x704] sm:$0xf] %v5539_v41 }
  0xcd   : > { %5542 = vst [vmem:[%s7016_s29 + $0x7b8] sm:$0xf] %v5541_v42  ;;  %v5543_v43 = vld [vmem:[%s7011_s28 + $0x275c] sm:$0xf]  ;;  %v5545_v44 = vld [vmem:[%s7011_s28 + $0x2ae0] sm:$0xf] }
  0xce   : > { %v5547_v45 = vld [vmem:[%s7011_s28 + $0x2e64] sm:$0xf]  ;;  %5544 = vst [vmem:[%s7016_s29 + $0x86c] sm:$0xf] %v5543_v43  ;;  %5546 = vst [vmem:[%s7016_s29 + $0x920] sm:$0xf] %v5545_v44 }
  0xcf   : > { %5548 = vst [vmem:[%s7016_s29 + $0x9d4] sm:$0xf] %v5547_v45  ;;  %v5549_v46 = vld [vmem:[%s7011_s28 + $0x31e8] sm:$0xf]  ;;  %v5551_v47 = vld [vmem:[%s7011_s28 + $0x356c] sm:$0xf] }
  0xd0   : > { %5550 = vst [vmem:[%s7016_s29 + $0xa88] sm:$0xf] %v5549_v46  ;;  %5552 = vst [vmem:[%s7016_s29 + $0xb3c] sm:$0xf] %v5551_v47 }
  0xd1 PF: > { %p5553_p8 = scmp.ge.s32.totalorder %s6938_s16, 1  ;;  %p951_p9 = scmp.lt.s32.totalorder %s6938_s16, 6 }
  0xd3   : > { %p952_p10 = pnand %p5553_p8, %p951_p9 }
  0xd4   : > { %s958_s30 = sand.u32 (!%p952_p10), 1, %s6922_s12   ;;  %v6940_v48 = vmov (!%p952_p10), 0   ;;  %v7795_v17 = vld [vmem:[%s8665_s0] sm:$0xff] (!%p952_p10)   ;;  %s1003_s10 = smul.u32 (!%p952_p10), 45, %s6930_s14 }
  0xd5   : > { %955 = sbr.rel (%p952_p10) target bundleno = 847 (0x34f), region = 54  ;;  %3464 = vmatprep.mubr.bf16.mxu0 (!%p952_p10), %v6940_v48  ;;  %3507 = vmatprep.mubr.bf16.mxu1 (!%p952_p10), %v6940_v48 }
  0xd6   : > { %s6136_s4 = smul.u32 (!%p952_p10), 2880, %s958_s30  ;;  %p1004_p11 = scmp.lt.s32.totalorder (!%p952_p10), %s1003_s10, 224 }
  0xd7   : > { %s8121_s20 = smul.u32 (!%p952_p10), 360, %s958_s30 }
  0xd8   : > { %s7758_s5 = scalar_lea.vmem (!%p952_p10), [#allocation2], %s6136_s4 }
  0xd9   : > { %v6181_v49 = vld [vmem:[%s7758_s5 + $0x4] ss:$180 sps:$4 sm:$0xff] (!%p952_p10)   ;;  %v6183_v50 = vld [vmem:[%s7758_s5] ss:$180 sps:$4 sm:$0xff] (!%p952_p10)   ;;  %v6186_v52 = vld [vmem:[%s7758_s5 + $0x168] ss:$180 sps:$4 sm:$0xff] (!%p952_p10)  }
  0xda   : > { %3432 = vmatprep.subr.bf16.mxu0 (!%p952_p10), %v6181_v49  ;;  %v6184_v51 = vld [vmem:[%s7758_s5 + $0x16c] ss:$180 sps:$4 sm:$0xff] (!%p952_p10)   ;;  %v6187_v53 = vld [vmem:[%s7758_s5 + $0x2d4] ss:$180 sps:$4 sm:$0xff] (!%p952_p10)   ;;  %v6189_v55 = vld [vmem:[%s7758_s5 + $0x2d0] ss:$180 sps:$4 sm:$0xff] (!%p952_p10)  }
  0xdb   : > { %3433 = vmatpush1.bf16.msra.mxu0 (!%p952_p10), %v6183_v50  ;;  %v6190_v54 = vld [vmem:[%s7758_s5 + $0xc] ss:$180 sps:$4 sm:$0xff] (!%p952_p10)   ;;  %v6194_v56 = vld [vmem:[%s7758_s5 + $0x8] ss:$180 sps:$4 sm:$0xff] (!%p952_p10)   ;;  %v6200_v59 = vld [vmem:[%s7758_s5 + $0x170] ss:$180 sps:$4 sm:$0xff] (!%p952_p10)  }
  0xdc   : > { %3434 = vmatprep.subr.bf16.mxu0 %v6184_v51  ;;  %3475 = vmatprep.subr.bf16.mxu1 %v6190_v54  ;;  %v6196_v57 = vld [vmem:[%s7758_s5 + $0x174] ss:$180 sps:$4 sm:$0xff]   ;;  %v6192_v58 = vld [vmem:[%s7758_s5 + $0x43c] ss:$180 sps:$4 sm:$0xff]   ;;  %v6195_v61 = vld [vmem:[%s7758_s5 + $0x438] ss:$180 sps:$4 sm:$0xff]  }
  0xdd   : > { %3476 = vmatpush1.bf16.msra.mxu1 %v6194_v56  ;;  %v6202_v60 = vld [vmem:[%s7758_s5 + $0x2dc] ss:$180 sps:$4 sm:$0xff]   ;;  %v6198_v62 = vld [vmem:[%s7758_s5 + $0x5a4] ss:$180 sps:$4 sm:$0xff]   ;;  %v6201_v1 = vld [vmem:[%s7758_s5 + $0x5a0] ss:$180 sps:$4 sm:$0xff]  }
  0xde   : > { %3477 = vmatprep.subr.bf16.mxu1 %v6196_v57  ;;  %v6206_v63 = vld [vmem:[%s7758_s5 + $0x2d8] ss:$180 sps:$4 sm:$0xff]   ;;  %v6212_v3 = vld [vmem:[%s7758_s5 + $0x440] ss:$180 sps:$4 sm:$0xff]   ;;  %v6207_v5 = vld [vmem:[%s7758_s5 + $0x708] ss:$180 sps:$4 sm:$0xff]  }
  0xdf   : > { %3435 = vmatpush1.bf16.msra.mxu0 %v6186_v52  ;;  %v6208_v0 = vld [vmem:[%s7758_s5 + $0x444] ss:$180 sps:$4 sm:$0xff]   ;;  %v6204_v2 = vld [vmem:[%s7758_s5 + $0x70c] ss:$180 sps:$4 sm:$0xff]   ;;  %v6210_v6 = vld [vmem:[%s7758_s5 + $0x874] ss:$180 sps:$4 sm:$0xff]  }
  0xe0   : > { %3436 = vmatprep.subr.bf16.mxu0 %v6187_v53  ;;  %v6214_v4 = vld [vmem:[%s7758_s5 + $0x5ac] ss:$180 sps:$4 sm:$0xff]   ;;  %v6218_v7 = vld [vmem:[%s7758_s5 + $0x5a8] ss:$180 sps:$4 sm:$0xff]   ;;  %v6213_v9 = vld [vmem:[%s7758_s5 + $0x870] ss:$180 sps:$4 sm:$0xff]  }
  0xe1   : > { %3478 = vmatpush1.bf16.msra.mxu1 %v6200_v59  ;;  %v6220_v8 = vld [vmem:[%s7758_s5 + $0x714] ss:$180 sps:$4 sm:$0xff]   ;;  %v6216_v10 = vld [vmem:[%s7758_s5 + $0x9dc] ss:$180 sps:$4 sm:$0xff]   ;;  %v6219_v13 = vld [vmem:[%s7758_s5 + $0x9d8] ss:$180 sps:$4 sm:$0xff]  }
  0xe2   : > { %3479 = vmatprep.subr.bf16.mxu1 %v6202_v60  ;;  %v6223_v11 = vld [vmem:[%s7758_s5 + $0x710] ss:$180 sps:$4 sm:$0xff]   ;;  %v6226_v14 = vld [vmem:[%s7758_s5 + $0x14] ss:$180 sps:$4 sm:$0xff]   ;;  %v6229_v15 = vld [vmem:[%s7758_s5 + $0x878] ss:$180 sps:$4 sm:$0xff]  }
  0xe3   : > { %3437 = vmatpush1.bf16.msra.mxu0 %v6189_v55  ;;  %v6227_v12 = vld [vmem:[%s7758_s5 + $0x87c] ss:$180 sps:$4 sm:$0xff]   ;;  %v6233_v16 = vld [vmem:[%s7758_s5 + $0x9e4] ss:$180 sps:$4 sm:$0xff]   ;;  %v6235_v20 = vld [vmem:[%s7758_s5 + $0x9e0] ss:$180 sps:$4 sm:$0xff]  }
  0xe4   : > { %3438 = vmatprep.subr.bf16.mxu0 %v6192_v58  ;;  %v6224_v18 = vld [vmem:[%s7758_s5 + $0x10] ss:$180 sps:$4 sm:$0xff]   ;;  %v6230_v22 = vld [vmem:[%s7758_s5 + $0x178] ss:$180 sps:$4 sm:$0xff]   ;;  %v6236_v26 = vld [vmem:[%s7758_s5 + $0x2e0] ss:$180 sps:$4 sm:$0xff]  }
  0xe5   : > { %3480 = vmatpush1.bf16.msra.mxu1 %v6206_v63  ;;  %v6232_v19 = vld [vmem:[%s7758_s5 + $0x17c] ss:$180 sps:$4 sm:$0xff]   ;;  %v6238_v23 = vld [vmem:[%s7758_s5 + $0x2e4] ss:$180 sps:$4 sm:$0xff]   ;;  %v6244_v27 = vld [vmem:[%s7758_s5 + $0x44c] ss:$180 sps:$4 sm:$0xff]  }
  0xe6   : > { %3481 = vmatprep.subr.bf16.mxu1 %v6208_v0  ;;  %v6241_v21 = vld [vmem:[%s7758_s5 + $0x1c] ss:$180 sps:$4 sm:$0xff]   ;;  %v6239_v24 = vld [vmem:[%s7758_s5 + $0x18] ss:$180 sps:$4 sm:$0xff]   ;;  %v6245_v28 = vld [vmem:[%s7758_s5 + $0x180] ss:$180 sps:$4 sm:$0xff]  }
  0xe7   : > { %3439 = vmatpush1.bf16.msra.mxu0 %v6195_v61  ;;  %v6247_v25 = vld [vmem:[%s7758_s5 + $0x184] ss:$180 sps:$4 sm:$0xff]   ;;  %v6253_v29 = vld [vmem:[%s7758_s5 + $0x2ec] ss:$180 sps:$4 sm:$0xff]   ;;  %v6242_v30 = vld [vmem:[%s7758_s5 + $0x448] ss:$180 sps:$4 sm:$0xff]  }
  0xe8   : > { %3440 = vmatprep.subr.bf16.mxu0 %v6198_v62  ;;  %v6250_v31 = vld [vmem:[%s7758_s5 + $0x5b4] ss:$180 sps:$4 sm:$0xff]   ;;  %v6248_v34 = vld [vmem:[%s7758_s5 + $0x5b0] ss:$180 sps:$4 sm:$0xff]   ;;  %v6254_v38 = vld [vmem:[%s7758_s5 + $0x718] ss:$180 sps:$4 sm:$0xff]  }
  0xe9   : > { %3482 = vmatpush1.bf16.msra.mxu1 %v6212_v3  ;;  %v6251_v32 = vld [vmem:[%s7758_s5 + $0x2e8] ss:$180 sps:$4 sm:$0xff]   ;;  %v6257_v36 = vld [vmem:[%s7758_s5 + $0x450] ss:$180 sps:$4 sm:$0xff]   ;;  %v6263_v40 = vld [vmem:[%s7758_s5 + $0x5b8] ss:$180 sps:$4 sm:$0xff]  }
  0xea   : > { %3483 = vmatprep.subr.bf16.mxu1 %v6214_v4  ;;  %v6259_v33 = vld [vmem:[%s7758_s5 + $0x454] ss:$180 sps:$4 sm:$0xff]   ;;  %v6256_v35 = vld [vmem:[%s7758_s5 + $0x71c] ss:$180 sps:$4 sm:$0xff]   ;;  %v6262_v39 = vld [vmem:[%s7758_s5 + $0x884] ss:$180 sps:$4 sm:$0xff]  }
  0xeb   : > { %3441 = vmatpush1.bf16.msra.mxu0 %v6201_v1  ;;  %v6265_v37 = vld [vmem:[%s7758_s5 + $0x5bc] ss:$180 sps:$4 sm:$0xff]   ;;  %v6271_v41 = vld [vmem:[%s7758_s5 + $0x724] ss:$180 sps:$4 sm:$0xff]   ;;  %v6260_v42 = vld [vmem:[%s7758_s5 + $0x880] ss:$180 sps:$4 sm:$0xff]  }
  0xec   : > { %3442 = vmatprep.subr.bf16.mxu0 %v6204_v2  ;;  %v6268_v43 = vld [vmem:[%s7758_s5 + $0x9ec] ss:$180 sps:$4 sm:$0xff]   ;;  %v6266_v46 = vld [vmem:[%s7758_s5 + $0x9e8] ss:$180 sps:$4 sm:$0xff]   ;;  %v6274_v47 = vld [vmem:[%s7758_s5 + $0x24] ss:$180 sps:$4 sm:$0xff]  }
  0xed   : > { %3484 = vmatpush1.bf16.msra.mxu1 %v6218_v7  ;;  %v6269_v44 = vld [vmem:[%s7758_s5 + $0x720] ss:$180 sps:$4 sm:$0xff]   ;;  %v6275_v49 = vld [vmem:[%s7758_s5 + $0x888] ss:$180 sps:$4 sm:$0xff]   ;;  %v6281_v53 = vld [vmem:[%s7758_s5 + $0x9f0] ss:$180 sps:$4 sm:$0xff]  }
  0xee   : > { %3485 = vmatprep.subr.bf16.mxu1 %v6220_v8  ;;  %v6277_v45 = vld [vmem:[%s7758_s5 + $0x88c] ss:$180 sps:$4 sm:$0xff]   ;;  %v6283_v50 = vld [vmem:[%s7758_s5 + $0x9f4] ss:$180 sps:$4 sm:$0xff]   ;;  %v6284_v59 = vld [vmem:[%s7758_s5 + $0x2f0] ss:$180 sps:$4 sm:$0xff]  }
  0xef   : > { %3443 = vmatpush1.bf16.msra.mxu0 %v6207_v5  ;;  %v6272_v51 = vld [vmem:[%s7758_s5 + $0x20] ss:$180 sps:$4 sm:$0xff]   ;;  %v6278_v55 = vld [vmem:[%s7758_s5 + $0x188] ss:$180 sps:$4 sm:$0xff]   ;;  %v6293_v61 = vld [vmem:[%s7758_s5 + $0x190] ss:$180 sps:$4 sm:$0xff]  }
  0xf0   : > { %3444 = vmatprep.subr.bf16.mxu0 %v6210_v6  ;;  %v6280_v52 = vld [vmem:[%s7758_s5 + $0x18c] ss:$180 sps:$4 sm:$0xff]   ;;  %v6286_v56 = vld [vmem:[%s7758_s5 + $0x2f4] ss:$180 sps:$4 sm:$0xff]   ;;  %v6292_v60 = vld [vmem:[%s7758_s5 + $0x45c] ss:$180 sps:$4 sm:$0xff]  }
  0xf1   : > { %3486 = vmatpush1.bf16.msra.mxu1 %v6223_v11  ;;  %v6289_v54 = vld [vmem:[%s7758_s5 + $0x2c] ss:$180 sps:$4 sm:$0xff]   ;;  %v6287_v57 = vld [vmem:[%s7758_s5 + $0x28] ss:$180 sps:$4 sm:$0xff]   ;;  %v6298_v0 = vld [vmem:[%s7758_s5 + $0x5c4] ss:$180 sps:$4 sm:$0xff]  }
  0xf2   : > { %3487 = vmatprep.subr.bf16.mxu1 %v6227_v12  ;;  %v6295_v58 = vld [vmem:[%s7758_s5 + $0x194] ss:$180 sps:$4 sm:$0xff]   ;;  %v6301_v62 = vld [vmem:[%s7758_s5 + $0x2fc] ss:$180 sps:$4 sm:$0xff]   ;;  %v6290_v63 = vld [vmem:[%s7758_s5 + $0x458] ss:$180 sps:$4 sm:$0xff]  }
  0xf3   : > { %3445 = vmatpush1.bf16.msra.mxu0 %v6213_v9  ;;  %v6299_v1 = vld [vmem:[%s7758_s5 + $0x2f8] ss:$180 sps:$4 sm:$0xff]   ;;  %v6296_v3 = vld [vmem:[%s7758_s5 + $0x5c0] ss:$180 sps:$4 sm:$0xff]   ;;  %v6302_v7 = vld [vmem:[%s7758_s5 + $0x728] ss:$180 sps:$4 sm:$0xff]  }
  0xf4   : > { %3446 = vmatprep.subr.bf16.mxu0 %v6216_v10  ;;  %v6307_v2 = vld [vmem:[%s7758_s5 + $0x464] ss:$180 sps:$4 sm:$0xff]   ;;  %v6304_v4 = vld [vmem:[%s7758_s5 + $0x72c] ss:$180 sps:$4 sm:$0xff]   ;;  %v6310_v8 = vld [vmem:[%s7758_s5 + $0x894] ss:$180 sps:$4 sm:$0xff]  }
  0xf5   : > { %3488 = vmatpush1.bf16.msra.mxu1 %v6229_v15  ;;  %v6305_v5 = vld [vmem:[%s7758_s5 + $0x460] ss:$180 sps:$4 sm:$0xff]   ;;  %v6311_v9 = vld [vmem:[%s7758_s5 + $0x5c8] ss:$180 sps:$4 sm:$0xff]   ;;  %v6308_v11 = vld [vmem:[%s7758_s5 + $0x890] ss:$180 sps:$4 sm:$0xff]  }
  0xf6   : > { %3489 = vmatprep.subr.bf16.mxu1 %v6233_v16  ;;  %v6313_v6 = vld [vmem:[%s7758_s5 + $0x5cc] ss:$180 sps:$4 sm:$0xff]   ;;  %v6319_v10 = vld [vmem:[%s7758_s5 + $0x734] ss:$180 sps:$4 sm:$0xff]   ;;  %v6316_v12 = vld [vmem:[%s7758_s5 + $0x9fc] ss:$180 sps:$4 sm:$0xff]  }
  0xf7   : > { %3447 = vmatpush1.bf16.msra.mxu0 %v6219_v13  ;;  %v6317_v13 = vld [vmem:[%s7758_s5 + $0x730] ss:$180 sps:$4 sm:$0xff]   ;;  %v6314_v15 = vld [vmem:[%s7758_s5 + $0x9f8] ss:$180 sps:$4 sm:$0xff]   ;;  %v6322_v16 = vld [vmem:[%s7758_s5 + $0x34] ss:$180 sps:$4 sm:$0xff]  }
  0xf8   : > { %3518 = vmatprep.subr.bf16.mxu0 %v6226_v14  ;;  %v6325_v14 = vld [vmem:[%s7758_s5 + $0x89c] ss:$180 sps:$4 sm:$0xff]   ;;  %s8677_s10 = smov (!%p1004_p11, %s1003_s10), 224  ;;  %s8143_s12 = scalar_lea.vmem [#allocation3], %s8121_s20 }
  0xf9   : > { %3490 = vmatpush1.bf16.msra.mxu1 %v6235_v20  ;;  %v6320_v20 = vld [vmem:[%s7758_s5 + $0x30] ss:$180 sps:$4 sm:$0xff]   ;;  %s8041_s19 = scalar_lea.vmem %s8667_s2, %s8677_s10  ;;  %s6105_s25 = smul.u32 (%p6998_p6), 180, %s6930_s14 }
  0xfa   : > { %3465 = vmatmul.mubr.bf16.vlgmr.msra.gmra.mrb[0].mxu0 %v7795_v17  ;;  %3561 = vmatprep.subr.bf16.mxu1 %v6241_v21  ;;  %v6328_v21 = vld [vmem:[%s7758_s5 + $0x19c] ss:$180 sps:$4 sm:$0xff]  }
  0xfb   : > { %3519 = vmatpush1.bf16.msra.mxu0 %v6224_v18  ;;  %3550 = vmatprep.mubr.bf16.mxu0 %v6940_v48  ;;  %v6323_v18 = vld [vmem:[%s7758_s5 + $0x898] ss:$180 sps:$4 sm:$0xff]   ;;  %s8562_s27 = scalar_lea.vmem (%p6998_p6), %s8668_s3, %s6105_s25 }
  0xfc   : > { %3520 = vmatprep.subr.bf16.mxu0 %v6232_v19  ;;  %3508 = vmatmul.mubr.bf16.vlgmr.msra.gmra.mrb[0].mxu1 %v7795_v17  ;;  %v6331_v19 = vld [vmem:[%s7758_s5 + $0xa04] ss:$180 sps:$4 sm:$0xff]  }
  0xfd   : > { %3562 = vmatpush1.bf16.msra.mxu1 %v6239_v24  ;;  %3593 = vmatprep.mubr.bf16.mxu1 %v6940_v48  ;;  %v6326_v24 = vld [vmem:[%s7758_s5 + $0x198] ss:$180 sps:$4 sm:$0xff]  }
  0xfe   : > { %3563 = vmatprep.subr.bf16.mxu1 %v6247_v25  ;;  %v6334_v25 = vld [vmem:[%s7758_s5 + $0x304] ss:$180 sps:$4 sm:$0xff]  }
  0xff   : > { %3521 = vmatpush1.bf16.msra.mxu0 %v6230_v22  ;;  %v6329_v22 = vld [vmem:[%s7758_s5 + $0xa00] ss:$180 sps:$4 sm:$0xff]  }
 0x100   : > { %3522 = vmatprep.subr.bf16.mxu0 %v6238_v23  ;;  %v6337_v23 = vld [vmem:[%s7758_s5 + $0x3c] ss:$180 sps:$4 sm:$0xff]  }
 0x101   : > { %3564 = vmatpush1.bf16.msra.mxu1 %v6245_v28  ;;  %v6332_v28 = vld [vmem:[%s7758_s5 + $0x300] ss:$180 sps:$4 sm:$0xff]  }
 0x102   : > { %3565 = vmatprep.subr.bf16.mxu1 %v6253_v29  ;;  %v6340_v29 = vld [vmem:[%s7758_s5 + $0x46c] ss:$180 sps:$4 sm:$0xff]  }
 0x103   : > { %3523 = vmatpush1.bf16.msra.mxu0 %v6236_v26  ;;  %v6335_v26 = vld [vmem:[%s7758_s5 + $0x38] ss:$180 sps:$4 sm:$0xff]  }
 0x104   : > { %3524 = vmatprep.subr.bf16.mxu0 %v6244_v27  ;;  %v6343_v27 = vld [vmem:[%s7758_s5 + $0x1a4] ss:$180 sps:$4 sm:$0xff]  }
 0x105   : > { %3566 = vmatpush1.bf16.msra.mxu1 %v6251_v32  ;;  %v6338_v32 = vld [vmem:[%s7758_s5 + $0x468] ss:$180 sps:$4 sm:$0xff]  }
 0x106   : > { %3567 = vmatprep.subr.bf16.mxu1 %v6259_v33  ;;  %v6346_v33 = vld [vmem:[%s7758_s5 + $0x5d4] ss:$180 sps:$4 sm:$0xff]  }
 0x107   : > { %3525 = vmatpush1.bf16.msra.mxu0 %v6242_v30  ;;  %v6341_v30 = vld [vmem:[%s7758_s5 + $0x1a0] ss:$180 sps:$4 sm:$0xff]  }
 0x108   : > { %3526 = vmatprep.subr.bf16.mxu0 %v6250_v31  ;;  %v6349_v31 = vld [vmem:[%s7758_s5 + $0x30c] ss:$180 sps:$4 sm:$0xff]  }
 0x109   : > { %3568 = vmatpush1.bf16.msra.mxu1 %v6257_v36  ;;  %v6344_v36 = vld [vmem:[%s7758_s5 + $0x5d0] ss:$180 sps:$4 sm:$0xff]  }
 0x10a   : > { %3569 = vmatprep.subr.bf16.mxu1 %v6265_v37  ;;  %v6352_v37 = vld [vmem:[%s7758_s5 + $0x73c] ss:$180 sps:$4 sm:$0xff]  }
 0x10b   : > { %3527 = vmatpush1.bf16.msra.mxu0 %v6248_v34  ;;  %v6347_v34 = vld [vmem:[%s7758_s5 + $0x308] ss:$180 sps:$4 sm:$0xff]  }
 0x10c   : > { %3528 = vmatprep.subr.bf16.mxu0 %v6256_v35  ;;  %v6355_v35 = vld [vmem:[%s7758_s5 + $0x474] ss:$180 sps:$4 sm:$0xff]  }
 0x10d   : > { %3570 = vmatpush1.bf16.msra.mxu1 %v6263_v40  ;;  %v6350_v40 = vld [vmem:[%s7758_s5 + $0x738] ss:$180 sps:$4 sm:$0xff]  }
 0x10e   : > { %3571 = vmatprep.subr.bf16.mxu1 %v6271_v41  ;;  %v6358_v41 = vld [vmem:[%s7758_s5 + $0x8a4] ss:$180 sps:$4 sm:$0xff]  }
 0x10f   : > { %3529 = vmatpush1.bf16.msra.mxu0 %v6254_v38  ;;  %v6353_v38 = vld [vmem:[%s7758_s5 + $0x470] ss:$180 sps:$4 sm:$0xff]  }
 0x110   : > { %3530 = vmatprep.subr.bf16.mxu0 %v6262_v39  ;;  %v6361_v39 = vld [vmem:[%s7758_s5 + $0x5dc] ss:$180 sps:$4 sm:$0xff]  }
 0x111   : > { %3572 = vmatpush1.bf16.msra.mxu1 %v6269_v44  ;;  %v6356_v44 = vld [vmem:[%s7758_s5 + $0x8a0] ss:$180 sps:$4 sm:$0xff]  }
 0x112   : > { %3573 = vmatprep.subr.bf16.mxu1 %v6277_v45  ;;  %v6364_v45 = vld [vmem:[%s7758_s5 + $0xa0c] ss:$180 sps:$4 sm:$0xff]  }
 0x113   : > { %3531 = vmatpush1.bf16.msra.mxu0 %v6260_v42  ;;  %v6359_v42 = vld [vmem:[%s7758_s5 + $0x5d8] ss:$180 sps:$4 sm:$0xff]  }
 0x114   : > { %3532 = vmatprep.subr.bf16.mxu0 %v6268_v43  ;;  %v6367_v43 = vld [vmem:[%s7758_s5 + $0x744] ss:$180 sps:$4 sm:$0xff]  }
 0x115   : > { %3574 = vmatpush1.bf16.msra.mxu1 %v6275_v49  ;;  %v6362_v49 = vld [vmem:[%s7758_s5 + $0xa08] ss:$180 sps:$4 sm:$0xff]  }
 0x116   : > { %3575 = vmatprep.subr.bf16.mxu1 %v6283_v50  ;;  %v6370_v50 = vld [vmem:[%s7758_s5 + $0x44] ss:$180 sps:$4 sm:$0xff]  }
 0x117   : > { %3533 = vmatpush1.bf16.msra.mxu0 %v6266_v46  ;;  %v6365_v46 = vld [vmem:[%s7758_s5 + $0x740] ss:$180 sps:$4 sm:$0xff]  }
 0x118   : > { %3604 = vmatprep.subr.bf16.mxu0 %v6274_v47  ;;  %v6373_v47 = vld [vmem:[%s7758_s5 + $0x8ac] ss:$180 sps:$4 sm:$0xff]  }
 0x119   : > { %3576 = vmatpush1.bf16.msra.mxu1 %v6281_v53  ;;  %v6368_v53 = vld [vmem:[%s7758_s5 + $0x40] ss:$180 sps:$4 sm:$0xff]  }
 0x11a   : > { %3551 = vmatmul.mubr.bf16.vlgmr.msra.gmra.mrb[4].mxu0 %v7795_v17  ;;  %3647 = vmatprep.subr.bf16.mxu1 %v6289_v54  ;;  %v6376_v54 = vld [vmem:[%s7758_s5 + $0x1ac] ss:$180 sps:$4 sm:$0xff]  }
 0x11b   : > { %3605 = vmatpush1.bf16.msra.mxu0 %v6272_v51  ;;  %3636 = vmatprep.mubr.bf16.mxu0 %v6940_v48  ;;  %v6371_v51 = vld [vmem:[%s7758_s5 + $0x8a8] ss:$180 sps:$4 sm:$0xff]  }
 0x11c   : > { %3606 = vmatprep.subr.bf16.mxu0 %v6280_v52  ;;  %3594 = vmatmul.mubr.bf16.vlgmr.msra.gmra.mrb[4].mxu1 %v7795_v17  ;;  %v6379_v52 = vld [vmem:[%s7758_s5 + $0xa14] ss:$180 sps:$4 sm:$0xff]  }
 0x11d   : > { %3648 = vmatpush1.bf16.msra.mxu1 %v6287_v57  ;;  %3679 = vmatprep.mubr.bf16.mxu1 %v6940_v48  ;;  %v6374_v57 = vld [vmem:[%s7758_s5 + $0x1a8] ss:$180 sps:$4 sm:$0xff]  }
 0x11e   : > { %3649 = vmatprep.subr.bf16.mxu1 %v6295_v58  ;;  %v6382_v58 = vld [vmem:[%s7758_s5 + $0x314] ss:$180 sps:$4 sm:$0xff]  }
 0x11f   : > { %3607 = vmatpush1.bf16.msra.mxu0 %v6278_v55  ;;  %v6377_v55 = vld [vmem:[%s7758_s5 + $0xa10] ss:$180 sps:$4 sm:$0xff]  }
 0x120   : > { %3608 = vmatprep.subr.bf16.mxu0 %v6286_v56  ;;  %v6385_v56 = vld [vmem:[%s7758_s5 + $0x4c] ss:$180 sps:$4 sm:$0xff]  }
 0x121   : > { %3650 = vmatpush1.bf16.msra.mxu1 %v6293_v61  ;;  %v6380_v61 = vld [vmem:[%s7758_s5 + $0x310] ss:$180 sps:$4 sm:$0xff]  }
 0x122   : > { %3651 = vmatprep.subr.bf16.mxu1 %v6301_v62  ;;  %v6388_v62 = vld [vmem:[%s7758_s5 + $0x47c] ss:$180 sps:$4 sm:$0xff]  }
 0x123   : > { %3609 = vmatpush1.bf16.msra.mxu0 %v6284_v59  ;;  %v6383_v59 = vld [vmem:[%s7758_s5 + $0x48] ss:$180 sps:$4 sm:$0xff]  }
 0x124   : > { %3610 = vmatprep.subr.bf16.mxu0 %v6292_v60  ;;  %v6391_v60 = vld [vmem:[%s7758_s5 + $0x1b4] ss:$180 sps:$4 sm:$0xff]  }
 0x125   : > { %3652 = vmatpush1.bf16.msra.mxu1 %v6299_v1  ;;  %v6386_v1 = vld [vmem:[%s7758_s5 + $0x478] ss:$180 sps:$4 sm:$0xff]  }
 0x126   : > { %3653 = vmatprep.subr.bf16.mxu1 %v6307_v2  ;;  %v6394_v2 = vld [vmem:[%s7758_s5 + $0x5e4] ss:$180 sps:$4 sm:$0xff]  }
 0x127   : > { %3611 = vmatpush1.bf16.msra.mxu0 %v6290_v63  ;;  %v6389_v63 = vld [vmem:[%s7758_s5 + $0x1b0] ss:$180 sps:$4 sm:$0xff]  }
 0x128   : > { %3612 = vmatprep.subr.bf16.mxu0 %v6298_v0  ;;  %v6397_v0 = vld [vmem:[%s7758_s5 + $0x31c] ss:$180 sps:$4 sm:$0xff]  }
 0x129   : > { %3654 = vmatpush1.bf16.msra.mxu1 %v6305_v5  ;;  %v6392_v5 = vld [vmem:[%s7758_s5 + $0x5e0] ss:$180 sps:$4 sm:$0xff]  }
 0x12a   : > { %3655 = vmatprep.subr.bf16.mxu1 %v6313_v6  ;;  %v6400_v6 = vld [vmem:[%s7758_s5 + $0x74c] ss:$180 sps:$4 sm:$0xff]  }
 0x12b   : > { %3613 = vmatpush1.bf16.msra.mxu0 %v6296_v3  ;;  %v6395_v3 = vld [vmem:[%s7758_s5 + $0x318] ss:$180 sps:$4 sm:$0xff]  }
 0x12c   : > { %3614 = vmatprep.subr.bf16.mxu0 %v6304_v4  ;;  %v6403_v4 = vld [vmem:[%s7758_s5 + $0x484] ss:$180 sps:$4 sm:$0xff]  }
 0x12d   : > { %3656 = vmatpush1.bf16.msra.mxu1 %v6311_v9  ;;  %v6398_v9 = vld [vmem:[%s7758_s5 + $0x748] ss:$180 sps:$4 sm:$0xff]  }
 0x12e   : > { %3657 = vmatprep.subr.bf16.mxu1 %v6319_v10  ;;  %v6406_v10 = vld [vmem:[%s7758_s5 + $0x8b4] ss:$180 sps:$4 sm:$0xff]  }
 0x12f   : > { %3615 = vmatpush1.bf16.msra.mxu0 %v6302_v7  ;;  %v6401_v7 = vld [vmem:[%s7758_s5 + $0x480] ss:$180 sps:$4 sm:$0xff]  }
 0x130   : > { %3616 = vmatprep.subr.bf16.mxu0 %v6310_v8  ;;  %v6409_v8 = vld [vmem:[%s7758_s5 + $0x5ec] ss:$180 sps:$4 sm:$0xff]  }
 0x131   : > { %3658 = vmatpush1.bf16.msra.mxu1 %v6317_v13  ;;  %v6404_v13 = vld [vmem:[%s7758_s5 + $0x8b0] ss:$180 sps:$4 sm:$0xff]  }
 0x132   : > { %3659 = vmatprep.subr.bf16.mxu1 %v6325_v14  ;;  %v6412_v14 = vld [vmem:[%s7758_s5 + $0xa1c] ss:$180 sps:$4 sm:$0xff]  }
 0x133   : > { %3617 = vmatpush1.bf16.msra.mxu0 %v6308_v11  ;;  %v6407_v11 = vld [vmem:[%s7758_s5 + $0x5e8] ss:$180 sps:$4 sm:$0xff]  }
 0x134   : > { %3618 = vmatprep.subr.bf16.mxu0 %v6316_v12  ;;  %v6415_v12 = vld [vmem:[%s7758_s5 + $0x754] ss:$180 sps:$4 sm:$0xff]  }
 0x135   : > { %3660 = vmatpush1.bf16.msra.mxu1 %v6323_v18  ;;  %v6410_v18 = vld [vmem:[%s7758_s5 + $0xa18] ss:$180 sps:$4 sm:$0xff]  }
 0x136   : > { %3661 = vmatprep.subr.bf16.mxu1 %v6331_v19  ;;  %v6418_v19 = vld [vmem:[%s7758_s5 + $0x54] ss:$180 sps:$4 sm:$0xff]  }
 0x137   : > { %3619 = vmatpush1.bf16.msra.mxu0 %v6314_v15  ;;  %v6413_v15 = vld [vmem:[%s7758_s5 + $0x750] ss:$180 sps:$4 sm:$0xff]  }
 0x138   : > { %3690 = vmatprep.subr.bf16.mxu0 %v6322_v16  ;;  %v6421_v16 = vld [vmem:[%s7758_s5 + $0x8bc] ss:$180 sps:$4 sm:$0xff]  }
 0x139   : > { %3662 = vmatpush1.bf16.msra.mxu1 %v6329_v22  ;;  %v6416_v22 = vld [vmem:[%s7758_s5 + $0x50] ss:$180 sps:$4 sm:$0xff]  }
 0x13a   : > { %3637 = vmatmul.mubr.bf16.vlgmr.msra.gmra.mrb[8].mxu0 %v7795_v17  ;;  %3733 = vmatprep.subr.bf16.mxu1 %v6337_v23  ;;  %v6424_v23 = vld [vmem:[%s7758_s5 + $0x1bc] ss:$180 sps:$4 sm:$0xff]  }
 0x13b   : > { %3691 = vmatpush1.bf16.msra.mxu0 %v6320_v20  ;;  %3722 = vmatprep.mubr.bf16.mxu0 %v6940_v48  ;;  %v6419_v20 = vld [vmem:[%s7758_s5 + $0x8b8] ss:$180 sps:$4 sm:$0xff]  }
 0x13c   : > { %3692 = vmatprep.subr.bf16.mxu0 %v6328_v21  ;;  %3680 = vmatmul.mubr.bf16.vlgmr.msra.gmra.mrb[8].mxu1 %v7795_v17  ;;  %v6427_v21 = vld [vmem:[%s7758_s5 + $0xa24] ss:$180 sps:$4 sm:$0xff]  }
 0x13d   : > { %3734 = vmatpush1.bf16.msra.mxu1 %v6335_v26  ;;  %3765 = vmatprep.mubr.bf16.mxu1 %v6940_v48  ;;  %v6422_v26 = vld [vmem:[%s7758_s5 + $0x1b8] ss:$180 sps:$4 sm:$0xff]  }
 0x13e   : > { %3735 = vmatprep.subr.bf16.mxu1 %v6343_v27  ;;  %v6430_v27 = vld [vmem:[%s7758_s5 + $0x324] ss:$180 sps:$4 sm:$0xff]  }
 0x13f   : > { %3693 = vmatpush1.bf16.msra.mxu0 %v6326_v24  ;;  %v6425_v24 = vld [vmem:[%s7758_s5 + $0xa20] ss:$180 sps:$4 sm:$0xff]  }
 0x140   : > { %3694 = vmatprep.subr.bf16.mxu0 %v6334_v25  ;;  %v6433_v25 = vld [vmem:[%s7758_s5 + $0x5c] ss:$180 sps:$4 sm:$0xff]  }
 0x141   : > { %3736 = vmatpush1.bf16.msra.mxu1 %v6341_v30  ;;  %v6428_v30 = vld [vmem:[%s7758_s5 + $0x320] ss:$180 sps:$4 sm:$0xff]  }
 0x142   : > { %3737 = vmatprep.subr.bf16.mxu1 %v6349_v31  ;;  %v6436_v31 = vld [vmem:[%s7758_s5 + $0x48c] ss:$180 sps:$4 sm:$0xff]  }
 0x143   : > { %3695 = vmatpush1.bf16.msra.mxu0 %v6332_v28  ;;  %v6431_v28 = vld [vmem:[%s7758_s5 + $0x58] ss:$180 sps:$4 sm:$0xff]  }
 0x144   : > { %3696 = vmatprep.subr.bf16.mxu0 %v6340_v29  ;;  %v6439_v29 = vld [vmem:[%s7758_s5 + $0x1c4] ss:$180 sps:$4 sm:$0xff]  }
 0x145   : > { %3738 = vmatpush1.bf16.msra.mxu1 %v6347_v34  ;;  %v6434_v34 = vld [vmem:[%s7758_s5 + $0x488] ss:$180 sps:$4 sm:$0xff]  }
 0x146   : > { %3739 = vmatprep.subr.bf16.mxu1 %v6355_v35  ;;  %v6442_v35 = vld [vmem:[%s7758_s5 + $0x5f4] ss:$180 sps:$4 sm:$0xff]  }
 0x147   : > { %3697 = vmatpush1.bf16.msra.mxu0 %v6338_v32  ;;  %v6437_v32 = vld [vmem:[%s7758_s5 + $0x1c0] ss:$180 sps:$4 sm:$0xff]  }
 0x148   : > { %3698 = vmatprep.subr.bf16.mxu0 %v6346_v33  ;;  %v6445_v33 = vld [vmem:[%s7758_s5 + $0x32c] ss:$180 sps:$4 sm:$0xff]  }
 0x149   : > { %3740 = vmatpush1.bf16.msra.mxu1 %v6353_v38  ;;  %v6448_v38 = vld [vmem:[%s7758_s5 + $0x75c] ss:$180 sps:$4 sm:$0xff]  }
 0x14a   : > { %3741 = vmatprep.subr.bf16.mxu1 %v6361_v39  ;;  %v6449_v39 = vld [vmem:[%s7758_s5 + $0x490] ss:$180 sps:$4 sm:$0xff]  }
 0x14b   : > { %3699 = vmatpush1.bf16.msra.mxu0 %v6344_v36  ;;  %v6451_v36 = vld [vmem:[%s7758_s5 + $0x494] ss:$180 sps:$4 sm:$0xff]  }
 0x14c   : > { %3700 = vmatprep.subr.bf16.mxu0 %v6352_v37  ;;  %v6440_v37 = vld [vmem:[%s7758_s5 + $0x5f0] ss:$180 sps:$4 sm:$0xff]  }
 0x14d   : > { %3742 = vmatpush1.bf16.msra.mxu1 %v6359_v42  ;;  %v6454_v42 = vld [vmem:[%s7758_s5 + $0x8c4] ss:$180 sps:$4 sm:$0xff]  }
 0x14e   : > { %3743 = vmatprep.subr.bf16.mxu1 %v6367_v43  ;;  %v6455_v43 = vld [vmem:[%s7758_s5 + $0x5f8] ss:$180 sps:$4 sm:$0xff]  }
 0x14f   : > { %3701 = vmatpush1.bf16.msra.mxu0 %v6350_v40  ;;  %v6457_v40 = vld [vmem:[%s7758_s5 + $0x5fc] ss:$180 sps:$4 sm:$0xff]  }
 0x150   : > { %3702 = vmatprep.subr.bf16.mxu0 %v6358_v41  ;;  %v6446_v41 = vld [vmem:[%s7758_s5 + $0x758] ss:$180 sps:$4 sm:$0xff]  }
 0x151   : > { %3744 = vmatpush1.bf16.msra.mxu1 %v6365_v46  ;;  %v6460_v46 = vld [vmem:[%s7758_s5 + $0xa2c] ss:$180 sps:$4 sm:$0xff]  }
 0x152   : > { %3745 = vmatprep.subr.bf16.mxu1 %v6373_v47  ;;  %v6461_v47 = vld [vmem:[%s7758_s5 + $0x760] ss:$180 sps:$4 sm:$0xff]  }
 0x153   : > { %3703 = vmatpush1.bf16.msra.mxu0 %v6356_v44  ;;  %v6463_v44 = vld [vmem:[%s7758_s5 + $0x764] ss:$180 sps:$4 sm:$0xff]  }
 0x154   : > { %3704 = vmatprep.subr.bf16.mxu0 %v6364_v45  ;;  %v6452_v45 = vld [vmem:[%s7758_s5 + $0x8c0] ss:$180 sps:$4 sm:$0xff]  }
 0x155   : > { %3746 = vmatpush1.bf16.msra.mxu1 %v6371_v51  ;;  %v6466_v51 = vld [vmem:[%s7758_s5 + $0x64] ss:$180 sps:$4 sm:$0xff]  }
 0x156   : > { %3747 = vmatprep.subr.bf16.mxu1 %v6379_v52  ;;  %v6467_v52 = vld [vmem:[%s7758_s5 + $0x8c8] ss:$180 sps:$4 sm:$0xff]  }
 0x157   : > { %3705 = vmatpush1.bf16.msra.mxu0 %v6362_v49  ;;  %v6469_v49 = vld [vmem:[%s7758_s5 + $0x8cc] ss:$180 sps:$4 sm:$0xff]  }
 0x158   : > { %3776 = vmatprep.subr.bf16.mxu0 %v6370_v50  ;;  %v6458_v50 = vld [vmem:[%s7758_s5 + $0xa28] ss:$180 sps:$4 sm:$0xff]  }
 0x159   : > { %3748 = vmatpush1.bf16.msra.mxu1 %v6377_v55  ;;  %v6472_v55 = vld [vmem:[%s7758_s5 + $0x1cc] ss:$180 sps:$4 sm:$0xff]  }
 0x15a   : > { %3723 = vmatmul.mubr.bf16.vlgmr.msra.gmra.mrb[12].mxu0 %v7795_v17  ;;  %3819 = vmatprep.subr.bf16.mxu1 %v6385_v56  ;;  %v6473_v56 = vld [vmem:[%s7758_s5 + $0xa30] ss:$180 sps:$4 sm:$0xff]  }
 0x15b   : > { %3777 = vmatpush1.bf16.msra.mxu0 %v6368_v53  ;;  %3808 = vmatprep.mubr.bf16.mxu0 %v6940_v48  ;;  %v6475_v53 = vld [vmem:[%s7758_s5 + $0xa34] ss:$180 sps:$4 sm:$0xff]  }
 0x15c   : > { %3778 = vmatprep.subr.bf16.mxu0 %v6376_v54  ;;  %3766 = vmatmul.mubr.bf16.vlgmr.msra.gmra.mrb[12].mxu1 %v7795_v17  ;;  %v6464_v54 = vld [vmem:[%s7758_s5 + $0x60] ss:$180 sps:$4 sm:$0xff]  }
 0x15d   : > { %3820 = vmatpush1.bf16.msra.mxu1 %v6383_v59  ;;  %3851 = vmatprep.mubr.bf16.mxu1 %v6940_v48  ;;  %v6470_v59 = vld [vmem:[%s7758_s5 + $0x1c8] ss:$180 sps:$4 sm:$0xff]  }
 0x15e   : > { %3821 = vmatprep.subr.bf16.mxu1 %v6391_v60  ;;  %v6478_v60 = vld [vmem:[%s7758_s5 + $0x334] ss:$180 sps:$4 sm:$0xff]  }
 0x15f   : > { %3779 = vmatpush1.bf16.msra.mxu0 %v6374_v57  ;;  %v6481_v57 = vld [vmem:[%s7758_s5 + $0x6c] ss:$180 sps:$4 sm:$0xff]  }
 0x160   : > { %3780 = vmatprep.subr.bf16.mxu0 %v6382_v58  ;;  %v7984_v58 = vld [vmem:[%s8665_s0] sm:$0xff]  }
 0x161   : > { %3822 = vmatpush1.bf16.msra.mxu1 %v6389_v63  ;;  %v6476_v63 = vld [vmem:[%s7758_s5 + $0x330] ss:$180 sps:$4 sm:$0xff]  }
 0x162   : > { %3823 = vmatprep.subr.bf16.mxu1 %v6397_v0  ;;  %v6484_v0 = vld [vmem:[%s7758_s5 + $0x49c] ss:$180 sps:$4 sm:$0xff]  }
 0x163   : > { %3781 = vmatpush1.bf16.msra.mxu0 %v6380_v61  ;;  %v6479_v61 = vld [vmem:[%s7758_s5 + $0x68] ss:$180 sps:$4 sm:$0xff]  }
 0x164   : > { %3782 = vmatprep.subr.bf16.mxu0 %v6388_v62  ;;  %v6487_v62 = vld [vmem:[%s7758_s5 + $0x1d4] ss:$180 sps:$4 sm:$0xff]  }
 0x165   : > { %3824 = vmatpush1.bf16.msra.mxu1 %v6395_v3  ;;  %v6482_v3 = vld [vmem:[%s7758_s5 + $0x498] ss:$180 sps:$4 sm:$0xff]  }
 0x166   : > { %3825 = vmatprep.subr.bf16.mxu1 %v6403_v4  ;;  %v6490_v4 = vld [vmem:[%s7758_s5 + $0x604] ss:$180 sps:$4 sm:$0xff]  }
 0x167   : > { %3783 = vmatpush1.bf16.msra.mxu0 %v6386_v1  ;;  %v6485_v1 = vld [vmem:[%s7758_s5 + $0x1d0] ss:$180 sps:$4 sm:$0xff]  }
 0x168   : > { %3784 = vmatprep.subr.bf16.mxu0 %v6394_v2  ;;  %v6493_v2 = vld [vmem:[%s7758_s5 + $0x33c] ss:$180 sps:$4 sm:$0xff]  }
 0x169   : > { %3826 = vmatpush1.bf16.msra.mxu1 %v6401_v7  ;;  %v6488_v7 = vld [vmem:[%s7758_s5 + $0x600] ss:$180 sps:$4 sm:$0xff]  }
 0x16a   : > { %3827 = vmatprep.subr.bf16.mxu1 %v6409_v8  ;;  %v6496_v8 = vld [vmem:[%s7758_s5 + $0x76c] ss:$180 sps:$4 sm:$0xff]  }
 0x16b   : > { %3785 = vmatpush1.bf16.msra.mxu0 %v6392_v5  ;;  %v6491_v5 = vld [vmem:[%s7758_s5 + $0x338] ss:$180 sps:$4 sm:$0xff]  }
 0x16c   : > { %3786 = vmatprep.subr.bf16.mxu0 %v6400_v6  ;;  %v6499_v6 = vld [vmem:[%s7758_s5 + $0x4a4] ss:$180 sps:$4 sm:$0xff]  }
 0x16d   : > { %3828 = vmatpush1.bf16.msra.mxu1 %v6407_v11  ;;  %v6494_v11 = vld [vmem:[%s7758_s5 + $0x768] ss:$180 sps:$4 sm:$0xff]  }
 0x16e   : > { %3829 = vmatprep.subr.bf16.mxu1 %v6415_v12  ;;  %v6502_v12 = vld [vmem:[%s7758_s5 + $0x8d4] ss:$180 sps:$4 sm:$0xff]  }
 0x16f   : > { %3787 = vmatpush1.bf16.msra.mxu0 %v6398_v9  ;;  %v6497_v9 = vld [vmem:[%s7758_s5 + $0x4a0] ss:$180 sps:$4 sm:$0xff]  }
 0x170   : > { %3788 = vmatprep.subr.bf16.mxu0 %v6406_v10  ;;  %v6505_v10 = vld [vmem:[%s7758_s5 + $0x60c] ss:$180 sps:$4 sm:$0xff]  }
 0x171   : > { %3830 = vmatpush1.bf16.msra.mxu1 %v6413_v15  ;;  %v6500_v15 = vld [vmem:[%s7758_s5 + $0x8d0] ss:$180 sps:$4 sm:$0xff]  }
 0x172   : > { %3831 = vmatprep.subr.bf16.mxu1 %v6421_v16  ;;  %v6508_v16 = vld [vmem:[%s7758_s5 + $0xa3c] ss:$180 sps:$4 sm:$0xff]  }
 0x173   : > { %3789 = vmatpush1.bf16.msra.mxu0 %v6404_v13  ;;  %v6503_v13 = vld [vmem:[%s7758_s5 + $0x608] ss:$180 sps:$4 sm:$0xff]  }
 0x174   : > { %3790 = vmatprep.subr.bf16.mxu0 %v6412_v14  ;;  %v6511_v14 = vld [vmem:[%s7758_s5 + $0x774] ss:$180 sps:$4 sm:$0xff]  }
 0x175   : > { %3832 = vmatpush1.bf16.msra.mxu1 %v6419_v20  ;;  %v6506_v20 = vld [vmem:[%s7758_s5 + $0xa38] ss:$180 sps:$4 sm:$0xff]  }
 0x176   : > { %3833 = vmatprep.subr.bf16.mxu1 %v6427_v21  ;;  %v6514_v21 = vld [vmem:[%s7758_s5 + $0x74] ss:$180 sps:$4 sm:$0xff]  }
 0x177   : > { %3791 = vmatpush1.bf16.msra.mxu0 %v6410_v18  ;;  %v6509_v18 = vld [vmem:[%s7758_s5 + $0x770] ss:$180 sps:$4 sm:$0xff]  }
 0x178   : > { %3862 = vmatprep.subr.bf16.mxu0 %v6418_v19  ;;  %v6517_v19 = vld [vmem:[%s7758_s5 + $0x8dc] ss:$180 sps:$4 sm:$0xff]  }
 0x179   : > { %3834 = vmatpush1.bf16.msra.mxu1 %v6425_v24  ;;  %v6512_v24 = vld [vmem:[%s7758_s5 + $0x70] ss:$180 sps:$4 sm:$0xff]  }
 0x17a   : > { %3809 = vmatmul.mubr.bf16.vlgmr.msra.gmra.mrb[16].mxu0 %v7795_v17  ;;  %3905 = vmatprep.subr.bf16.mxu1 %v6433_v25  ;;  %v6520_v25 = vld [vmem:[%s7758_s5 + $0x1dc] ss:$180 sps:$4 sm:$0xff]  }
 0x17b   : > { %3863 = vmatpush1.bf16.msra.mxu0 %v6416_v22  ;;  %3894 = vmatprep.mubr.bf16.mxu0 %v6940_v48  ;;  %v6515_v22 = vld [vmem:[%s7758_s5 + $0x8d8] ss:$180 sps:$4 sm:$0xff]  }
 0x17c   : > { %3864 = vmatprep.subr.bf16.mxu0 %v6424_v23  ;;  %3852 = vmatmul.mubr.bf16.vlgmr.msra.gmra.mrb[16].mxu1 %v7795_v17  ;;  %v6443_v17 = vld [vmem:[%s7758_s5 + $0x328] ss:$180 sps:$4 sm:$0xff]   ;;  %v6523_v23 = vld [vmem:[%s7758_s5 + $0xa44] ss:$180 sps:$4 sm:$0xff]  }
 0x17d   : > { %3906 = vmatpush1.bf16.msra.mxu1 %v6431_v28  ;;  %3937 = vmatprep.mubr.bf16.mxu1 %v6940_v48  ;;  %v6518_v28 = vld [vmem:[%s7758_s5 + $0x1d8] ss:$180 sps:$4 sm:$0xff]  }
 0x17e   : > { %3907 = vmatprep.subr.bf16.mxu1 %v6439_v29  ;;  %v1393_v29 = vlaneseq }
 0x17f   : > { %3865 = vmatpush1.bf16.msra.mxu0 %v6422_v26  ;;  %v6521_v26 = vld [vmem:[%s7758_s5 + $0xa40] ss:$180 sps:$4 sm:$0xff]  }
 0x180   : > { %3866 = vmatprep.subr.bf16.mxu0 %v6430_v27  ;;  %v6529_v27 = vld [vmem:[%s7758_s5 + $0x7c] ss:$180 sps:$4 sm:$0xff]  }
 0x181   : > { %3908 = vmatpush1.bf16.msra.mxu1 %v6437_v32  ;;  %v6535_v32 = vld [vmem:[%s7758_s5 + $0x1e4] ss:$180 sps:$4 sm:$0xff]  }
 0x182   : > { %3909 = vmatprep.subr.bf16.mxu1 %v6445_v33  ;;  %v6524_v33 = vld [vmem:[%s7758_s5 + $0x340] ss:$180 sps:$4 sm:$0xff]  }
 0x183   : > { %3867 = vmatpush1.bf16.msra.mxu0 %v6428_v30  ;;  %v6526_v30 = vld [vmem:[%s7758_s5 + $0x344] ss:$180 sps:$4 sm:$0xff]  }
 0x184   : > { %3868 = vmatprep.subr.bf16.mxu0 %v6436_v31  ;;  %v6527_v31 = vld [vmem:[%s7758_s5 + $0x78] ss:$180 sps:$4 sm:$0xff]  }
 0x185   : > { %3910 = vmatpush1.bf16.msra.mxu1 %v6443_v17  ;;  %v6533_v17 = vld [vmem:[%s7758_s5 + $0x1e0] ss:$180 sps:$4 sm:$0xff]  }
 0x186   : > { %3911 = vmatprep.subr.bf16.mxu1 %v6451_v36  ;;  %v6541_v36 = vld [vmem:[%s7758_s5 + $0x34c] ss:$180 sps:$4 sm:$0xff]  }
 0x187   : > { %3869 = vmatpush1.bf16.msra.mxu0 %v6434_v34  ;;  %v8031_v34 = vshrl.u32 %v1393_v29, 7 }
 0x188   : > { %3870 = vmatprep.subr.bf16.mxu0 %v6442_v35  ;;  %v6532_v35 = vld [vmem:[%s7758_s5 + $0x4ac] ss:$180 sps:$4 sm:$0xff]  }
 0x189   : > { %3912 = vmatpush1.bf16.msra.mxu1 %v6449_v39  ;;  %v8045_v39 = vsub.s32 0, %v8031_v34 }
 0x18a   : > { %3913 = vmatprep.subr.bf16.mxu1 %v6457_v40  ;;  %v6539_v40 = vld [vmem:[%s7758_s5 + $0x348] ss:$180 sps:$4 sm:$0xff]  }
 0x18b   : > { %3871 = vmatpush1.bf16.msra.mxu0 %v6440_v37  ;;  %v6530_v37 = vld [vmem:[%s7758_s5 + $0x4a8] ss:$180 sps:$4 sm:$0xff]  }
 0x18c   : > { %3872 = vmatprep.subr.bf16.mxu0 %v6448_v38  ;;  %v6538_v38 = vld [vmem:[%s7758_s5 + $0x614] ss:$180 sps:$4 sm:$0xff]  }
 0x18d   : > { %3914 = vmatpush1.bf16.msra.mxu1 %v6455_v43  ;;  %v8053_v43 = vld [vmem:[%s8041_s19] sm:$0xff] }
 0x18e   : > { %3915 = vmatprep.subr.bf16.mxu1 %v6463_v44  ;;  %v6547_v44 = vld [vmem:[%s7758_s5 + $0x4b4] ss:$180 sps:$4 sm:$0xff]  }
 0x18f   : > { %3873 = vmatpush1.bf16.msra.mxu0 %v6446_v41  ;;  %v8049_v41 = vsub.s32 1, %v8031_v34 }
 0x190   : > { %3874 = vmatprep.subr.bf16.mxu0 %v6454_v42  ;;  %v6536_v42 = vld [vmem:[%s7758_s5 + $0x610] ss:$180 sps:$4 sm:$0xff]  }
 0x191   : > { %3916 = vmatpush1.bf16.msra.mxu1 %v6461_v47  ;;  %v6553_v47 = vld [vmem:[%s7758_s5 + $0x61c] ss:$180 sps:$4 sm:$0xff]  }
 0x192   : > { %3917 = vmatprep.subr.bf16.mxu1 %v6469_v49  ;;  %v1396_v49 = vrot.slane %v8053_v43, %v8045_v39 }
 0x193   : > { %3875 = vmatpush1.bf16.msra.mxu0 %v6452_v45  ;;  %v6544_v45 = vld [vmem:[%s7758_s5 + $0x77c] ss:$180 sps:$4 sm:$0xff]  }
 0x194   : > { %3876 = vmatprep.subr.bf16.mxu0 %v6460_v46  ;;  %v6545_v46 = vld [vmem:[%s7758_s5 + $0x4b0] ss:$180 sps:$4 sm:$0xff]  }
 0x195   : > { %3918 = vmatpush1.bf16.msra.mxu1 %v6467_v52  ;;  %v8065_v52 = vsub.s32 2, %v8031_v34 }
 0x196   : > { %3919 = vmatprep.subr.bf16.mxu1 %v6475_v53  ;;  %v6550_v53 = vld [vmem:[%s7758_s5 + $0x8e4] ss:$180 sps:$4 sm:$0xff]  }
 0x197   : > { %3877 = vmatpush1.bf16.msra.mxu0 %v6458_v50  ;;  %v1400_v50 = vrot.slane %v8053_v43, %v8049_v41 }
 0x198   : > { %3948 = vmatprep.subr.bf16.mxu0 %v6466_v51  ;;  %v6542_v51 = vld [vmem:[%s7758_s5 + $0x778] ss:$180 sps:$4 sm:$0xff]  }
 0x199   : > { %3920 = vmatpush1.bf16.msra.mxu1 %v6473_v56 }
 0x19a   : > { %3895 = vmatmul.mubr.bf16.vlgmr.msra.gmra.mrb[20].mxu0 %v7984_v58  ;;  %3991 = vmatprep.subr.bf16.mxu1 %v6481_v57  ;;  %v6559_v57 = vld [vmem:[%s7758_s5 + $0x784] ss:$180 sps:$4 sm:$0xff]  }
 0x19b   : > { %3949 = vmatpush1.bf16.msra.mxu0 %v6464_v54  ;;  %3980 = vmatprep.mubr.bf16.mxu0 %v6940_v48  ;;  %v6551_v54 = vld [vmem:[%s7758_s5 + $0x618] ss:$180 sps:$4 sm:$0xff]  }
 0x19c   : > { %3950 = vmatprep.subr.bf16.mxu0 %v6472_v55  ;;  %3938 = vmatmul.mubr.bf16.vlgmr.msra.gmra.mrb[20].mxu1 %v7984_v58  ;;  %v8070_v55 = vsub.s32 3, %v8031_v34 }
 0x19d   : > { %3992 = vmatpush1.bf16.msra.mxu1 %v6479_v61  ;;  %4023 = vmatprep.mubr.bf16.mxu1 %v6940_v48 }
 0x19e   : > { %3993 = vmatprep.subr.bf16.mxu1 %v6487_v62 }
 0x19f   : > { %3951 = vmatpush1.bf16.msra.mxu0 %v6470_v59 }
 0x1a0   : > { %3952 = vmatprep.subr.bf16.mxu0 %v6478_v60 }
 0x1a1   : > { %3994 = vmatpush1.bf16.msra.mxu1 %v6485_v1 }
 0x1a2   : > { %3995 = vmatprep.subr.bf16.mxu1 %v6493_v2 }
 0x1a3   : > { %3953 = vmatpush1.bf16.msra.mxu0 %v6476_v63  ;;  %v6548_v63 = vld [vmem:[%s7758_s5 + $0x8e0] ss:$180 sps:$4 sm:$0xff]  }
 0x1a4   : > { %3954 = vmatprep.subr.bf16.mxu0 %v6484_v0  ;;  %v1404_v0 = vrot.slane %v8053_v43, %v8065_v52 }
 0x1a5   : > { %3996 = vmatpush1.bf16.msra.mxu1 %v6491_v5  ;;  %v6557_v5 = vld [vmem:[%s7758_s5 + $0x780] ss:$180 sps:$4 sm:$0xff]  }
 0x1a6   : > { %3997 = vmatprep.subr.bf16.mxu1 %v6499_v6  ;;  %v1408_v6 = vrot.slane %v8053_v43, %v8070_v55 }
 0x1a7   : > { %3955 = vmatpush1.bf16.msra.mxu0 %v6482_v3 }
 0x1a8   : > { %3956 = vmatprep.subr.bf16.mxu0 %v6490_v4  ;;  %v6556_v4 = vld [vmem:[%s7758_s5 + $0xa4c] ss:$180 sps:$4 sm:$0xff]  }
 0x1a9   : > { %3998 = vmatpush1.bf16.msra.mxu1 %v6497_v9  ;;  %v6565_v9 = vld [vmem:[%s7758_s5 + $0x8ec] ss:$180 sps:$4 sm:$0xff]  }
 0x1aa   : > { %3999 = vmatprep.subr.bf16.mxu1 %v6505_v10 }
 0x1ab   : > { %3957 = vmatpush1.bf16.msra.mxu0 %v6488_v7 }
 0x1ac   : > { %3958 = vmatprep.subr.bf16.mxu0 %v6496_v8 }
 0x1ad   : > { %4000 = vmatpush1.bf16.msra.mxu1 %v6503_v13 }
 0x1ae   : > { %4001 = vmatprep.subr.bf16.mxu1 %v6511_v14 }
 0x1af   : > { %3959 = vmatpush1.bf16.msra.mxu0 %v6494_v11 }
 0x1b0   : > { %3960 = vmatprep.subr.bf16.mxu0 %v6502_v12  ;;  %v6554_v12 = vld [vmem:[%s7758_s5 + $0xa48] ss:$180 sps:$4 sm:$0xff]  }
 0x1b1   : > { %4002 = vmatpush1.bf16.msra.mxu1 %v6509_v18 }
 0x1b2   : > { %4003 = vmatprep.subr.bf16.mxu1 %v6517_v19  ;;  %v6562_v19 = vld [vmem:[%s7758_s5 + $0x84] ss:$180 sps:$4 sm:$0xff]  }
 0x1b3   : > { %3961 = vmatpush1.bf16.msra.mxu0 %v6500_v15 }
 0x1b4   : > { %3962 = vmatprep.subr.bf16.mxu0 %v6508_v16 }
 0x1b5   : > { %4004 = vmatpush1.bf16.msra.mxu1 %v6515_v22 }
 0x1b6   : > { %4005 = vmatprep.subr.bf16.mxu1 %v6523_v23  ;;  %v6563_v23 = vld [vmem:[%s7758_s5 + $0x8e8] ss:$180 sps:$4 sm:$0xff]  }
 0x1b7   : > { %3963 = vmatpush1.bf16.msra.mxu0 %v6506_v20 }
 0x1b8   : > { %4034 = vmatprep.subr.bf16.mxu0 %v6514_v21 }
 0x1b9   : > { %4006 = vmatpush1.bf16.msra.mxu1 %v6521_v26 }
 0x1ba   : > { %3981 = vmatmul.mubr.bf16.vlgmr.msra.gmra.mrb[24].mxu0 %v7984_v58  ;;  %4077 = vmatprep.subr.bf16.mxu1 %v6529_v27  ;;  %v6571_v27 = vld [vmem:[%s7758_s5 + $0xa54] ss:$180 sps:$4 sm:$0xff]  }
 0x1bb   : > { %4035 = vmatpush1.bf16.msra.mxu0 %v6512_v24  ;;  %4066 = vmatprep.mubr.bf16.mxu0 %v6940_v48 }
 0x1bc   : > { %4036 = vmatprep.subr.bf16.mxu0 %v6520_v25  ;;  %4024 = vmatmul.mubr.bf16.vlgmr.msra.gmra.mrb[24].mxu1 %v7984_v58 }
 0x1bd   : > { %4078 = vmatpush1.bf16.msra.mxu1 %v6527_v31  ;;  %4109 = vmatprep.mubr.bf16.mxu1 %v6940_v48  ;;  %v6560_v31 = vld [vmem:[%s7758_s5 + $0x80] ss:$180 sps:$4 sm:$0xff]  }
 0x1be   : > { %4079 = vmatprep.subr.bf16.mxu1 %v6535_v32 }
 0x1bf   : > { %4037 = vmatpush1.bf16.msra.mxu0 %v6518_v28 }
 0x1c0   : > { %4038 = vmatprep.subr.bf16.mxu0 %v6526_v30 }
 0x1c1   : > { %4080 = vmatpush1.bf16.msra.mxu1 %v6533_v17 }
 0x1c2   : > { %4081 = vmatprep.subr.bf16.mxu1 %v6541_v36  ;;  %v6569_v36 = vld [vmem:[%s7758_s5 + $0xa50] ss:$180 sps:$4 sm:$0xff]  }
 0x1c3   : > { %4039 = vmatpush1.bf16.msra.mxu0 %v6524_v33  ;;  %v6568_v33 = vld [vmem:[%s7758_s5 + $0x1ec] ss:$180 sps:$4 sm:$0xff]  }
 0x1c4   : > { %4040 = vmatprep.subr.bf16.mxu0 %v6532_v35 }
 0x1c5   : > { %4082 = vmatpush1.bf16.msra.mxu1 %v6539_v40 }
 0x1c6   : > { %4083 = vmatprep.subr.bf16.mxu1 %v6547_v44  ;;  %v6566_v44 = vld [vmem:[%s7758_s5 + $0x1e8] ss:$180 sps:$4 sm:$0xff]  }
 0x1c7   : > { %4041 = vmatpush1.bf16.msra.mxu0 %v6530_v37 }
 0x1c8   : > { %4042 = vmatprep.subr.bf16.mxu0 %v6538_v38  ;;  %v6577_v38 = vld [vmem:[%s7758_s5 + $0x8c] ss:$180 sps:$4 sm:$0xff]  }
 0x1c9   : > { %4084 = vmatpush1.bf16.msra.mxu1 %v6545_v46  ;;  %v6575_v46 = vld [vmem:[%s7758_s5 + $0x88] ss:$180 sps:$4 sm:$0xff]  }
 0x1ca   : > { %4085 = vmatprep.subr.bf16.mxu1 %v6553_v47  ;;  %v6583_v47 = vld [vmem:[%s7758_s5 + $0x1f4] ss:$180 sps:$4 sm:$0xff]  }
 0x1cb   : > { %4043 = vmatpush1.bf16.msra.mxu0 %v6536_v42 }
 0x1cc   : > { %4044 = vmatprep.subr.bf16.mxu0 %v6544_v45  ;;  %v6574_v45 = vld [vmem:[%s7758_s5 + $0x354] ss:$180 sps:$4 sm:$0xff]  }
 0x1cd   : > { %v3466_v56 = vpop.f32.mrb[0].mxu0  ;;  %4086 = vmatpush1.bf16.msra.mxu1 %v6551_v54 }
 0x1ce   : > { %v8073_v59 = vadd.f32 %v3466_v56, %v1396_v49  ;;  %v3468_v60 = vpop.f32.mrb[1].mxu0  ;;  %4087 = vmatprep.subr.bf16.mxu1 %v6559_v57  ;;  %v6580_v57 = vld [vmem:[%s7758_s5 + $0x4bc] ss:$180 sps:$4 sm:$0xff]  }
 0x1cf   : > { %v8075_v61 = vadd.f32 %v3468_v60, %v1400_v50  ;;  %v3470_v62 = vpop.f32.mrb[2].mxu0  ;;  %4045 = vmatpush1.bf16.msra.mxu0 %v6542_v51  ;;  %v3509_v13 = vpop.f32.mrb[0].mxu1  ;;  %v6581_v60 = vld [vmem:[%s7758_s5 + $0x1f0] ss:$180 sps:$4 sm:$0xff]  }
 0x1d0   : > { %v4509_v1 = vmin.f32 %v8073_v59, 0.0  ;;  %v8081_v2 = vadd.f32 %v3470_v62, %v1396_v49  ;;  %v3472_v3 = vpop.f32.mrb[3].mxu0  ;;  %4046 = vmatprep.subr.bf16.mxu0 %v6550_v53  ;;  %v8094_v16 = vadd.f32 %v3509_v13, %v1404_v0  ;;  %v3511_v18 = vpop.f32.mrb[1].mxu1  ;;  %v6572_v53 = vld [vmem:[%s7758_s5 + $0x350] ss:$180 sps:$4 sm:$0xff]   ;;  %vm4419_vm0 = vcmp.gt.f32.partialorder %v8073_v59, 0.0 }
 0x1d1   : > { %v4510_v7 = vmin.f32 %v8075_v61, 0.0  ;;  %v8088_v8 = vadd.f32 %v3472_v3, %v1400_v50  ;;  %v8097_v21 = vadd.f32 %v3511_v18, %v1408_v6  ;;  %4088 = vmatpush1.bf16.msra.mxu1 %v6557_v5  ;;  %v3513_v22 = vpop.f32.mrb[2].mxu1  ;;  %vm4420_vm1 = vcmp.gt.f32.partialorder %v8075_v61, 0.0 }
 0x1d2   : > { %v4599_v10 = vmul.f32 1.442695, %v4509_v1  ;;  %v4554_v11 = vmin.f32 %v8081_v2, 0.0  ;;  %v4511_v25 = vmin.f32 %v8094_v16, 0.0  ;;  %v3515_v26 = vpop.f32.mrb[3].mxu1  ;;  %4089 = vmatprep.subr.bf16.mxu1 %v6565_v9  ;;  %v8103_v29 = vadd.f32 %v3513_v22, %v1404_v0 }
 0x1d3   : > { %v4601_v14 = vmul.f32 1.442695, %v4510_v7  ;;  %v4555_v15 = vmin.f32 %v8088_v8, 0.0  ;;  %4047 = vmatpush1.bf16.msra.mxu0 %v6548_v63  ;;  %v4512_v28 = vmin.f32 %v8097_v21, 0.0  ;;  %v8106_v32 = vadd.f32 %v3515_v26, %v1408_v6  ;;  %v6589_v1 = vld [vmem:[%s7758_s5 + $0x35c] ss:$180 sps:$4 sm:$0xff]  }
 0x1d4   : > { %6718 = vpow2.f32 %v4599_v10  ;;  %v4689_v20 = vmul.f32 1.442695, %v4554_v11  ;;  %4048 = vmatprep.subr.bf16.mxu0 %v6556_v4  ;;  %v4603_v30 = vmul.f32 1.442695, %v4511_v25  ;;  %v4556_v17 = vmin.f32 %v8103_v29, 0.0 }
 0x1d5   : > { %6720 = vpow2.f32 %v4601_v14  ;;  %v4691_v24 = vmul.f32 1.442695, %v4555_v15  ;;  %v4605_v35 = vmul.f32 1.442695, %v4512_v28  ;;  %4090 = vmatpush1.bf16.msra.mxu1 %v6563_v23  ;;  %v4557_v37 = vmin.f32 %v8106_v32, 0.0 }
 0x1d6   : > { %6722 = vpow2.f32 %v4689_v20  ;;  %4091 = vmatprep.subr.bf16.mxu1 %v6571_v27  ;;  %v4693_v40 = vmul.f32 1.442695, %v4556_v17  ;;  %vm4464_vm2 = vcmp.gt.f32.partialorder %v8081_v2, 0.0  ;;  %vm4465_vm3 = vcmp.gt.f32.partialorder %v8088_v8, 0.0  ;;  %v6586_v11 = vld [vmem:[%s7758_s5 + $0x624] ss:$180 sps:$4 sm:$0xff]  }
 0x1d7   : > { %6724 = vpow2.f32 %v4691_v24  ;;  %4049 = vmatpush1.bf16.msra.mxu0 %v6554_v12  ;;  %v4695_v42 = vmul.f32 1.442695, %v4557_v37  ;;  %vm4421_vm4 = vcmp.gt.f32.partialorder %v8094_v16, 0.0  ;;  %vm4422_vm5 = vcmp.gt.f32.partialorder %v8097_v21, 0.0  ;;  %v6587_v12 = vld [vmem:[%s7758_s5 + $0x358] ss:$180 sps:$4 sm:$0xff]  }
 0x1d8   : > { %4120 = vmatprep.subr.bf16.mxu0 %v6562_v19  ;;  %6726 = vpow2.f32 %v4603_v30  ;;  %v6595_v14 = vld [vmem:[%s7758_s5 + $0x4c4] ss:$180 sps:$4 sm:$0xff]   ;;  %vm4466_vm6 = vcmp.gt.f32.partialorder %v8103_v29, 0.0  ;;  %v8152_v18 = vsub.s32 4, %v8031_v34  ;;  %vm4467_vm7 = vcmp.gt.f32.partialorder %v8106_v32, 0.0 }
 0x1d9   : > { %6728 = vpow2.f32 %v4605_v35  ;;  %4092 = vmatpush1.bf16.msra.mxu1 %v6569_v36  ;;  %v6584_v23 = vld [vmem:[%s7758_s5 + $0x620] ss:$180 sps:$4 sm:$0xff]   ;;  %v6590_v17 = vld [vmem:[%s7758_s5 + $0x788] ss:$180 sps:$4 sm:$0xff]   ;;  %v8177_v36 = vsub.s32 6, %v8031_v34 }
 0x1da   : > { %4067 = vmatmul.mubr.bf16.vlgmr.msra.gmra.mrb[28].mxu0 %v7984_v58  ;;  %6730 = vpow2.f32 %v4693_v40  ;;  %4163 = vmatprep.subr.bf16.mxu1 %v6577_v38  ;;  %v6592_v26 = vld [vmem:[%s7758_s5 + $0x78c] ss:$180 sps:$4 sm:$0xff]   ;;  %v6599_v37 = vld [vmem:[%s7758_s5 + $0x628] ss:$180 sps:$4 sm:$0xff]   ;;  %v8182_v38 = vsub.s32 7, %v8031_v34 }
 0x1db   : > { %4121 = vmatpush1.bf16.msra.mxu0 %v6560_v31  ;;  %4152 = vmatprep.mubr.bf16.mxu0 %v6940_v48  ;;  %6732 = vpow2.f32 %v4695_v42  ;;  %v6593_v27 = vld [vmem:[%s7758_s5 + $0x4c0] ss:$180 sps:$4 sm:$0xff]   ;;  %v1412_v31 = vrot.slane %v8053_v43, %v8152_v18 }
 0x1dc   : > { %4122 = vmatprep.subr.bf16.mxu0 %v6568_v33  ;;  %4110 = vmatmul.mubr.bf16.vlgmr.msra.gmra.mrb[28].mxu1 %v7984_v58  ;;  %v6601_v28 = vld [vmem:[%s7758_s5 + $0x62c] ss:$180 sps:$4 sm:$0xff]   ;;  %v6607_v40 = vld [vmem:[%s7758_s5 + $0x794] ss:$180 sps:$4 sm:$0xff]  }
 0x1dd   : > { %4164 = vmatpush1.bf16.msra.mxu1 %v6575_v46  ;;  %4195 = vmatprep.mubr.bf16.mxu1 %v6940_v48 }
 0x1de   : > { %v6719_v49 = vpop.eup %6718  ;;  %4165 = vmatprep.subr.bf16.mxu1 %v6583_v47  ;;  %v6596_v47 = vld [vmem:[%s7758_s5 + $0x8f0] ss:$180 sps:$4 sm:$0xff]  }
 0x1df   : > { %v6721_v50 = vpop.eup %6720  ;;  %v5915_v51 = vadd.f32 -1.0, %v6719_v49  ;;  %4123 = vmatpush1.bf16.msra.mxu0 %v6566_v44 }
 0x1e0   : > { %v6723_v54 = vpop.eup %6722  ;;  %v5916_v56 = vadd.f32 -1.0, %v6721_v50  ;;  %4124 = vmatprep.subr.bf16.mxu0 %v6574_v45 }
 0x1e1   : > { %v6725_v62 = vpop.eup %6724  ;;  %v4869_v63 = vsel %vm4419_vm0, %v8073_v59, %v5915_v51  ;;  %v5960_v0 = vadd.f32 -1.0, %v6723_v54  ;;  %v6578_v59 = vld [vmem:[%s7758_s5 + $0x4b8] ss:$180 sps:$4 sm:$0xff]   ;;  %4166 = vmatpush1.bf16.msra.mxu1 %v6581_v60  ;;  %v6605_v54 = vld [vmem:[%s7758_s5 + $0x790] ss:$180 sps:$4 sm:$0xff]  }
 0x1e2   : > { %v4870_v3 = vsel %vm4420_vm1, %v8075_v61, %v5916_v56  ;;  %v5961_v4 = vadd.f32 -1.0, %v6725_v62  ;;  %v6727_v5 = vpop.eup %6726  ;;  %4167 = vmatprep.subr.bf16.mxu1 %v6589_v1  ;;  %v1424_v56 = vrot.slane %v8053_v43, %v8182_v38  ;;  %v6613_v62 = vld [vmem:[%s7758_s5 + $0x8fc] ss:$180 sps:$4 sm:$0xff]   ;;  %v6602_v1 = vld [vmem:[%s7758_s5 + $0xa58] ss:$180 sps:$4 sm:$0xff]  }
 0x1e3   : > { %v6059_v6 = vpack.c.bf16 %v4870_v3, %v4869_v63  ;;  %v4914_v7 = vsel %vm4464_vm2, %v8081_v2, %v5960_v0  ;;  %4125 = vmatpush1.bf16.msra.mxu0 %v6572_v53  ;;  %v6729_v9 = vpop.eup %6728  ;;  %v5917_v61 = vadd.f32 -1.0, %v6727_v5  ;;  %v6604_v53 = vld [vmem:[%s7758_s5 + $0xa5c] ss:$180 sps:$4 sm:$0xff]  }
 0x1e4   : > { %v4915_v10 = vsel %vm4465_vm3, %v8088_v8, %v5961_v4  ;;  %4126 = vmatprep.subr.bf16.mxu0 %v6580_v57  ;;  %v5918_v13 = vadd.f32 -1.0, %v6729_v9  ;;  %v6731_v15 = vpop.eup %6730 }
 0x1e5   : > { %5231 = vst [vmem:[%s8143_s12] sm:$0xff] %v6059_v6  ;;  %v6082_v2 = vpack.c.bf16 %v4915_v10, %v4914_v7  ;;  %v4871_v8 = vsel %vm4421_vm4, %v8094_v16, %v5917_v61  ;;  %v6733_v19 = vpop.eup %6732  ;;  %v5962_v22 = vadd.f32 -1.0, %v6731_v15  ;;  %v8161_v16 = vsub.s32 5, %v8031_v34  ;;  %4168 = vmatpush1.bf16.msra.mxu1 %v6587_v12  ;;  %v6610_v7 = vld [vmem:[%s7758_s5 + $0x94] ss:$180 sps:$4 sm:$0xff]   ;;  %v6611_v61 = vld [vmem:[%s7758_s5 + $0x8f8] ss:$180 sps:$4 sm:$0xff]  }
 0x1e6   : > { %v4872_v20 = vsel %vm4422_vm5, %v8097_v21, %v5918_v13  ;;  %v5963_v25 = vadd.f32 -1.0, %v6733_v19  ;;  %4169 = vmatprep.subr.bf16.mxu1 %v6595_v14  ;;  %v1420_v34 = vrot.slane %v8053_v43, %v8177_v36  ;;  %v6619_v13 = vld [vmem:[%s7758_s5 + $0xa64] ss:$180 sps:$4 sm:$0xff]  }
 0x1e7   : > { %5254 = vst [vmem:[%s8143_s12 + $0xb4] sm:$0xff] %v6082_v2  ;;  %4127 = vmatpush1.bf16.msra.mxu0 %v6578_v59  ;;  %v6060_v24 = vpack.c.bf16 %v4872_v20, %v4871_v8  ;;  %v4916_v21 = vsel %vm4466_vm6, %v8103_v29, %v5962_v22  ;;  %v1416_v35 = vrot.slane %v8053_v43, %v8161_v16  ;;  %v6598_v29 = vld [vmem:[%s7758_s5 + $0x8f4] ss:$180 sps:$4 sm:$0xff]   ;;  %v6608_v19 = vld [vmem:[%s7758_s5 + $0x90] ss:$180 sps:$4 sm:$0xff]  }
 0x1e8   : > { %4128 = vmatprep.subr.bf16.mxu0 %v6586_v11  ;;  %v4917_v30 = vsel %vm4467_vm7, %v8106_v32, %v5963_v25  ;;  %v6616_v22 = vld [vmem:[%s7758_s5 + $0x1fc] ss:$180 sps:$4 sm:$0xff]   ;;  %v6617_v25 = vld [vmem:[%s7758_s5 + $0xa60] ss:$180 sps:$4 sm:$0xff]  }
 0x1e9   : > { %5232 = vst [vmem:[%s8143_s12 + $0x8] sm:$0xff] %v6060_v24  ;;  %v6083_v33 = vpack.c.bf16 %v4917_v30, %v4916_v21  ;;  %4170 = vmatpush1.bf16.msra.mxu1 %v6593_v27  ;;  %v6625_v27 = vld [vmem:[%s7758_s5 + $0x9c] ss:$180 sps:$4 sm:$0xff]   ;;  %v6614_v30 = vld [vmem:[%s7758_s5 + $0x1f8] ss:$180 sps:$4 sm:$0xff]  }
 0x1ea   : > { %4171 = vmatprep.subr.bf16.mxu1 %v6601_v28 }
 0x1eb   : > { %4129 = vmatpush1.bf16.msra.mxu0 %v6584_v23  ;;  %5255 = vst [vmem:[%s8143_s12 + $0xbc] sm:$0xff] %v6083_v33  ;;  %v6623_v33 = vld [vmem:[%s7758_s5 + $0x98] ss:$180 sps:$4 sm:$0xff]  }
 0x1ec   : > { %4130 = vmatprep.subr.bf16.mxu0 %v6592_v26 }
 0x1ed   : > { %v3552_v32 = vpop.f32.mrb[4].mxu0  ;;  %4172 = vmatpush1.bf16.msra.mxu1 %v6599_v37 }
 0x1ee   : > { %v8186_v42 = vadd.f32 %v3552_v32, %v1412_v31  ;;  %v3554_v44 = vpop.f32.mrb[5].mxu0  ;;  %4173 = vmatprep.subr.bf16.mxu1 %v6607_v40  ;;  %v6620_v32 = vld [vmem:[%s7758_s5 + $0x360] ss:$180 sps:$4 sm:$0xff]  }
 0x1ef   : > { %v8188_v45 = vadd.f32 %v3554_v44, %v1416_v35  ;;  %v3556_v46 = vpop.f32.mrb[6].mxu0  ;;  %4131 = vmatpush1.bf16.msra.mxu0 %v6590_v17  ;;  %v3595_v3 = vpop.f32.mrb[4].mxu1 }
 0x1f0   : > { %v4513_v49 = vmin.f32 %v8186_v42, 0.0  ;;  %v8194_v50 = vadd.f32 %v3556_v46, %v1412_v31  ;;  %v3558_v51 = vpop.f32.mrb[7].mxu0  ;;  %4132 = vmatprep.subr.bf16.mxu0 %v6598_v29  ;;  %v8207_v6 = vadd.f32 %v3595_v3, %v1420_v34  ;;  %v3597_v43 = vpop.f32.mrb[5].mxu1  ;;  %v6622_v31 = vld [vmem:[%s7758_s5 + $0x364] ss:$180 sps:$4 sm:$0xff]   ;;  %vm4423_vm8 = vcmp.gt.f32.partialorder %v8186_v42, 0.0 }
 0x1f1   : > { %v4514_v57 = vmin.f32 %v8188_v45, 0.0  ;;  %v8201_v60 = vadd.f32 %v3558_v51, %v1416_v35  ;;  %v8210_v9 = vadd.f32 %v3597_v43, %v1424_v56  ;;  %4174 = vmatpush1.bf16.msra.mxu1 %v6605_v54  ;;  %v3599_v10 = vpop.f32.mrb[6].mxu1  ;;  %v6631_v35 = vld [vmem:[%s7758_s5 + $0x204] ss:$180 sps:$4 sm:$0xff]   ;;  %v6628_v46 = vld [vmem:[%s7758_s5 + $0x4cc] ss:$180 sps:$4 sm:$0xff]  }
 0x1f2   : > { %v4607_v63 = vmul.f32 1.442695, %v4513_v49  ;;  %v4558_v0 = vmin.f32 %v8194_v50, 0.0  ;;  %v4515_v12 = vmin.f32 %v8207_v6, 0.0  ;;  %v3601_v2 = vpop.f32.mrb[7].mxu1  ;;  %4175 = vmatprep.subr.bf16.mxu1 %v6613_v62  ;;  %v8216_v15 = vadd.f32 %v3599_v10, %v1420_v34 }
 0x1f3   : > { %v4609_v4 = vmul.f32 1.442695, %v4514_v57  ;;  %v4559_v5 = vmin.f32 %v8201_v60, 0.0  ;;  %4133 = vmatpush1.bf16.msra.mxu0 %v6596_v47  ;;  %v4516_v14 = vmin.f32 %v8210_v9, 0.0  ;;  %v8219_v20 = vadd.f32 %v3601_v2, %v1424_v56  ;;  %v6629_v47 = vld [vmem:[%s7758_s5 + $0x200] ss:$180 sps:$4 sm:$0xff]  }
 0x1f4   : > { %6734 = vpow2.f32 %v4607_v63  ;;  %v4697_v59 = vmul.f32 1.442695, %v4558_v0  ;;  %4134 = vmatprep.subr.bf16.mxu0 %v6604_v53  ;;  %v4611_v8 = vmul.f32 1.442695, %v4515_v12  ;;  %v4560_v24 = vmin.f32 %v8216_v15, 0.0 }
 0x1f5   : > { %6736 = vpow2.f32 %v4609_v4  ;;  %v4699_v11 = vmul.f32 1.442695, %v4559_v5  ;;  %v4613_v23 = vmul.f32 1.442695, %v4516_v14  ;;  %4176 = vmatpush1.bf16.msra.mxu1 %v6611_v61  ;;  %v4561_v26 = vmin.f32 %v8219_v20, 0.0 }
 0x1f6   : > { %6738 = vpow2.f32 %v4697_v59  ;;  %4177 = vmatprep.subr.bf16.mxu1 %v6619_v13  ;;  %v4701_v21 = vmul.f32 1.442695, %v4560_v24  ;;  %vm4424_vm9 = vcmp.gt.f32.partialorder %v8188_v45, 0.0  ;;  %v6637_v53 = vld [vmem:[%s7758_s5 + $0x36c] ss:$180 sps:$4 sm:$0xff]   ;;  %vm4468_vm10 = vcmp.gt.f32.partialorder %v8194_v50, 0.0 }
 0x1f7   : > { %6740 = vpow2.f32 %v4699_v11  ;;  %4135 = vmatpush1.bf16.msra.mxu0 %v6602_v1  ;;  %v4703_v28 = vmul.f32 1.442695, %v4561_v26  ;;  %vm4469_vm11 = vcmp.gt.f32.partialorder %v8201_v60, 0.0  ;;  %vm4425_vm12 = vcmp.gt.f32.partialorder %v8207_v6, 0.0  ;;  %v6634_v1 = vld [vmem:[%s7758_s5 + $0x634] ss:$180 sps:$4 sm:$0xff]  }
 0x1f8   : > { %4206 = vmatprep.subr.bf16.mxu0 %v6610_v7  ;;  %6742 = vpow2.f32 %v4611_v8  ;;  %vm4426_vm13 = vcmp.gt.f32.partialorder %v8210_v9, 0.0  ;;  %v6635_v3 = vld [vmem:[%s7758_s5 + $0x368] ss:$180 sps:$4 sm:$0xff]   ;;  %vm4470_vm14 = vcmp.gt.f32.partialorder %v8216_v15, 0.0  ;;  %vm4471_vm15 = vcmp.gt.f32.partialorder %v8219_v20, 0.0 }
 0x1f9   : > { %6744 = vpow2.f32 %v4613_v23  ;;  %4178 = vmatpush1.bf16.msra.mxu1 %v6617_v25  ;;  %v6643_v5 = vld [vmem:[%s7758_s5 + $0x4d4] ss:$180 sps:$4 sm:$0xff]   ;;  %v6632_v61 = vld [vmem:[%s7758_s5 + $0x630] ss:$180 sps:$4 sm:$0xff]   ;;  %v6638_v24 = vld [vmem:[%s7758_s5 + $0x798] ss:$180 sps:$4 sm:$0xff]  }
 0x1fa   : > { %4153 = vmatmul.mubr.bf16.vlgmr.msra.gmra.mrb[32].mxu0 %v7984_v58  ;;  %6746 = vpow2.f32 %v4701_v21  ;;  %4249 = vmatprep.subr.bf16.mxu1 %v6625_v27  ;;  %v8262_v11 = vld [vmem:[%s8041_s19 + $0x8] sm:$0xff]  ;;  %v6641_v13 = vld [vmem:[%s7758_s5 + $0x4d0] ss:$180 sps:$4 sm:$0xff]  }
 0x1fb   : > { %4207 = vmatpush1.bf16.msra.mxu0 %v6608_v19  ;;  %4238 = vmatprep.mubr.bf16.mxu0 %v6940_v48  ;;  %6748 = vpow2.f32 %v4703_v28  ;;  %v1428_v19 = vrot.slane %v8262_v11, %v8045_v39  ;;  %v1432_v23 = vrot.slane %v8262_v11, %v8049_v41  ;;  %v6646_v25 = vld [vmem:[%s7758_s5 + $0x904] ss:$180 sps:$4 sm:$0xff]  }
 0x1fc   : > { %4208 = vmatprep.subr.bf16.mxu0 %v6616_v22  ;;  %4196 = vmatmul.mubr.bf16.vlgmr.msra.gmra.mrb[32].mxu1 %v7984_v58 }
 0x1fd   : > { %4250 = vmatpush1.bf16.msra.mxu1 %v6623_v33  ;;  %4281 = vmatprep.mubr.bf16.mxu1 %v6940_v48  ;;  %v1436_v33 = vrot.slane %v8262_v11, %v8065_v52 }
 0x1fe   : > { %v6735_v17 = vpop.eup %6734  ;;  %4251 = vmatprep.subr.bf16.mxu1 %v6631_v35 }
 0x1ff   : > { %v6737_v29 = vpop.eup %6736  ;;  %v5919_v37 = vadd.f32 -1.0, %v6735_v17  ;;  %4209 = vmatpush1.bf16.msra.mxu0 %v6614_v30 }
 0x200   : > { %v6739_v40 = vpop.eup %6738  ;;  %v5920_v44 = vadd.f32 -1.0, %v6737_v29  ;;  %4210 = vmatprep.subr.bf16.mxu0 %v6622_v31  ;;  %v6644_v31 = vld [vmem:[%s7758_s5 + $0x900] ss:$180 sps:$4 sm:$0xff]  }
 0x201   : > { %v6741_v34 = vpop.eup %6740  ;;  %v4873_v49 = vsel %vm4423_vm8, %v8186_v42, %v5919_v37  ;;  %v5964_v51 = vadd.f32 -1.0, %v6739_v40  ;;  %v6626_v42 = vld [vmem:[%s7758_s5 + $0x4c8] ss:$180 sps:$4 sm:$0xff]   ;;  %4252 = vmatpush1.bf16.msra.mxu1 %v6629_v47  ;;  %v6652_v37 = vld [vmem:[%s7758_s5 + $0xa6c] ss:$180 sps:$4 sm:$0xff]   ;;  %v1440_v40 = vrot.slane %v8262_v11, %v8070_v55  ;;  %vm6942_vm8 = vmmov 0  }
 0x202   : > { %v4874_v58 = vsel %vm4424_vm9, %v8188_v45, %v5920_v44  ;;  %v5965_v54 = vadd.f32 -1.0, %v6741_v34  ;;  %v6743_v56 = vpop.eup %6742  ;;  %4253 = vmatprep.subr.bf16.mxu1 %v6637_v53  ;;  %v6661_v47 = vld [vmem:[%s7758_s5 + $0x90c] ss:$180 sps:$4 sm:$0xff]  }
 0x203   : > { %v6061_v57 = vpack.c.bf16 %v4874_v58, %v4873_v49  ;;  %v4918_v62 = vsel %vm4468_vm10, %v8194_v50, %v5964_v51  ;;  %4211 = vmatpush1.bf16.msra.mxu0 %v6620_v32  ;;  %v6745_v63 = vpop.eup %6744  ;;  %v5921_v45 = vadd.f32 -1.0, %v6743_v56  ;;  %v6653_v32 = vld [vmem:[%s7758_s5 + $0x7a0] ss:$180 sps:$4 sm:$0xff]   ;;  %v6650_v51 = vld [vmem:[%s7758_s5 + $0xa68] ss:$180 sps:$4 sm:$0xff]  }
 0x204   : > { %v4919_v0 = vsel %vm4469_vm11, %v8201_v60, %v5965_v54  ;;  %4212 = vmatprep.subr.bf16.mxu0 %v6628_v46  ;;  %v5922_v4 = vadd.f32 -1.0, %v6745_v63  ;;  %v6747_v43 = vpop.eup %6746 }
 0x205   : > { %5233 = vst [vmem:[%s8143_s12 + $0x10] sm:$0xff] %v6061_v57  ;;  %v6084_v50 = vpack.c.bf16 %v4919_v0, %v4918_v62  ;;  %v4875_v60 = vsel %vm4425_vm12, %v8207_v6, %v5921_v45  ;;  %v6749_v7 = vpop.eup %6748  ;;  %v5966_v10 = vadd.f32 -1.0, %v6747_v43  ;;  %v6640_v6 = vld [vmem:[%s7758_s5 + $0x79c] ss:$180 sps:$4 sm:$0xff]   ;;  %4254 = vmatpush1.bf16.msra.mxu1 %v6635_v3  ;;  %v6658_v62 = vld [vmem:[%s7758_s5 + $0xa4] ss:$180 sps:$4 sm:$0xff]  }
 0x206   : > { %v4876_v59 = vsel %vm4426_vm13, %v8210_v9, %v5922_v4  ;;  %v5967_v2 = vadd.f32 -1.0, %v6749_v7  ;;  %4255 = vmatprep.subr.bf16.mxu1 %v6643_v5  ;;  %v6649_v9 = vld [vmem:[%s7758_s5 + $0x63c] ss:$180 sps:$4 sm:$0xff]   ;;  %v6667_v4 = vld [vmem:[%s7758_s5 + $0xa74] ss:$180 sps:$4 sm:$0xff]  }
 0x207   : > { %5256 = vst [vmem:[%s8143_s12 + $0xc4] sm:$0xff] %v6084_v50  ;;  %4213 = vmatpush1.bf16.msra.mxu0 %v6626_v42  ;;  %v6062_v12 = vpack.c.bf16 %v4876_v59, %v4875_v60  ;;  %v4920_v14 = vsel %vm4470_vm14, %v8216_v15, %v5966_v10  ;;  %v6647_v15 = vld [vmem:[%s7758_s5 + $0x638] ss:$180 sps:$4 sm:$0xff]   ;;  %v6659_v45 = vld [vmem:[%s7758_s5 + $0x908] ss:$180 sps:$4 sm:$0xff]  }
 0x208   : > { %4214 = vmatprep.subr.bf16.mxu0 %v6634_v1  ;;  %v4921_v8 = vsel %vm4471_vm15, %v8219_v20, %v5967_v2  ;;  %v6655_v20 = vld [vmem:[%s7758_s5 + $0x7a4] ss:$180 sps:$4 sm:$0xff]   ;;  %v6656_v7 = vld [vmem:[%s7758_s5 + $0xa0] ss:$180 sps:$4 sm:$0xff]  }
 0x209   : > { %5234 = vst [vmem:[%s8143_s12 + $0x18] sm:$0xff] %v6062_v12  ;;  %v6085_v22 = vpack.c.bf16 %v4921_v8, %v4920_v14  ;;  %4256 = vmatpush1.bf16.msra.mxu1 %v6641_v13  ;;  %v6664_v10 = vld [vmem:[%s7758_s5 + $0x20c] ss:$180 sps:$4 sm:$0xff]   ;;  %v6665_v2 = vld [vmem:[%s7758_s5 + $0xa70] ss:$180 sps:$4 sm:$0xff]  }
 0x20a   : > { %4257 = vmatprep.subr.bf16.mxu1 %v6649_v9  ;;  %v6673_v13 = vld [vmem:[%s7758_s5 + $0xac] ss:$180 sps:$4 sm:$0xff]  }
 0x20b   : > { %4215 = vmatpush1.bf16.msra.mxu0 %v6632_v61  ;;  %5257 = vst [vmem:[%s8143_s12 + $0xcc] sm:$0xff] %v6085_v22  ;;  %v8322_v14 = vld [vmem:[%s8665_s0] sm:$0xff]   ;;  %v6670_v22 = vld [vmem:[%s7758_s5 + $0x374] ss:$180 sps:$4 sm:$0xff]  }
 0x20c   : > { %4216 = vmatprep.subr.bf16.mxu0 %v6640_v6 }
 0x20d   : > { %v3638_v26 = vpop.f32.mrb[8].mxu0  ;;  %4258 = vmatpush1.bf16.msra.mxu1 %v6647_v15 }
 0x20e   : > { %v8279_v27 = vadd.f32 %v3638_v26, %v1428_v19  ;;  %v3640_v21 = vpop.f32.mrb[9].mxu0  ;;  %4259 = vmatprep.subr.bf16.mxu1 %v6655_v20  ;;  %v6668_v20 = vld [vmem:[%s7758_s5 + $0x370] ss:$180 sps:$4 sm:$0xff]  }
 0x20f   : > { %v8281_v28 = vadd.f32 %v3640_v21, %v1432_v23  ;;  %v3642_v30 = vpop.f32.mrb[10].mxu0  ;;  %4217 = vmatpush1.bf16.msra.mxu0 %v6638_v24  ;;  %v3681_v53 = vpop.f32.mrb[8].mxu1  ;;  %v6679_v24 = vld [vmem:[%s7758_s5 + $0x214] ss:$180 sps:$4 sm:$0xff]  }
 0x210   : > { %v4517_v35 = vmin.f32 %v8279_v27, 0.0  ;;  %v8287_v17 = vadd.f32 %v3642_v30, %v1428_v19  ;;  %v3644_v29 = vpop.f32.mrb[11].mxu0  ;;  %4218 = vmatprep.subr.bf16.mxu0 %v6646_v25  ;;  %v8300_v56 = vadd.f32 %v3681_v53, %v1436_v33  ;;  %v3683_v57 = vpop.f32.mrb[9].mxu1  ;;  %v6662_v19 = vld [vmem:[%s7758_s5 + $0x208] ss:$180 sps:$4 sm:$0xff]   ;;  %vm4427_vm0 = vcmp.gt.f32.partialorder %v8279_v27, 0.0 }
 0x211   : > { %v4518_v44 = vmin.f32 %v8281_v28, 0.0  ;;  %v8294_v46 = vadd.f32 %v3644_v29, %v1432_v23  ;;  %v8303_v63 = vadd.f32 %v3683_v57, %v1440_v40  ;;  %4260 = vmatpush1.bf16.msra.mxu1 %v6653_v32  ;;  %v3685_v0 = vpop.f32.mrb[10].mxu1  ;;  %v6671_v23 = vld [vmem:[%s7758_s5 + $0xa8] ss:$180 sps:$4 sm:$0xff]   ;;  %vm4428_vm1 = vcmp.gt.f32.partialorder %v8281_v28, 0.0 }
 0x212   : > { %v4615_v34 = vmul.f32 1.442695, %v4517_v35  ;;  %v4562_v49 = vmin.f32 %v8287_v17, 0.0  ;;  %v4519_v3 = vmin.f32 %v8300_v56, 0.0  ;;  %v3687_v50 = vpop.f32.mrb[11].mxu1  ;;  %4261 = vmatprep.subr.bf16.mxu1 %v6661_v47  ;;  %v8309_v43 = vadd.f32 %v3685_v0, %v1436_v33 }
 0x213   : > { %v4617_v58 = vmul.f32 1.442695, %v4518_v44  ;;  %v4563_v54 = vmin.f32 %v8294_v46, 0.0  ;;  %4219 = vmatpush1.bf16.msra.mxu0 %v6644_v31  ;;  %v4520_v5 = vmin.f32 %v8303_v63, 0.0  ;;  %v8312_v59 = vadd.f32 %v3687_v50, %v1440_v40  ;;  %v6676_v31 = vld [vmem:[%s7758_s5 + $0x4dc] ss:$180 sps:$4 sm:$0xff]  }
 0x214   : > { %6750 = vpow2.f32 %v4615_v34  ;;  %v4705_v42 = vmul.f32 1.442695, %v4562_v49  ;;  %4220 = vmatprep.subr.bf16.mxu0 %v6652_v37  ;;  %v4619_v60 = vmul.f32 1.442695, %v4519_v3  ;;  %v4564_v12 = vmin.f32 %v8309_v43, 0.0 }
 0x215   : > { %6752 = vpow2.f32 %v4617_v58  ;;  %v4707_v1 = vmul.f32 1.442695, %v4563_v54  ;;  %v4621_v61 = vmul.f32 1.442695, %v4520_v5  ;;  %4262 = vmatpush1.bf16.msra.mxu1 %v6659_v45  ;;  %v4565_v6 = vmin.f32 %v8312_v59, 0.0 }
 0x216   : > { %6754 = vpow2.f32 %v4705_v42  ;;  %4263 = vmatprep.subr.bf16.mxu1 %v6667_v4  ;;  %v4709_v9 = vmul.f32 1.442695, %v4564_v12  ;;  %v6677_v33 = vld [vmem:[%s7758_s5 + $0x210] ss:$180 sps:$4 sm:$0xff]   ;;  %vm4472_vm2 = vcmp.gt.f32.partialorder %v8287_v17, 0.0  ;;  %vm4473_vm3 = vcmp.gt.f32.partialorder %v8294_v46, 0.0 }
 0x217   : > { %6756 = vpow2.f32 %v4707_v1  ;;  %4221 = vmatpush1.bf16.msra.mxu0 %v6650_v51  ;;  %v4711_v8 = vmul.f32 1.442695, %v4565_v6  ;;  %v6685_v32 = vld [vmem:[%s7758_s5 + $0x37c] ss:$180 sps:$4 sm:$0xff]   ;;  %vm4429_vm4 = vcmp.gt.f32.partialorder %v8300_v56, 0.0  ;;  %vm4430_vm5 = vcmp.gt.f32.partialorder %v8303_v63, 0.0 }
 0x218   : > { %4292 = vmatprep.subr.bf16.mxu0 %v6658_v62  ;;  %6758 = vpow2.f32 %v4619_v60  ;;  %v6682_v53 = vld [vmem:[%s7758_s5 + $0x644] ss:$180 sps:$4 sm:$0xff]   ;;  %vm4474_vm6 = vcmp.gt.f32.partialorder %v8309_v43, 0.0  ;;  %vm4475_vm7 = vcmp.gt.f32.partialorder %v8312_v59, 0.0  ;;  %v6680_v1 = vld [vmem:[%s7758_s5 + $0x640] ss:$180 sps:$4 sm:$0xff]  }
 0x219   : > { %6760 = vpow2.f32 %v4621_v61  ;;  %4264 = vmatpush1.bf16.msra.mxu1 %v6665_v2  ;;  %v6683_v58 = vld [vmem:[%s7758_s5 + $0x378] ss:$180 sps:$4 sm:$0xff]   ;;  %v1448_v61 = vrot.slane %v8262_v11, %v8161_v16  ;;  %v6686_v12 = vld [vmem:[%s7758_s5 + $0x7a8] ss:$180 sps:$4 sm:$0xff]  }
 0x21a   : > { %4239 = vmatmul.mubr.bf16.vlgmr.msra.gmra.mrb[36].mxu0 %v8322_v14  ;;  %6762 = vpow2.f32 %v4709_v9  ;;  %4335 = vmatprep.subr.bf16.mxu1 %v6673_v13  ;;  %v6691_v57 = vld [vmem:[%s7758_s5 + $0x4e4] ss:$180 sps:$4 sm:$0xff]   ;;  %v6688_v4 = vld [vmem:[%s7758_s5 + $0x7ac] ss:$180 sps:$4 sm:$0xff]   ;;  %v6694_v2 = vld [vmem:[%s7758_s5 + $0x914] ss:$180 sps:$4 sm:$0xff]  }
 0x21b   : > { %4293 = vmatpush1.bf16.msra.mxu0 %v6656_v7  ;;  %4324 = vmatprep.mubr.bf16.mxu0 %v6940_v48  ;;  %6764 = vpow2.f32 %v4711_v8  ;;  %v1444_v7 = vrot.slane %v8262_v11, %v8152_v18 }
 0x21c   : > { %4294 = vmatprep.subr.bf16.mxu0 %v6664_v10  ;;  %4282 = vmatmul.mubr.bf16.vlgmr.msra.gmra.mrb[36].mxu1 %v8322_v14 }
 0x21d   : > { %4336 = vmatpush1.bf16.msra.mxu1 %v6671_v23  ;;  %4367 = vmatprep.mubr.bf16.mxu1 %v6940_v48  ;;  %v1452_v23 = vrot.slane %v8262_v11, %v8177_v36 }
 0x21e   : > { %v6751_v25 = vpop.eup %6750  ;;  %4337 = vmatprep.subr.bf16.mxu1 %v6679_v24 }
 0x21f   : > { %v6753_v15 = vpop.eup %6752  ;;  %v5923_v26 = vadd.f32 -1.0, %v6751_v25  ;;  %4295 = vmatpush1.bf16.msra.mxu0 %v6662_v19 }
 0x220   : > { %v6755_v21 = vpop.eup %6754  ;;  %v5924_v30 = vadd.f32 -1.0, %v6753_v15  ;;  %4296 = vmatprep.subr.bf16.mxu0 %v6670_v22  ;;  %v6692_v22 = vld [vmem:[%s7758_s5 + $0x910] ss:$180 sps:$4 sm:$0xff]  }
 0x221   : > { %v6757_v35 = vpop.eup %6756  ;;  %v4877_v29 = vsel %vm4427_vm0, %v8279_v27, %v5923_v26  ;;  %v5968_v37 = vadd.f32 -1.0, %v6755_v21  ;;  %v6674_v27 = vld [vmem:[%s7758_s5 + $0x4d8] ss:$180 sps:$4 sm:$0xff]   ;;  %4338 = vmatpush1.bf16.msra.mxu1 %v6677_v33  ;;  %v6700_v26 = vld [vmem:[%s7758_s5 + $0xa7c] ss:$180 sps:$4 sm:$0xff]   ;;  %v1456_v21 = vrot.slane %v8262_v11, %v8182_v38 }
 0x222   : > { %v4878_v40 = vsel %vm4428_vm1, %v8281_v28, %v5924_v30  ;;  %v5969_v44 = vadd.f32 -1.0, %v6757_v35  ;;  %v6759_v47 = vpop.eup %6758  ;;  %4339 = vmatprep.subr.bf16.mxu1 %v6685_v32  ;;  %v6707_v33 = vld [vmem:[%s7758_s5 + $0x91c] ss:$180 sps:$4 sm:$0xff]  }
 0x223   : > { %v6063_v34 = vpack.c.bf16 %v4878_v40, %v4877_v29  ;;  %v4922_v49 = vsel %vm4472_vm2, %v8287_v17, %v5968_v37  ;;  %4297 = vmatpush1.bf16.msra.mxu0 %v6668_v20  ;;  %v6761_v48 = vpop.eup %6760  ;;  %v5925_v28 = vadd.f32 -1.0, %v6759_v47  ;;  %v6701_v20 = vld [vmem:[%s7758_s5 + $0x7b0] ss:$180 sps:$4 sm:$0xff]  }
 0x224   : > { %v4923_v51 = vsel %vm4473_vm3, %v8294_v46, %v5969_v44  ;;  %4298 = vmatprep.subr.bf16.mxu0 %v6676_v31  ;;  %v5926_v54 = vadd.f32 -1.0, %v6761_v48  ;;  %v6763_v62 = vpop.eup %6762  ;;  %v6698_v44 = vld [vmem:[%s7758_s5 + $0xa78] ss:$180 sps:$4 sm:$0xff]  }
 0x225   : > { %5235 = vst [vmem:[%s8143_s12 + $0x20] sm:$0xff] %v6063_v34  ;;  %v6086_v17 = vpack.c.bf16 %v4923_v51, %v4922_v49  ;;  %v4879_v46 = vsel %vm4429_vm4, %v8300_v56, %v5925_v28  ;;  %v6765_v42 = vpop.eup %6764  ;;  %v5970_v45 = vadd.f32 -1.0, %v6763_v62  ;;  %4340 = vmatpush1.bf16.msra.mxu1 %v6683_v58  ;;  %v6689_v56 = vld [vmem:[%s7758_s5 + $0x4e0] ss:$180 sps:$4 sm:$0xff]   ;;  %v6705_v48 = vld [vmem:[%s7758_s5 + $0x918] ss:$180 sps:$4 sm:$0xff]  }
 0x226   : > { %v4880_v0 = vsel %vm4430_vm5, %v8303_v63, %v5926_v54  ;;  %v5971_v50 = vadd.f32 -1.0, %v6765_v42  ;;  %4341 = vmatprep.subr.bf16.mxu1 %v6691_v57  ;;  %v6697_v63 = vld [vmem:[%s7758_s5 + $0x64c] ss:$180 sps:$4 sm:$0xff]   ;;  %v6711_v58 = vld [vmem:[%s7758_s5 + $0xa84] ss:$180 sps:$4 sm:$0xff]  }
 0x227   : > { %5258 = vst [vmem:[%s8143_s12 + $0xd4] sm:$0xff] %v6086_v17  ;;  %4299 = vmatpush1.bf16.msra.mxu0 %v6674_v27  ;;  %v6064_v3 = vpack.c.bf16 %v4880_v0, %v4879_v46  ;;  %v4924_v5 = vsel %vm4474_vm6, %v8309_v43, %v5970_v45  ;;  %v6695_v43 = vld [vmem:[%s7758_s5 + $0x648] ss:$180 sps:$4 sm:$0xff]   ;;  %v6704_v62 = vld [vmem:[%s7758_s5 + $0xb0] ss:$180 sps:$4 sm:$0xff]   ;;  %v6941_v0 = vmov 0.0  }
 0x228   : > { %4300 = vmatprep.subr.bf16.mxu0 %v6682_v53  ;;  %v4925_v60 = vsel %vm4475_vm7, %v8312_v59, %v5971_v50  ;;  %v6703_v59 = vld [vmem:[%s7758_s5 + $0x7b4] ss:$180 sps:$4 sm:$0xff]  }
 0x229   : > { %5236 = vst [vmem:[%s8143_s12 + $0x28] sm:$0xff] %v6064_v3  ;;  %v6087_v10 = vpack.c.bf16 %v4925_v60, %v4924_v5  ;;  %4342 = vmatpush1.bf16.msra.mxu1 %v6689_v56  ;;  %v6708_v56 = vld [vmem:[%s7758_s5 + $0x218] ss:$180 sps:$4 sm:$0xff]  }
 0x22a   : > { %4343 = vmatprep.subr.bf16.mxu1 %v6697_v63 }
 0x22b   : > { %4301 = vmatpush1.bf16.msra.mxu0 %v6680_v1  ;;  %5259 = vst [vmem:[%s8143_s12 + $0xdc] sm:$0xff] %v6087_v10  ;;  %v6709_v1 = vld [vmem:[%s7758_s5 + $0xa80] ss:$180 sps:$4 sm:$0xff]  }
 0x22c   : > { %4302 = vmatprep.subr.bf16.mxu0 %v6688_v4 }
 0x22d   : > { %v3724_v6 = vpop.f32.mrb[12].mxu0  ;;  %4344 = vmatpush1.bf16.msra.mxu1 %v6695_v43 }
 0x22e   : > { %v8374_v13 = vadd.f32 %v3724_v6, %v1444_v7  ;;  %v3726_v9 = vpop.f32.mrb[13].mxu0  ;;  %4345 = vmatprep.subr.bf16.mxu1 %v6703_v59 }
 0x22f   : > { %v8376_v8 = vadd.f32 %v3726_v9, %v1448_v61  ;;  %v3728_v19 = vpop.f32.mrb[14].mxu0  ;;  %4303 = vmatpush1.bf16.msra.mxu0 %v6686_v12  ;;  %v3767_v37 = vpop.f32.mrb[12].mxu1 }
 0x230   : > { %v4521_v24 = vmin.f32 %v8374_v13, 0.0  ;;  %v8382_v25 = vadd.f32 %v3728_v19, %v1444_v7  ;;  %v3730_v15 = vpop.f32.mrb[15].mxu0  ;;  %4304 = vmatprep.subr.bf16.mxu0 %v6694_v2  ;;  %v8395_v47 = vadd.f32 %v3767_v37, %v1452_v23  ;;  %v3769_v11 = vpop.f32.mrb[13].mxu1  ;;  %v6712_v7 = vld [vmem:[%s7758_s5 + $0x380] ss:$180 sps:$4 sm:$0xff]   ;;  %vm4431_vm9 = vcmp.gt.f32.partialorder %v8374_v13, 0.0 }
 0x231   : > { %v4522_v30 = vmin.f32 %v8376_v8, 0.0  ;;  %v8389_v31 = vadd.f32 %v3730_v15, %v1448_v61  ;;  %v8397_v49 = vadd.f32 %v3769_v11, %v1456_v21  ;;  %4346 = vmatpush1.bf16.msra.mxu1 %v6701_v20  ;;  %v3771_v27 = vpop.f32.mrb[14].mxu1  ;;  %vm4432_vm10 = vcmp.gt.f32.partialorder %v8376_v8, 0.0 }
 0x232   : > { %v4623_v35 = vmul.f32 1.442695, %v4521_v24  ;;  %v4566_v29 = vmin.f32 %v8382_v25, 0.0  ;;  %v4523_v28 = vmin.f32 %v8395_v47, 0.0  ;;  %v3773_v53 = vpop.f32.mrb[15].mxu1  ;;  %4347 = vmatprep.subr.bf16.mxu1 %v6707_v33  ;;  %v8403_v54 = vadd.f32 %v3771_v27, %v1452_v23 }
 0x233   : > { %v4625_v32 = vmul.f32 1.442695, %v4522_v30  ;;  %v4567_v40 = vmin.f32 %v8389_v31, 0.0  ;;  %4305 = vmatpush1.bf16.msra.mxu0 %v6692_v22  ;;  %v4524_v17 = vmin.f32 %v8397_v49, 0.0  ;;  %v8406_v46 = vadd.f32 %v3773_v53, %v1456_v21  ;;  %v6714_v33 = vld [vmem:[%s7758_s5 + $0x650] ss:$180 sps:$4 sm:$0xff]  }
 0x234   : > { %6766 = vpow2.f32 %v4623_v35  ;;  %v4713_v34 = vmul.f32 1.442695, %v4566_v29  ;;  %4306 = vmatprep.subr.bf16.mxu0 %v6700_v26  ;;  %v4627_v57 = vmul.f32 1.442695, %v4523_v28  ;;  %v4568_v45 = vmin.f32 %v8403_v54, 0.0  ;;  %v8439_v35 = vld [vmem:[%s8041_s19 + $0x10] sm:$0xff] }
 0x235   : > { %6768 = vpow2.f32 %v4625_v32  ;;  %v4715_v51 = vmul.f32 1.442695, %v4567_v40  ;;  %v4629_v42 = vmul.f32 1.442695, %v4524_v17  ;;  %4348 = vmatpush1.bf16.msra.mxu1 %v6705_v48  ;;  %v4569_v3 = vmin.f32 %v8406_v46, 0.0 }
 0x236   : > { %6770 = vpow2.f32 %v4713_v34  ;;  %4349 = vmatprep.subr.bf16.mxu1 %v6711_v58  ;;  %v4717_v50 = vmul.f32 1.442695, %v4568_v45  ;;  %vm4476_vm11 = vcmp.gt.f32.partialorder %v8382_v25, 0.0  ;;  %vm4477_vm12 = vcmp.gt.f32.partialorder %v8389_v31, 0.0  ;;  %v6715_v34 = vld [vmem:[%s7758_s5 + $0x7b8] ss:$180 sps:$4 sm:$0xff]  }
 0x237   : > { %6772 = vpow2.f32 %v4715_v51  ;;  %4307 = vmatpush1.bf16.msra.mxu0 %v6698_v44  ;;  %v4719_v4 = vmul.f32 1.442695, %v4569_v3  ;;  %vm4433_vm13 = vcmp.gt.f32.partialorder %v8395_v47, 0.0  ;;  %vm4434_vm14 = vcmp.gt.f32.partialorder %v8397_v49, 0.0  ;;  %v6716_v53 = vld [vmem:[%s7758_s5 + $0x920] ss:$180 sps:$4 sm:$0xff]  }
 0x238   : > { %6115 = vmatprep.subr.bf16.mxu0 %v6941_v0  ;;  %6774 = vpow2.f32 %v4627_v57  ;;  %vm4478_vm15 = vcmp.gt.f32.partialorder %v8403_v54, 0.0  ;;  %vm4479_vm0 = vcmp.gt.f32.partialorder %v8406_v46, 0.0  ;;  %v1460_v44 = vrot.slane %v8439_v35, %v8045_v39 }
 0x239   : > { %6776 = vpow2.f32 %v4629_v42  ;;  %4350 = vmatpush1.bf16.msra.mxu1 %v6709_v1  ;;  %v1464_v11 = vrot.slane %v8439_v35, %v8049_v41  ;;  %v1468_v58 = vrot.slane %v8439_v35, %v8065_v52 }
 0x23a   : > { %4325 = vmatmul.mubr.bf16.vlgmr.msra.gmra.mrb[40].mxu0 %v8322_v14  ;;  %6778 = vpow2.f32 %v4717_v50 }
 0x23b   : > { %6116 = vmatpush3.bf16.msra.mxu0 %v6704_v62  ;;  %6131 = vmatprep.mubr.msk.bf16.mxu0 %vm6942_vm8, %v6941_v0  ;;  %6780 = vpow2.f32 %v4719_v4  ;;  %v1472_v62 = vrot.slane %v8439_v35, %v8070_v55 }
 0x23c   : > { %6117 = vmatprep.subr.bf16.mxu0 %v6941_v0  ;;  %4368 = vmatmul.mubr.bf16.vlgmr.msra.gmra.mrb[40].mxu1 %v8322_v14 }
 0x23e   : > { %v6767_v5 = vpop.eup %6766 }
 0x23f   : > { %v6769_v63 = vpop.eup %6768  ;;  %v5927_v60 = vadd.f32 -1.0, %v6767_v5  ;;  %6118 = vmatpush3.bf16.msra.mxu0 %v6708_v56  ;;  %v6717_v56 = vld [vmem:[%s7758_s5 + $0xa88] ss:$180 sps:$4 sm:$0xff]  }
 0x240   : > { %v6771_v10 = vpop.eup %6770  ;;  %v5928_v61 = vadd.f32 -1.0, %v6769_v63  ;;  %6119 = vmatprep.subr.bf16.mxu0 %v6941_v0 }
 0x241   : > { %v6773_v12 = vpop.eup %6772  ;;  %v4881_v2 = vsel %vm4431_vm9, %v8374_v13, %v5927_v60  ;;  %v5972_v43 = vadd.f32 -1.0, %v6771_v10  ;;  %v6713_v13 = vld [vmem:[%s7758_s5 + $0x4e8] ss:$180 sps:$4 sm:$0xff]  }
 0x242   : > { %v4882_v6 = vsel %vm4432_vm10, %v8376_v8, %v5928_v61  ;;  %v5973_v59 = vadd.f32 -1.0, %v6773_v12  ;;  %v6775_v9 = vpop.eup %6774 }
 0x243   : > { %v6065_v19 = vpack.c.bf16 %v4882_v6, %v4881_v2  ;;  %v4926_v22 = vsel %vm4476_vm11, %v8382_v25, %v5972_v43  ;;  %6120 = vmatpush3.bf16.msra.mxu0 %v6712_v7  ;;  %v6777_v23 = vpop.eup %6776  ;;  %v5929_v15 = vadd.f32 -1.0, %v6775_v9 }
 0x244   : > { %v4927_v24 = vsel %vm4477_vm12, %v8389_v31, %v5973_v59  ;;  %6121 = vmatprep.subr.bf16.mxu0 %v6941_v0  ;;  %v5930_v25 = vadd.f32 -1.0, %v6777_v23  ;;  %v6779_v26 = vpop.eup %6778 }
 0x245   : > { %5237 = vst [vmem:[%s8143_s12 + $0x30] sm:$0xff] %v6065_v19  ;;  %v6088_v8 = vpack.c.bf16 %v4927_v24, %v4926_v22  ;;  %v4883_v20 = vsel %vm4433_vm13, %v8395_v47, %v5929_v15  ;;  %v6781_v21 = vpop.eup %6780  ;;  %v5974_v31 = vadd.f32 -1.0, %v6779_v26 }
 0x246   : > { %v4884_v30 = vsel %vm4434_vm14, %v8397_v49, %v5930_v25  ;;  %v5975_v37 = vadd.f32 -1.0, %v6781_v21 }
 0x247   : > { %5260 = vst [vmem:[%s8143_s12 + $0xe4] sm:$0xff] %v6088_v8  ;;  %6122 = vmatpush3.bf16.msra.mxu0 %v6713_v13  ;;  %v6066_v29 = vpack.c.bf16 %v4884_v30, %v4883_v20  ;;  %v4928_v32 = vsel %vm4478_vm15, %v8403_v54, %v5974_v31 }
 0x248   : > { %6123 = vmatprep.subr.bf16.mxu0 %v6941_v0  ;;  %v4929_v40 = vsel %vm4479_vm0, %v8406_v46, %v5975_v37 }
 0x249   : > { %5238 = vst [vmem:[%s8143_s12 + $0x38] sm:$0xff] %v6066_v29  ;;  %v6089_v47 = vpack.c.bf16 %v4929_v40, %v4928_v32 }
 0x24b   : > { %6124 = vmatpush3.bf16.msra.mxu0 %v6714_v33  ;;  %5261 = vst [vmem:[%s8143_s12 + $0xec] sm:$0xff] %v6089_v47 }
 0x24c   : > { %6125 = vmatprep.subr.bf16.mxu0 %v6941_v0 }
 0x24d   : > { %v3810_v49 = vpop.f32.mrb[16].mxu0 }
 0x24e   : > { %v3811_v27 = vadd.f32 %v3810_v49, %v1460_v44  ;;  %v3812_v48 = vpop.f32.mrb[17].mxu0 }
 0x24f   : > { %v3813_v51 = vadd.f32 %v3812_v48, %v1464_v11  ;;  %v3814_v28 = vpop.f32.mrb[18].mxu0  ;;  %6126 = vmatpush3.bf16.msra.mxu0 %v6715_v34  ;;  %v3853_v3 = vpop.f32.mrb[16].mxu1 }
 0x250   : > { %v4525_v17 = vmin.f32 %v3811_v27, 0.0  ;;  %v3815_v54 = vadd.f32 %v3814_v28, %v1460_v44  ;;  %v3816_v57 = vpop.f32.mrb[19].mxu0  ;;  %6127 = vmatprep.subr.bf16.mxu0 %v6941_v0  ;;  %v3854_v5 = vadd.f32 %v3853_v3, %v1468_v58  ;;  %v3855_v63 = vpop.f32.mrb[17].mxu1  ;;  %vm4435_vm1 = vcmp.gt.f32.partialorder %v3811_v27, 0.0 }
 0x251   : > { %v4526_v46 = vmin.f32 %v3813_v51, 0.0  ;;  %v3817_v42 = vadd.f32 %v3816_v57, %v1464_v11  ;;  %v3856_v7 = vadd.f32 %v3855_v63, %v1472_v62  ;;  %v3857_v10 = vpop.f32.mrb[18].mxu1  ;;  %vm4436_vm2 = vcmp.gt.f32.partialorder %v3813_v51, 0.0 }
 0x252   : > { %v4631_v45 = vmul.f32 1.442695, %v4525_v17  ;;  %v4570_v1 = vmin.f32 %v3815_v54, 0.0  ;;  %v4527_v12 = vmin.f32 %v3854_v5, 0.0  ;;  %v3859_v2 = vpop.f32.mrb[19].mxu1  ;;  %v3858_v6 = vadd.f32 %v3857_v10, %v1468_v58 }
 0x253   : > { %v4633_v50 = vmul.f32 1.442695, %v4526_v46  ;;  %v4571_v4 = vmin.f32 %v3817_v42, 0.0  ;;  %6128 = vmatpush3.bf16.msra.mxu0 %v6716_v53  ;;  %v4528_v43 = vmin.f32 %v3856_v7, 0.0  ;;  %v3860_v9 = vadd.f32 %v3859_v2, %v1472_v62 }
 0x254   : > { %6782 = vpow2.f32 %v4631_v45  ;;  %v4721_v60 = vmul.f32 1.442695, %v4570_v1  ;;  %6129 = vmatprep.subr.bf16.mxu0 %v6941_v0  ;;  %v4635_v59 = vmul.f32 1.442695, %v4527_v12  ;;  %v4572_v22 = vmin.f32 %v3858_v6, 0.0 }
 0x255   : > { %6784 = vpow2.f32 %v4633_v50  ;;  %v4723_v61 = vmul.f32 1.442695, %v4571_v4  ;;  %v4637_v19 = vmul.f32 1.442695, %v4528_v43  ;;  %v4573_v13 = vmin.f32 %v3860_v9, 0.0 }
 0x256   : > { %6786 = vpow2.f32 %v4721_v60  ;;  %v4725_v0 = vmul.f32 1.442695, %v4572_v22  ;;  %vm4480_vm3 = vcmp.gt.f32.partialorder %v3815_v54, 0.0  ;;  %vm4481_vm4 = vcmp.gt.f32.partialorder %v3817_v42, 0.0 }
 0x257   : > { %6788 = vpow2.f32 %v4723_v61  ;;  %6130 = vmatpush3.bf16.msra.mxu0 %v6717_v56  ;;  %v4727_v23 = vmul.f32 1.442695, %v4573_v13  ;;  %vm4437_vm5 = vcmp.gt.f32.partialorder %v3854_v5, 0.0  ;;  %vm4438_vm6 = vcmp.gt.f32.partialorder %v3856_v7, 0.0 }
 0x258   : > { %6790 = vpow2.f32 %v4635_v59  ;;  %vm4482_vm7 = vcmp.gt.f32.partialorder %v3858_v6, 0.0  ;;  %vm4483_vm8 = vcmp.gt.f32.partialorder %v3860_v9, 0.0  ;;  %v1480_v62 = vrot.slane %v8439_v35, %v8161_v16 }
 0x259   : > { %6792 = vpow2.f32 %v4637_v19  ;;  %v1484_v50 = vrot.slane %v8439_v35, %v8177_v36  ;;  %v1488_v63 = vrot.slane %v8439_v35, %v8182_v38 }
 0x25a   : > { %6132 = vmatmul.mubr.bf16.vlgmr.msra.gmra.mrb[44].mxu0 %v8322_v14  ;;  %6794 = vpow2.f32 %v4725_v0 }
 0x25b   : > { %6796 = vpow2.f32 %v4727_v23 }
 0x25e   : > { %v6783_v24 = vpop.eup %6782 }
 0x25f   : > { %v6785_v15 = vpop.eup %6784  ;;  %v5931_v8 = vadd.f32 -1.0, %v6783_v24 }
 0x260   : > { %v6787_v25 = vpop.eup %6786  ;;  %v5932_v26 = vadd.f32 -1.0, %v6785_v15 }
 0x261   : > { %v6789_v20 = vpop.eup %6788  ;;  %v4885_v21 = vsel %vm4435_vm1, %v3811_v27, %v5931_v8  ;;  %v5976_v30 = vadd.f32 -1.0, %v6787_v25 }
 0x262   : > { %v4886_v31 = vsel %vm4436_vm2, %v3813_v51, %v5932_v26  ;;  %v5977_v33 = vadd.f32 -1.0, %v6789_v20  ;;  %v6791_v29 = vpop.eup %6790 }
 0x263   : > { %v6067_v14 = vpack.c.bf16 %v4886_v31, %v4885_v21  ;;  %v4930_v37 = vsel %vm4480_vm3, %v3815_v54, %v5976_v30  ;;  %v6793_v32 = vpop.eup %6792  ;;  %v5933_v44 = vadd.f32 -1.0, %v6791_v29  ;;  %v1476_v54 = vrot.slane %v8439_v35, %v8152_v18 }
 0x264   : > { %v4931_v40 = vsel %vm4481_vm4, %v3817_v42, %v5977_v33  ;;  %v5934_v11 = vadd.f32 -1.0, %v6793_v32  ;;  %v6795_v34 = vpop.eup %6794 }
 0x265   : > { %5239 = vst [vmem:[%s8143_s12 + $0x40] sm:$0xff] %v6067_v14  ;;  %v6090_v47 = vpack.c.bf16 %v4931_v40, %v4930_v37  ;;  %v4887_v49 = vsel %vm4437_vm5, %v3854_v5, %v5933_v44  ;;  %v6797_v27 = vpop.eup %6796  ;;  %v5978_v51 = vadd.f32 -1.0, %v6795_v34 }
 0x266   : > { %v4888_v48 = vsel %vm4438_vm6, %v3856_v7, %v5934_v11  ;;  %v5979_v53 = vadd.f32 -1.0, %v6797_v27 }
 0x267   : > { %5262 = vst [vmem:[%s8143_s12 + $0xf4] sm:$0xff] %v6090_v47  ;;  %v6068_v28 = vpack.c.bf16 %v4888_v48, %v4887_v49  ;;  %v4932_v58 = vsel %vm4482_vm7, %v3858_v6, %v5978_v51 }
 0x268   : > { %v4933_v17 = vsel %vm4483_vm8, %v3860_v9, %v5979_v53 }
 0x269   : > { %5240 = vst [vmem:[%s8143_s12 + $0x48] sm:$0xff] %v6068_v28  ;;  %v6091_v57 = vpack.c.bf16 %v4933_v17, %v4932_v58 }
 0x26b   : > { %5263 = vst [vmem:[%s8143_s12 + $0xfc] sm:$0xff] %v6091_v57 }
 0x26d   : > { %v3896_v46 = vpop.f32.mrb[20].mxu0 }
 0x26e   : > { %v3897_v42 = vadd.f32 %v3896_v46, %v1476_v54  ;;  %v3898_v45 = vpop.f32.mrb[21].mxu0 }
 0x26f   : > { %v3899_v1 = vadd.f32 %v3898_v45, %v1480_v62  ;;  %v3900_v3 = vpop.f32.mrb[22].mxu0  ;;  %v3939_v12 = vpop.f32.mrb[20].mxu1 }
 0x270   : > { %v4529_v4 = vmin.f32 %v3897_v42, 0.0  ;;  %v3901_v56 = vadd.f32 %v3900_v3, %v1476_v54  ;;  %v3902_v5 = vpop.f32.mrb[23].mxu0  ;;  %v3940_v6 = vadd.f32 %v3939_v12, %v1484_v50  ;;  %v3941_v59 = vpop.f32.mrb[21].mxu1  ;;  %vm4439_vm9 = vcmp.gt.f32.partialorder %v3897_v42, 0.0 }
 0x271   : > { %v4530_v60 = vmin.f32 %v3899_v1, 0.0  ;;  %v3903_v7 = vadd.f32 %v3902_v5, %v1480_v62  ;;  %v3942_v19 = vadd.f32 %v3941_v59, %v1488_v63  ;;  %v3943_v22 = vpop.f32.mrb[22].mxu1  ;;  %vm4440_vm10 = vcmp.gt.f32.partialorder %v3899_v1, 0.0 }
 0x272   : > { %v4639_v10 = vmul.f32 1.442695, %v4529_v4  ;;  %v4574_v61 = vmin.f32 %v3901_v56, 0.0  ;;  %v4531_v0 = vmin.f32 %v3940_v6, 0.0  ;;  %v3945_v23 = vpop.f32.mrb[23].mxu1  ;;  %v3944_v35 = vadd.f32 %v3943_v22, %v1484_v50 }
 0x273   : > { %v4641_v2 = vmul.f32 1.442695, %v4530_v60  ;;  %v4575_v43 = vmin.f32 %v3903_v7, 0.0  ;;  %v4532_v24 = vmin.f32 %v3942_v19, 0.0  ;;  %v3946_v8 = vadd.f32 %v3945_v23, %v1488_v63 }
 0x274   : > { %6798 = vpow2.f32 %v4639_v10  ;;  %v4729_v9 = vmul.f32 1.442695, %v4574_v61  ;;  %v4643_v15 = vmul.f32 1.442695, %v4531_v0  ;;  %v4576_v26 = vmin.f32 %v3944_v35, 0.0 }
 0x275   : > { %6800 = vpow2.f32 %v4641_v2  ;;  %v4731_v13 = vmul.f32 1.442695, %v4575_v43  ;;  %v4645_v25 = vmul.f32 1.442695, %v4532_v24  ;;  %v4577_v20 = vmin.f32 %v3946_v8, 0.0 }
 0x276   : > { %6802 = vpow2.f32 %v4729_v9  ;;  %v4733_v21 = vmul.f32 1.442695, %v4576_v26  ;;  %vm4484_vm11 = vcmp.gt.f32.partialorder %v3901_v56, 0.0  ;;  %vm4485_vm12 = vcmp.gt.f32.partialorder %v3903_v7, 0.0 }
 0x277   : > { %6804 = vpow2.f32 %v4731_v13  ;;  %v4735_v30 = vmul.f32 1.442695, %v4577_v20  ;;  %vm4441_vm13 = vcmp.gt.f32.partialorder %v3940_v6, 0.0  ;;  %vm4442_vm14 = vcmp.gt.f32.partialorder %v3942_v19, 0.0 }
 0x278   : > { %6806 = vpow2.f32 %v4643_v15  ;;  %vm4486_vm15 = vcmp.gt.f32.partialorder %v3944_v35, 0.0  ;;  %vm4487_vm0 = vcmp.gt.f32.partialorder %v3946_v8, 0.0 }
 0x279   : > { %6808 = vpow2.f32 %v4645_v25 }
 0x27a   : > { %6810 = vpow2.f32 %v4733_v21 }
 0x27b   : > { %6812 = vpow2.f32 %v4735_v30 }
 0x27e   : > { %v6799_v31 = vpop.eup %6798 }
 0x27f   : > { %v6801_v33 = vpop.eup %6800  ;;  %v5935_v29 = vadd.f32 -1.0, %v6799_v31 }
 0x280   : > { %v6803_v14 = vpop.eup %6802  ;;  %v5936_v37 = vadd.f32 -1.0, %v6801_v33 }
 0x281   : > { %v6805_v32 = vpop.eup %6804  ;;  %v4889_v40 = vsel %vm4439_vm9, %v3897_v42, %v5935_v29  ;;  %v5980_v44 = vadd.f32 -1.0, %v6803_v14  ;;  %v8476_v42 = vld [vmem:[%s8041_s19 + $0x18] sm:$0xff] }
 0x282   : > { %v4890_v47 = vsel %vm4440_vm10, %v3899_v1, %v5936_v37  ;;  %v5981_v11 = vadd.f32 -1.0, %v6805_v32  ;;  %v6807_v34 = vpop.eup %6806  ;;  %v1492_v4 = vrot.slane %v8476_v42, %v8045_v39  ;;  %v1496_v5 = vrot.slane %v8476_v42, %v8049_v41 }
 0x283   : > { %v6069_v49 = vpack.c.bf16 %v4890_v47, %v4889_v40  ;;  %v4934_v27 = vsel %vm4484_vm11, %v3901_v56, %v5980_v44  ;;  %v6809_v48 = vpop.eup %6808  ;;  %v5937_v28 = vadd.f32 -1.0, %v6807_v34  ;;  %v1500_v12 = vrot.slane %v8476_v42, %v8065_v52 }
 0x284   : > { %v4935_v51 = vsel %vm4485_vm12, %v3903_v7, %v5981_v11  ;;  %v5938_v58 = vadd.f32 -1.0, %v6809_v48  ;;  %v6811_v17 = vpop.eup %6810  ;;  %v1504_v59 = vrot.slane %v8476_v42, %v8070_v55 }
 0x285   : > { %5241 = vst [vmem:[%s8143_s12 + $0x50] sm:$0xff] %v6069_v49  ;;  %v6092_v53 = vpack.c.bf16 %v4935_v51, %v4934_v27  ;;  %v4891_v54 = vsel %vm4441_vm13, %v3940_v6, %v5937_v28  ;;  %v6813_v57 = vpop.eup %6812  ;;  %v5982_v46 = vadd.f32 -1.0, %v6811_v17 }
 0x286   : > { %v4892_v62 = vsel %vm4442_vm14, %v3942_v19, %v5938_v58  ;;  %v5983_v1 = vadd.f32 -1.0, %v6813_v57 }
 0x287   : > { %5264 = vst [vmem:[%s8143_s12 + $0x104] sm:$0xff] %v6092_v53  ;;  %v6070_v45 = vpack.c.bf16 %v4892_v62, %v4891_v54  ;;  %v4936_v3 = vsel %vm4486_vm15, %v3944_v35, %v5982_v46 }
 0x288   : > { %v4937_v50 = vsel %vm4487_vm0, %v3946_v8, %v5983_v1 }
 0x289   : > { %5242 = vst [vmem:[%s8143_s12 + $0x58] sm:$0xff] %v6070_v45  ;;  %v6093_v56 = vpack.c.bf16 %v4937_v50, %v4936_v3 }
 0x28b   : > { %5265 = vst [vmem:[%s8143_s12 + $0x10c] sm:$0xff] %v6093_v56 }
 0x28d   : > { %v3982_v63 = vpop.f32.mrb[24].mxu0 }
 0x28e   : > { %v3983_v60 = vadd.f32 %v3982_v63, %v1492_v4  ;;  %v3984_v7 = vpop.f32.mrb[25].mxu0 }
 0x28f   : > { %v3985_v10 = vadd.f32 %v3984_v7, %v1496_v5  ;;  %v3986_v61 = vpop.f32.mrb[26].mxu0  ;;  %v4025_v0 = vpop.f32.mrb[24].mxu1 }
 0x290   : > { %v4533_v2 = vmin.f32 %v3983_v60, 0.0  ;;  %v3987_v43 = vadd.f32 %v3986_v61, %v1492_v4  ;;  %v3988_v6 = vpop.f32.mrb[27].mxu0  ;;  %v4026_v35 = vadd.f32 %v4025_v0, %v1500_v12  ;;  %v4027_v15 = vpop.f32.mrb[25].mxu1  ;;  %vm4443_vm1 = vcmp.gt.f32.partialorder %v3983_v60, 0.0 }
 0x291   : > { %v4534_v9 = vmin.f32 %v3985_v10, 0.0  ;;  %v3989_v19 = vadd.f32 %v3988_v6, %v1496_v5  ;;  %v4028_v25 = vadd.f32 %v4027_v15, %v1504_v59  ;;  %v4029_v26 = vpop.f32.mrb[26].mxu1  ;;  %vm4444_vm2 = vcmp.gt.f32.partialorder %v3985_v10, 0.0 }
 0x292   : > { %v4647_v22 = vmul.f32 1.442695, %v4533_v2  ;;  %v4578_v13 = vmin.f32 %v3987_v43, 0.0  ;;  %v4535_v21 = vmin.f32 %v4026_v35, 0.0  ;;  %v4031_v30 = vpop.f32.mrb[27].mxu1  ;;  %v4030_v33 = vadd.f32 %v4029_v26, %v1500_v12 }
 0x293   : > { %v4649_v23 = vmul.f32 1.442695, %v4534_v9  ;;  %v4579_v24 = vmin.f32 %v3989_v19, 0.0  ;;  %v4536_v31 = vmin.f32 %v4028_v25, 0.0  ;;  %v4032_v14 = vadd.f32 %v4031_v30, %v1504_v59 }
 0x294   : > { %6814 = vpow2.f32 %v4647_v22  ;;  %v4737_v8 = vmul.f32 1.442695, %v4578_v13  ;;  %v4651_v29 = vmul.f32 1.442695, %v4535_v21  ;;  %v4580_v32 = vmin.f32 %v4030_v33, 0.0 }
 0x295   : > { %6816 = vpow2.f32 %v4649_v23  ;;  %v4739_v20 = vmul.f32 1.442695, %v4579_v24  ;;  %v4653_v37 = vmul.f32 1.442695, %v4536_v31  ;;  %v4581_v40 = vmin.f32 %v4032_v14, 0.0 }
 0x296   : > { %6818 = vpow2.f32 %v4737_v8  ;;  %v4741_v44 = vmul.f32 1.442695, %v4580_v32  ;;  %vm4488_vm3 = vcmp.gt.f32.partialorder %v3987_v43, 0.0  ;;  %vm4489_vm4 = vcmp.gt.f32.partialorder %v3989_v19, 0.0 }
 0x297   : > { %6820 = vpow2.f32 %v4739_v20  ;;  %v4743_v47 = vmul.f32 1.442695, %v4581_v40  ;;  %vm4445_vm5 = vcmp.gt.f32.partialorder %v4026_v35, 0.0  ;;  %vm4446_vm6 = vcmp.gt.f32.partialorder %v4028_v25, 0.0 }
 0x298   : > { %6822 = vpow2.f32 %v4651_v29  ;;  %vm4490_vm7 = vcmp.gt.f32.partialorder %v4030_v33, 0.0  ;;  %vm4491_vm8 = vcmp.gt.f32.partialorder %v4032_v14, 0.0  ;;  %v1508_v2 = vrot.slane %v8476_v42, %v8152_v18 }
 0x299   : > { %6824 = vpow2.f32 %v4653_v37  ;;  %v1512_v6 = vrot.slane %v8476_v42, %v8161_v16  ;;  %v1516_v0 = vrot.slane %v8476_v42, %v8177_v36  ;;  %v1520_v15 = vrot.slane %v8476_v42, %v8182_v38 }
 0x29a   : > { %6826 = vpow2.f32 %v4741_v44 }
 0x29b   : > { %6828 = vpow2.f32 %v4743_v47 }
 0x29e   : > { %v6815_v11 = vpop.eup %6814 }
 0x29f   : > { %v6817_v34 = vpop.eup %6816  ;;  %v5939_v49 = vadd.f32 -1.0, %v6815_v11 }
 0x2a0   : > { %v6819_v27 = vpop.eup %6818  ;;  %v5940_v48 = vadd.f32 -1.0, %v6817_v34 }
 0x2a1   : > { %v6821_v51 = vpop.eup %6820  ;;  %v4893_v28 = vsel %vm4443_vm1, %v3983_v60, %v5939_v49  ;;  %v5984_v53 = vadd.f32 -1.0, %v6819_v27 }
 0x2a2   : > { %v4894_v58 = vsel %vm4444_vm2, %v3985_v10, %v5940_v48  ;;  %v5985_v17 = vadd.f32 -1.0, %v6821_v51  ;;  %v6823_v54 = vpop.eup %6822 }
 0x2a3   : > { %v6071_v57 = vpack.c.bf16 %v4894_v58, %v4893_v28  ;;  %v4938_v62 = vsel %vm4488_vm3, %v3987_v43, %v5984_v53  ;;  %v6825_v46 = vpop.eup %6824  ;;  %v5941_v1 = vadd.f32 -1.0, %v6823_v54 }
 0x2a4   : > { %v4939_v45 = vsel %vm4489_vm4, %v3989_v19, %v5985_v17  ;;  %v5942_v50 = vadd.f32 -1.0, %v6825_v46  ;;  %v6827_v4 = vpop.eup %6826 }
 0x2a5   : > { %5243 = vst [vmem:[%s8143_s12 + $0x60] sm:$0xff] %v6071_v57  ;;  %v6094_v3 = vpack.c.bf16 %v4939_v45, %v4938_v62  ;;  %v4895_v56 = vsel %vm4445_vm5, %v4026_v35, %v5941_v1  ;;  %v6829_v5 = vpop.eup %6828  ;;  %v5986_v60 = vadd.f32 -1.0, %v6827_v4 }
 0x2a6   : > { %v4896_v63 = vsel %vm4446_vm6, %v4028_v25, %v5942_v50  ;;  %v5987_v10 = vadd.f32 -1.0, %v6829_v5 }
 0x2a7   : > { %5266 = vst [vmem:[%s8143_s12 + $0x114] sm:$0xff] %v6094_v3  ;;  %v6072_v7 = vpack.c.bf16 %v4896_v63, %v4895_v56  ;;  %v4940_v61 = vsel %vm4490_vm7, %v4030_v33, %v5986_v60 }
 0x2a8   : > { %v4941_v12 = vsel %vm4491_vm8, %v4032_v14, %v5987_v10 }
 0x2a9   : > { %5244 = vst [vmem:[%s8143_s12 + $0x68] sm:$0xff] %v6072_v7  ;;  %v6095_v43 = vpack.c.bf16 %v4941_v12, %v4940_v61 }
 0x2ab   : > { %5267 = vst [vmem:[%s8143_s12 + $0x11c] sm:$0xff] %v6095_v43 }
 0x2ad   : > { %v4068_v59 = vpop.f32.mrb[28].mxu0 }
 0x2ae   : > { %v4069_v9 = vadd.f32 %v4068_v59, %v1508_v2  ;;  %v4070_v19 = vpop.f32.mrb[29].mxu0 }
 0x2af   : > { %v4071_v22 = vadd.f32 %v4070_v19, %v1512_v6  ;;  %v4072_v13 = vpop.f32.mrb[30].mxu0  ;;  %v4111_v21 = vpop.f32.mrb[28].mxu1 }
 0x2b0   : > { %v4537_v23 = vmin.f32 %v4069_v9, 0.0  ;;  %v4073_v24 = vadd.f32 %v4072_v13, %v1508_v2  ;;  %v4074_v35 = vpop.f32.mrb[31].mxu0  ;;  %v4112_v33 = vadd.f32 %v4111_v21, %v1516_v0  ;;  %v4113_v29 = vpop.f32.mrb[29].mxu1  ;;  %vm4447_vm9 = vcmp.gt.f32.partialorder %v4069_v9, 0.0 }
 0x2b1   : > { %v4538_v8 = vmin.f32 %v4071_v22, 0.0  ;;  %v4075_v25 = vadd.f32 %v4074_v35, %v1512_v6  ;;  %v4114_v37 = vadd.f32 %v4113_v29, %v1520_v15  ;;  %v4115_v32 = vpop.f32.mrb[30].mxu1  ;;  %vm4448_vm10 = vcmp.gt.f32.partialorder %v4071_v22, 0.0 }
 0x2b2   : > { %v4655_v26 = vmul.f32 1.442695, %v4537_v23  ;;  %v4582_v20 = vmin.f32 %v4073_v24, 0.0  ;;  %v4539_v44 = vmin.f32 %v4112_v33, 0.0  ;;  %v4117_v47 = vpop.f32.mrb[31].mxu1  ;;  %v4116_v42 = vadd.f32 %v4115_v32, %v1516_v0 }
 0x2b3   : > { %v4657_v30 = vmul.f32 1.442695, %v4538_v8  ;;  %v4583_v31 = vmin.f32 %v4075_v25, 0.0  ;;  %v4540_v11 = vmin.f32 %v4114_v37, 0.0  ;;  %v4118_v49 = vadd.f32 %v4117_v47, %v1520_v15 }
 0x2b4   : > { %6830 = vpow2.f32 %v4655_v26  ;;  %v4745_v14 = vmul.f32 1.442695, %v4582_v20  ;;  %v4659_v34 = vmul.f32 1.442695, %v4539_v44  ;;  %v4584_v48 = vmin.f32 %v4116_v42, 0.0 }
 0x2b5   : > { %6832 = vpow2.f32 %v4657_v30  ;;  %v4747_v40 = vmul.f32 1.442695, %v4583_v31  ;;  %v4661_v27 = vmul.f32 1.442695, %v4540_v11  ;;  %v4585_v51 = vmin.f32 %v4118_v49, 0.0 }
 0x2b6   : > { %6834 = vpow2.f32 %v4745_v14  ;;  %v4749_v28 = vmul.f32 1.442695, %v4584_v48  ;;  %vm4492_vm11 = vcmp.gt.f32.partialorder %v4073_v24, 0.0  ;;  %vm4493_vm12 = vcmp.gt.f32.partialorder %v4075_v25, 0.0 }
 0x2b7   : > { %6836 = vpow2.f32 %v4747_v40  ;;  %v4751_v53 = vmul.f32 1.442695, %v4585_v51  ;;  %vm4449_vm13 = vcmp.gt.f32.partialorder %v4112_v33, 0.0  ;;  %vm4450_vm14 = vcmp.gt.f32.partialorder %v4114_v37, 0.0 }
 0x2b8   : > { %6838 = vpow2.f32 %v4659_v34  ;;  %vm4494_vm15 = vcmp.gt.f32.partialorder %v4116_v42, 0.0  ;;  %vm4495_vm0 = vcmp.gt.f32.partialorder %v4118_v49, 0.0 }
 0x2b9   : > { %6840 = vpow2.f32 %v4661_v27 }
 0x2ba   : > { %6842 = vpow2.f32 %v4749_v28 }
 0x2bb   : > { %6844 = vpow2.f32 %v4751_v53 }
 0x2be   : > { %v6831_v58 = vpop.eup %6830 }
 0x2bf   : > { %v6833_v17 = vpop.eup %6832  ;;  %v5943_v54 = vadd.f32 -1.0, %v6831_v58 }
 0x2c0   : > { %v6835_v57 = vpop.eup %6834  ;;  %v5944_v62 = vadd.f32 -1.0, %v6833_v17 }
 0x2c1   : > { %v6837_v46 = vpop.eup %6836  ;;  %v4897_v45 = vsel %vm4447_vm9, %v4069_v9, %v5943_v54  ;;  %v5988_v1 = vadd.f32 -1.0, %v6835_v57  ;;  %v8503_v9 = vld [vmem:[%s8041_s19 + $0x20] sm:$0xff] }
 0x2c2   : > { %v4898_v3 = vsel %vm4448_vm10, %v4071_v22, %v5944_v62  ;;  %v5989_v50 = vadd.f32 -1.0, %v6837_v46  ;;  %v6839_v4 = vpop.eup %6838  ;;  %v1524_v23 = vrot.slane %v8503_v9, %v8045_v39  ;;  %v1528_v35 = vrot.slane %v8503_v9, %v8049_v41 }
 0x2c3   : > { %v6073_v56 = vpack.c.bf16 %v4898_v3, %v4897_v45  ;;  %v4942_v5 = vsel %vm4492_vm11, %v4073_v24, %v5988_v1  ;;  %v6841_v63 = vpop.eup %6840  ;;  %v5945_v7 = vadd.f32 -1.0, %v6839_v4  ;;  %v1532_v21 = vrot.slane %v8503_v9, %v8065_v52 }
 0x2c4   : > { %v4943_v60 = vsel %vm4493_vm12, %v4075_v25, %v5989_v50  ;;  %v5946_v61 = vadd.f32 -1.0, %v6841_v63  ;;  %v6843_v12 = vpop.eup %6842  ;;  %v1536_v29 = vrot.slane %v8503_v9, %v8070_v55 }
 0x2c5   : > { %5245 = vst [vmem:[%s8143_s12 + $0x70] sm:$0xff] %v6073_v56  ;;  %v6096_v10 = vpack.c.bf16 %v4943_v60, %v4942_v5  ;;  %v4899_v2 = vsel %vm4449_vm13, %v4112_v33, %v5945_v7  ;;  %v6845_v43 = vpop.eup %6844  ;;  %v5990_v59 = vadd.f32 -1.0, %v6843_v12 }
 0x2c6   : > { %v4900_v6 = vsel %vm4450_vm14, %v4114_v37, %v5946_v61  ;;  %v5991_v22 = vadd.f32 -1.0, %v6845_v43 }
 0x2c7   : > { %5268 = vst [vmem:[%s8143_s12 + $0x124] sm:$0xff] %v6096_v10  ;;  %v6074_v19 = vpack.c.bf16 %v4900_v6, %v4899_v2  ;;  %v4944_v13 = vsel %vm4494_vm15, %v4116_v42, %v5990_v59 }
 0x2c8   : > { %v4945_v0 = vsel %vm4495_vm0, %v4118_v49, %v5991_v22 }
 0x2c9   : > { %5246 = vst [vmem:[%s8143_s12 + $0x78] sm:$0xff] %v6074_v19  ;;  %v6097_v24 = vpack.c.bf16 %v4945_v0, %v4944_v13 }
 0x2cb   : > { %5269 = vst [vmem:[%s8143_s12 + $0x12c] sm:$0xff] %v6097_v24 }
 0x2cd   : > { %v4154_v15 = vpop.f32.mrb[32].mxu0 }
 0x2ce   : > { %v4155_v8 = vadd.f32 %v4154_v15, %v1524_v23  ;;  %v4156_v25 = vpop.f32.mrb[33].mxu0 }
 0x2cf   : > { %v4157_v26 = vadd.f32 %v4156_v25, %v1528_v35  ;;  %v4158_v20 = vpop.f32.mrb[34].mxu0  ;;  %v4197_v44 = vpop.f32.mrb[32].mxu1 }
 0x2d0   : > { %v4541_v30 = vmin.f32 %v4155_v8, 0.0  ;;  %v4159_v31 = vadd.f32 %v4158_v20, %v1524_v23  ;;  %v4160_v33 = vpop.f32.mrb[35].mxu0  ;;  %v4198_v42 = vadd.f32 %v4197_v44, %v1532_v21  ;;  %v4199_v34 = vpop.f32.mrb[33].mxu1  ;;  %vm4451_vm1 = vcmp.gt.f32.partialorder %v4155_v8, 0.0 }
 0x2d1   : > { %v4542_v14 = vmin.f32 %v4157_v26, 0.0  ;;  %v4161_v37 = vadd.f32 %v4160_v33, %v1528_v35  ;;  %v4200_v27 = vadd.f32 %v4199_v34, %v1536_v29  ;;  %v4201_v48 = vpop.f32.mrb[34].mxu1  ;;  %vm4452_vm2 = vcmp.gt.f32.partialorder %v4157_v26, 0.0 }
 0x2d2   : > { %v4663_v32 = vmul.f32 1.442695, %v4541_v30  ;;  %v4586_v40 = vmin.f32 %v4159_v31, 0.0  ;;  %v4543_v28 = vmin.f32 %v4198_v42, 0.0  ;;  %v4203_v53 = vpop.f32.mrb[35].mxu1  ;;  %v4202_v17 = vadd.f32 %v4201_v48, %v1532_v21 }
 0x2d3   : > { %v4665_v47 = vmul.f32 1.442695, %v4542_v14  ;;  %v4587_v11 = vmin.f32 %v4161_v37, 0.0  ;;  %v4544_v58 = vmin.f32 %v4200_v27, 0.0  ;;  %v4204_v57 = vadd.f32 %v4203_v53, %v1536_v29 }
 0x2d4   : > { %6846 = vpow2.f32 %v4663_v32  ;;  %v4753_v49 = vmul.f32 1.442695, %v4586_v40  ;;  %v4667_v54 = vmul.f32 1.442695, %v4543_v28  ;;  %v4588_v46 = vmin.f32 %v4202_v17, 0.0 }
 0x2d5   : > { %6848 = vpow2.f32 %v4665_v47  ;;  %v4755_v51 = vmul.f32 1.442695, %v4587_v11  ;;  %v4669_v62 = vmul.f32 1.442695, %v4544_v58  ;;  %v4589_v45 = vmin.f32 %v4204_v57, 0.0 }
 0x2d6   : > { %6850 = vpow2.f32 %v4753_v49  ;;  %v4757_v1 = vmul.f32 1.442695, %v4588_v46  ;;  %vm4496_vm3 = vcmp.gt.f32.partialorder %v4159_v31, 0.0  ;;  %vm4497_vm4 = vcmp.gt.f32.partialorder %v4161_v37, 0.0 }
 0x2d7   : > { %6852 = vpow2.f32 %v4755_v51  ;;  %v4759_v3 = vmul.f32 1.442695, %v4589_v45  ;;  %vm4453_vm5 = vcmp.gt.f32.partialorder %v4198_v42, 0.0  ;;  %vm4454_vm6 = vcmp.gt.f32.partialorder %v4200_v27, 0.0 }
 0x2d8   : > { %6854 = vpow2.f32 %v4667_v54  ;;  %vm4498_vm7 = vcmp.gt.f32.partialorder %v4202_v17, 0.0  ;;  %vm4499_vm8 = vcmp.gt.f32.partialorder %v4204_v57, 0.0  ;;  %v1540_v30 = vrot.slane %v8503_v9, %v8152_v18 }
 0x2d9   : > { %6856 = vpow2.f32 %v4669_v62  ;;  %v1544_v33 = vrot.slane %v8503_v9, %v8161_v16  ;;  %v1548_v44 = vrot.slane %v8503_v9, %v8177_v36  ;;  %v1552_v34 = vrot.slane %v8503_v9, %v8182_v38 }
 0x2da   : > { %6858 = vpow2.f32 %v4757_v1 }
 0x2db   : > { %6860 = vpow2.f32 %v4759_v3 }
 0x2de   : > { %v6847_v50 = vpop.eup %6846 }
 0x2df   : > { %v6849_v4 = vpop.eup %6848  ;;  %v5947_v56 = vadd.f32 -1.0, %v6847_v50 }
 0x2e0   : > { %v6851_v5 = vpop.eup %6850  ;;  %v5948_v63 = vadd.f32 -1.0, %v6849_v4 }
 0x2e1   : > { %v6853_v60 = vpop.eup %6852  ;;  %v4901_v7 = vsel %vm4451_vm1, %v4155_v8, %v5947_v56  ;;  %v5992_v10 = vadd.f32 -1.0, %v6851_v5 }
 0x2e2   : > { %v4902_v61 = vsel %vm4452_vm2, %v4157_v26, %v5948_v63  ;;  %v5993_v12 = vadd.f32 -1.0, %v6853_v60  ;;  %v6855_v2 = vpop.eup %6854 }
 0x2e3   : > { %v6075_v43 = vpack.c.bf16 %v4902_v61, %v4901_v7  ;;  %v4946_v6 = vsel %vm4496_vm3, %v4159_v31, %v5992_v10  ;;  %v6857_v59 = vpop.eup %6856  ;;  %v5949_v22 = vadd.f32 -1.0, %v6855_v2 }
 0x2e4   : > { %v4947_v19 = vsel %vm4497_vm4, %v4161_v37, %v5993_v12  ;;  %v5950_v0 = vadd.f32 -1.0, %v6857_v59  ;;  %v6859_v23 = vpop.eup %6858 }
 0x2e5   : > { %5247 = vst [vmem:[%s8143_s12 + $0x80] sm:$0xff] %v6075_v43  ;;  %v6098_v13 = vpack.c.bf16 %v4947_v19, %v4946_v6  ;;  %v4903_v24 = vsel %vm4453_vm5, %v4198_v42, %v5949_v22  ;;  %v6861_v35 = vpop.eup %6860  ;;  %v5994_v8 = vadd.f32 -1.0, %v6859_v23 }
 0x2e6   : > { %v4904_v15 = vsel %vm4454_vm6, %v4200_v27, %v5950_v0  ;;  %v5995_v26 = vadd.f32 -1.0, %v6861_v35 }
 0x2e7   : > { %5270 = vst [vmem:[%s8143_s12 + $0x134] sm:$0xff] %v6098_v13  ;;  %v6076_v25 = vpack.c.bf16 %v4904_v15, %v4903_v24  ;;  %v4948_v20 = vsel %vm4498_vm7, %v4202_v17, %v5994_v8 }
 0x2e8   : > { %v4949_v21 = vsel %vm4499_vm8, %v4204_v57, %v5995_v26 }
 0x2e9   : > { %5248 = vst [vmem:[%s8143_s12 + $0x88] sm:$0xff] %v6076_v25  ;;  %v6099_v31 = vpack.c.bf16 %v4949_v21, %v4948_v20 }
 0x2eb   : > { %5271 = vst [vmem:[%s8143_s12 + $0x13c] sm:$0xff] %v6099_v31  ;;  %v8530_v31 = vld [vmem:[%s8041_s19 + $0x28] sm:$0x1f] }
 0x2ed   : > { %v4240_v29 = vpop.f32.mrb[36].mxu0 }
 0x2ee   : > { %v4241_v14 = vadd.f32 %v4240_v29, %v1540_v30  ;;  %v4242_v37 = vpop.f32.mrb[37].mxu0 }
 0x2ef   : > { %v4243_v32 = vadd.f32 %v4242_v37, %v1544_v33  ;;  %v4244_v40 = vpop.f32.mrb[38].mxu0  ;;  %v4283_v16 = vpop.f32.mrb[36].mxu1 }
 0x2f0   : > { %v4545_v47 = vmin.f32 %v4241_v14, 0.0  ;;  %v4245_v11 = vadd.f32 %v4244_v40, %v1540_v30  ;;  %v4246_v42 = vpop.f32.mrb[39].mxu0  ;;  %v4284_v58 = vadd.f32 %v4283_v16, %v1548_v44  ;;  %v4285_v17 = vpop.f32.mrb[37].mxu1  ;;  %vm4455_vm9 = vcmp.gt.f32.partialorder %v4241_v14, 0.0 }
 0x2f1   : > { %v4546_v49 = vmin.f32 %v4243_v32, 0.0  ;;  %v4247_v27 = vadd.f32 %v4246_v42, %v1544_v33  ;;  %v4286_v57 = vadd.f32 %v4285_v17, %v1552_v34  ;;  %v4287_v62 = vpop.f32.mrb[38].mxu1  ;;  %vm4456_vm10 = vcmp.gt.f32.partialorder %v4243_v32, 0.0 }
 0x2f2   : > { %v4671_v48 = vmul.f32 1.442695, %v4545_v47  ;;  %v4590_v51 = vmin.f32 %v4245_v11, 0.0  ;;  %v4547_v46 = vmin.f32 %v4284_v58, 0.0  ;;  %v4289_v45 = vpop.f32.mrb[39].mxu1  ;;  %v4288_v38 = vadd.f32 %v4287_v62, %v1548_v44 }
 0x2f3   : > { %v4673_v28 = vmul.f32 1.442695, %v4546_v49  ;;  %v4591_v53 = vmin.f32 %v4247_v27, 0.0  ;;  %v4548_v1 = vmin.f32 %v4286_v57, 0.0  ;;  %v4290_v3 = vadd.f32 %v4289_v45, %v1552_v34 }
 0x2f4   : > { %6862 = vpow2.f32 %v4671_v48  ;;  %v4761_v54 = vmul.f32 1.442695, %v4590_v51  ;;  %v4675_v9 = vmul.f32 1.442695, %v4547_v46  ;;  %v4592_v4 = vmin.f32 %v4288_v38, 0.0 }
 0x2f5   : > { %6864 = vpow2.f32 %v4673_v28  ;;  %v4763_v36 = vmul.f32 1.442695, %v4591_v53  ;;  %v4677_v50 = vmul.f32 1.442695, %v4548_v1  ;;  %v4593_v56 = vmin.f32 %v4290_v3, 0.0 }
 0x2f6   : > { %6866 = vpow2.f32 %v4761_v54  ;;  %v4765_v5 = vmul.f32 1.442695, %v4592_v4  ;;  %vm4500_vm11 = vcmp.gt.f32.partialorder %v4245_v11, 0.0  ;;  %vm4501_vm12 = vcmp.gt.f32.partialorder %v4247_v27, 0.0 }
 0x2f7   : > { %6868 = vpow2.f32 %v4763_v36  ;;  %v4767_v63 = vmul.f32 1.442695, %v4593_v56  ;;  %vm4457_vm13 = vcmp.gt.f32.partialorder %v4284_v58, 0.0  ;;  %vm4458_vm14 = vcmp.gt.f32.partialorder %v4286_v57, 0.0 }
 0x2f8   : > { %6870 = vpow2.f32 %v4675_v9  ;;  %vm4502_vm15 = vcmp.gt.f32.partialorder %v4288_v38, 0.0  ;;  %vm4503_vm0 = vcmp.gt.f32.partialorder %v4290_v3, 0.0  ;;  %v1560_v44 = vrot.slane %v8530_v31, %v8049_v41 }
 0x2f9   : > { %6872 = vpow2.f32 %v4677_v50  ;;  %v1568_v28 = vrot.slane %v8530_v31, %v8070_v55 }
 0x2fa   : > { %6874 = vpow2.f32 %v4765_v5 }
 0x2fb   : > { %6876 = vpow2.f32 %v4767_v63 }
 0x2fe   : > { %v6863_v60 = vpop.eup %6862 }
 0x2ff   : > { %v6865_v7 = vpop.eup %6864  ;;  %v5951_v10 = vadd.f32 -1.0, %v6863_v60 }
 0x300   : > { %v6867_v61 = vpop.eup %6866  ;;  %v5952_v12 = vadd.f32 -1.0, %v6865_v7 }
 0x301   : > { %v6869_v2 = vpop.eup %6868  ;;  %v4905_v43 = vsel %vm4455_vm9, %v4241_v14, %v5951_v10  ;;  %v5996_v6 = vadd.f32 -1.0, %v6867_v61 }
 0x302   : > { %v4906_v59 = vsel %vm4456_vm10, %v4243_v32, %v5952_v12  ;;  %v5997_v19 = vadd.f32 -1.0, %v6869_v2  ;;  %v6871_v22 = vpop.eup %6870  ;;  %v1556_v32 = vrot.slane %v8530_v31, %v8045_v39 }
 0x303   : > { %v6077_v13 = vpack.c.bf16 %v4906_v59, %v4905_v43  ;;  %v4950_v0 = vsel %vm4500_vm11, %v4245_v11, %v5996_v6  ;;  %v6873_v23 = vpop.eup %6872  ;;  %v5953_v35 = vadd.f32 -1.0, %v6871_v22 }
 0x304   : > { %v4951_v24 = vsel %vm4501_vm12, %v4247_v27, %v5997_v19  ;;  %v5954_v8 = vadd.f32 -1.0, %v6873_v23  ;;  %v6875_v25 = vpop.eup %6874  ;;  %v1564_v27 = vrot.slane %v8530_v31, %v8065_v52 }
 0x305   : > { %5249 = vst [vmem:[%s8143_s12 + $0x90] sm:$0xff] %v6077_v13  ;;  %v6100_v15 = vpack.c.bf16 %v4951_v24, %v4950_v0  ;;  %v4907_v26 = vsel %vm4457_vm13, %v4284_v58, %v5953_v35  ;;  %v6877_v20 = vpop.eup %6876  ;;  %v5998_v30 = vadd.f32 -1.0, %v6875_v25 }
 0x306   : > { %v4908_v21 = vsel %vm4458_vm14, %v4286_v57, %v5954_v8  ;;  %v5999_v29 = vadd.f32 -1.0, %v6877_v20 }
 0x307   : > { %5272 = vst [vmem:[%s8143_s12 + $0x144] sm:$0xff] %v6100_v15  ;;  %v6078_v33 = vpack.c.bf16 %v4908_v21, %v4907_v26  ;;  %v4952_v14 = vsel %vm4502_vm15, %v4288_v38, %v5998_v30 }
 0x308   : > { %v4953_v37 = vsel %vm4503_vm0, %v4290_v3, %v5999_v29 }
 0x309   : > { %5250 = vst [vmem:[%s8143_s12 + $0x98] sm:$0xff] %v6078_v33  ;;  %v6101_v40 = vpack.c.bf16 %v4953_v37, %v4952_v14 }
 0x30b   : > { %5273 = vst [vmem:[%s8143_s12 + $0x14c] sm:$0xff] %v6101_v40 }
 0x30d   : > { %v4326_v47 = vpop.f32.mrb[40].mxu0 }
 0x30e   : > { %v4327_v11 = vadd.f32 %v4326_v47, %v1556_v32  ;;  %v4328_v42 = vpop.f32.mrb[41].mxu0 }
 0x30f   : > { %v4329_v34 = vadd.f32 %v4328_v42, %v1560_v44  ;;  %v4330_v49 = vpop.f32.mrb[42].mxu0  ;;  %v4369_v41 = vpop.f32.mrb[40].mxu1 }
 0x310   : > { %v4549_v48 = vmin.f32 %v4327_v11, 0.0  ;;  %v4331_v51 = vadd.f32 %v4330_v49, %v1556_v32  ;;  %v4332_v16 = vpop.f32.mrb[43].mxu0  ;;  %v4370_v62 = vadd.f32 %v4369_v41, %v1564_v27  ;;  %v4371_v36 = vpop.f32.mrb[41].mxu1  ;;  %vm4459_vm1 = vcmp.gt.f32.partialorder %v4327_v11, 0.0 }
 0x311   : > { %v4550_v39 = vmin.f32 %v4329_v34, 0.0  ;;  %v4333_v53 = vadd.f32 %v4332_v16, %v1560_v44  ;;  %v4372_v45 = vadd.f32 %v4371_v36, %v1568_v28  ;;  %v4373_v1 = vpop.f32.mrb[42].mxu1  ;;  %vm4460_vm2 = vcmp.gt.f32.partialorder %v4329_v34, 0.0  ;;  %v5306_v36 = vld [vmem:[%s8143_s12 + $0x8] sm:$0xff] (%p6998_p6) }
 0x312   : > { %v4679_v58 = vmul.f32 1.442695, %v4549_v48  ;;  %v4594_v17 = vmin.f32 %v4331_v51, 0.0  ;;  %v4551_v38 = vmin.f32 %v4370_v62, 0.0  ;;  %v4375_v9 = vpop.f32.mrb[43].mxu1  ;;  %v4374_v55 = vadd.f32 %v4373_v1, %v1564_v27  ;;  %v5312_v1 = vld [vmem:[%s8143_s12 + $0x20] sm:$0xff] (%p6998_p6) }
 0x313   : > { %v4681_v54 = vmul.f32 1.442695, %v4550_v39  ;;  %v4595_v57 = vmin.f32 %v4333_v53, 0.0  ;;  %v4552_v3 = vmin.f32 %v4372_v45, 0.0  ;;  %v4376_v4 = vadd.f32 %v4375_v9, %v1568_v28  ;;  %v5318_v9 = vld [vmem:[%s8143_s12 + $0x38] sm:$0xff] (%p6998_p6)  ;;  %5307 = vst [vmem:[%s8562_s27 + $0x8] sm:$0xff] (%p6998_p6), %v5306_v36 }
 0x314   : > { %6878 = vpow2.f32 %v4679_v58  ;;  %v4769_v46 = vmul.f32 1.442695, %v4594_v17  ;;  %v4683_v50 = vmul.f32 1.442695, %v4551_v38  ;;  %v4596_v5 = vmin.f32 %v4374_v55, 0.0  ;;  %v5316_v38 = vld [vmem:[%s8143_s12 + $0x30] sm:$0xff] (%p6998_p6) }
 0x315   : > { %6880 = vpow2.f32 %v4681_v54  ;;  %v4771_v52 = vmul.f32 1.442695, %v4595_v57  ;;  %v4685_v56 = vmul.f32 1.442695, %v4552_v3  ;;  %v4597_v63 = vmin.f32 %v4376_v4, 0.0  ;;  %v5320_v3 = vld [vmem:[%s8143_s12 + $0x40] sm:$0xff] (%p6998_p6) }
 0x316   : > { %6882 = vpow2.f32 %v4769_v46  ;;  %v4773_v60 = vmul.f32 1.442695, %v4596_v5  ;;  %vm4504_vm3 = vcmp.gt.f32.partialorder %v4331_v51, 0.0  ;;  %vm4505_vm4 = vcmp.gt.f32.partialorder %v4333_v53, 0.0  ;;  %v5308_v46 = vld [vmem:[%s8143_s12 + $0x10] sm:$0xff] (%p6998_p6)  ;;  %5313 = vst [vmem:[%s8562_s27 + $0x20] sm:$0xff] (%p6998_p6), %v5312_v1 }
 0x317   : > { %6884 = vpow2.f32 %v4771_v52  ;;  %v4775_v7 = vmul.f32 1.442695, %v4597_v63  ;;  %vm4461_vm5 = vcmp.gt.f32.partialorder %v4370_v62, 0.0  ;;  %vm4462_vm6 = vcmp.gt.f32.partialorder %v4372_v45, 0.0  ;;  %v5314_v52 = vld [vmem:[%s8143_s12 + $0x28] sm:$0xff] (%p6998_p6)  ;;  %5309 = vst [vmem:[%s8562_s27 + $0x10] sm:$0xff] (%p6998_p6), %v5308_v46 }
 0x318   : > { %6886 = vpow2.f32 %v4683_v50  ;;  %vm4506_vm7 = vcmp.gt.f32.partialorder %v4374_v55, 0.0  ;;  %vm4507_vm8 = vcmp.gt.f32.partialorder %v4376_v4, 0.0  ;;  %v1572_v44 = vrot.slane %v8530_v31, %v8152_v18  ;;  %5315 = vst [vmem:[%s8562_s27 + $0x28] sm:$0xff] (%p6998_p6), %v5314_v52  ;;  %5317 = vst [vmem:[%s8562_s27 + $0x30] sm:$0xff] (%p6998_p6), %v5316_v38  ;;  %v5324_v50 = vld [vmem:[%s8143_s12 + $0x50] sm:$0xff] (%p6998_p6)  ;;  %v5330_v5 = vld [vmem:[%s8143_s12 + $0x68] sm:$0xff] (%p6998_p6) }
 0x319   : > { %6888 = vpow2.f32 %v4685_v56  ;;  %5319 = vst [vmem:[%s8562_s27 + $0x38] sm:$0xff] (%p6998_p6), %v5318_v9  ;;  %5321 = vst [vmem:[%s8562_s27 + $0x40] sm:$0xff] (%p6998_p6), %v5320_v3  ;;  %v5328_v56 = vld [vmem:[%s8143_s12 + $0x60] sm:$0xff] (%p6998_p6)  ;;  %v5332_v63 = vld [vmem:[%s8143_s12 + $0x70] sm:$0xff] (%p6998_p6) }
 0x31a   : > { %6890 = vpow2.f32 %v4773_v60  ;;  %5325 = vst [vmem:[%s8562_s27 + $0x50] sm:$0xff] (%p6998_p6), %v5324_v50  ;;  %5329 = vst [vmem:[%s8562_s27 + $0x60] sm:$0xff] (%p6998_p6), %v5328_v56  ;;  %v5334_v60 = vld [vmem:[%s8143_s12 + $0x78] sm:$0xff] (%p6998_p6) }
 0x31b   : > { %6892 = vpow2.f32 %v4775_v7  ;;  %5331 = vst [vmem:[%s8562_s27 + $0x68] sm:$0xff] (%p6998_p6), %v5330_v5  ;;  %5333 = vst [vmem:[%s8562_s27 + $0x70] sm:$0xff] (%p6998_p6), %v5332_v63  ;;  %v5336_v7 = vld [vmem:[%s8143_s12 + $0x80] sm:$0xff] (%p6998_p6) }
 0x31c   : > { %5335 = vst [vmem:[%s8562_s27 + $0x78] sm:$0xff] (%p6998_p6), %v5334_v60  ;;  %5337 = vst [vmem:[%s8562_s27 + $0x80] sm:$0xff] (%p6998_p6), %v5336_v7 }
 0x31e   : > { %v6879_v10 = vpop.eup %6878 }
 0x31f   : > { %v6881_v61 = vpop.eup %6880  ;;  %v5955_v12 = vadd.f32 -1.0, %v6879_v10  ;;  %v5338_v10 = vld [vmem:[%s8143_s12 + $0x88] sm:$0xff] (%p6998_p6) }
 0x320   : > { %v6883_v2 = vpop.eup %6882  ;;  %v5956_v43 = vadd.f32 -1.0, %v6881_v61  ;;  %5339 = vst [vmem:[%s8562_s27 + $0x88] sm:$0xff] (%p6998_p6), %v5338_v10  ;;  %v5340_v61 = vld [vmem:[%s8143_s12 + $0x90] sm:$0xff] (%p6998_p6) }
 0x321   : > { %v6885_v6 = vpop.eup %6884  ;;  %v4909_v59 = vsel %vm4459_vm1, %v4327_v11, %v5955_v12  ;;  %v6000_v19 = vadd.f32 -1.0, %v6883_v2  ;;  %v5342_v12 = vld [vmem:[%s8143_s12 + $0x98] sm:$0xff] (%p6998_p6)  ;;  %5341 = vst [vmem:[%s8562_s27 + $0x90] sm:$0xff] (%p6998_p6), %v5340_v61 }
 0x322   : > { %v4910_v22 = vsel %vm4460_vm2, %v4329_v34, %v5956_v43  ;;  %v6001_v13 = vadd.f32 -1.0, %v6885_v6  ;;  %v6887_v0 = vpop.eup %6886  ;;  %5343 = vst [vmem:[%s8562_s27 + $0x98] sm:$0xff] (%p6998_p6), %v5342_v12  ;;  %v5348_v6 = vld [vmem:[%s8143_s12 + $0xb4] sm:$0xff] (%p6998_p6) }
 0x323   : > { %v6079_v23 = vpack.c.bf16 %v4910_v22, %v4909_v59  ;;  %v4954_v24 = vsel %vm4504_vm3, %v4331_v51, %v6000_v19  ;;  %v6889_v35 = vpop.eup %6888  ;;  %v5957_v8 = vadd.f32 -1.0, %v6887_v0  ;;  %v5350_v59 = vld [vmem:[%s8143_s12 + $0xbc] sm:$0xff] (%p6998_p6)  ;;  %5349 = vst [vmem:[%s8562_s27 + $0x384] sm:$0xff] (%p6998_p6), %v5348_v6  ;;  %v5352_v19 = vld [vmem:[%s8143_s12 + $0xc4] sm:$0xff] (%p6998_p6)  ;;  %v5354_v22 = vld [vmem:[%s8143_s12 + $0xcc] sm:$0xff] (%p6998_p6) }
 0x324   : > { %v4955_v15 = vsel %vm4505_vm4, %v4333_v53, %v6001_v13  ;;  %v5958_v26 = vadd.f32 -1.0, %v6889_v35  ;;  %v6891_v20 = vpop.eup %6890  ;;  %5351 = vst [vmem:[%s8562_s27 + $0x38c] sm:$0xff] (%p6998_p6), %v5350_v59  ;;  %v5356_v13 = vld [vmem:[%s8143_s12 + $0xd4] sm:$0xff] (%p6998_p6)  ;;  %5353 = vst [vmem:[%s8562_s27 + $0x394] sm:$0xff] (%p6998_p6), %v5352_v19  ;;  %v5358_v0 = vld [vmem:[%s8143_s12 + $0xdc] sm:$0xff] (%p6998_p6) }
 0x325   : > { %5251 = vst [vmem:[%s8143_s12 + $0xa0] sm:$0xff] %v6079_v23  ;;  %v6102_v25 = vpack.c.bf16 %v4955_v15, %v4954_v24  ;;  %v4911_v21 = vsel %vm4461_vm5, %v4370_v62, %v5957_v8  ;;  %v6893_v30 = vpop.eup %6892  ;;  %v6002_v29 = vadd.f32 -1.0, %v6891_v20  ;;  %v5304_v62 = vld [vmem:[%s8143_s12] sm:$0xff] (%p6998_p6)  ;;  %5355 = vst [vmem:[%s8562_s27 + $0x39c] sm:$0xff] (%p6998_p6), %v5354_v22  ;;  %v5362_v24 = vld [vmem:[%s8143_s12 + $0xec] sm:$0xff] (%p6998_p6) }
 0x326   : > { %v4912_v33 = vsel %vm4462_vm6, %v4372_v45, %v5958_v26  ;;  %v6003_v37 = vadd.f32 -1.0, %v6893_v30  ;;  %v5310_v45 = vld [vmem:[%s8143_s12 + $0x18] sm:$0xff] (%p6998_p6)  ;;  %5305 = vst [vmem:[%s8562_s27] sm:$0xff] (%p6998_p6), %v5304_v62  ;;  %5357 = vst [vmem:[%s8562_s27 + $0x3a4] sm:$0xff] (%p6998_p6), %v5356_v13  ;;  %v5360_v23 = vld [vmem:[%s8143_s12 + $0xe4] sm:$0xff] (%p6998_p6) }
 0x327   : > { %5274 = vst [vmem:[%s8143_s12 + $0x154] sm:$0xff] %v6102_v25  ;;  %v6080_v14 = vpack.c.bf16 %v4912_v33, %v4911_v21  ;;  %v4956_v32 = vsel %vm4506_vm7, %v4374_v55, %v6002_v29  ;;  %5311 = vst [vmem:[%s8562_s27 + $0x18] sm:$0xff] (%p6998_p6), %v5310_v45  ;;  %v5322_v55 = vld [vmem:[%s8143_s12 + $0x48] sm:$0xff] (%p6998_p6)  ;;  %v5364_v35 = vld [vmem:[%s8143_s12 + $0xf4] sm:$0xff] (%p6998_p6) }
 0x328   : > { %v4957_v40 = vsel %vm4507_vm8, %v4376_v4, %v6003_v37  ;;  %v5326_v4 = vld [vmem:[%s8143_s12 + $0x58] sm:$0xff] (%p6998_p6)  ;;  %5323 = vst [vmem:[%s8562_s27 + $0x48] sm:$0xff] (%p6998_p6), %v5322_v55  ;;  %5359 = vst [vmem:[%s8562_s27 + $0x3ac] sm:$0xff] (%p6998_p6), %v5358_v0  ;;  %v5368_v8 = vld [vmem:[%s8143_s12 + $0x104] sm:$0xff] (%p6998_p6) }
 0x329   : > { %5252 = vst [vmem:[%s8143_s12 + $0xa8] sm:$0xff] %v6080_v14  ;;  %v6103_v47 = vpack.c.bf16 %v4957_v40, %v4956_v32  ;;  %5327 = vst [vmem:[%s8562_s27 + $0x58] sm:$0xff] (%p6998_p6), %v5326_v4  ;;  %v5366_v15 = vld [vmem:[%s8143_s12 + $0xfc] sm:$0xff] (%p6998_p6)  ;;  %v5370_v25 = vld [vmem:[%s8143_s12 + $0x10c] sm:$0xff] (%p6998_p6) }
 0x32a   : > { %5361 = vst [vmem:[%s8562_s27 + $0x3b4] sm:$0xff] (%p6998_p6), %v5360_v23  ;;  %5363 = vst [vmem:[%s8562_s27 + $0x3bc] sm:$0xff] (%p6998_p6), %v5362_v24  ;;  %v5372_v26 = vld [vmem:[%s8143_s12 + $0x114] sm:$0xff] (%p6998_p6)  ;;  %v5374_v20 = vld [vmem:[%s8143_s12 + $0x11c] sm:$0xff] (%p6998_p6) }
 0x32b   : > { %5275 = vst [vmem:[%s8143_s12 + $0x15c] sm:$0xff] %v6103_v47  ;;  %5365 = vst [vmem:[%s8562_s27 + $0x3c4] sm:$0xff] (%p6998_p6), %v5364_v35  ;;  %v5376_v21 = vld [vmem:[%s8143_s12 + $0x124] sm:$0xff] (%p6998_p6)  ;;  %v5378_v30 = vld [vmem:[%s8143_s12 + $0x12c] sm:$0xff] (%p6998_p6) }
 0x32c   : > { %v5344_v2 = vld [vmem:[%s8143_s12 + $0xa0] sm:$0xff] (%p6998_p6)  ;;  %5367 = vst [vmem:[%s8562_s27 + $0x3cc] sm:$0xff] (%p6998_p6), %v5366_v15  ;;  %5369 = vst [vmem:[%s8562_s27 + $0x3d4] sm:$0xff] (%p6998_p6), %v5368_v8  ;;  %v5380_v33 = vld [vmem:[%s8143_s12 + $0x134] sm:$0xff] (%p6998_p6) }
 0x32d   : > { %v4412_v11 = vpop.f32.mrb[44].mxu0  ;;  %5345 = vst [vmem:[%s8562_s27 + $0xa0] sm:$0xff] (%p6998_p6), %v5344_v2  ;;  %5371 = vst [vmem:[%s8562_s27 + $0x3dc] sm:$0xff] (%p6998_p6), %v5370_v25  ;;  %v5382_v29 = vld [vmem:[%s8143_s12 + $0x13c] sm:$0xff] (%p6998_p6)  ;;  %v5384_v14 = vld [vmem:[%s8143_s12 + $0x144] sm:$0xff] (%p6998_p6) }
 0x32e   : > { %v4413_v42 = vadd.f32 %v4412_v11, %v1572_v44  ;;  %v6133_v34 = vpop.f32.mrb[45].mxu0  ;;  %5373 = vst [vmem:[%s8562_s27 + $0x3e4] sm:$0xff] (%p6998_p6), %v5372_v26  ;;  %5375 = vst [vmem:[%s8562_s27 + $0x3ec] sm:$0xff] (%p6998_p6), %v5374_v20  ;;  %v5386_v37 = vld [vmem:[%s8143_s12 + $0x14c] sm:$0xff] (%p6998_p6)  ;;  %v5388_v32 = vld [vmem:[%s8143_s12 + $0x154] sm:$0xff] (%p6998_p6) }
 0x32f   : > { %v4415_v49 = vpop.f32.mrb[46].mxu0  ;;  %5377 = vst [vmem:[%s8562_s27 + $0x3f4] sm:$0xff] (%p6998_p6), %v5376_v21  ;;  %5379 = vst [vmem:[%s8562_s27 + $0x3fc] sm:$0xff] (%p6998_p6), %v5378_v30 }
 0x330   : > { %v4553_v27 = vmin.f32 %v4413_v42, 0.0  ;;  %v4416_v48 = vadd.f32 %v4415_v49, %v1572_v44  ;;  %v6134_v51 = vpop.f32.mrb[47].mxu0  ;;  %vm4463_vm9 = vcmp.gt.f32.partialorder %v4413_v42, 0.0  ;;  %v5346_v43 = vld [vmem:[%s8143_s12 + $0xa8] sm:$0xff] (%p6998_p6)  ;;  %5381 = vst [vmem:[%s8562_s27 + $0x404] sm:$0xff] (%p6998_p6), %v5380_v33  ;;  %5383 = vst [vmem:[%s8562_s27 + $0x40c] sm:$0xff] (%p6998_p6), %v5382_v29 }
 0x331   : > { %5347 = vst [vmem:[%s8562_s27 + $0xa8] sm:$0xff] (%p6998_p6), %v5346_v43  ;;  %5385 = vst [vmem:[%s8562_s27 + $0x414] sm:$0xff] (%p6998_p6), %v5384_v14 }
 0x332   : > { %v4687_v16 = vmul.f32 1.442695, %v4553_v27  ;;  %v4598_v28 = vmin.f32 %v4416_v48, 0.0  ;;  %vm4508_vm10 = vcmp.gt.f32.partialorder %v4416_v48, 0.0  ;;  %5387 = vst [vmem:[%s8562_s27 + $0x41c] sm:$0xff] (%p6998_p6), %v5386_v37  ;;  %v5390_v40 = vld [vmem:[%s8143_s12 + $0x15c] sm:$0xff] (%p6998_p6) }
 0x333   : > { %5389 = vst [vmem:[%s8562_s27 + $0x424] sm:$0xff] (%p6998_p6), %v5388_v32  ;;  %5391 = vst [vmem:[%s8562_s27 + $0x42c] sm:$0xff] (%p6998_p6), %v5390_v40 }
 0x334   : > { %6894 = vpow2.f32 %v4687_v16  ;;  %v4777_v39 = vmul.f32 1.442695, %v4598_v28 }
 0x336   : > { %6896 = vpow2.f32 %v4777_v39 }
 0x33e   : > { %v6895_v53 = vpop.eup %6894 }
 0x33f   : > { %v5959_v58 = vadd.f32 -1.0, %v6895_v53 }
 0x340   : > { %v6897_v17 = vpop.eup %6896  ;;  %5283 = sbr.rel (!%p6998_p6) target bundleno = 847 (0x34f), region = 62 }
 0x341   : > { %v4913_v18 = vsel %vm4463_vm9, %v4413_v42, %v5959_v58  ;;  %v6004_v31 = vadd.f32 -1.0, %v6897_v17 }
 0x342   : > { %v6081_v41 = vpack.c.bf16 %v4913_v18, %v4913_v18 }
 0x343   : > { %v4958_v54 = vsel %vm4508_vm10, %v4416_v48, %v6004_v31 }
 0x344   : > { %5253 = vst [vmem:[%s8143_s12 + $0xb0] sm:$0xf] %v6081_v41  ;;  %v6104_v57 = vpack.c.bf16 %v4958_v54, %v4958_v54 }
 0x346   : > { %5276 = vst [vmem:[%s8143_s12 + $0x164] sm:$0xf] %v6104_v57 }
 0x34b   : > { %v6052_v44 = vld [vmem:[%s8143_s12 + $0xb0] sm:$0xf] }
 0x34c   : > { %6053 = vst [vmem:[%s8562_s27 + $0xb0] sm:$0xf] %v6052_v44 }
 0x34d   : > { %v6054_v47 = vld [vmem:[%s8143_s12 + $0x164] sm:$0xf] }
 0x34e   : > { %6055 = vst [vmem:[%s8562_s27 + $0x434] sm:$0xf] %v6054_v47 }
 0x34f PF: > { %s13_s16 = sadd.s32 1, %s6938_s16   ;;  %s8670_s12 = smov %s6926_s13 }
 0x350   : > { %p10_p12 = scmp.ge.s32.totalorder %s13_s16, 7   ;;  %s8671_s13 = smov %s7003_s22 }
 0x351   : > { %s8672_s14 = smov %s6934_s15  ;;  %s8673_s15 = smov %s8675_s17 }
 0x352   :  { %12 = sbr.rel (!%p10_p12) target bundleno = 3 (0x3), region = 137 }

// kernel: image_autoencoder_forward.14
= control target key start
LH: loop header
LB: loop body
LE: loop exit
PB: predicated region body
PF: predicated region fallthrough
CT: control target
= control target key end

     0   :  { %s2501_s12 = smov 0   ;;  %s2503_s13 = smov 0   ;;  %s3262_s0 = inlined_call_operand.vmem [shape: bf16[2048,128], index: 0, kind: input, shape index: {}]   ;;  %s3263_s1 = inlined_call_operand.vmem [shape: bf16[128,128], index: 1, kind: input, shape index: {}]   ;;  %s3264_s2 = inlined_call_operand.vmem [shape: f32[1,128], index: 2, kind: input, shape index: {}]   ;;  %s3265_s3 = inlined_call_operand.vmem [shape: bf16[2048,128], index: 3, kind: output, shape index: {}]  }
   0x1   :  { %s2505_s14 = smov 0  }
   0x2 LB: > { %s32_s15 = sadd.s32 1, %s2475_s13  ;;  %p1697_p0 = scmp.ge.s32.totalorder %s2479_s14, 1  ;;  %s2479_s14 = sphi %s2505_s14, %s13_s14   ;;  %s2475_s13 = sphi %s2503_s13, %s3267_s13   ;;  %s2471_s12 = sphi %s2501_s12, %s3266_s12  }
   0x3   : > { %p34_p1 = scmp.ge.s32.totalorder %s32_s15, 4  ;;  %p188_p2 = scmp.lt.s32.totalorder %s2479_s14, 5 }
   0x5   : > { %s3269_s15 = smov (%p34_p1, %s32_s15), 0  ;;  %p189_p3 = pnand %p1697_p0, %p188_p2 }
   0x6   : > { %v2288_v0 = vld [vmem:[%s3263_s1] sm:$0xff] (!%p189_p3)   ;;  %s1698_s18 = sshll.u32 (!%p189_p3), %s2471_s12, 6  ;;  %v2289_v1 = vld [vmem:[%s3263_s1 + $0x8] sm:$0xff] (!%p189_p3)   ;;  %v2290_v2 = vld [vmem:[%s3263_s1 + $0x10] sm:$0xff] (!%p189_p3)  }
   0x7   : > { %192 = sbr.rel (%p189_p3) target bundleno = 382 (0x17e), region = 32  ;;  %p230_p4 = scmp.lt.s32.totalorder (!%p189_p3), %s1698_s18, 255  ;;  %2168 = vmatprep.subr.bf16.mxu0 (!%p189_p3), %v2288_v0  ;;  %2248 = vmatprep.subr.bf16.mxu1 (!%p189_p3), %v2288_v0  ;;  %v2291_v3 = vld [vmem:[%s3263_s1 + $0x18] sm:$0xff] (!%p189_p3)   ;;  %v2292_v6 = vld [vmem:[%s3263_s1 + $0x20] sm:$0xff] (!%p189_p3)   ;;  %v2293_v7 = vld [vmem:[%s3263_s1 + $0x28] sm:$0xff] (!%p189_p3)  }
   0x8   : > { %2169 = vmatpush3.bf16.msra.mxu0 (!%p189_p3), %v2288_v0  ;;  %2256 = vmatpush3.bf16.msra.mxu1 (!%p189_p3), %v2288_v0  ;;  %v2294_v8 = vld [vmem:[%s3263_s1 + $0x30] sm:$0xff] (!%p189_p3)   ;;  %v2295_v9 = vld [vmem:[%s3263_s1 + $0x38] sm:$0xff] (!%p189_p3)   ;;  %v2588_v40 = vld [vmem:[%s3264_s2] ss:$0 sm:$0xff] (!%p189_p3) }
   0x9   : > { %2170 = vmatprep.subr.bf16.mxu0 (!%p189_p3), %v2289_v1  ;;  %2249 = vmatprep.subr.bf16.mxu1 (!%p189_p3), %v2289_v1 }
   0xc   : > { %2171 = vmatpush3.bf16.msra.mxu0 (!%p189_p3), %v2289_v1  ;;  %2257 = vmatpush3.bf16.msra.mxu1 (!%p189_p3), %v2289_v1 }
   0xd   : > { %2172 = vmatprep.subr.bf16.mxu0 (!%p189_p3), %v2290_v2  ;;  %2250 = vmatprep.subr.bf16.mxu1 (!%p189_p3), %v2290_v2 }
   0xe   : > { %s3271_s18 = smov (!%p230_p4, %s1698_s18), 255 }
   0xf   : > { %s1699_s23 = sshll.u32 %s3271_s18, 2 }
  0x10   : > { %s2536_s26 = scalar_lea.vmem %s3262_s0, %s1699_s23  ;;  %2173 = vmatpush3.bf16.msra.mxu0 %v2290_v2  ;;  %2258 = vmatpush3.bf16.msra.mxu1 %v2290_v2  ;;  %s2692_s17 = scalar_lea.vmem %s3265_s3, %s1699_s23 }
  0x11   : > { %v2296_v4 = vld [vmem:[%s2536_s26] sm:$0xff]   ;;  %2174 = vmatprep.subr.bf16.mxu0 %v2291_v3  ;;  %2251 = vmatprep.subr.bf16.mxu1 %v2291_v3  ;;  %v2298_v10 = vld [vmem:[%s2536_s26 + $0x8] sm:$0xff]   ;;  %v2300_v12 = vld [vmem:[%s2536_s26 + $0x10] sm:$0xff]  }
  0x12   : > { %v2297_v5 = vld [vmem:[%s2536_s26 + $0x80] sm:$0xff]   ;;  %2184 = vmatprep.mubr.bf16.mxu0 %v2296_v4  ;;  %v2299_v11 = vld [vmem:[%s2536_s26 + $0x88] sm:$0xff]   ;;  %v2301_v13 = vld [vmem:[%s2536_s26 + $0x90] sm:$0xff]  }
  0x13   : > { %2216 = vmatprep.mubr.bf16.mxu1 %v2297_v5  ;;  %v2302_v14 = vld [vmem:[%s2536_s26 + $0x18] sm:$0xff]   ;;  %v2304_v16 = vld [vmem:[%s2536_s26 + $0x20] sm:$0xff]   ;;  %v2306_v18 = vld [vmem:[%s2536_s26 + $0x28] sm:$0xff]  }
  0x14   : > { %2175 = vmatpush3.bf16.msra.mxu0 %v2291_v3  ;;  %2259 = vmatpush3.bf16.msra.mxu1 %v2291_v3  ;;  %v2303_v15 = vld [vmem:[%s2536_s26 + $0x98] sm:$0xff]   ;;  %v2305_v17 = vld [vmem:[%s2536_s26 + $0xa0] sm:$0xff]   ;;  %v2307_v19 = vld [vmem:[%s2536_s26 + $0xa8] sm:$0xff]  }
  0x15   : > { %2176 = vmatprep.subr.bf16.mxu0 %v2292_v6  ;;  %2252 = vmatprep.subr.bf16.mxu1 %v2292_v6  ;;  %v2308_v20 = vld [vmem:[%s2536_s26 + $0x30] sm:$0xff]   ;;  %v2310_v22 = vld [vmem:[%s2536_s26 + $0x38] sm:$0xff]   ;;  %v2312_v24 = vld [vmem:[%s2536_s26 + $0x40] sm:$0xff]  }
  0x16   : > { %v2309_v21 = vld [vmem:[%s2536_s26 + $0xb0] sm:$0xff]   ;;  %v2311_v23 = vld [vmem:[%s2536_s26 + $0xb8] sm:$0xff]   ;;  %v2313_v25 = vld [vmem:[%s2536_s26 + $0xc0] sm:$0xff]  }
  0x17   : > { %v2314_v26 = vld [vmem:[%s2536_s26 + $0x48] sm:$0xff]   ;;  %v2316_v28 = vld [vmem:[%s2536_s26 + $0x50] sm:$0xff]   ;;  %v2318_v30 = vld [vmem:[%s2536_s26 + $0x58] sm:$0xff]  }
  0x18   : > { %2177 = vmatpush3.bf16.msra.mxu0 %v2292_v6  ;;  %2260 = vmatpush3.bf16.msra.mxu1 %v2292_v6  ;;  %v2315_v27 = vld [vmem:[%s2536_s26 + $0xc8] sm:$0xff]   ;;  %v2317_v29 = vld [vmem:[%s2536_s26 + $0xd0] sm:$0xff]   ;;  %v2319_v31 = vld [vmem:[%s2536_s26 + $0xd8] sm:$0xff]  }
  0x19   : > { %2178 = vmatprep.subr.bf16.mxu0 %v2293_v7  ;;  %2253 = vmatprep.subr.bf16.mxu1 %v2293_v7  ;;  %v2320_v32 = vld [vmem:[%s2536_s26 + $0x60] sm:$0xff]   ;;  %v2322_v34 = vld [vmem:[%s2536_s26 + $0x68] sm:$0xff]   ;;  %v2324_v36 = vld [vmem:[%s2536_s26 + $0x70] sm:$0xff]  }
  0x1a   : > { %v2321_v33 = vld [vmem:[%s2536_s26 + $0xe0] sm:$0xff]   ;;  %v2323_v35 = vld [vmem:[%s2536_s26 + $0xe8] sm:$0xff]   ;;  %v2325_v37 = vld [vmem:[%s2536_s26 + $0xf0] sm:$0xff]  }
  0x1b   : > { %v2326_v38 = vld [vmem:[%s2536_s26 + $0x78] sm:$0xff]  }
  0x1c   : > { %2179 = vmatpush3.bf16.msra.mxu0 %v2293_v7  ;;  %2261 = vmatpush3.bf16.msra.mxu1 %v2293_v7  ;;  %v2327_v39 = vld [vmem:[%s2536_s26 + $0xf8] sm:$0xff]  }
  0x1d   : > { %2180 = vmatprep.subr.bf16.mxu0 %v2294_v8  ;;  %2254 = vmatprep.subr.bf16.mxu1 %v2294_v8 }
  0x20   : > { %2181 = vmatpush3.bf16.msra.mxu0 %v2294_v8  ;;  %2262 = vmatpush3.bf16.msra.mxu1 %v2294_v8 }
  0x21   : > { %2182 = vmatprep.subr.bf16.mxu0 %v2295_v9  ;;  %2255 = vmatprep.subr.bf16.mxu1 %v2295_v9 }
  0x24   : > { %2183 = vmatpush3.bf16.msra.mxu0 %v2295_v9  ;;  %2263 = vmatpush3.bf16.msra.mxu1 %v2295_v9 }
  0x27   : > { %2185 = vmatmul.mubr.bf16.vlgmr.msra.gmra.mrb[0].mxu0 %v2298_v10  ;;  %2217 = vmatmul.mubr.bf16.vlgmr.msra.gmra.mrb[0].mxu1 %v2299_v11 }
  0x28   : > { %2188 = vmatprep.mubr.bf16.mxu0 %v2300_v12  ;;  %2220 = vmatprep.mubr.bf16.mxu1 %v2301_v13 }
  0x2f   : > { %2189 = vmatmul.mubr.bf16.gmra.mrb[4].mxu0 %v2302_v14  ;;  %2221 = vmatmul.mubr.bf16.gmra.mrb[4].mxu1 %v2303_v15 }
  0x30   : > { %2192 = vmatprep.mubr.bf16.mxu0 %v2304_v16  ;;  %2224 = vmatprep.mubr.bf16.mxu1 %v2305_v17 }
  0x37   : > { %2193 = vmatmul.mubr.bf16.gmra.mrb[8].mxu0 %v2306_v18  ;;  %2225 = vmatmul.mubr.bf16.gmra.mrb[8].mxu1 %v2307_v19 }
  0x38   : > { %2196 = vmatprep.mubr.bf16.mxu0 %v2308_v20  ;;  %2228 = vmatprep.mubr.bf16.mxu1 %v2309_v21 }
  0x3f   : > { %2197 = vmatmul.mubr.bf16.gmra.mrb[12].mxu0 %v2310_v22  ;;  %2229 = vmatmul.mubr.bf16.gmra.mrb[12].mxu1 %v2311_v23 }
  0x40   : > { %2200 = vmatprep.mubr.bf16.mxu0 %v2312_v24  ;;  %2232 = vmatprep.mubr.bf16.mxu1 %v2313_v25 }
  0x47   : > { %2201 = vmatmul.mubr.bf16.gmra.mrb[16].mxu0 %v2314_v26  ;;  %2233 = vmatmul.mubr.bf16.gmra.mrb[16].mxu1 %v2315_v27 }
  0x48   : > { %2204 = vmatprep.mubr.bf16.mxu0 %v2316_v28  ;;  %2236 = vmatprep.mubr.bf16.mxu1 %v2317_v29 }
  0x4f   : > { %2205 = vmatmul.mubr.bf16.gmra.mrb[20].mxu0 %v2318_v30  ;;  %2237 = vmatmul.mubr.bf16.gmra.mrb[20].mxu1 %v2319_v31 }
  0x50   : > { %2208 = vmatprep.mubr.bf16.mxu0 %v2320_v32  ;;  %2240 = vmatprep.mubr.bf16.mxu1 %v2321_v33 }
  0x57   : > { %2209 = vmatmul.mubr.bf16.gmra.mrb[24].mxu0 %v2322_v34  ;;  %2241 = vmatmul.mubr.bf16.gmra.mrb[24].mxu1 %v2323_v35 }
  0x58   : > { %2212 = vmatprep.mubr.bf16.mxu0 %v2324_v36  ;;  %2244 = vmatprep.mubr.bf16.mxu1 %v2325_v37 }
  0x5f   : > { %2213 = vmatmul.mubr.bf16.gmra.mrb[28].mxu0 %v2326_v38  ;;  %2245 = vmatmul.mubr.bf16.gmra.mrb[28].mxu1 %v2327_v39 }
  0xfa   : > { %v2186_v41 = vpop.f32.mrb[0].mxu0  ;;  %v2218_v42 = vpop.f32.mrb[0].mxu1 }
  0xfb   : > { %v2591_v43 = vadd.f32 %v2186_v41, %v2588_v40  ;;  %v2594_v44 = vadd.f32 %v2218_v42, %v2588_v40  ;;  %v621_v45 = vpop.f32.mrb[1].mxu0  ;;  %v749_v46 = vpop.f32.mrb[1].mxu1 }
  0xfc   : > { %v2597_v47 = vadd.f32 %v2588_v40, %v621_v45  ;;  %v2600_v48 = vadd.f32 %v2588_v40, %v749_v46  ;;  %v2187_v49 = vpop.f32.mrb[2].mxu0  ;;  %v2219_v50 = vpop.f32.mrb[2].mxu1 }
  0xfd   : > { %v942_v51 = vmin.f32 %v2591_v43, 0.0  ;;  %v974_v52 = vmin.f32 %v2594_v44, 0.0  ;;  %v624_v53 = vpop.f32.mrb[3].mxu0  ;;  %v752_v54 = vpop.f32.mrb[3].mxu1  ;;  %v2607_v59 = vadd.f32 %v2187_v49, %v2588_v40  ;;  %v2610_v60 = vadd.f32 %v2219_v50, %v2588_v40 }
  0xfe   : > { %v940_v55 = vmin.f32 %v2597_v47, 0.0  ;;  %v972_v56 = vmin.f32 %v2600_v48, 0.0  ;;  %v2613_v63 = vadd.f32 %v2588_v40, %v624_v53  ;;  %v2616_v0 = vadd.f32 %v2588_v40, %v752_v54 }
  0xff   : > { %v1008_v57 = vmul.f32 1.442695, %v942_v51  ;;  %v1072_v58 = vmul.f32 1.442695, %v974_v52  ;;  %v943_v1 = vmin.f32 %v2607_v59, 0.0  ;;  %v975_v2 = vmin.f32 %v2610_v60, 0.0 }
 0x100   : > { %v1004_v61 = vmul.f32 1.442695, %v940_v55  ;;  %v1068_v62 = vmul.f32 1.442695, %v972_v56  ;;  %v941_v3 = vmin.f32 %v2613_v63, 0.0  ;;  %v973_v7 = vmin.f32 %v2616_v0, 0.0 }
 0x101   : > { %2328 = vpow2.f32 %v1008_v57  ;;  %v1010_v6 = vmul.f32 1.442695, %v943_v1  ;;  %v1074_v10 = vmul.f32 1.442695, %v975_v2  ;;  %vm878_vm0 = vcmp.gt.f32.partialorder %v2591_v43, 0.0 }
 0x102   : > { %2330 = vpow2.f32 %v1072_v58  ;;  %v2190_v4 = vpop.f32.mrb[4].mxu0  ;;  %v2222_v5 = vpop.f32.mrb[4].mxu1  ;;  %v1006_v11 = vmul.f32 1.442695, %v941_v3  ;;  %v1070_v15 = vmul.f32 1.442695, %v973_v7 }
 0x103   : > { %2332 = vpow2.f32 %v1004_v61  ;;  %v637_v8 = vpop.f32.mrb[5].mxu0  ;;  %v765_v9 = vpop.f32.mrb[5].mxu1  ;;  %v2623_v12 = vadd.f32 %v2190_v4, %v2588_v40  ;;  %v2626_v16 = vadd.f32 %v2222_v5, %v2588_v40  ;;  %vm910_vm1 = vcmp.gt.f32.partialorder %v2594_v44, 0.0 }
 0x104   : > { %2334 = vpow2.f32 %v1068_v62  ;;  %v2191_v13 = vpop.f32.mrb[6].mxu0  ;;  %v2223_v14 = vpop.f32.mrb[6].mxu1  ;;  %v2629_v17 = vadd.f32 %v2588_v40, %v637_v8  ;;  %v2633_v21 = vadd.f32 %v2588_v40, %v765_v9  ;;  %vm876_vm2 = vcmp.gt.f32.partialorder %v2597_v47, 0.0 }
 0x105   : > { %2336 = vpow2.f32 %v1010_v6  ;;  %v640_v18 = vpop.f32.mrb[7].mxu0  ;;  %v768_v19 = vpop.f32.mrb[7].mxu1  ;;  %v946_v20 = vmin.f32 %v2623_v12, 0.0  ;;  %v978_v22 = vmin.f32 %v2626_v16, 0.0  ;;  %v2641_v27 = vadd.f32 %v2191_v13, %v2588_v40 }
 0x106   : > { %2338 = vpow2.f32 %v1074_v10  ;;  %v944_v24 = vmin.f32 %v2629_v17, 0.0  ;;  %v976_v26 = vmin.f32 %v2633_v21, 0.0  ;;  %v2644_v28 = vadd.f32 %v2223_v14, %v2588_v40 }
 0x107   : > { %2340 = vpow2.f32 %v1006_v11  ;;  %v1016_v23 = vmul.f32 1.442695, %v946_v20  ;;  %v1080_v25 = vmul.f32 1.442695, %v978_v22  ;;  %v2648_v30 = vadd.f32 %v2588_v40, %v640_v18 }
 0x108   : > { %2342 = vpow2.f32 %v1070_v15  ;;  %v1012_v29 = vmul.f32 1.442695, %v944_v24  ;;  %vm908_vm3 = vcmp.gt.f32.partialorder %v2600_v48, 0.0  ;;  %vm879_vm4 = vcmp.gt.f32.partialorder %v2607_v59, 0.0 }
 0x109   : > { %2344 = vpow2.f32 %v1016_v23  ;;  %v1076_v34 = vmul.f32 1.442695, %v976_v26  ;;  %v947_v35 = vmin.f32 %v2641_v27, 0.0  ;;  %vm911_vm5 = vcmp.gt.f32.partialorder %v2610_v60, 0.0 }
 0x10a   : > { %v2194_v31 = vpop.f32.mrb[8].mxu0  ;;  %v2226_v32 = vpop.f32.mrb[8].mxu1  ;;  %2346 = vpow2.f32 %v1080_v25  ;;  %v979_v41 = vmin.f32 %v2644_v28, 0.0  ;;  %v2664_v51 = vadd.f32 %v2588_v40, %v768_v19  ;;  %vm877_vm6 = vcmp.gt.f32.partialorder %v2613_v63, 0.0 }
 0x10b   : > { %v2329_v33 = vpop.eup %2328  ;;  %v2653_v36 = vpop.f32.mrb[9].mxu0  ;;  %2348 = vpow2.f32 %v1012_v29  ;;  %v1018_v50 = vmul.f32 1.442695, %v947_v35  ;;  %v945_v57 = vmin.f32 %v2648_v30, 0.0  ;;  %vm909_vm7 = vcmp.gt.f32.partialorder %v2616_v0, 0.0 }
 0x10c   : > { %v2655_v37 = vpop.f32.mrb[9].mxu1  ;;  %v2331_v38 = vpop.eup %2330  ;;  %v1745_v39 = vadd.f32 -1.0, %v2329_v33  ;;  %2350 = vpow2.f32 %v1076_v34  ;;  %v1082_v56 = vmul.f32 1.442695, %v979_v41  ;;  %vm882_vm8 = vcmp.gt.f32.partialorder %v2623_v12, 0.0 }
 0x10d   : > { %v2659_v42 = vpop.f32.mrb[10].mxu0  ;;  %v2661_v45 = vpop.f32.mrb[10].mxu1  ;;  %v1777_v49 = vadd.f32 -1.0, %v2331_v38  ;;  %2352 = vpow2.f32 %v1018_v50  ;;  %v1014_v4 = vmul.f32 1.442695, %v945_v57  ;;  %v977_v7 = vmin.f32 %v2664_v51, 0.0 }
 0x10e   : > { %v2333_v46 = vpop.eup %2332  ;;  %v2666_v52 = vpop.f32.mrb[11].mxu0  ;;  %v1198_v61 = vsel %vm878_vm0, %v2591_v43, %v1745_v39  ;;  %2354 = vpow2.f32 %v1082_v56  ;;  %vm914_vm9 = vcmp.gt.f32.partialorder %v2626_v16, 0.0  ;;  %vm880_vm10 = vcmp.gt.f32.partialorder %v2629_v17, 0.0 }
 0x10f   : > { %v2668_v53 = vpop.f32.mrb[11].mxu1  ;;  %v2335_v54 = vpop.eup %2334  ;;  %v1743_v55 = vadd.f32 -1.0, %v2333_v46  ;;  %v1230_v62 = vsel %vm910_vm1, %v2594_v44, %v1777_v49  ;;  %v2685_v44 = vadd.f32 %v2194_v31, %v2588_v40  ;;  %2356 = vpow2.f32 %v1014_v4 }
 0x110   : > { %v2337_v58 = vpop.eup %2336  ;;  %v1775_v2 = vadd.f32 -1.0, %v2335_v54  ;;  %v1078_v19 = vmul.f32 1.442695, %v977_v7  ;;  %vm912_vm11 = vcmp.gt.f32.partialorder %v2633_v21, 0.0  ;;  %vm883_vm12 = vcmp.gt.f32.partialorder %v2641_v27, 0.0 }
 0x111   : > { %v2339_v1 = vpop.eup %2338  ;;  %v1746_v3 = vadd.f32 -1.0, %v2337_v58  ;;  %v1196_v43 = vsel %vm876_vm2, %v2597_v47, %v1743_v55  ;;  %v2698_v47 = vadd.f32 %v2226_v32, %v2588_v40  ;;  %v950_v26 = vmin.f32 %v2685_v44, 0.0 }
 0x112   : > { %v2341_v5 = vpop.eup %2340  ;;  %v1778_v6 = vadd.f32 -1.0, %v2339_v1  ;;  %v2700_v11 = vpop.f32.mrb[12].mxu0  ;;  %v1228_v23 = vsel %vm908_vm3, %v2600_v48, %v1775_v2  ;;  %2358 = vpow2.f32 %v1078_v19  ;;  %v2739_v46 = vadd.f32 %v2588_v40, %v2653_v36 }
 0x113   : > { %v2343_v8 = vpop.eup %2342  ;;  %v1199_v9 = vsel %vm879_vm4, %v2607_v59, %v1746_v3  ;;  %v1744_v10 = vadd.f32 -1.0, %v2341_v5  ;;  %v2702_v13 = vpop.f32.mrb[12].mxu1  ;;  %v1024_v39 = vmul.f32 1.442695, %v950_v26  ;;  %vm915_vm13 = vcmp.gt.f32.partialorder %v2644_v28, 0.0 }
 0x114   : > { %v1945_v14 = vpack.c.bf16 %v1199_v9, %v1198_v61  ;;  %v1231_v15 = vsel %vm911_vm5, %v2610_v60, %v1778_v6  ;;  %v1776_v18 = vadd.f32 -1.0, %v2343_v8  ;;  %v2707_v20 = vpop.f32.mrb[13].mxu0  ;;  %v2709_v59 = vpop.f32.mrb[13].mxu1  ;;  %vm881_vm14 = vcmp.gt.f32.partialorder %v2648_v30, 0.0 }
 0x115   : > { %v2345_v22 = vpop.eup %2344  ;;  %v2025_v24 = vpack.c.bf16 %v1231_v15, %v1230_v62  ;;  %v1197_v25 = vsel %vm877_vm6, %v2613_v63, %v1744_v10  ;;  %v2718_v60 = vpop.f32.mrb[14].mxu0  ;;  %v2746_v50 = vadd.f32 %v2588_v40, %v2655_v37  ;;  %vm913_vm15 = vcmp.gt.f32.partialorder %v2664_v51, 0.0 }
 0x116   : > { %v2720_v29 = vpop.f32.mrb[14].mxu1  ;;  %v2347_v31 = vpop.eup %2346  ;;  %2097 = vst [vmem:[%s2692_s17 + $0x8] sm:$0xff] %v1945_v14   ;;  %v1940_v32 = vpack.c.bf16 %v1197_v25, %v1196_v43  ;;  %v1229_v33 = vsel %vm909_vm7, %v2616_v0, %v1776_v18  ;;  %v1749_v48 = vadd.f32 -1.0, %v2345_v22  ;;  %v982_v0 = vmin.f32 %v2698_v47, 0.0 }
 0x117   : > { %v2726_v34 = vpop.f32.mrb[15].mxu0  ;;  %v2728_v63 = vpop.f32.mrb[15].mxu1  ;;  %2113 = vst [vmem:[%s2692_s17 + $0x88] sm:$0xff] %v2025_v24   ;;  %v2020_v38 = vpack.c.bf16 %v1229_v33, %v1228_v23  ;;  %v1781_v49 = vadd.f32 -1.0, %v2347_v31  ;;  %2360 = vpow2.f32 %v1024_v39  ;;  %v948_v56 = vmin.f32 %v2739_v46, 0.0 }
 0x118   : > { %v2349_v35 = vpop.eup %2348  ;;  %1941 = vst [vmem:[%s2692_s17] sm:$0xff] %v1940_v32   ;;  %v1202_v55 = vsel %vm882_vm8, %v2623_v12, %v1749_v48  ;;  %v1088_v36 = vmul.f32 1.442695, %v982_v0  ;;  %v980_v1 = vmin.f32 %v2746_v50, 0.0  ;;  %v2760_v12 = vadd.f32 %v2659_v42, %v2588_v40 }
 0x119   : > { %v2351_v41 = vpop.eup %2350  ;;  %2112 = vst [vmem:[%s2692_s17 + $0x80] sm:$0xff] %v2020_v38   ;;  %v1747_v58 = vadd.f32 -1.0, %v2349_v35  ;;  %v1020_v4 = vmul.f32 1.442695, %v948_v56  ;;  %v2771_v9 = vadd.f32 %v2661_v45, %v2588_v40  ;;  %v2775_v10 = vadd.f32 %v2588_v40, %v2666_v52 }
 0x11a   : > { %v2353_v54 = vpop.eup %2352  ;;  %v1779_v61 = vadd.f32 -1.0, %v2351_v41  ;;  %v2754_v2 = vpop.f32.mrb[16].mxu0  ;;  %2362 = vpow2.f32 %v1088_v36  ;;  %v1084_v8 = vmul.f32 1.442695, %v980_v1  ;;  %v1234_v15 = vsel %vm914_vm9, %v2626_v16, %v1781_v49 }
 0x11b   : > { %v2355_v57 = vpop.eup %2354  ;;  %v1750_v62 = vadd.f32 -1.0, %v2353_v54  ;;  %v2756_v37 = vpop.f32.mrb[16].mxu1  ;;  %v1200_v52 = vsel %vm880_vm10, %v2629_v17, %v1747_v58  ;;  %2364 = vpow2.f32 %v1020_v4  ;;  %v951_v24 = vmin.f32 %v2760_v12, 0.0 }
 0x11c   : > { %v1782_v3 = vadd.f32 -1.0, %v2355_v57  ;;  %v2762_v5 = vpop.f32.mrb[17].mxu0  ;;  %v2764_v43 = vpop.f32.mrb[17].mxu1  ;;  %v1232_v25 = vsel %vm912_vm11, %v2633_v21, %v1779_v61  ;;  %2366 = vpow2.f32 %v1084_v8  ;;  %v983_v26 = vmin.f32 %v2771_v9, 0.0 }
 0x11d   : > { %v2357_v6 = vpop.eup %2356  ;;  %v1203_v7 = vsel %vm883_vm12, %v2641_v27, %v1750_v62  ;;  %v2777_v42 = vpop.f32.mrb[18].mxu0  ;;  %v1026_v32 = vmul.f32 1.442695, %v951_v24  ;;  %v949_v33 = vmin.f32 %v2775_v10, 0.0  ;;  %v2807_v35 = vadd.f32 %v2588_v40, %v2668_v53 }
 0x11e   : > { %v2779_v14 = vpop.f32.mrb[18].mxu1  ;;  %v1955_v27 = vpack.c.bf16 %v1203_v7, %v1202_v55  ;;  %v1235_v45 = vsel %vm915_vm13, %v2644_v28, %v1782_v3  ;;  %v1748_v18 = vadd.f32 -1.0, %v2357_v6  ;;  %v2787_v19 = vpop.f32.mrb[19].mxu0  ;;  %v1090_v48 = vmul.f32 1.442695, %v983_v26 }
 0x11f   : > { %v2789_v22 = vpop.f32.mrb[19].mxu1  ;;  %v2035_v23 = vpack.c.bf16 %v1235_v45, %v1234_v15  ;;  %v2359_v16 = vpop.eup %2358  ;;  %v2811_v21 = vadd.f32 %v2700_v11, %v2588_v40  ;;  %2368 = vpow2.f32 %v1026_v32  ;;  %v1022_v39 = vmul.f32 1.442695, %v949_v33 }
 0x120   : > { %2099 = vst [vmem:[%s2692_s17 + $0x18] sm:$0xff] %v1955_v27   ;;  %v1201_v28 = vsel %vm881_vm14, %v2648_v30, %v1748_v18  ;;  %v1780_v31 = vadd.f32 -1.0, %v2359_v16  ;;  %v2815_v30 = vadd.f32 %v2702_v13, %v2588_v40  ;;  %v2823_v53 = vadd.f32 %v2588_v40, %v2707_v20 }
 0x121   : > { %2115 = vst [vmem:[%s2692_s17 + $0x98] sm:$0xff] %v2035_v23   ;;  %v1950_v17 = vpack.c.bf16 %v1201_v28, %v1200_v52  ;;  %v2361_v0 = vpop.eup %2360  ;;  %2370 = vpow2.f32 %v1090_v48  ;;  %v954_v55 = vmin.f32 %v2811_v21, 0.0  ;;  %vm886_vm0 = vcmp.gt.f32.partialorder %v2685_v44, 0.0 }
 0x122   : > { %v1233_v38 = vsel %vm913_vm15, %v2664_v51, %v1780_v31  ;;  %v2825_v41 = vpop.f32.mrb[20].mxu0  ;;  %v2827_v11 = vpop.f32.mrb[20].mxu1  ;;  %2372 = vpow2.f32 %v1022_v39  ;;  %v981_v51 = vmin.f32 %v2807_v35, 0.0  ;;  %v986_v57 = vmin.f32 %v2815_v30, 0.0 }
 0x123   : > { %2098 = vst [vmem:[%s2692_s17 + $0x10] sm:$0xff] %v1950_v17   ;;  %v2030_v49 = vpack.c.bf16 %v1233_v38, %v1232_v25  ;;  %v2829_v13 = vpop.f32.mrb[21].mxu0  ;;  %v2831_v54 = vpop.f32.mrb[21].mxu1  ;;  %v1753_v62 = vadd.f32 -1.0, %v2361_v0  ;;  %v1032_v3 = vmul.f32 1.442695, %v954_v55  ;;  %v2849_v8 = vadd.f32 %v2588_v40, %v2709_v59 }
 0x124   : > { %v2835_v36 = vpop.f32.mrb[22].mxu0  ;;  %v2837_v20 = vpop.f32.mrb[22].mxu1  ;;  %v1086_v1 = vmul.f32 1.442695, %v981_v51  ;;  %v952_v4 = vmin.f32 %v2823_v53, 0.0  ;;  %v2853_v15 = vadd.f32 %v2718_v60, %v2588_v40  ;;  %vm918_vm1 = vcmp.gt.f32.partialorder %v2698_v47, 0.0 }
 0x125   : > { %v2363_v56 = vpop.eup %2362  ;;  %2114 = vst [vmem:[%s2692_s17 + $0x90] sm:$0xff] %v2030_v49   ;;  %v2842_v58 = vpop.f32.mrb[23].mxu0  ;;  %v1096_v7 = vmul.f32 1.442695, %v986_v57  ;;  %v2858_v18 = vadd.f32 %v2720_v29, %v2588_v40  ;;  %vm884_vm2 = vcmp.gt.f32.partialorder %v2739_v46, 0.0  ;;  %vm887_vm3 = vcmp.gt.f32.partialorder %v2760_v12, 0.0 }
 0x126   : > { %v2844_v61 = vpop.f32.mrb[23].mxu1  ;;  %v1785_v6 = vadd.f32 -1.0, %v2363_v56  ;;  %v2365_v27 = vpop.eup %2364  ;;  %2374 = vpow2.f32 %v1086_v1  ;;  %v1028_v45 = vmul.f32 1.442695, %v952_v4  ;;  %v984_v59 = vmin.f32 %v2849_v8, 0.0 }
 0x127   : > { %v2367_v52 = vpop.eup %2366  ;;  %2376 = vpow2.f32 %v1032_v3  ;;  %vm919_vm4 = vcmp.gt.f32.partialorder %v2771_v9, 0.0  ;;  %vm885_vm5 = vcmp.gt.f32.partialorder %v2775_v10, 0.0  ;;  %v955_v60 = vmin.f32 %v2853_v15, 0.0 }
 0x128   : > { %2378 = vpow2.f32 %v1096_v7  ;;  %v1206_v29 = vsel %vm886_vm0, %v2685_v44, %v1753_v62  ;;  %v1238_v16 = vsel %vm918_vm1, %v2698_v47, %v1785_v6  ;;  %v1092_v25 = vmul.f32 1.442695, %v984_v59 }
 0x129   : > { %2380 = vpow2.f32 %v1028_v45  ;;  %v2369_v17 = vpop.eup %2368  ;;  %vm916_vm6 = vcmp.gt.f32.partialorder %v2746_v50, 0.0  ;;  %vm917_vm7 = vcmp.gt.f32.partialorder %v2807_v35, 0.0  ;;  %v1034_v31 = vmul.f32 1.442695, %v955_v60 }
 0x12a   : > { %v2866_v23 = vpop.f32.mrb[24].mxu0  ;;  %v2868_v24 = vpop.f32.mrb[24].mxu1  ;;  %v987_v32 = vmin.f32 %v2858_v18, 0.0  ;;  %v2885_v44 = vadd.f32 %v2588_v40, %v2726_v34  ;;  %v2889_v47 = vadd.f32 %v2588_v40, %v2728_v63  ;;  %v1751_v39 = vadd.f32 -1.0, %v2365_v27 }
 0x12b   : > { %v2876_v28 = vpop.f32.mrb[25].mxu0  ;;  %v2878_v26 = vpop.f32.mrb[25].mxu1  ;;  %v1783_v0 = vadd.f32 -1.0, %v2367_v52  ;;  %v1754_v49 = vadd.f32 -1.0, %v2369_v17  ;;  %2382 = vpow2.f32 %v1092_v25  ;;  %v2901_v63 = vadd.f32 %v2754_v2, %v2588_v40 }
 0x12c   : > { %v2891_v33 = vpop.f32.mrb[26].mxu0  ;;  %v2893_v48 = vpop.f32.mrb[26].mxu1  ;;  %2384 = vpow2.f32 %v1034_v31  ;;  %v1098_v57 = vmul.f32 1.442695, %v987_v32  ;;  %v953_v3 = vmin.f32 %v2885_v44, 0.0  ;;  %v2909_v4 = vadd.f32 %v2756_v37, %v2588_v40 }
 0x12d   : > { %v2371_v38 = vpop.eup %2370  ;;  %v2895_v51 = vpop.f32.mrb[27].mxu0  ;;  %v1207_v62 = vsel %vm887_vm3, %v2760_v12, %v1754_v49  ;;  %v985_v2 = vmin.f32 %v2889_v47, 0.0  ;;  %v1204_v12 = vsel %vm884_vm2, %v2739_v46, %v1751_v39  ;;  %vm890_vm8 = vcmp.gt.f32.partialorder %v2811_v21, 0.0 }
 0x12e   : > { %v2897_v55 = vpop.f32.mrb[27].mxu1  ;;  %v2373_v56 = vpop.eup %2372  ;;  %v1786_v34 = vadd.f32 -1.0, %v2371_v38  ;;  %v1965_v6 = vpack.c.bf16 %v1207_v62, %v1206_v29  ;;  %2386 = vpow2.f32 %v1098_v57  ;;  %v1030_v37 = vmul.f32 1.442695, %v953_v3 }
 0x12f   : > { %v1752_v1 = vadd.f32 -1.0, %v2373_v56  ;;  %v958_v60 = vmin.f32 %v2901_v63, 0.0  ;;  %v2932_v17 = vadd.f32 %v2588_v40, %v2762_v5  ;;  %vm922_vm9 = vcmp.gt.f32.partialorder %v2815_v30, 0.0 }
 0x130   : > { %v1239_v7 = vsel %vm919_vm4, %v2771_v9, %v1786_v34  ;;  %v2375_v52 = vpop.eup %2374  ;;  %2101 = vst [vmem:[%s2692_s17 + $0x28] sm:$0xff] %v1965_v6   ;;  %v1094_v9 = vmul.f32 1.442695, %v985_v2  ;;  %2388 = vpow2.f32 %v1030_v37  ;;  %v2942_v49 = vadd.f32 %v2588_v40, %v2764_v43 }
 0x131   : > { %v2045_v27 = vpack.c.bf16 %v1239_v7, %v1238_v16  ;;  %v1205_v45 = vsel %vm885_vm5, %v2775_v10, %v1752_v1  ;;  %v2377_v46 = vpop.eup %2376  ;;  %v1784_v16 = vadd.f32 -1.0, %v2375_v52  ;;  %v990_v10 = vmin.f32 %v2909_v4, 0.0 }
 0x132   : > { %v1960_v59 = vpack.c.bf16 %v1205_v45, %v1204_v12  ;;  %v2924_v29 = vpop.f32.mrb[28].mxu0  ;;  %v2926_v25 = vpop.f32.mrb[28].mxu1  ;;  %2390 = vpow2.f32 %v1094_v9  ;;  %v1040_v39 = vmul.f32 1.442695, %v958_v60  ;;  %v1236_v57 = vsel %vm916_vm6, %v2746_v50, %v1783_v0 }
 0x133   : > { %2117 = vst [vmem:[%s2692_s17 + $0xa8] sm:$0xff] %v2045_v27   ;;  %v2934_v31 = vpop.f32.mrb[29].mxu0  ;;  %v2936_v32 = vpop.f32.mrb[29].mxu1  ;;  %v1237_v62 = vsel %vm917_vm7, %v2807_v35, %v1784_v16  ;;  %vm888_vm10 = vcmp.gt.f32.partialorder %v2823_v53, 0.0  ;;  %v1104_v1 = vmul.f32 1.442695, %v990_v10  ;;  %v2968_v45 = vadd.f32 %v2777_v42, %v2588_v40 }
 0x134   : > { %v2379_v38 = vpop.eup %2378  ;;  %2100 = vst [vmem:[%s2692_s17 + $0x20] sm:$0xff] %v1960_v59   ;;  %v2944_v56 = vpop.f32.mrb[30].mxu0  ;;  %v2040_v6 = vpack.c.bf16 %v1237_v62, %v1236_v57  ;;  %v1757_v7 = vadd.f32 -1.0, %v2377_v46  ;;  %vm891_vm11 = vcmp.gt.f32.partialorder %v2853_v15, 0.0  ;;  %vm923_vm12 = vcmp.gt.f32.partialorder %v2858_v18, 0.0 }
 0x135   : > { %v2946_v34 = vpop.f32.mrb[30].mxu1  ;;  %v2381_v5 = vpop.eup %2380  ;;  %v1789_v2 = vadd.f32 -1.0, %v2379_v38  ;;  %2392 = vpow2.f32 %v1040_v39  ;;  %v956_v50 = vmin.f32 %v2932_v17, 0.0  ;;  %vm920_vm13 = vcmp.gt.f32.partialorder %v2849_v8, 0.0 }
 0x136   : > { %v2955_v3 = vpop.f32.mrb[31].mxu0  ;;  %v2957_v43 = vpop.f32.mrb[31].mxu1  ;;  %v1755_v27 = vadd.f32 -1.0, %v2381_v5  ;;  %2116 = vst [vmem:[%s2692_s17 + $0xa0] sm:$0xff] %v2040_v6   ;;  %vm889_vm14 = vcmp.gt.f32.partialorder %v2885_v44, 0.0  ;;  %2394 = vpow2.f32 %v1104_v1  ;;  %v988_v0 = vmin.f32 %v2942_v49, 0.0 }
 0x137   : > { %v2383_v12 = vpop.eup %2382  ;;  %v1036_v52 = vmul.f32 1.442695, %v956_v50  ;;  %v2972_v59 = vadd.f32 %v2779_v14, %v2588_v40  ;;  %v2976_v9 = vadd.f32 %v2588_v40, %v2787_v19  ;;  %v1210_v46 = vsel %vm890_vm8, %v2811_v21, %v1757_v7 }
 0x138   : > { %v2385_v35 = vpop.eup %2384  ;;  %v1242_v42 = vsel %vm922_vm9, %v2815_v30, %v1789_v2  ;;  %vm921_vm15 = vcmp.gt.f32.partialorder %v2889_v47, 0.0  ;;  %v959_v16 = vmin.f32 %v2968_v45, 0.0  ;;  %v1208_v14 = vsel %vm888_vm10, %v2823_v53, %v1755_v27 }
 0x139   : > { %v1758_v37 = vadd.f32 -1.0, %v2385_v35  ;;  %v2387_v60 = vpop.eup %2386  ;;  %v1100_v38 = vmul.f32 1.442695, %v988_v0  ;;  %2396 = vpow2.f32 %v1036_v52  ;;  %v991_v30 = vmin.f32 %v2972_v59, 0.0 }
 0x13a   : > { %v1790_v10 = vadd.f32 -1.0, %v2387_v60  ;;  %v1042_v39 = vmul.f32 1.442695, %v959_v16  ;;  %v2389_v5 = vpop.eup %2388  ;;  %v1787_v57 = vadd.f32 -1.0, %v2383_v12  ;;  %v957_v53 = vmin.f32 %v2976_v9, 0.0 }
 0x13b   : > { %v1211_v19 = vsel %vm891_vm11, %v2853_v15, %v1758_v37  ;;  %v2999_v1 = vadd.f32 %v2588_v40, %v2789_v22  ;;  %v1756_v7 = vadd.f32 -1.0, %v2389_v5  ;;  %v1106_v2 = vmul.f32 1.442695, %v991_v30 }
 0x13c   : > { %v1975_v21 = vpack.c.bf16 %v1211_v19, %v1210_v46  ;;  %v1243_v62 = vsel %vm923_vm12, %v2858_v18, %v1790_v10  ;;  %v2391_v15 = vpop.eup %2390  ;;  %2398 = vpow2.f32 %v1042_v39  ;;  %v1038_v12 = vmul.f32 1.442695, %v957_v53 }
 0x13d   : > { %v2055_v6 = vpack.c.bf16 %v1243_v62, %v1242_v42  ;;  %v1788_v27 = vadd.f32 -1.0, %v2391_v15  ;;  %2400 = vpow2.f32 %v1100_v38  ;;  %v989_v50 = vmin.f32 %v2999_v1, 0.0 }
 0x13e   : > { %2103 = vst [vmem:[%s2692_s17 + $0x38] sm:$0xff] %v1975_v21   ;;  %v1209_v18 = vsel %vm889_vm14, %v2885_v44, %v1756_v7  ;;  %2402 = vpow2.f32 %v1106_v2  ;;  %v3009_v22 = vadd.f32 %v2825_v41, %v2588_v40  ;;  %v3013_v35 = vadd.f32 %v2827_v11, %v2588_v40 }
 0x13f   : > { %2119 = vst [vmem:[%s2692_s17 + $0xb8] sm:$0xff] %v2055_v6   ;;  %v2393_v0 = vpop.eup %2392  ;;  %v1240_v37 = vsel %vm920_vm13, %v2849_v8, %v1787_v57  ;;  %v1970_v52 = vpack.c.bf16 %v1209_v18, %v1208_v14  ;;  %v1241_v44 = vsel %vm921_vm15, %v2889_v47, %v1788_v27  ;;  %2404 = vpow2.f32 %v1038_v12 }
 0x140   : > { %v2395_v60 = vpop.eup %2394  ;;  %v2050_v46 = vpack.c.bf16 %v1241_v44, %v1240_v37  ;;  %v1102_v42 = vmul.f32 1.442695, %v989_v50  ;;  %vm894_vm0 = vcmp.gt.f32.partialorder %v2901_v63, 0.0  ;;  %vm926_vm1 = vcmp.gt.f32.partialorder %v2909_v4, 0.0 }
 0x141   : > { %2102 = vst [vmem:[%s2692_s17 + $0x30] sm:$0xff] %v1970_v52   ;;  %v962_v41 = vmin.f32 %v3009_v22, 0.0  ;;  %v994_v11 = vmin.f32 %v3013_v35, 0.0  ;;  %v1761_v8 = vadd.f32 -1.0, %v2393_v0  ;;  %v3029_v16 = vadd.f32 %v2588_v40, %v2829_v13 }
 0x142   : > { %2118 = vst [vmem:[%s2692_s17 + $0xb0] sm:$0xff] %v2050_v46   ;;  %2406 = vpow2.f32 %v1102_v42  ;;  %v3033_v47 = vadd.f32 %v2588_v40, %v2831_v54  ;;  %v1793_v14 = vadd.f32 -1.0, %v2395_v60  ;;  %v3037_v38 = vadd.f32 %v2835_v36, %v2588_v40 }
 0x143   : > { %v1048_v19 = vmul.f32 1.442695, %v962_v41  ;;  %v1112_v10 = vmul.f32 1.442695, %v994_v11  ;;  %v2397_v21 = vpop.eup %2396  ;;  %vm892_vm2 = vcmp.gt.f32.partialorder %v2932_v17, 0.0  ;;  %vm895_vm3 = vcmp.gt.f32.partialorder %v2968_v45, 0.0 }
 0x144   : > { %v960_v39 = vmin.f32 %v3029_v16, 0.0  ;;  %v3044_v13 = vadd.f32 %v2837_v20, %v2588_v40  ;;  %vm927_vm4 = vcmp.gt.f32.partialorder %v2972_v59, 0.0  ;;  %vm893_vm5 = vcmp.gt.f32.partialorder %v2976_v9, 0.0 }
 0x145   : > { %2408 = vpow2.f32 %v1048_v19  ;;  %v992_v54 = vmin.f32 %v3033_v47, 0.0  ;;  %v1214_v30 = vsel %vm894_vm0, %v2901_v63, %v1761_v8  ;;  %vm924_vm6 = vcmp.gt.f32.partialorder %v2942_v49, 0.0 }
 0x146   : > { %v2399_v36 = vpop.eup %2398  ;;  %vm925_vm7 = vcmp.gt.f32.partialorder %v2999_v1, 0.0  ;;  %2410 = vpow2.f32 %v1112_v10  ;;  %v1044_v5 = vmul.f32 1.442695, %v960_v39  ;;  %v963_v20 = vmin.f32 %v3037_v38, 0.0 }
 0x147   : > { %v2401_v57 = vpop.eup %2400  ;;  %v1246_v62 = vsel %vm926_vm1, %v2909_v4, %v1793_v14  ;;  %v1759_v53 = vadd.f32 -1.0, %v2397_v21  ;;  %v1762_v15 = vadd.f32 -1.0, %v2399_v36  ;;  %v1108_v6 = vmul.f32 1.442695, %v992_v54 }
 0x148   : > { %v2403_v7 = vpop.eup %2402  ;;  %2412 = vpow2.f32 %v1044_v5  ;;  %v1050_v2 = vmul.f32 1.442695, %v963_v20  ;;  %v995_v63 = vmin.f32 %v3044_v13, 0.0  ;;  %v3061_v27 = vadd.f32 %v2588_v40, %v2842_v58 }
 0x149   : > { %v2405_v12 = vpop.eup %2404  ;;  %v1215_v50 = vsel %vm895_vm3, %v2968_v45, %v1762_v15  ;;  %v1794_v18 = vadd.f32 -1.0, %v2403_v7  ;;  %2414 = vpow2.f32 %v1108_v6  ;;  %v3068_v4 = vadd.f32 %v2588_v40, %v2844_v61 }
 0x14a   : > { %v1985_v0 = vpack.c.bf16 %v1215_v50, %v1214_v30  ;;  %v1760_v37 = vadd.f32 -1.0, %v2405_v12  ;;  %2416 = vpow2.f32 %v1050_v2  ;;  %v1114_v52 = vmul.f32 1.442695, %v995_v63 }
 0x14b   : > { %v1212_v58 = vsel %vm892_vm2, %v2932_v17, %v1759_v53  ;;  %v1791_v44 = vadd.f32 -1.0, %v2401_v57  ;;  %v1247_v45 = vsel %vm927_vm4, %v2972_v59, %v1794_v18  ;;  %v961_v60 = vmin.f32 %v3061_v27, 0.0 }
 0x14c   : > { %v2407_v46 = vpop.eup %2406  ;;  %2105 = vst [vmem:[%s2692_s17 + $0x48] sm:$0xff] %v1985_v0   ;;  %v2065_v61 = vpack.c.bf16 %v1247_v45, %v1246_v62  ;;  %v1213_v42 = vsel %vm893_vm5, %v2976_v9, %v1760_v37  ;;  %2418 = vpow2.f32 %v1114_v52  ;;  %v993_v41 = vmin.f32 %v3068_v4, 0.0 }
 0x14d   : > { %v1980_v11 = vpack.c.bf16 %v1213_v42, %v1212_v58  ;;  %v1792_v17 = vadd.f32 -1.0, %v2407_v46  ;;  %v1046_v8 = vmul.f32 1.442695, %v961_v60  ;;  %v3084_v14 = vadd.f32 %v2866_v23, %v2588_v40 }
 0x14e   : > { %2121 = vst [vmem:[%s2692_s17 + $0xc8] sm:$0xff] %v2065_v61   ;;  %v1110_v59 = vmul.f32 1.442695, %v993_v41  ;;  %v3089_v19 = vadd.f32 %v2868_v24, %v2588_v40  ;;  %v3093_v10 = vadd.f32 %v2588_v40, %v2876_v28  ;;  %v3097_v9 = vadd.f32 %v2588_v40, %v2878_v26 }
 0x14f   : > { %v2409_v21 = vpop.eup %2408  ;;  %v1244_v23 = vsel %vm924_vm6, %v2942_v49, %v1791_v44  ;;  %2104 = vst [vmem:[%s2692_s17 + $0x40] sm:$0xff] %v1980_v11   ;;  %v1245_v24 = vsel %vm925_vm7, %v2999_v1, %v1792_v17  ;;  %2420 = vpow2.f32 %v1046_v8  ;;  %v966_v39 = vmin.f32 %v3084_v14, 0.0 }
 0x150   : > { %v2411_v28 = vpop.eup %2410  ;;  %v2060_v54 = vpack.c.bf16 %v1245_v24, %v1244_v23  ;;  %vm898_vm8 = vcmp.gt.f32.partialorder %v3009_v22, 0.0  ;;  %2422 = vpow2.f32 %v1110_v59  ;;  %v1765_v26 = vadd.f32 -1.0, %v2409_v21 }
 0x151   : > { %vm930_vm9 = vcmp.gt.f32.partialorder %v3013_v35, 0.0  ;;  %v1056_v36 = vmul.f32 1.442695, %v966_v39  ;;  %v998_v30 = vmin.f32 %v3089_v19, 0.0  ;;  %v1797_v5 = vadd.f32 -1.0, %v2411_v28 }
 0x152   : > { %v2413_v49 = vpop.eup %2412  ;;  %2120 = vst [vmem:[%s2692_s17 + $0xc0] sm:$0xff] %v2060_v54   ;;  %vm896_vm10 = vcmp.gt.f32.partialorder %v3029_v16, 0.0  ;;  %v964_v1 = vmin.f32 %v3093_v10, 0.0  ;;  %v996_v20 = vmin.f32 %v3097_v9, 0.0  ;;  %vm928_vm11 = vcmp.gt.f32.partialorder %v3033_v47, 0.0 }
 0x153   : > { %v2415_v57 = vpop.eup %2414  ;;  %v1763_v62 = vadd.f32 -1.0, %v2413_v49  ;;  %vm899_vm12 = vcmp.gt.f32.partialorder %v3037_v38, 0.0  ;;  %2424 = vpow2.f32 %v1056_v36  ;;  %v1120_v53 = vmul.f32 1.442695, %v998_v30 }
 0x154   : > { %v2417_v15 = vpop.eup %2416  ;;  %vm931_vm13 = vcmp.gt.f32.partialorder %v3044_v13, 0.0  ;;  %vm897_vm14 = vcmp.gt.f32.partialorder %v3061_v27, 0.0  ;;  %vm929_vm15 = vcmp.gt.f32.partialorder %v3068_v4, 0.0  ;;  %v3121_v6 = vadd.f32 %v2891_v33, %v2588_v40 }
 0x155   : > { %v1218_v7 = vsel %vm898_vm8, %v3009_v22, %v1765_v26  ;;  %v1766_v2 = vadd.f32 -1.0, %v2417_v15  ;;  %v1052_v63 = vmul.f32 1.442695, %v964_v1  ;;  %v3128_v12 = vadd.f32 %v2893_v48, %v2588_v40 }
 0x156   : > { %v2419_v50 = vpop.eup %2418  ;;  %v1250_v18 = vsel %vm930_vm9, %v3013_v35, %v1797_v5  ;;  %v1795_v0 = vadd.f32 -1.0, %v2415_v57  ;;  %v1116_v37 = vmul.f32 1.442695, %v996_v20  ;;  %v967_v33 = vmin.f32 %v3121_v6, 0.0 }
 0x157   : > { %v1216_v22 = vsel %vm896_vm10, %v3029_v16, %v1763_v62  ;;  %v1219_v52 = vsel %vm899_vm12, %v3037_v38, %v1766_v2  ;;  %v1798_v48 = vadd.f32 -1.0, %v2419_v50  ;;  %2426 = vpow2.f32 %v1120_v53 }
 0x158   : > { %v1995_v58 = vpack.c.bf16 %v1219_v52, %v1218_v7  ;;  %v1058_v44 = vmul.f32 1.442695, %v967_v33  ;;  %v999_v45 = vmin.f32 %v3128_v12, 0.0  ;;  %v3143_v35 = vadd.f32 %v2588_v40, %v2895_v51 }
 0x159   : > { %v2421_v60 = vpop.eup %2420  ;;  %v1251_v46 = vsel %vm931_vm13, %v3044_v13, %v1798_v48  ;;  %2428 = vpow2.f32 %v1052_v63  ;;  %v3150_v16 = vadd.f32 %v2588_v40, %v2897_v55  ;;  %v3154_v38 = vadd.f32 %v2924_v29, %v2588_v40  ;;  %v2456_v55 = vld [vmem:[%s3264_s2] ss:$0 sm:$0xff] }
 0x15a   : > { %v2423_v61 = vpop.eup %2422  ;;  %2107 = vst [vmem:[%s2692_s17 + $0x58] sm:$0xff] %v1995_v58   ;;  %v2075_v42 = vpack.c.bf16 %v1251_v46, %v1250_v18  ;;  %v1764_v51 = vadd.f32 -1.0, %v2421_v60  ;;  %2430 = vpow2.f32 %v1058_v44  ;;  %v1122_v41 = vmul.f32 1.442695, %v999_v45 }
 0x15b   : > { %v1796_v11 = vadd.f32 -1.0, %v2423_v61  ;;  %2432 = vpow2.f32 %v1116_v37  ;;  %v965_v13 = vmin.f32 %v3143_v35, 0.0  ;;  %v3162_v17 = vadd.f32 %v2456_v55, %v2926_v25 }
 0x15c   : > { %v1248_v40 = vsel %vm928_vm11, %v3033_v47, %v1795_v0  ;;  %2123 = vst [vmem:[%s2692_s17 + $0xd8] sm:$0xff] %v2075_v42   ;;  %v1217_v29 = vsel %vm897_vm14, %v3061_v27, %v1764_v51  ;;  %2434 = vpow2.f32 %v1122_v41  ;;  %v997_v8 = vmin.f32 %v3150_v16, 0.0 }
 0x15d   : > { %v2425_v59 = vpop.eup %2424  ;;  %v1990_v21 = vpack.c.bf16 %v1217_v29, %v1216_v22  ;;  %v1249_v25 = vsel %vm929_vm15, %v3068_v4, %v1796_v11  ;;  %v1054_v23 = vmul.f32 1.442695, %v965_v13  ;;  %v970_v24 = vmin.f32 %v3154_v38, 0.0 }
 0x15e   : > { %v2070_v39 = vpack.c.bf16 %v1249_v25, %v1248_v40  ;;  %v1118_v47 = vmul.f32 1.442695, %v997_v8  ;;  %v1002_v28 = vmin.f32 %v3162_v17, 0.0  ;;  %v3179_v27 = vadd.f32 %v2456_v55, %v2934_v31 }
 0x15f   : > { %2106 = vst [vmem:[%s2692_s17 + $0x50] sm:$0xff] %v1990_v21   ;;  %2436 = vpow2.f32 %v1054_v23  ;;  %v1769_v54 = vadd.f32 -1.0, %v2425_v59  ;;  %v3183_v26 = vadd.f32 %v2456_v55, %v2936_v32  ;;  %v1064_v4 = vmul.f32 1.442695, %v970_v24 }
 0x160   : > { %2122 = vst [vmem:[%s2692_s17 + $0xd0] sm:$0xff] %v2070_v39   ;;  %2438 = vpow2.f32 %v1118_v47  ;;  %vm902_vm0 = vcmp.gt.f32.partialorder %v3084_v14, 0.0  ;;  %vm934_vm1 = vcmp.gt.f32.partialorder %v3089_v19, 0.0  ;;  %v1128_v30 = vmul.f32 1.442695, %v1002_v28 }
 0x161   : > { %v2427_v36 = vpop.eup %2426  ;;  %v968_v49 = vmin.f32 %v3179_v27, 0.0  ;;  %vm900_vm2 = vcmp.gt.f32.partialorder %v3093_v10, 0.0  ;;  %vm903_vm3 = vcmp.gt.f32.partialorder %v3121_v6, 0.0  ;;  %vm935_vm4 = vcmp.gt.f32.partialorder %v3128_v12, 0.0 }
 0x162   : > { %v1000_v31 = vmin.f32 %v3183_v26, 0.0  ;;  %v3193_v32 = vadd.f32 %v2456_v55, %v2944_v56  ;;  %v1222_v20 = vsel %vm902_vm0, %v3084_v14, %v1769_v54  ;;  %vm932_vm5 = vcmp.gt.f32.partialorder %v3097_v9, 0.0 }
 0x163   : > { %v2429_v5 = vpop.eup %2428  ;;  %v1060_v57 = vmul.f32 1.442695, %v968_v49  ;;  %v3198_v62 = vadd.f32 %v2456_v55, %v2946_v34  ;;  %v3201_v53 = vadd.f32 %v2456_v55, %v2955_v3  ;;  %v1801_v7 = vadd.f32 -1.0, %v2427_v36 }
 0x164   : > { %v2431_v1 = vpop.eup %2430  ;;  %2440 = vpow2.f32 %v1064_v4  ;;  %v971_v63 = vmin.f32 %v3193_v32, 0.0  ;;  %v1767_v50 = vadd.f32 -1.0, %v2429_v5  ;;  %v1124_v18 = vmul.f32 1.442695, %v1000_v31 }
 0x165   : > { %v2433_v15 = vpop.eup %2432  ;;  %v1770_v2 = vadd.f32 -1.0, %v2431_v1  ;;  %2442 = vpow2.f32 %v1128_v30  ;;  %v1003_v14 = vmin.f32 %v3198_v62, 0.0  ;;  %v969_v22 = vmin.f32 %v3201_v53, 0.0 }
 0x166   : > { %v2435_v56 = vpop.eup %2434  ;;  %2444 = vpow2.f32 %v1060_v57  ;;  %v1066_v3 = vmul.f32 1.442695, %v971_v63  ;;  %v3210_v52 = vadd.f32 %v2456_v55, %v2957_v43  ;;  %v1254_v58 = vsel %vm934_vm1, %v3089_v19, %v1801_v7 }
 0x167   : > { %v1223_v34 = vsel %vm903_vm3, %v3121_v6, %v1770_v2  ;;  %v1802_v0 = vadd.f32 -1.0, %v2435_v56  ;;  %v1130_v33 = vmul.f32 1.442695, %v1003_v14  ;;  %v1799_v44 = vadd.f32 -1.0, %v2433_v15 }
 0x168   : > { %v2005_v37 = vpack.c.bf16 %v1223_v34, %v1222_v20  ;;  %2446 = vpow2.f32 %v1066_v3  ;;  %v1062_v61 = vmul.f32 1.442695, %v969_v22  ;;  %vm901_vm6 = vcmp.gt.f32.partialorder %v3143_v35, 0.0 }
 0x169   : > { %v2437_v48 = vpop.eup %2436  ;;  %v1255_v6 = vsel %vm935_vm4, %v3128_v12, %v1802_v0  ;;  %2448 = vpow2.f32 %v1130_v33  ;;  %v1001_v19 = vmin.f32 %v3210_v52, 0.0  ;;  %v1220_v42 = vsel %vm900_vm2, %v3093_v10, %v1767_v50 }
 0x16a   : > { %v2439_v45 = vpop.eup %2438  ;;  %2109 = vst [vmem:[%s2692_s17 + $0x68] sm:$0xff] %v2005_v37   ;;  %v2085_v60 = vpack.c.bf16 %v1255_v6, %v1254_v58  ;;  %v1768_v46 = vadd.f32 -1.0, %v2437_v48  ;;  %2450 = vpow2.f32 %v1124_v18  ;;  %vm933_vm7 = vcmp.gt.f32.partialorder %v3150_v16, 0.0 }
 0x16b   : > { %v1800_v43 = vadd.f32 -1.0, %v2439_v45  ;;  %2452 = vpow2.f32 %v1062_v61  ;;  %v1252_v51 = vsel %vm932_vm5, %v3097_v9, %v1799_v44  ;;  %v1126_v13 = vmul.f32 1.442695, %v1001_v19 }
 0x16c   : > { %2125 = vst [vmem:[%s2692_s17 + $0xe8] sm:$0xff] %v2085_v60   ;;  %v1221_v12 = vsel %vm901_vm6, %v3143_v35, %v1768_v46  ;;  %vm906_vm8 = vcmp.gt.f32.partialorder %v3154_v38, 0.0  ;;  %vm907_vm9 = vcmp.gt.f32.partialorder %v3193_v32, 0.0  ;;  %vm938_vm10 = vcmp.gt.f32.partialorder %v3162_v17, 0.0 }
 0x16d   : > { %v2000_v41 = vpack.c.bf16 %v1221_v12, %v1220_v42  ;;  %v1253_v11 = vsel %vm933_vm7, %v3150_v16, %v1800_v43  ;;  %2454 = vpow2.f32 %v1126_v13  ;;  %vm939_vm11 = vcmp.gt.f32.partialorder %v3198_v62, 0.0 }
 0x16e   : > { %v2080_v55 = vpack.c.bf16 %v1253_v11, %v1252_v51  ;;  %v2441_v40 = vpop.eup %2440  ;;  %vm904_vm12 = vcmp.gt.f32.partialorder %v3179_v27, 0.0  ;;  %vm905_vm13 = vcmp.gt.f32.partialorder %v3201_v53, 0.0  ;;  %vm936_vm14 = vcmp.gt.f32.partialorder %v3183_v26, 0.0 }
 0x16f   : > { %2108 = vst [vmem:[%s2692_s17 + $0x60] sm:$0xff] %v2000_v41   ;;  %v2443_v29 = vpop.eup %2442  ;;  %v1773_v8 = vadd.f32 -1.0, %v2441_v40  ;;  %vm937_vm15 = vcmp.gt.f32.partialorder %v3210_v52, 0.0 }
 0x170   : > { %2124 = vst [vmem:[%s2692_s17 + $0xe0] sm:$0xff] %v2080_v55   ;;  %v2445_v10 = vpop.eup %2444  ;;  %v1805_v59 = vadd.f32 -1.0, %v2443_v29 }
 0x171   : > { %v1771_v9 = vadd.f32 -1.0, %v2445_v10  ;;  %v1226_v39 = vsel %vm906_vm8, %v3154_v38, %v1773_v8 }
 0x172   : > { %v2447_v35 = vpop.eup %2446  ;;  %v1258_v28 = vsel %vm938_vm10, %v3162_v17, %v1805_v59 }
 0x173   : > { %v2449_v21 = vpop.eup %2448  ;;  %v1774_v25 = vadd.f32 -1.0, %v2447_v35  ;;  %v1224_v5 = vsel %vm904_vm12, %v3179_v27, %v1771_v9 }
 0x174   : > { %v2451_v23 = vpop.eup %2450  ;;  %v1806_v16 = vadd.f32 -1.0, %v2449_v21 }
 0x175   : > { %v2453_v24 = vpop.eup %2452  ;;  %v1227_v47 = vsel %vm907_vm9, %v3193_v32, %v1774_v25  ;;  %v1803_v30 = vadd.f32 -1.0, %v2451_v23 }
 0x176   : > { %v2015_v54 = vpack.c.bf16 %v1227_v47, %v1226_v39  ;;  %v1259_v36 = vsel %vm939_vm11, %v3198_v62, %v1806_v16  ;;  %v1772_v4 = vadd.f32 -1.0, %v2453_v24 }
 0x177   : > { %v2095_v49 = vpack.c.bf16 %v1259_v36, %v1258_v28  ;;  %v2455_v38 = vpop.eup %2454  ;;  %v1256_v1 = vsel %vm936_vm14, %v3183_v26, %v1803_v30 }
 0x178   : > { %2111 = vst [vmem:[%s2692_s17 + $0x78] sm:$0xff] %v2015_v54   ;;  %v1225_v31 = vsel %vm905_vm13, %v3201_v53, %v1772_v4  ;;  %v1804_v32 = vadd.f32 -1.0, %v2455_v38 }
 0x179   : > { %2127 = vst [vmem:[%s2692_s17 + $0xf8] sm:$0xff] %v2095_v49   ;;  %v2010_v17 = vpack.c.bf16 %v1225_v31, %v1224_v5 }
 0x17a   : > { %v1257_v20 = vsel %vm937_vm15, %v3210_v52, %v1804_v32 }
 0x17b   : > { %2110 = vst [vmem:[%s2692_s17 + $0x70] sm:$0xff] %v2010_v17   ;;  %v2090_v57 = vpack.c.bf16 %v1257_v20, %v1256_v1 }
 0x17d   : > { %2126 = vst [vmem:[%s2692_s17 + $0xf0] sm:$0xff] %v2090_v57  }
 0x17e PF: > { %s13_s14 = sadd.s32 1, %s2479_s14   ;;  %s3266_s12 = smov %s2475_s13 }
 0x17f   : > { %p10_p5 = scmp.ge.s32.totalorder %s13_s14, 6   ;;  %s3267_s13 = smov %s3269_s15 }
 0x181   :  { %12 = sbr.rel (!%p10_p5) target bundleno = 2 (0x2), region = 68 }

// kernel: image_autoencoder_forward.15
= control target key start
LH: loop header
LB: loop body
LE: loop exit
PB: predicated region body
PF: predicated region fallthrough
CT: control target
= control target key end

     0   :  { %s1349_s12 = smov 0   ;;  %s1351_s13 = smov 0   ;;  %s1579_s0 = inlined_call_operand.vmem [shape: bf16[8192,128], index: 0, kind: input, shape index: {}]   ;;  %s1580_s1 = inlined_call_operand.vmem [shape: bf16[128,128], index: 1, kind: input, shape index: {}]   ;;  %s1581_s2 = inlined_call_operand.vmem [shape: f32[1,128], index: 2, kind: input, shape index: {}]   ;;  %s1582_s3 = inlined_call_operand.vmem [shape: f32[8192,128], index: 3, kind: output, shape index: {}]  }
   0x1   :  { %s1353_s14 = smov 0  }
   0x2 LB: > { %s32_s15 = sadd.s32 1, %s1323_s13  ;;  %p1057_p0 = scmp.ge.s32.totalorder %s1327_s14, 1  ;;  %s1327_s14 = sphi %s1353_s14, %s13_s14   ;;  %s1323_s13 = sphi %s1351_s13, %s1584_s13   ;;  %s1319_s12 = sphi %s1349_s12, %s1583_s12  }
   0x3   : > { %p34_p1 = scmp.ge.s32.totalorder %s32_s15, 16  ;;  %p188_p2 = scmp.lt.s32.totalorder %s1327_s14, 17 }
   0x5   : > { %s1586_s15 = smov (%p34_p1, %s32_s15), 0  ;;  %p189_p3 = pnand %p1057_p0, %p188_p2 }
   0x6   : > { %v1265_v0 = vld [vmem:[%s1580_s1] sm:$0xff] (!%p189_p3)   ;;  %s1058_s18 = sshll.u32 (!%p189_p3), %s1319_s12, 6  ;;  %v1266_v1 = vld [vmem:[%s1580_s1 + $0x8] sm:$0xff] (!%p189_p3)   ;;  %v1267_v2 = vld [vmem:[%s1580_s1 + $0x10] sm:$0xff] (!%p189_p3)  }
   0x7   : > { %192 = sbr.rel (%p189_p3) target bundleno = 313 (0x139), region = 32  ;;  %p230_p4 = scmp.lt.s32.totalorder (!%p189_p3), %s1058_s18, 1023  ;;  %1145 = vmatprep.subr.bf16.mxu0 (!%p189_p3), %v1265_v0  ;;  %1225 = vmatprep.subr.bf16.mxu1 (!%p189_p3), %v1265_v0  ;;  %v1268_v3 = vld [vmem:[%s1580_s1 + $0x18] sm:$0xff] (!%p189_p3)   ;;  %v1269_v6 = vld [vmem:[%s1580_s1 + $0x20] sm:$0xff] (!%p189_p3)   ;;  %v1270_v7 = vld [vmem:[%s1580_s1 + $0x28] sm:$0xff] (!%p189_p3)  }
   0x8   : > { %1146 = vmatpush3.bf16.msra.mxu0 (!%p189_p3), %v1265_v0  ;;  %1233 = vmatpush3.bf16.msra.mxu1 (!%p189_p3), %v1265_v0  ;;  %v1271_v8 = vld [vmem:[%s1580_s1 + $0x30] sm:$0xff] (!%p189_p3)   ;;  %v1272_v9 = vld [vmem:[%s1580_s1 + $0x38] sm:$0xff] (!%p189_p3)   ;;  %v1435_v40 = vld [vmem:[%s1581_s2] ss:$0 sm:$0xff] (!%p189_p3) }
   0x9   : > { %1147 = vmatprep.subr.bf16.mxu0 (!%p189_p3), %v1266_v1  ;;  %1226 = vmatprep.subr.bf16.mxu1 (!%p189_p3), %v1266_v1 }
   0xc   : > { %1148 = vmatpush3.bf16.msra.mxu0 (!%p189_p3), %v1266_v1  ;;  %1234 = vmatpush3.bf16.msra.mxu1 (!%p189_p3), %v1266_v1 }
   0xd   : > { %1149 = vmatprep.subr.bf16.mxu0 (!%p189_p3), %v1267_v2  ;;  %1227 = vmatprep.subr.bf16.mxu1 (!%p189_p3), %v1267_v2 }
   0xe   : > { %s1588_s18 = smov (!%p230_p4, %s1058_s18), 1023 }
   0xf   : > { %s1059_s23 = sshll.u32 %s1588_s18, 2  ;;  %s1061_s10 = sshll.u32 %s1588_s18, 3 }
  0x10   : > { %s1382_s26 = scalar_lea.vmem %s1579_s0, %s1059_s23  ;;  %1150 = vmatpush3.bf16.msra.mxu0 %v1267_v2  ;;  %1235 = vmatpush3.bf16.msra.mxu1 %v1267_v2  ;;  %s1440_s19 = scalar_lea.vmem %s1582_s3, %s1061_s10 }
  0x11   : > { %v1273_v4 = vld [vmem:[%s1382_s26] sm:$0xff]   ;;  %1151 = vmatprep.subr.bf16.mxu0 %v1268_v3  ;;  %1228 = vmatprep.subr.bf16.mxu1 %v1268_v3  ;;  %v1275_v10 = vld [vmem:[%s1382_s26 + $0x8] sm:$0xff]   ;;  %v1277_v12 = vld [vmem:[%s1382_s26 + $0x10] sm:$0xff]  }
  0x12   : > { %v1274_v5 = vld [vmem:[%s1382_s26 + $0x80] sm:$0xff]   ;;  %1161 = vmatprep.mubr.bf16.mxu0 %v1273_v4  ;;  %v1276_v11 = vld [vmem:[%s1382_s26 + $0x88] sm:$0xff]   ;;  %v1278_v13 = vld [vmem:[%s1382_s26 + $0x90] sm:$0xff]  }
  0x13   : > { %1193 = vmatprep.mubr.bf16.mxu1 %v1274_v5  ;;  %v1279_v14 = vld [vmem:[%s1382_s26 + $0x18] sm:$0xff]   ;;  %v1281_v16 = vld [vmem:[%s1382_s26 + $0x20] sm:$0xff]   ;;  %v1283_v18 = vld [vmem:[%s1382_s26 + $0x28] sm:$0xff]  }
  0x14   : > { %1152 = vmatpush3.bf16.msra.mxu0 %v1268_v3  ;;  %1236 = vmatpush3.bf16.msra.mxu1 %v1268_v3  ;;  %v1280_v15 = vld [vmem:[%s1382_s26 + $0x98] sm:$0xff]   ;;  %v1282_v17 = vld [vmem:[%s1382_s26 + $0xa0] sm:$0xff]   ;;  %v1284_v19 = vld [vmem:[%s1382_s26 + $0xa8] sm:$0xff]  }
  0x15   : > { %1153 = vmatprep.subr.bf16.mxu0 %v1269_v6  ;;  %1229 = vmatprep.subr.bf16.mxu1 %v1269_v6  ;;  %v1285_v20 = vld [vmem:[%s1382_s26 + $0x30] sm:$0xff]   ;;  %v1287_v22 = vld [vmem:[%s1382_s26 + $0x38] sm:$0xff]   ;;  %v1289_v24 = vld [vmem:[%s1382_s26 + $0x40] sm:$0xff]  }
  0x16   : > { %v1286_v21 = vld [vmem:[%s1382_s26 + $0xb0] sm:$0xff]   ;;  %v1288_v23 = vld [vmem:[%s1382_s26 + $0xb8] sm:$0xff]   ;;  %v1290_v25 = vld [vmem:[%s1382_s26 + $0xc0] sm:$0xff]  }
  0x17   : > { %v1291_v26 = vld [vmem:[%s1382_s26 + $0x48] sm:$0xff]   ;;  %v1293_v28 = vld [vmem:[%s1382_s26 + $0x50] sm:$0xff]   ;;  %v1295_v30 = vld [vmem:[%s1382_s26 + $0x58] sm:$0xff]  }
  0x18   : > { %1154 = vmatpush3.bf16.msra.mxu0 %v1269_v6  ;;  %1237 = vmatpush3.bf16.msra.mxu1 %v1269_v6  ;;  %v1292_v27 = vld [vmem:[%s1382_s26 + $0xc8] sm:$0xff]   ;;  %v1294_v29 = vld [vmem:[%s1382_s26 + $0xd0] sm:$0xff]   ;;  %v1296_v31 = vld [vmem:[%s1382_s26 + $0xd8] sm:$0xff]  }
  0x19   : > { %1155 = vmatprep.subr.bf16.mxu0 %v1270_v7  ;;  %1230 = vmatprep.subr.bf16.mxu1 %v1270_v7  ;;  %v1297_v32 = vld [vmem:[%s1382_s26 + $0x60] sm:$0xff]   ;;  %v1299_v34 = vld [vmem:[%s1382_s26 + $0x68] sm:$0xff]   ;;  %v1301_v36 = vld [vmem:[%s1382_s26 + $0x70] sm:$0xff]  }
  0x1a   : > { %v1298_v33 = vld [vmem:[%s1382_s26 + $0xe0] sm:$0xff]   ;;  %v1300_v35 = vld [vmem:[%s1382_s26 + $0xe8] sm:$0xff]   ;;  %v1302_v37 = vld [vmem:[%s1382_s26 + $0xf0] sm:$0xff]  }
  0x1b   : > { %v1303_v38 = vld [vmem:[%s1382_s26 + $0x78] sm:$0xff]  }
  0x1c   : > { %1156 = vmatpush3.bf16.msra.mxu0 %v1270_v7  ;;  %1238 = vmatpush3.bf16.msra.mxu1 %v1270_v7  ;;  %v1304_v39 = vld [vmem:[%s1382_s26 + $0xf8] sm:$0xff]  }
  0x1d   : > { %1157 = vmatprep.subr.bf16.mxu0 %v1271_v8  ;;  %1231 = vmatprep.subr.bf16.mxu1 %v1271_v8 }
  0x20   : > { %1158 = vmatpush3.bf16.msra.mxu0 %v1271_v8  ;;  %1239 = vmatpush3.bf16.msra.mxu1 %v1271_v8 }
  0x21   : > { %1159 = vmatprep.subr.bf16.mxu0 %v1272_v9  ;;  %1232 = vmatprep.subr.bf16.mxu1 %v1272_v9 }
  0x24   : > { %1160 = vmatpush3.bf16.msra.mxu0 %v1272_v9  ;;  %1240 = vmatpush3.bf16.msra.mxu1 %v1272_v9 }
  0x27   : > { %1162 = vmatmul.mubr.bf16.vlgmr.msra.gmra.mrb[0].mxu0 %v1275_v10  ;;  %1194 = vmatmul.mubr.bf16.vlgmr.msra.gmra.mrb[0].mxu1 %v1276_v11 }
  0x28   : > { %1165 = vmatprep.mubr.bf16.mxu0 %v1277_v12  ;;  %1197 = vmatprep.mubr.bf16.mxu1 %v1278_v13 }
  0x2f   : > { %1166 = vmatmul.mubr.bf16.gmra.mrb[4].mxu0 %v1279_v14  ;;  %1198 = vmatmul.mubr.bf16.gmra.mrb[4].mxu1 %v1280_v15 }
  0x30   : > { %1169 = vmatprep.mubr.bf16.mxu0 %v1281_v16  ;;  %1201 = vmatprep.mubr.bf16.mxu1 %v1282_v17 }
  0x37   : > { %1170 = vmatmul.mubr.bf16.gmra.mrb[8].mxu0 %v1283_v18  ;;  %1202 = vmatmul.mubr.bf16.gmra.mrb[8].mxu1 %v1284_v19 }
  0x38   : > { %1173 = vmatprep.mubr.bf16.mxu0 %v1285_v20  ;;  %1205 = vmatprep.mubr.bf16.mxu1 %v1286_v21 }
  0x3f   : > { %1174 = vmatmul.mubr.bf16.gmra.mrb[12].mxu0 %v1287_v22  ;;  %1206 = vmatmul.mubr.bf16.gmra.mrb[12].mxu1 %v1288_v23 }
  0x40   : > { %1177 = vmatprep.mubr.bf16.mxu0 %v1289_v24  ;;  %1209 = vmatprep.mubr.bf16.mxu1 %v1290_v25 }
  0x47   : > { %1178 = vmatmul.mubr.bf16.gmra.mrb[16].mxu0 %v1291_v26  ;;  %1210 = vmatmul.mubr.bf16.gmra.mrb[16].mxu1 %v1292_v27 }
  0x48   : > { %1181 = vmatprep.mubr.bf16.mxu0 %v1293_v28  ;;  %1213 = vmatprep.mubr.bf16.mxu1 %v1294_v29 }
  0x4f   : > { %1182 = vmatmul.mubr.bf16.gmra.mrb[20].mxu0 %v1295_v30  ;;  %1214 = vmatmul.mubr.bf16.gmra.mrb[20].mxu1 %v1296_v31 }
  0x50   : > { %1185 = vmatprep.mubr.bf16.mxu0 %v1297_v32  ;;  %1217 = vmatprep.mubr.bf16.mxu1 %v1298_v33 }
  0x57   : > { %1186 = vmatmul.mubr.bf16.gmra.mrb[24].mxu0 %v1299_v34  ;;  %1218 = vmatmul.mubr.bf16.gmra.mrb[24].mxu1 %v1300_v35 }
  0x58   : > { %1189 = vmatprep.mubr.bf16.mxu0 %v1301_v36  ;;  %1221 = vmatprep.mubr.bf16.mxu1 %v1302_v37 }
  0x5f   : > { %1190 = vmatmul.mubr.bf16.gmra.mrb[28].mxu0 %v1303_v38  ;;  %1222 = vmatmul.mubr.bf16.gmra.mrb[28].mxu1 %v1304_v39 }
  0xfa   : > { %v1163_v41 = vpop.f32.mrb[0].mxu0  ;;  %v1195_v42 = vpop.f32.mrb[0].mxu1 }
  0xfb   : > { %v630_v43 = vadd.f32 %v1163_v41, %v1435_v40  ;;  %v758_v44 = vadd.f32 %v1195_v42, %v1435_v40  ;;  %v621_v45 = vpop.f32.mrb[1].mxu0  ;;  %v749_v46 = vpop.f32.mrb[1].mxu1 }
  0xfc   : > { %v622_v47 = vadd.f32 %v1435_v40, %v621_v45  ;;  %v750_v48 = vadd.f32 %v1435_v40, %v749_v46  ;;  %v1164_v49 = vpop.f32.mrb[2].mxu0  ;;  %v1196_v50 = vpop.f32.mrb[2].mxu1 }
  0xfd   : > { %878 = vst [vmem:[%s1440_s19 + $0x10] sm:$0xff] %v630_v43  ;;  %910 = vst [vmem:[%s1440_s19 + $0x110] sm:$0xff] %v758_v44  ;;  %v633_v51 = vadd.f32 %v1164_v49, %v1435_v40  ;;  %v761_v52 = vadd.f32 %v1196_v50, %v1435_v40  ;;  %v624_v53 = vpop.f32.mrb[3].mxu0  ;;  %v752_v54 = vpop.f32.mrb[3].mxu1 }
  0xfe   : > { %876 = vst [vmem:[%s1440_s19] sm:$0xff] %v622_v47  ;;  %908 = vst [vmem:[%s1440_s19 + $0x100] sm:$0xff] %v750_v48  ;;  %v625_v55 = vadd.f32 %v1435_v40, %v624_v53  ;;  %v753_v56 = vadd.f32 %v1435_v40, %v752_v54 }
  0xff   : > { %879 = vst [vmem:[%s1440_s19 + $0x18] sm:$0xff] %v633_v51  ;;  %911 = vst [vmem:[%s1440_s19 + $0x118] sm:$0xff] %v761_v52 }
 0x100   : > { %877 = vst [vmem:[%s1440_s19 + $0x8] sm:$0xff] %v625_v55  ;;  %909 = vst [vmem:[%s1440_s19 + $0x108] sm:$0xff] %v753_v56 }
 0x102   : > { %v1167_v57 = vpop.f32.mrb[4].mxu0  ;;  %v1199_v58 = vpop.f32.mrb[4].mxu1 }
 0x103   : > { %v646_v59 = vadd.f32 %v1167_v57, %v1435_v40  ;;  %v774_v60 = vadd.f32 %v1199_v58, %v1435_v40  ;;  %v637_v61 = vpop.f32.mrb[5].mxu0  ;;  %v765_v62 = vpop.f32.mrb[5].mxu1 }
 0x104   : > { %v638_v63 = vadd.f32 %v1435_v40, %v637_v61  ;;  %v766_v0 = vadd.f32 %v1435_v40, %v765_v62  ;;  %v1168_v1 = vpop.f32.mrb[6].mxu0  ;;  %v1200_v2 = vpop.f32.mrb[6].mxu1 }
 0x105   : > { %882 = vst [vmem:[%s1440_s19 + $0x30] sm:$0xff] %v646_v59  ;;  %914 = vst [vmem:[%s1440_s19 + $0x130] sm:$0xff] %v774_v60  ;;  %v649_v3 = vadd.f32 %v1168_v1, %v1435_v40  ;;  %v777_v4 = vadd.f32 %v1200_v2, %v1435_v40  ;;  %v640_v5 = vpop.f32.mrb[7].mxu0  ;;  %v768_v6 = vpop.f32.mrb[7].mxu1 }
 0x106   : > { %880 = vst [vmem:[%s1440_s19 + $0x20] sm:$0xff] %v638_v63  ;;  %912 = vst [vmem:[%s1440_s19 + $0x120] sm:$0xff] %v766_v0  ;;  %v641_v7 = vadd.f32 %v1435_v40, %v640_v5  ;;  %v769_v8 = vadd.f32 %v1435_v40, %v768_v6 }
 0x107   : > { %883 = vst [vmem:[%s1440_s19 + $0x38] sm:$0xff] %v649_v3  ;;  %915 = vst [vmem:[%s1440_s19 + $0x138] sm:$0xff] %v777_v4 }
 0x108   : > { %881 = vst [vmem:[%s1440_s19 + $0x28] sm:$0xff] %v641_v7  ;;  %913 = vst [vmem:[%s1440_s19 + $0x128] sm:$0xff] %v769_v8 }
 0x10a   : > { %v1171_v9 = vpop.f32.mrb[8].mxu0  ;;  %v1203_v10 = vpop.f32.mrb[8].mxu1 }
 0x10b   : > { %v662_v11 = vadd.f32 %v1171_v9, %v1435_v40  ;;  %v790_v12 = vadd.f32 %v1203_v10, %v1435_v40  ;;  %v653_v13 = vpop.f32.mrb[9].mxu0  ;;  %v781_v14 = vpop.f32.mrb[9].mxu1 }
 0x10c   : > { %v654_v15 = vadd.f32 %v1435_v40, %v653_v13  ;;  %v782_v16 = vadd.f32 %v1435_v40, %v781_v14  ;;  %v1172_v17 = vpop.f32.mrb[10].mxu0  ;;  %v1204_v18 = vpop.f32.mrb[10].mxu1 }
 0x10d   : > { %886 = vst [vmem:[%s1440_s19 + $0x50] sm:$0xff] %v662_v11  ;;  %918 = vst [vmem:[%s1440_s19 + $0x150] sm:$0xff] %v790_v12  ;;  %v665_v19 = vadd.f32 %v1172_v17, %v1435_v40  ;;  %v793_v20 = vadd.f32 %v1204_v18, %v1435_v40  ;;  %v656_v21 = vpop.f32.mrb[11].mxu0  ;;  %v784_v22 = vpop.f32.mrb[11].mxu1 }
 0x10e   : > { %884 = vst [vmem:[%s1440_s19 + $0x40] sm:$0xff] %v654_v15  ;;  %916 = vst [vmem:[%s1440_s19 + $0x140] sm:$0xff] %v782_v16  ;;  %v657_v23 = vadd.f32 %v1435_v40, %v656_v21  ;;  %v785_v24 = vadd.f32 %v1435_v40, %v784_v22 }
 0x10f   : > { %887 = vst [vmem:[%s1440_s19 + $0x58] sm:$0xff] %v665_v19  ;;  %919 = vst [vmem:[%s1440_s19 + $0x158] sm:$0xff] %v793_v20 }
 0x110   : > { %885 = vst [vmem:[%s1440_s19 + $0x48] sm:$0xff] %v657_v23  ;;  %917 = vst [vmem:[%s1440_s19 + $0x148] sm:$0xff] %v785_v24 }
 0x112   : > { %v1175_v25 = vpop.f32.mrb[12].mxu0  ;;  %v1207_v26 = vpop.f32.mrb[12].mxu1 }
 0x113   : > { %v678_v27 = vadd.f32 %v1175_v25, %v1435_v40  ;;  %v806_v28 = vadd.f32 %v1207_v26, %v1435_v40  ;;  %v669_v29 = vpop.f32.mrb[13].mxu0  ;;  %v797_v30 = vpop.f32.mrb[13].mxu1 }
 0x114   : > { %v670_v31 = vadd.f32 %v1435_v40, %v669_v29  ;;  %v798_v32 = vadd.f32 %v1435_v40, %v797_v30  ;;  %v1176_v33 = vpop.f32.mrb[14].mxu0  ;;  %v1208_v34 = vpop.f32.mrb[14].mxu1 }
 0x115   : > { %890 = vst [vmem:[%s1440_s19 + $0x70] sm:$0xff] %v678_v27  ;;  %922 = vst [vmem:[%s1440_s19 + $0x170] sm:$0xff] %v806_v28  ;;  %v681_v35 = vadd.f32 %v1176_v33, %v1435_v40  ;;  %v809_v36 = vadd.f32 %v1208_v34, %v1435_v40  ;;  %v672_v37 = vpop.f32.mrb[15].mxu0  ;;  %v800_v38 = vpop.f32.mrb[15].mxu1 }
 0x116   : > { %888 = vst [vmem:[%s1440_s19 + $0x60] sm:$0xff] %v670_v31  ;;  %920 = vst [vmem:[%s1440_s19 + $0x160] sm:$0xff] %v798_v32  ;;  %v673_v39 = vadd.f32 %v1435_v40, %v672_v37  ;;  %v801_v41 = vadd.f32 %v1435_v40, %v800_v38 }
 0x117   : > { %891 = vst [vmem:[%s1440_s19 + $0x78] sm:$0xff] %v681_v35  ;;  %923 = vst [vmem:[%s1440_s19 + $0x178] sm:$0xff] %v809_v36 }
 0x118   : > { %889 = vst [vmem:[%s1440_s19 + $0x68] sm:$0xff] %v673_v39  ;;  %921 = vst [vmem:[%s1440_s19 + $0x168] sm:$0xff] %v801_v41 }
 0x11a   : > { %v1179_v42 = vpop.f32.mrb[16].mxu0  ;;  %v1211_v43 = vpop.f32.mrb[16].mxu1 }
 0x11b   : > { %v694_v44 = vadd.f32 %v1179_v42, %v1435_v40  ;;  %v822_v45 = vadd.f32 %v1211_v43, %v1435_v40  ;;  %v685_v46 = vpop.f32.mrb[17].mxu0  ;;  %v813_v47 = vpop.f32.mrb[17].mxu1 }
 0x11c   : > { %v686_v48 = vadd.f32 %v1435_v40, %v685_v46  ;;  %v814_v49 = vadd.f32 %v1435_v40, %v813_v47  ;;  %v1180_v50 = vpop.f32.mrb[18].mxu0  ;;  %v1212_v51 = vpop.f32.mrb[18].mxu1 }
 0x11d   : > { %894 = vst [vmem:[%s1440_s19 + $0x90] sm:$0xff] %v694_v44  ;;  %926 = vst [vmem:[%s1440_s19 + $0x190] sm:$0xff] %v822_v45  ;;  %v697_v52 = vadd.f32 %v1180_v50, %v1435_v40  ;;  %v825_v53 = vadd.f32 %v1212_v51, %v1435_v40  ;;  %v688_v54 = vpop.f32.mrb[19].mxu0  ;;  %v816_v55 = vpop.f32.mrb[19].mxu1 }
 0x11e   : > { %892 = vst [vmem:[%s1440_s19 + $0x80] sm:$0xff] %v686_v48  ;;  %924 = vst [vmem:[%s1440_s19 + $0x180] sm:$0xff] %v814_v49  ;;  %v689_v56 = vadd.f32 %v1435_v40, %v688_v54  ;;  %v817_v57 = vadd.f32 %v1435_v40, %v816_v55 }
 0x11f   : > { %895 = vst [vmem:[%s1440_s19 + $0x98] sm:$0xff] %v697_v52  ;;  %927 = vst [vmem:[%s1440_s19 + $0x198] sm:$0xff] %v825_v53 }
 0x120   : > { %893 = vst [vmem:[%s1440_s19 + $0x88] sm:$0xff] %v689_v56  ;;  %925 = vst [vmem:[%s1440_s19 + $0x188] sm:$0xff] %v817_v57 }
 0x122   : > { %v1183_v58 = vpop.f32.mrb[20].mxu0  ;;  %v1215_v59 = vpop.f32.mrb[20].mxu1 }
 0x123   : > { %v710_v60 = vadd.f32 %v1183_v58, %v1435_v40  ;;  %v838_v61 = vadd.f32 %v1215_v59, %v1435_v40  ;;  %v701_v62 = vpop.f32.mrb[21].mxu0  ;;  %v829_v63 = vpop.f32.mrb[21].mxu1 }
 0x124   : > { %v702_v0 = vadd.f32 %v1435_v40, %v701_v62  ;;  %v830_v1 = vadd.f32 %v1435_v40, %v829_v63  ;;  %v1184_v2 = vpop.f32.mrb[22].mxu0  ;;  %v1216_v3 = vpop.f32.mrb[22].mxu1 }
 0x125   : > { %898 = vst [vmem:[%s1440_s19 + $0xb0] sm:$0xff] %v710_v60  ;;  %930 = vst [vmem:[%s1440_s19 + $0x1b0] sm:$0xff] %v838_v61  ;;  %v713_v4 = vadd.f32 %v1184_v2, %v1435_v40  ;;  %v841_v5 = vadd.f32 %v1216_v3, %v1435_v40  ;;  %v704_v6 = vpop.f32.mrb[23].mxu0  ;;  %v832_v7 = vpop.f32.mrb[23].mxu1 }
 0x126   : > { %896 = vst [vmem:[%s1440_s19 + $0xa0] sm:$0xff] %v702_v0  ;;  %928 = vst [vmem:[%s1440_s19 + $0x1a0] sm:$0xff] %v830_v1  ;;  %v705_v8 = vadd.f32 %v1435_v40, %v704_v6  ;;  %v833_v9 = vadd.f32 %v1435_v40, %v832_v7 }
 0x127   : > { %899 = vst [vmem:[%s1440_s19 + $0xb8] sm:$0xff] %v713_v4  ;;  %931 = vst [vmem:[%s1440_s19 + $0x1b8] sm:$0xff] %v841_v5 }
 0x128   : > { %897 = vst [vmem:[%s1440_s19 + $0xa8] sm:$0xff] %v705_v8  ;;  %929 = vst [vmem:[%s1440_s19 + $0x1a8] sm:$0xff] %v833_v9 }
 0x12a   : > { %v1187_v10 = vpop.f32.mrb[24].mxu0  ;;  %v1219_v11 = vpop.f32.mrb[24].mxu1 }
 0x12b   : > { %v726_v12 = vadd.f32 %v1187_v10, %v1435_v40  ;;  %v854_v13 = vadd.f32 %v1219_v11, %v1435_v40  ;;  %v717_v14 = vpop.f32.mrb[25].mxu0  ;;  %v845_v15 = vpop.f32.mrb[25].mxu1 }
 0x12c   : > { %v718_v16 = vadd.f32 %v1435_v40, %v717_v14  ;;  %v846_v17 = vadd.f32 %v1435_v40, %v845_v15  ;;  %v1188_v18 = vpop.f32.mrb[26].mxu0  ;;  %v1220_v19 = vpop.f32.mrb[26].mxu1 }
 0x12d   : > { %902 = vst [vmem:[%s1440_s19 + $0xd0] sm:$0xff] %v726_v12  ;;  %934 = vst [vmem:[%s1440_s19 + $0x1d0] sm:$0xff] %v854_v13  ;;  %v729_v20 = vadd.f32 %v1188_v18, %v1435_v40  ;;  %v857_v21 = vadd.f32 %v1220_v19, %v1435_v40  ;;  %v720_v22 = vpop.f32.mrb[27].mxu0  ;;  %v848_v23 = vpop.f32.mrb[27].mxu1 }
 0x12e   : > { %900 = vst [vmem:[%s1440_s19 + $0xc0] sm:$0xff] %v718_v16  ;;  %932 = vst [vmem:[%s1440_s19 + $0x1c0] sm:$0xff] %v846_v17  ;;  %v721_v24 = vadd.f32 %v1435_v40, %v720_v22  ;;  %v849_v25 = vadd.f32 %v1435_v40, %v848_v23 }
 0x12f   : > { %903 = vst [vmem:[%s1440_s19 + $0xd8] sm:$0xff] %v729_v20  ;;  %935 = vst [vmem:[%s1440_s19 + $0x1d8] sm:$0xff] %v857_v21 }
 0x130   : > { %901 = vst [vmem:[%s1440_s19 + $0xc8] sm:$0xff] %v721_v24  ;;  %933 = vst [vmem:[%s1440_s19 + $0x1c8] sm:$0xff] %v849_v25 }
 0x132   : > { %v1191_v26 = vpop.f32.mrb[28].mxu0  ;;  %v1223_v27 = vpop.f32.mrb[28].mxu1 }
 0x133   : > { %v742_v28 = vadd.f32 %v1191_v26, %v1435_v40  ;;  %v870_v29 = vadd.f32 %v1223_v27, %v1435_v40  ;;  %v733_v30 = vpop.f32.mrb[29].mxu0  ;;  %v861_v31 = vpop.f32.mrb[29].mxu1 }
 0x134   : > { %v734_v32 = vadd.f32 %v1435_v40, %v733_v30  ;;  %v862_v33 = vadd.f32 %v1435_v40, %v861_v31  ;;  %v1192_v34 = vpop.f32.mrb[30].mxu0  ;;  %v1224_v35 = vpop.f32.mrb[30].mxu1 }
 0x135   : > { %906 = vst [vmem:[%s1440_s19 + $0xf0] sm:$0xff] %v742_v28  ;;  %938 = vst [vmem:[%s1440_s19 + $0x1f0] sm:$0xff] %v870_v29  ;;  %v745_v36 = vadd.f32 %v1192_v34, %v1435_v40  ;;  %v873_v37 = vadd.f32 %v1224_v35, %v1435_v40  ;;  %v736_v38 = vpop.f32.mrb[31].mxu0  ;;  %v864_v39 = vpop.f32.mrb[31].mxu1 }
 0x136   : > { %904 = vst [vmem:[%s1440_s19 + $0xe0] sm:$0xff] %v734_v32  ;;  %936 = vst [vmem:[%s1440_s19 + $0x1e0] sm:$0xff] %v862_v33  ;;  %v737_v41 = vadd.f32 %v1435_v40, %v736_v38  ;;  %v865_v42 = vadd.f32 %v1435_v40, %v864_v39 }
 0x137   : > { %907 = vst [vmem:[%s1440_s19 + $0xf8] sm:$0xff] %v745_v36  ;;  %939 = vst [vmem:[%s1440_s19 + $0x1f8] sm:$0xff] %v873_v37 }
 0x138   : > { %905 = vst [vmem:[%s1440_s19 + $0xe8] sm:$0xff] %v737_v41  ;;  %937 = vst [vmem:[%s1440_s19 + $0x1e8] sm:$0xff] %v865_v42 }
 0x139 PF: > { %s13_s14 = sadd.s32 1, %s1327_s14   ;;  %s1583_s12 = smov %s1323_s13 }
 0x13a   : > { %p10_p5 = scmp.ge.s32.totalorder %s13_s14, 18   ;;  %s1584_s13 = smov %s1586_s15 }
 0x13c   :  { %12 = sbr.rel (!%p10_p5) target bundleno = 2 (0x2), region = 68 }

</bundles_post_ra>
